<compile_context>
chip_gen: v6e
topology: v6e:2x2x1
jax: 0.10.0
libtpu: 0.0.40
codegen_flags: <defaults>
</compile_context>

<pallas_src>
import jax
import jax.numpy as jnp
import numpy as np
from jax.experimental import pallas as pl
from jax.experimental.pallas import tpu as pltpu

NEG_SLOPE = 0.2
EPS = 1e-5
INPUT_DIM = 1
OUTPUT_DIM = 1


def _round_up(x, m):
    return ((x + m - 1) // m) * m


def _pick_tm(m, cap=512):
    """Largest tile <= cap that is a multiple of 8 and divides m (else full m)."""
    if m <= cap:
        return m
    for t in range(cap - cap % 8, 7, -8):
        if m % t == 0:
            return t
    return m


# ----------------------------------------------------------------------------
# Kernels
# ----------------------------------------------------------------------------
def _conv_leaky_kernel(a_ref, w_ref, b_ref, o_ref):
    # Y = LeakyReLU(A @ W + b), bf16 MXU path, f32 accumulation, bf16 store.
    y = jnp.dot(a_ref[...].astype(jnp.bfloat16), w_ref[...],
                preferred_element_type=jnp.float32) + b_ref[...]
    y = jnp.where(y > 0, y, NEG_SLOPE * y)
    o_ref[...] = y.astype(o_ref.dtype)


def _conv_bn_leaky_kernel(a_ref, w_ref, b_ref, g_ref, beta_ref, o_ref):
    # Y = A @ W + b; BatchNorm2d over all rows (= N*H*W) fused in-kernel,
    # two-pass centered variance (robust vs E[x^2]-E[x]^2 cancellation).
    y = jnp.dot(a_ref[...].astype(jnp.bfloat16), w_ref[...],
                preferred_element_type=jnp.float32) + b_ref[...]
    mean = jnp.mean(y, axis=0, keepdims=True)
    cent = y - mean
    var = jnp.mean(cent * cent, axis=0, keepdims=True)      # biased batch var
    yn = cent * (g_ref[...] * jax.lax.rsqrt(var + EPS)) + beta_ref[...]
    o_ref[...] = jnp.where(yn > 0, yn, NEG_SLOPE * yn).astype(o_ref.dtype)


def _fc_fused_kernel(a_ref, w1_ref, b1_ref, g1_ref, be1_ref, w2_ref, b2_ref,
                     o_ref):
    # f = A @ W1 + b1 ; BatchNorm1d (batch stats) ; LeakyReLU ;
    # y = f @ W2 + b2 ; Sigmoid.  Everything stays in VMEM / values.
    f = jnp.dot(a_ref[...], w1_ref[...],
                preferred_element_type=jnp.float32) + b1_ref[...]
    mean = jnp.mean(f, axis=0, keepdims=True)
    cent = f - mean
    var = jnp.mean(cent * cent, axis=0, keepdims=True)
    f = cent * (g1_ref[...] * jax.lax.rsqrt(var + EPS)) + be1_ref[...]
    f = jnp.where(f > 0, f, NEG_SLOPE * f)
    y = jnp.dot(f.astype(jnp.bfloat16), w2_ref[...],
                preferred_element_type=jnp.float32) + b2_ref[...]
    o_ref[...] = jax.nn.sigmoid(y)


# ----------------------------------------------------------------------------
# pallas_call wrappers
# ----------------------------------------------------------------------------
def conv_matmul_leaky(a, w, b, out_dtype=jnp.bfloat16, tm_cap=512):
    """a: (M, K). w: (Kp, Cout) bf16. b: (1, Cout) f32. -> (M, Cout) bf16."""
    M, K = a.shape
    Kp, Cout = w.shape
    if Kp != K:                               # only conv1 (K=8 -> 16) hits this
        a = jnp.pad(a, ((0, 0), (0, Kp - K)))
    tm = _pick_tm(M, tm_cap)
    grid = (M // tm,)
    return pl.pallas_call(
        _conv_leaky_kernel,
        out_shape=jax.ShapeDtypeStruct((M, Cout), out_dtype),
        grid_spec=pltpu.PrefetchScalarGridSpec(
            num_scalar_prefetch=0,
            grid=grid,
            in_specs=[pl.BlockSpec((tm, Kp), lambda i: (i, 0)),
                      pl.BlockSpec((Kp, Cout), lambda i: (0, 0)),
                      pl.BlockSpec((1, Cout), lambda i: (0, 0))],
            out_specs=pl.BlockSpec((tm, Cout), lambda i: (i, 0))),
        compiler_params=pltpu.CompilerParams(
            dimension_semantics=("parallel",)),
    )(a, w, b)


def conv_bn_leaky(a, w, b, gamma, beta, out_dtype=jnp.bfloat16):
    """Single-step conv matmul with fused BatchNorm2d (batch stats) + LeakyReLU."""
    M, K = a.shape
    Kp, Cout = w.shape
    assert Kp == K
    return pl.pallas_call(
        _conv_bn_leaky_kernel,
        out_shape=jax.ShapeDtypeStruct((M, Cout), out_dtype),
        grid_spec=pltpu.PrefetchScalarGridSpec(
            num_scalar_prefetch=0,
            grid=(1,),
            in_specs=[pl.BlockSpec((M, K), lambda i: (0, 0)),
                      pl.BlockSpec((K, Cout), lambda i: (0, 0)),
                      pl.BlockSpec((1, Cout), lambda i: (0, 0)),
                      pl.BlockSpec((1, Cout), lambda i: (0, 0)),
                      pl.BlockSpec((1, Cout), lambda i: (0, 0))],
            out_specs=pl.BlockSpec((M, Cout), lambda i: (0, 0))),
        compiler_params=pltpu.CompilerParams(
            dimension_semantics=("arbitrary",)),
    )(a, w, b, gamma, beta)


def fc_fused(flat, w1, b1, g1, be1, w2, b2):
    """flat: (N, 2048) bf16 -> sigmoid(fc2(leaky(BN1d(fc1(flat))))): (N, N2p) f32."""
    M, K1 = flat.shape
    _, N1 = w1.shape
    _, N2p = w2.shape
    return pl.pallas_call(
        _fc_fused_kernel,
        out_shape=jax.ShapeDtypeStruct((M, N2p), jnp.float32),
        grid_spec=pltpu.PrefetchScalarGridSpec(
            num_scalar_prefetch=0,
            grid=(1,),
            in_specs=[pl.BlockSpec((M, K1), lambda i: (0, 0)),
                      pl.BlockSpec((K1, N1), lambda i: (0, 0)),
                      pl.BlockSpec((1, N1), lambda i: (0, 0)),
                      pl.BlockSpec((1, N1), lambda i: (0, 0)),
                      pl.BlockSpec((1, N1), lambda i: (0, 0)),
                      pl.BlockSpec((N1, N2p), lambda i: (0, 0)),
                      pl.BlockSpec((1, N2p), lambda i: (0, 0))],
            out_specs=pl.BlockSpec((M, N2p), lambda i: (0, 0))),
        compiler_params=pltpu.CompilerParams(
            dimension_semantics=("arbitrary",)),
    )(flat, w1, b1, g1, be1, w2, b2)


# ----------------------------------------------------------------------------
# Host-side glue: NHWC im2col, parameters (PyTorch layout) + one-time prep
# ----------------------------------------------------------------------------
def im2col_nhwc(x, kh, kw, stride, pad):
    """x: (N, H, W, C) -> patches (N*Ho*Wo, kh*kw*C); column order (i, j, c)."""
    N, H, W, C = x.shape
    Ho = (H + 2 * pad - kh) // stride + 1
    Wo = (W + 2 * pad - kw) // stride + 1
    xp = jnp.pad(x, ((0, 0), (pad, pad), (pad, pad), (0, 0)))
    pieces = []
    for i in range(kh):
        for j in range(kw):
            pieces.append(xp[:, i:i + stride * Ho:stride,
                             j:j + stride * Wo:stride, :])
    cols = jnp.stack(pieces, axis=3)              # (N, Ho, Wo, kh*kw, C)
    return cols.reshape(N * Ho * Wo, kh * kw * C), Ho, Wo


def init_params(key, input_dim=INPUT_DIM, output_dim=OUTPUT_DIM):
    """Mimics utils.initialize_weights: conv/linear ~ N(0, 0.02), zero bias,
    BN gamma=1 beta=0.  PyTorch tensor layouts."""
    ks = jax.random.split(key, 5)
    p = {}
    p["w1"] = 0.02 * jax.random.normal(ks[0], (16, input_dim, 4, 2), jnp.float32)
    p["b1"] = jnp.zeros((16,), jnp.float32)
    p["w2"] = 0.02 * jax.random.normal(ks[1], (32, 16, 4, 2), jnp.float32)
    p["b2"] = jnp.zeros((32,), jnp.float32)
    p["w3"] = 0.02 * jax.random.normal(ks[2], (64, 32, 4, 2), jnp.float32)
    p["b3"] = jnp.zeros((64,), jnp.float32)
    p["bn2d_g"] = jnp.ones((64,), jnp.float32)
    p["bn2d_b"] = jnp.zeros((64,), jnp.float32)
    p["fc1_w"] = 0.02 * jax.random.normal(ks[3], (1024, 64 * 8 * 4), jnp.float32)
    p["fc1_b"] = jnp.zeros((1024,), jnp.float32)
    p["bn1d_g"] = jnp.ones((1024,), jnp.float32)
    p["bn1d_b"] = jnp.zeros((1024,), jnp.float32)
    p["fc2_w"] = 0.02 * jax.random.normal(ks[4], (output_dim, 1024), jnp.float32)
    p["fc2_b"] = jnp.zeros((output_dim,), jnp.float32)
    return p


def prepare_params(p):
    """One-time: permute weight K-rows to match NHWC im2col / (h,w,c) flatten,
    cast streamed weights to bf16, reshape biases/BN params to (1, N)."""
    def prep_conv(w, b):
        cout, cin, kh, kw = w.shape
        k = cin * kh * kw
        kp = _round_up(k, 16)                    # bf16 sublane multiple
        w_kn = jnp.transpose(w, (2, 3, 1, 0)).reshape(k, cout)   # (i, j, c) rows
        wp = jnp.pad(w_kn, ((0, kp - k), (0, 0))).astype(jnp.bfloat16)
        return wp, b.reshape(1, cout).astype(jnp.float32)

    q = {}
    q["w1"], q["b1"] = prep_conv(p["w1"], p["b1"])
    q["w2"], q["b2"] = prep_conv(p["w2"], p["b2"])
    q["w3"], q["b3"] = prep_conv(p["w3"], p["b3"])
    q["bn2d_g"] = p["bn2d_g"].reshape(1, -1).astype(jnp.float32)
    q["bn2d_b"] = p["bn2d_b"].reshape(1, -1).astype(jnp.float32)

    # fc1: PyTorch flatten order is (c, h, w); ours is (h, w, c) -> permute rows.
    c3, h3, w3 = 64, 8, 4
    fc1 = p["fc1_w"].reshape(1024, c3, h3, w3).transpose(0, 2, 3, 1)
    q["fc1_w"] = fc1.reshape(1024, c3 * h3 * w3).T.astype(jnp.bfloat16)  # (2048,1024)
    q["fc1_b"] = p["fc1_b"].reshape(1, -1).astype(jnp.float32)
    q["bn1d_g"] = p["bn1d_g"].reshape(1, -1).astype(jnp.float32)
    q["bn1d_b"] = p["bn1d_b"].reshape(1, -1).astype(jnp.float32)

    # fc2: pad out-columns to 128 for a lane-friendly (tiny) final store.
    n_out = p["fc2_w"].shape[0]
    n2p = _round_up(max(n_out, 128), 128)
    q["fc2_w"] = jnp.pad(p["fc2_w"].T.astype(jnp.float32),
                         ((0, 0), (0, n2p - n_out))).astype(jnp.bfloat16)
    q["fc2_b"] = jnp.pad(p["fc2_b"].astype(jnp.float32),
                         (0, n2p - n_out)).reshape(1, n2p)
    # TODO(synk): optional int8 (v5e/v6e) / fp8 (v7x) storage for fc1_w to halve
    # the only bandwidth-bound transfer; kept bf16 here for accuracy.
    return q


# ----------------------------------------------------------------------------
# Forward pass
# ----------------------------------------------------------------------------
def discriminator_forward(pp, x):
    # x: (N, C, H, W) NCHW float32 (PyTorch layout) -> (N, OUTPUT_DIM)
    N = x.shape[0]
    xh = jnp.transpose(x, (0, 2, 3, 1))                  # NHWC (C=1: trivial)

    # conv1 + LeakyReLU  (M-tiled, bf16 activations out)
    a1, H1, W1 = im2col_nhwc(xh, 4, 2, 2, 1)
    h1 = conv_matmul_leaky(a1, pp["w1"], pp["b1"]).reshape(N, H1, W1, -1)

    # conv2 + LeakyReLU
    a2, H2, W2 = im2col_nhwc(h1, 4, 2, 2, 1)
    h2 = conv_matmul_leaky(a2, pp["w2"], pp["b2"]).reshape(N, H2, W2, -1)

    # conv3 + BatchNorm2d (batch stats, fully in-kernel) + LeakyReLU
    a3, H3, W3 = im2col_nhwc(h2, 4, 2, 2, 1)
    h3 = conv_bn_leaky(a3, pp["w3"], pp["b3"], pp["bn2d_g"], pp["bn2d_b"])

    # Flatten: rows of h3 are (n, h, w), cols are c -> (h, w, c) flatten order
    # (fc1_w rows were permuted to match) -> contiguous, copy-free reshape.
    flat = h3.reshape(N, H3 * W3 * h3.shape[-1])

    # fc1 + BatchNorm1d + LeakyReLU + fc2 + Sigmoid in ONE pallas_call.
    out = fc_fused(flat, pp["fc1_w"], pp["fc1_b"], pp["bn1d_g"], pp["bn1d_b"],
                   pp["fc2_w"], pp["fc2_b"])
    return out[:, :OUTPUT_DIM]


# ----------------------------------------------------------------------------
# Pure-JAX f32 reference (mirrors the PyTorch forward) for a sanity check
# ----------------------------------------------------------------------------
def reference_forward(params, x):
    def conv(h, w, b):
        y = jax.lax.conv_general_dilated(
            h, w, (2, 2), [(1, 1), (1, 1)],
            dimension_numbers=("NCHW", "OIHW", "NCHW"))
        return y + b[None, :, None, None]

    def leaky(v):
        return jnp.where(v > 0, v, NEG_SLOPE * v)

    h = leaky(conv(x, params["w1"], params["b1"]))
    h = leaky(conv(h, params["w2"], params["b2"]))
    h = conv(h, params["w3"], params["b3"])
    m = jnp.mean(h, axis=(0, 2, 3), keepdims=True)
    v = jnp.var(h, axis=(0, 2, 3), keepdims=True)
    h = (h - m) * jax.lax.rsqrt(v + EPS)
    h = h * params["bn2d_g"][None, :, None, None] + params["bn2d_b"][None, :, None, None]
    h = leaky(h)
    flat = h.reshape(h.shape[0], -1)
    f = flat @ params["fc1_w"].T + params["fc1_b"]
    m1 = jnp.mean(f, axis=0)
    v1 = jnp.var(f, axis=0)
    f = (f - m1) * jax.lax.rsqrt(v1 + EPS) * params["bn1d_g"] + params["bn1d_b"]
    f = leaky(f)
    return jax.nn.sigmoid(f @ params["fc2_w"].T + params["fc2_b"])


if __name__ == "__main__":
    key = jax.random.PRNGKey(0)
    pkey, xkey = jax.random.split(key)
    params = init_params(pkey)
    prepped = prepare_params(params)   # one-time weight permute/pad/bf16 cast

    # Input (batch=8, channels=1, H=64, W=20): the three stride-2 convs with
    # kernel (4,2)/pad 1 map (64, 20) -> (8, 4), matching view(-1, 64*8*4).
    x = jax.random.normal(xkey, (8, 1, 64, 20), jnp.float32)

    out = jax.block_until_ready(jax.jit(discriminator_forward)(prepped, x))
    ref = jax.block_until_ready(jax.jit(reference_forward)(params, x))

    assert out.shape == (8, OUTPUT_DIM), out.shape
    # bf16 weights + bf16 inter-layer activations -> looser tolerance vs f32 ref
    np.testing.assert_allclose(np.asarray(out), np.asarray(ref),
                               atol=3e-2, rtol=5e-2)
    print("KERNEL_OK")
</pallas_src>

<mosaic_0001>
module attributes {stable_mosaic.version = 11 : i64} {
  func.func @_conv_leaky_kernel(%arg0: i32, %arg1: memref<352x16xf32, #tpu.memory_space<vmem>>, %arg2: memref<16x16xbf16, #tpu.memory_space<vmem>>, %arg3: memref<1x16xf32, #tpu.memory_space<vmem>>, %arg4: memref<352x16xbf16, #tpu.memory_space<vmem>>) attributes {dimension_semantics = [#tpu.dimension_semantics<parallel>], iteration_bounds = array<i64: 8>, scalar_prefetch = 0 : i64, scratch_operands = 0 : i64, tpu.core_type = #tpu.core_type<tc>, window_params = [{transform_indices = @transform_0, window_bounds = array<i64: 352, 16>}, {pipeline_mode = #tpu.pipeline_mode<synchronous>, transform_indices = @transform_1, window_bounds = array<i64: 16, 16>}, {pipeline_mode = #tpu.pipeline_mode<synchronous>, transform_indices = @transform_2, window_bounds = array<i64: 1, 16>}, {transform_indices = @transform_3, window_bounds = array<i64: 352, 16>}]} {
    %c0 = arith.constant 0 : index
    %c0_0 = arith.constant 0 : index
    %0 = vector.load %arg1[%c0, %c0_0] : memref<352x16xf32, #tpu.memory_space<vmem>>, vector<352x16xf32>
    %1 = arith.truncf %0 : vector<352x16xf32> to vector<352x16xbf16>
    %c0_1 = arith.constant 0 : index
    %c0_2 = arith.constant 0 : index
    %2 = vector.load %arg2[%c0_1, %c0_2] : memref<16x16xbf16, #tpu.memory_space<vmem>>, vector<16x16xbf16>
    %cst = arith.constant dense<0.000000e+00> : vector<352x16xf32>
    %3 = tpu.matmul %1, %2, %cst {dimension_numbers = #tpu.dot_dimension_numbers<[1], [0], [0], [1], [0, 0, 1, 1], [], []>} : vector<352x16xbf16>, vector<16x16xbf16>, vector<352x16xf32> -> vector<352x16xf32>
    %c0_3 = arith.constant 0 : index
    %c0_4 = arith.constant 0 : index
    %4 = vector.load %arg3[%c0_3, %c0_4] : memref<1x16xf32, #tpu.memory_space<vmem>>, vector<1x16xf32>
    %5 = vector.broadcast %4 : vector<1x16xf32> to vector<352x16xf32>
    %6 = arith.addf %3, %5 : vector<352x16xf32>
    %cst_5 = arith.constant 0.000000e+00 : f32
    %7 = vector.broadcast %cst_5 : f32 to vector<352x16xf32>
    %8 = arith.cmpf ogt, %6, %7 : vector<352x16xf32>
    %cst_6 = arith.constant 2.000000e-01 : f32
    %9 = vector.broadcast %cst_6 : f32 to vector<352x16xf32>
    %10 = arith.mulf %9, %6 : vector<352x16xf32>
    %11 = arith.select %8, %6, %10 : vector<352x16xi1>, vector<352x16xf32>
    %12 = arith.truncf %11 : vector<352x16xf32> to vector<352x16xbf16>
    %c0_7 = arith.constant 0 : index
    %c0_8 = arith.constant 0 : index
    %13 = vector.load %arg4[%c0_7, %c0_8] : memref<352x16xbf16, #tpu.memory_space<vmem>>, vector<352x16xbf16>
    tpu.vector_store %arg4[%c0_7, %c0_8], %12 {strides = array<i32>} : memref<352x16xbf16, #tpu.memory_space<vmem>>, vector<352x16xbf16>,
    return
  }
  func.func @transform_0(%arg0: i32) -> (i32, i32) {
    %c0_i32 = arith.constant 0 : i32
    %c0_i32_0 = arith.constant 0 : i32
    return %arg0, %c0_i32 : i32, i32
  }
  func.func @transform_1(%arg0: i32) -> (i32, i32) {
    %c0_i32 = arith.constant 0 : i32
    %c0_i32_0 = arith.constant 0 : i32
    %c0_i32_1 = arith.constant 0 : i32
    return %c0_i32, %c0_i32_0 : i32, i32
  }
  func.func @transform_2(%arg0: i32) -> (i32, i32) {
    %c0_i32 = arith.constant 0 : i32
    %c0_i32_0 = arith.constant 0 : i32
    %c0_i32_1 = arith.constant 0 : i32
    return %c0_i32, %c0_i32_0 : i32, i32
  }
  func.func @transform_3(%arg0: i32) -> (i32, i32) {
    %c0_i32 = arith.constant 0 : i32
    %c0_i32_0 = arith.constant 0 : i32
    return %arg0, %c0_i32 : i32, i32
  }
}

module attributes {stable_mosaic.version = 11 : i64} {
  func.func @_conv_leaky_kernel(%arg0: i32, %arg1: memref<384x128xbf16, #tpu.memory_space<vmem>>, %arg2: memref<128x32xbf16, #tpu.memory_space<vmem>>, %arg3: memref<1x32xf32, #tpu.memory_space<vmem>>, %arg4: memref<384x32xbf16, #tpu.memory_space<vmem>>) attributes {dimension_semantics = [#tpu.dimension_semantics<parallel>], iteration_bounds = array<i64: 2>, scalar_prefetch = 0 : i64, scratch_operands = 0 : i64, tpu.core_type = #tpu.core_type<tc>, window_params = [{transform_indices = @transform_0, window_bounds = array<i64: 384, 128>}, {pipeline_mode = #tpu.pipeline_mode<synchronous>, transform_indices = @transform_1, window_bounds = array<i64: 128, 32>}, {pipeline_mode = #tpu.pipeline_mode<synchronous>, transform_indices = @transform_2, window_bounds = array<i64: 1, 32>}, {transform_indices = @transform_3, window_bounds = array<i64: 384, 32>}]} {
    %c0 = arith.constant 0 : index
    %c0_0 = arith.constant 0 : index
    %0 = vector.load %arg1[%c0, %c0_0] : memref<384x128xbf16, #tpu.memory_space<vmem>>, vector<384x128xbf16>
    %c0_1 = arith.constant 0 : index
    %c0_2 = arith.constant 0 : index
    %1 = vector.load %arg2[%c0_1, %c0_2] : memref<128x32xbf16, #tpu.memory_space<vmem>>, vector<128x32xbf16>
    %cst = arith.constant dense<0.000000e+00> : vector<384x32xf32>
    %2 = tpu.matmul %0, %1, %cst {dimension_numbers = #tpu.dot_dimension_numbers<[1], [0], [0], [1], [0, 0, 1, 1], [], []>} : vector<384x128xbf16>, vector<128x32xbf16>, vector<384x32xf32> -> vector<384x32xf32>
    %c0_3 = arith.constant 0 : index
    %c0_4 = arith.constant 0 : index
    %3 = vector.load %arg3[%c0_3, %c0_4] : memref<1x32xf32, #tpu.memory_space<vmem>>, vector<1x32xf32>
    %4 = vector.broadcast %3 : vector<1x32xf32> to vector<384x32xf32>
    %5 = arith.addf %2, %4 : vector<384x32xf32>
    %cst_5 = arith.constant 0.000000e+00 : f32
    %6 = vector.broadcast %cst_5 : f32 to vector<384x32xf32>
    %7 = arith.cmpf ogt, %5, %6 : vector<384x32xf32>
    %cst_6 = arith.constant 2.000000e-01 : f32
    %8 = vector.broadcast %cst_6 : f32 to vector<384x32xf32>
    %9 = arith.mulf %8, %5 : vector<384x32xf32>
    %10 = arith.select %7, %5, %9 : vector<384x32xi1>, vector<384x32xf32>
    %11 = arith.truncf %10 : vector<384x32xf32> to vector<384x32xbf16>
    %c0_7 = arith.constant 0 : index
    %c0_8 = arith.constant 0 : index
    %12 = vector.load %arg4[%c0_7, %c0_8] : memref<384x32xbf16, #tpu.memory_space<vmem>>, vector<384x32xbf16>
    tpu.vector_store %arg4[%c0_7, %c0_8], %11 {strides = array<i32>} : memref<384x32xbf16, #tpu.memory_space<vmem>>, vector<384x32xbf16>,
    return
  }
  func.func @transform_0(%arg0: i32) -> (i32, i32) {
    %c0_i32 = arith.constant 0 : i32
    %c0_i32_0 = arith.constant 0 : i32
    return %arg0, %c0_i32 : i32, i32
  }
  func.func @transform_1(%arg0: i32) -> (i32, i32) {
    %c0_i32 = arith.constant 0 : i32
    %c0_i32_0 = arith.constant 0 : i32
    %c0_i32_1 = arith.constant 0 : i32
    return %c0_i32, %c0_i32_0 : i32, i32
  }
  func.func @transform_2(%arg0: i32) -> (i32, i32) {
    %c0_i32 = arith.constant 0 : i32
    %c0_i32_0 = arith.constant 0 : i32
    %c0_i32_1 = arith.constant 0 : i32
    return %c0_i32, %c0_i32_0 : i32, i32
  }
  func.func @transform_3(%arg0: i32) -> (i32, i32) {
    %c0_i32 = arith.constant 0 : i32
    %c0_i32_0 = arith.constant 0 : i32
    return %arg0, %c0_i32 : i32, i32
  }
}

module attributes {stable_mosaic.version = 11 : i64} {
  func.func @_conv_bn_leaky_kernel(%arg0: i32, %arg1: memref<256x256xbf16, #tpu.memory_space<vmem>>, %arg2: memref<256x64xbf16, #tpu.memory_space<vmem>>, %arg3: memref<1x64xf32, #tpu.memory_space<vmem>>, %arg4: memref<1x64xf32, #tpu.memory_space<vmem>>, %arg5: memref<1x64xf32, #tpu.memory_space<vmem>>, %arg6: memref<256x64xbf16, #tpu.memory_space<vmem>>) attributes {dimension_semantics = [#tpu.dimension_semantics<arbitrary>], iteration_bounds = array<i64: 1>, scalar_prefetch = 0 : i64, scratch_operands = 0 : i64, tpu.core_type = #tpu.core_type<tc>, window_params = [{pipeline_mode = #tpu.pipeline_mode<synchronous>, transform_indices = @transform_0, window_bounds = array<i64: 256, 256>}, {pipeline_mode = #tpu.pipeline_mode<synchronous>, transform_indices = @transform_1, window_bounds = array<i64: 256, 64>}, {pipeline_mode = #tpu.pipeline_mode<synchronous>, transform_indices = @transform_2, window_bounds = array<i64: 1, 64>}, {pipeline_mode = #tpu.pipeline_mode<synchronous>, transform_indices = @transform_3, window_bounds = array<i64: 1, 64>}, {pipeline_mode = #tpu.pipeline_mode<synchronous>, transform_indices = @transform_4, window_bounds = array<i64: 1, 64>}, {pipeline_mode = #tpu.pipeline_mode<synchronous>, transform_indices = @transform_5, window_bounds = array<i64: 256, 64>}]} {
    %c0 = arith.constant 0 : index
    %c0_0 = arith.constant 0 : index
    %0 = vector.load %arg1[%c0, %c0_0] : memref<256x256xbf16, #tpu.memory_space<vmem>>, vector<256x256xbf16>
    %c0_1 = arith.constant 0 : index
    %c0_2 = arith.constant 0 : index
    %1 = vector.load %arg2[%c0_1, %c0_2] : memref<256x64xbf16, #tpu.memory_space<vmem>>, vector<256x64xbf16>
    %cst = arith.constant dense<0.000000e+00> : vector<256x64xf32>
    %2 = tpu.matmul %0, %1, %cst {dimension_numbers = #tpu.dot_dimension_numbers<[1], [0], [0], [1], [0, 0, 1, 1], [], []>} : vector<256x256xbf16>, vector<256x64xbf16>, vector<256x64xf32> -> vector<256x64xf32>
    %c0_3 = arith.constant 0 : index
    %c0_4 = arith.constant 0 : index
    %3 = vector.load %arg3[%c0_3, %c0_4] : memref<1x64xf32, #tpu.memory_space<vmem>>, vector<1x64xf32>
    %4 = vector.broadcast %3 : vector<1x64xf32> to vector<256x64xf32>
    %5 = arith.addf %2, %4 : vector<256x64xf32>
    %cst_5 = arith.constant dense<0.000000e+00> : vector<64xf32>
    %6 = vector.multi_reduction <add>, %5, %cst_5 [0] : vector<256x64xf32> to vector<64xf32>
    %7 = vector.shape_cast %6 : vector<64xf32> to vector<1x64xf32>
    %cst_6 = arith.constant 2.560000e+02 : f32
    %8 = vector.broadcast %cst_6 : f32 to vector<1x64xf32>
    %9 = arith.divf %7, %8 : vector<1x64xf32>
    %10 = vector.broadcast %9 : vector<1x64xf32> to vector<256x64xf32>
    %11 = arith.subf %5, %10 : vector<256x64xf32>
    %12 = arith.mulf %11, %11 : vector<256x64xf32>
    %cst_7 = arith.constant dense<0.000000e+00> : vector<64xf32>
    %13 = vector.multi_reduction <add>, %12, %cst_7 [0] : vector<256x64xf32> to vector<64xf32>
    %14 = vector.shape_cast %13 : vector<64xf32> to vector<1x64xf32>
    %cst_8 = arith.constant 2.560000e+02 : f32
    %15 = vector.broadcast %cst_8 : f32 to vector<1x64xf32>
    %16 = arith.divf %14, %15 : vector<1x64xf32>
    %c0_9 = arith.constant 0 : index
    %c0_10 = arith.constant 0 : index
    %17 = vector.load %arg4[%c0_9, %c0_10] : memref<1x64xf32, #tpu.memory_space<vmem>>, vector<1x64xf32>
    %cst_11 = arith.constant 9.99999974E-6 : f32
    %18 = vector.broadcast %cst_11 : f32 to vector<1x64xf32>
    %19 = arith.addf %16, %18 : vector<1x64xf32>
    %20 = math.rsqrt %19 : vector<1x64xf32>
    %21 = arith.mulf %17, %20 : vector<1x64xf32>
    %22 = vector.broadcast %21 : vector<1x64xf32> to vector<256x64xf32>
    %23 = arith.mulf %11, %22 : vector<256x64xf32>
    %c0_12 = arith.constant 0 : index
    %c0_13 = arith.constant 0 : index
    %24 = vector.load %arg5[%c0_12, %c0_13] : memref<1x64xf32, #tpu.memory_space<vmem>>, vector<1x64xf32>
    %25 = vector.broadcast %24 : vector<1x64xf32> to vector<256x64xf32>
    %26 = arith.addf %23, %25 : vector<256x64xf32>
    %cst_14 = arith.constant 0.000000e+00 : f32
    %27 = vector.broadcast %cst_14 : f32 to vector<256x64xf32>
    %28 = arith.cmpf ogt, %26, %27 : vector<256x64xf32>
    %cst_15 = arith.constant 2.000000e-01 : f32
    %29 = vector.broadcast %cst_15 : f32 to vector<256x64xf32>
    %30 = arith.mulf %29, %26 : vector<256x64xf32>
    %31 = arith.select %28, %26, %30 : vector<256x64xi1>, vector<256x64xf32>
    %32 = arith.truncf %31 : vector<256x64xf32> to vector<256x64xbf16>
    %c0_16 = arith.constant 0 : index
    %c0_17 = arith.constant 0 : index
    %33 = vector.load %arg6[%c0_16, %c0_17] : memref<256x64xbf16, #tpu.memory_space<vmem>>, vector<256x64xbf16>
    tpu.vector_store %arg6[%c0_16, %c0_17], %32 {strides = array<i32>} : memref<256x64xbf16, #tpu.memory_space<vmem>>, vector<256x64xbf16>,
    return
  }
  func.func @transform_0(%arg0: i32) -> (i32, i32) {
    %c0_i32 = arith.constant 0 : i32
    %c0_i32_0 = arith.constant 0 : i32
    %c0_i32_1 = arith.constant 0 : i32
    return %c0_i32, %c0_i32_0 : i32, i32
  }
  func.func @transform_1(%arg0: i32) -> (i32, i32) {
    %c0_i32 = arith.constant 0 : i32
    %c0_i32_0 = arith.constant 0 : i32
    %c0_i32_1 = arith.constant 0 : i32
    return %c0_i32, %c0_i32_0 : i32, i32
  }
  func.func @transform_2(%arg0: i32) -> (i32, i32) {
    %c0_i32 = arith.constant 0 : i32
    %c0_i32_0 = arith.constant 0 : i32
    %c0_i32_1 = arith.constant 0 : i32
    return %c0_i32, %c0_i32_0 : i32, i32
  }
  func.func @transform_3(%arg0: i32) -> (i32, i32) {
    %c0_i32 = arith.constant 0 : i32
    %c0_i32_0 = arith.constant 0 : i32
    %c0_i32_1 = arith.constant 0 : i32
    return %c0_i32, %c0_i32_0 : i32, i32
  }
  func.func @transform_4(%arg0: i32) -> (i32, i32) {
    %c0_i32 = arith.constant 0 : i32
    %c0_i32_0 = arith.constant 0 : i32
    %c0_i32_1 = arith.constant 0 : i32
    return %c0_i32, %c0_i32_0 : i32, i32
  }
  func.func @transform_5(%arg0: i32) -> (i32, i32) {
    %c0_i32 = arith.constant 0 : i32
    %c0_i32_0 = arith.constant 0 : i32
    %c0_i32_1 = arith.constant 0 : i32
    return %c0_i32, %c0_i32_0 : i32, i32
  }
}

module attributes {stable_mosaic.version = 11 : i64} {
  func.func @_fc_fused_kernel(%arg0: i32, %arg1: memref<8x2048xbf16, #tpu.memory_space<vmem>>, %arg2: memref<2048x1024xbf16, #tpu.memory_space<vmem>>, %arg3: memref<1x1024xf32, #tpu.memory_space<vmem>>, %arg4: memref<1x1024xf32, #tpu.memory_space<vmem>>, %arg5: memref<1x1024xf32, #tpu.memory_space<vmem>>, %arg6: memref<1024x128xbf16, #tpu.memory_space<vmem>>, %arg7: memref<1x128xf32, #tpu.memory_space<vmem>>, %arg8: memref<8x128xf32, #tpu.memory_space<vmem>>) attributes {dimension_semantics = [#tpu.dimension_semantics<arbitrary>], iteration_bounds = array<i64: 1>, scalar_prefetch = 0 : i64, scratch_operands = 0 : i64, tpu.core_type = #tpu.core_type<tc>, window_params = [{pipeline_mode = #tpu.pipeline_mode<synchronous>, transform_indices = @transform_0, window_bounds = array<i64: 8, 2048>}, {pipeline_mode = #tpu.pipeline_mode<synchronous>, transform_indices = @transform_1, window_bounds = array<i64: 2048, 1024>}, {pipeline_mode = #tpu.pipeline_mode<synchronous>, transform_indices = @transform_2, window_bounds = array<i64: 1, 1024>}, {pipeline_mode = #tpu.pipeline_mode<synchronous>, transform_indices = @transform_3, window_bounds = array<i64: 1, 1024>}, {pipeline_mode = #tpu.pipeline_mode<synchronous>, transform_indices = @transform_4, window_bounds = array<i64: 1, 1024>}, {pipeline_mode = #tpu.pipeline_mode<synchronous>, transform_indices = @transform_5, window_bounds = array<i64: 1024, 128>}, {pipeline_mode = #tpu.pipeline_mode<synchronous>, transform_indices = @transform_6, window_bounds = array<i64: 1, 128>}, {pipeline_mode = #tpu.pipeline_mode<synchronous>, transform_indices = @transform_7, window_bounds = array<i64: 8, 128>}]} {
    %c0 = arith.constant 0 : index
    %c0_0 = arith.constant 0 : index
    %0 = vector.load %arg1[%c0, %c0_0] : memref<8x2048xbf16, #tpu.memory_space<vmem>>, vector<8x2048xbf16>
    %c0_1 = arith.constant 0 : index
    %c0_2 = arith.constant 0 : index
    %1 = vector.load %arg2[%c0_1, %c0_2] : memref<2048x1024xbf16, #tpu.memory_space<vmem>>, vector<2048x1024xbf16>
    %cst = arith.constant dense<0.000000e+00> : vector<8x1024xf32>
    %2 = tpu.matmul %0, %1, %cst {dimension_numbers = #tpu.dot_dimension_numbers<[1], [0], [0], [1], [0, 0, 1, 1], [], []>} : vector<8x2048xbf16>, vector<2048x1024xbf16>, vector<8x1024xf32> -> vector<8x1024xf32>
    %c0_3 = arith.constant 0 : index
    %c0_4 = arith.constant 0 : index
    %3 = vector.load %arg3[%c0_3, %c0_4] : memref<1x1024xf32, #tpu.memory_space<vmem>>, vector<1x1024xf32>
    %4 = vector.broadcast %3 : vector<1x1024xf32> to vector<8x1024xf32>
    %5 = arith.addf %2, %4 : vector<8x1024xf32>
    %cst_5 = arith.constant dense<0.000000e+00> : vector<1024xf32>
    %6 = vector.multi_reduction <add>, %5, %cst_5 [0] : vector<8x1024xf32> to vector<1024xf32>
    %7 = vector.shape_cast %6 : vector<1024xf32> to vector<1x1024xf32>
    %cst_6 = arith.constant 8.000000e+00 : f32
    %8 = vector.broadcast %cst_6 : f32 to vector<1x1024xf32>
    %9 = arith.divf %7, %8 : vector<1x1024xf32>
    %10 = vector.broadcast %9 : vector<1x1024xf32> to vector<8x1024xf32>
    %11 = arith.subf %5, %10 : vector<8x1024xf32>
    %12 = arith.mulf %11, %11 : vector<8x1024xf32>
    %cst_7 = arith.constant dense<0.000000e+00> : vector<1024xf32>
    %13 = vector.multi_reduction <add>, %12, %cst_7 [0] : vector<8x1024xf32> to vector<1024xf32>
    %14 = vector.shape_cast %13 : vector<1024xf32> to vector<1x1024xf32>
    %cst_8 = arith.constant 8.000000e+00 : f32
    %15 = vector.broadcast %cst_8 : f32 to vector<1x1024xf32>
    %16 = arith.divf %14, %15 : vector<1x1024xf32>
    %c0_9 = arith.constant 0 : index
    %c0_10 = arith.constant 0 : index
    %17 = vector.load %arg4[%c0_9, %c0_10] : memref<1x1024xf32, #tpu.memory_space<vmem>>, vector<1x1024xf32>
    %cst_11 = arith.constant 9.99999974E-6 : f32
    %18 = vector.broadcast %cst_11 : f32 to vector<1x1024xf32>
    %19 = arith.addf %16, %18 : vector<1x1024xf32>
    %20 = math.rsqrt %19 : vector<1x1024xf32>
    %21 = arith.mulf %17, %20 : vector<1x1024xf32>
    %22 = vector.broadcast %21 : vector<1x1024xf32> to vector<8x1024xf32>
    %23 = arith.mulf %11, %22 : vector<8x1024xf32>
    %c0_12 = arith.constant 0 : index
    %c0_13 = arith.constant 0 : index
    %24 = vector.load %arg5[%c0_12, %c0_13] : memref<1x1024xf32, #tpu.memory_space<vmem>>, vector<1x1024xf32>
    %25 = vector.broadcast %24 : vector<1x1024xf32> to vector<8x1024xf32>
    %26 = arith.addf %23, %25 : vector<8x1024xf32>
    %cst_14 = arith.constant 0.000000e+00 : f32
    %27 = vector.broadcast %cst_14 : f32 to vector<8x1024xf32>
    %28 = arith.cmpf ogt, %26, %27 : vector<8x1024xf32>
    %cst_15 = arith.constant 2.000000e-01 : f32
    %29 = vector.broadcast %cst_15 : f32 to vector<8x1024xf32>
    %30 = arith.mulf %29, %26 : vector<8x1024xf32>
    %31 = arith.select %28, %26, %30 : vector<8x1024xi1>, vector<8x1024xf32>
    %32 = arith.truncf %31 : vector<8x1024xf32> to vector<8x1024xbf16>
    %c0_16 = arith.constant 0 : index
    %c0_17 = arith.constant 0 : index
    %33 = vector.load %arg6[%c0_16, %c0_17] : memref<1024x128xbf16, #tpu.memory_space<vmem>>, vector<1024x128xbf16>
    %cst_18 = arith.constant dense<0.000000e+00> : vector<8x128xf32>
    %34 = tpu.matmul %32, %33, %cst_18 {dimension_numbers = #tpu.dot_dimension_numbers<[1], [0], [0], [1], [0, 0, 1, 1], [], []>} : vector<8x1024xbf16>, vector<1024x128xbf16>, vector<8x128xf32> -> vector<8x128xf32>
    %c0_19 = arith.constant 0 : index
    %c0_20 = arith.constant 0 : index
    %35 = vector.load %arg7[%c0_19, %c0_20] : memref<1x128xf32, #tpu.memory_space<vmem>>, vector<1x128xf32>
    %36 = vector.broadcast %35 : vector<1x128xf32> to vector<8x128xf32>
    %37 = arith.addf %34, %36 : vector<8x128xf32>
    %38 = arith.negf %37 : vector<8x128xf32>
    %39 = math.exp %38 : vector<8x128xf32>
    %cst_21 = arith.constant 1.000000e+00 : f32
    %40 = vector.broadcast %cst_21 : f32 to vector<8x128xf32>
    %41 = arith.addf %40, %39 : vector<8x128xf32>
    %42 = arith.divf %40, %41 : vector<8x128xf32>
    %c0_22 = arith.constant 0 : index
    %c0_23 = arith.constant 0 : index
    %43 = vector.load %arg8[%c0_22, %c0_23] : memref<8x128xf32, #tpu.memory_space<vmem>>, vector<8x128xf32>
    tpu.vector_store %arg8[%c0_22, %c0_23], %42 {strides = array<i32>} : memref<8x128xf32, #tpu.memory_space<vmem>>, vector<8x128xf32>,
    return
  }
  func.func @transform_0(%arg0: i32) -> (i32, i32) {
    %c0_i32 = arith.constant 0 : i32
    %c0_i32_0 = arith.constant 0 : i32
    %c0_i32_1 = arith.constant 0 : i32
    return %c0_i32, %c0_i32_0 : i32, i32
  }
  func.func @transform_1(%arg0: i32) -> (i32, i32) {
    %c0_i32 = arith.constant 0 : i32
    %c0_i32_0 = arith.constant 0 : i32
    %c0_i32_1 = arith.constant 0 : i32
    return %c0_i32, %c0_i32_0 : i32, i32
  }
  func.func @transform_2(%arg0: i32) -> (i32, i32) {
    %c0_i32 = arith.constant 0 : i32
    %c0_i32_0 = arith.constant 0 : i32
    %c0_i32_1 = arith.constant 0 : i32
    return %c0_i32, %c0_i32_0 : i32, i32
  }
  func.func @transform_3(%arg0: i32) -> (i32, i32) {
    %c0_i32 = arith.constant 0 : i32
    %c0_i32_0 = arith.constant 0 : i32
    %c0_i32_1 = arith.constant 0 : i32
    return %c0_i32, %c0_i32_0 : i32, i32
  }
  func.func @transform_4(%arg0: i32) -> (i32, i32) {
    %c0_i32 = arith.constant 0 : i32
    %c0_i32_0 = arith.constant 0 : i32
    %c0_i32_1 = arith.constant 0 : i32
    return %c0_i32, %c0_i32_0 : i32, i32
  }
  func.func @transform_5(%arg0: i32) -> (i32, i32) {
    %c0_i32 = arith.constant 0 : i32
    %c0_i32_0 = arith.constant 0 : i32
    %c0_i32_1 = arith.constant 0 : i32
    return %c0_i32, %c0_i32_0 : i32, i32
  }
  func.func @transform_6(%arg0: i32) -> (i32, i32) {
    %c0_i32 = arith.constant 0 : i32
    %c0_i32_0 = arith.constant 0 : i32
    %c0_i32_1 = arith.constant 0 : i32
    return %c0_i32, %c0_i32_0 : i32, i32
  }
  func.func @transform_7(%arg0: i32) -> (i32, i32) {
    %c0_i32 = arith.constant 0 : i32
    %c0_i32_0 = arith.constant 0 : i32
    %c0_i32_1 = arith.constant 0 : i32
    return %c0_i32, %c0_i32_0 : i32, i32
  }
}

</mosaic_0001>

<bundles_post_ra>
// kernel: discriminator_forward.4
= control target key start
LH: loop header
LB: loop body
LE: loop exit
PB: predicated region body
PF: predicated region fallthrough
CT: control target
= control target key end

     0   :  { %s1170_s12 = smov 0   ;;  %s1402_s0 = inlined_call_operand.vmem [shape: f32[2816,16], index: 0, kind: input, shape index: {}]   ;;  %s1403_s1 = inlined_call_operand.vmem [shape: bf16[16,16], index: 1, kind: input, shape index: {}]   ;;  %s1404_s2 = inlined_call_operand.vmem [shape: f32[1,16], index: 2, kind: input, shape index: {}]   ;;  %s1405_s3 = inlined_call_operand.vmem [shape: bf16[2816,16], index: 3, kind: output, shape index: {}]  }
   0x1 LB: > { %s941_s13 = sadd.s32 4294967295, %s1148_s12   ;;  %p945_p0 = scmp.ge.s32.totalorder %s1148_s12, 1  ;;  %s1148_s12 = sphi %s1170_s12, %s13_s12  }
   0x2   : > { %p138_p1 = scmp.lt.s32.totalorder %s1148_s12, 9 }
   0x4   : > { %p139_p2 = pnand %p945_p0, %p138_p1 }
   0x5   : > { %s162_s16 = smul.u32 (!%p139_p2), 44, %s941_s13 }
   0x6   : > { %142 = sbr.rel (%p139_p2) target bundleno = 273 (0x111), region = 32 }
   0x7   : > { %p163_p3 = scmp.lt.s32.totalorder (!%p139_p2), %s162_s16, 351 }
   0xb   : > { %v1141_v0 = vld [vmem:[%s1403_s1] sm:$0xff]   ;;  %s1407_s16 = smov (!%p163_p3, %s162_s16), 351  ;;  %vm256_vm0 = vcmask 130048   ;;  %vm840_vm2 = vcmask 125952  }
   0xc   : > { %1085 = vmatprep.subr.bf16.mxu0 %v1141_v0  ;;  %1131 = vmatprep.subr.bf16.mxu1 %v1141_v0  ;;  %s946_s17 = sshll.u32 %s1407_s16, 3  ;;  %s947_s23 = sshll.u32 %s1407_s16, 2 }
   0xd   : > { %1086 = vmatpush3.bf16.msra.mxu0 %v1141_v0  ;;  %1132 = vmatpush3.bf16.msra.mxu1 %v1141_v0  ;;  %s1187_s20 = scalar_lea.vmem %s1402_s0, %s946_s17  ;;  %s1268_s26 = scalar_lea.vmem %s1405_s3, %s947_s23 }
   0xe   : > { %v175_v1 = vld [vmem:[%s1187_s20] sm:$0xff]  ;;  %v176_v2 = vld [vmem:[%s1187_s20 + $0x8] sm:$0xff]  ;;  %v177_v6 = vld [vmem:[%s1187_s20 + $0x10] sm:$0xff] }
   0xf   : > { %v199_v3 = vld [vmem:[%s1187_s20 + $0xc0] sm:$0xff]  ;;  %v219_v4 = vpack.c.bf16 %v176_v2, %v175_v1  ;;  %v200_v5 = vld [vmem:[%s1187_s20 + $0xc8] sm:$0xff]  ;;  %v178_v7 = vld [vmem:[%s1187_s20 + $0x18] sm:$0xff] }
  0x10   : > { %v231_v8 = vpack.c.bf16 %v200_v5, %v199_v3  ;;  %v220_v9 = vpack.c.bf16 %v178_v7, %v177_v6  ;;  %v201_v10 = vld [vmem:[%s1187_s20 + $0xd0] sm:$0xff]  ;;  %v202_v11 = vld [vmem:[%s1187_s20 + $0xd8] sm:$0xff]  ;;  %v179_v12 = vld [vmem:[%s1187_s20 + $0x20] sm:$0xff] }
  0x11   : > { %1087 = vmatprep.mubr.msk.bf16.mxu0 %vm256_vm0, %v219_v4  ;;  %v232_v13 = vpack.c.bf16 %v202_v11, %v201_v10  ;;  %v180_v14 = vld [vmem:[%s1187_s20 + $0x28] sm:$0xff]  ;;  %v203_v15 = vld [vmem:[%s1187_s20 + $0xe0] sm:$0xff]  ;;  %v181_v19 = vld [vmem:[%s1187_s20 + $0x30] sm:$0xff] }
  0x12   : > { %v204_v16 = vld [vmem:[%s1187_s20 + $0xe8] sm:$0xff]  ;;  %1111 = vmatprep.mubr.msk.bf16.mxu1 %vm256_vm0, %v231_v8  ;;  %1088 = vmatmul.mubr.msk.bf16.vlgmr.msra.gmra.mxu0 %vm256_vm0, %v220_v9  ;;  %v221_v17 = vpack.c.bf16 %v180_v14, %v179_v12  ;;  %v182_v20 = vld [vmem:[%s1187_s20 + $0x38] sm:$0xff]  ;;  %v205_v21 = vld [vmem:[%s1187_s20 + $0xf0] sm:$0xff] }
  0x13   : > { %v233_v18 = vpack.c.bf16 %v204_v16, %v203_v15  ;;  %1112 = vmatmul.mubr.msk.bf16.vlgmr.msra.gmra.mxu1 %vm256_vm0, %v232_v13  ;;  %v206_v22 = vld [vmem:[%s1187_s20 + $0xf8] sm:$0xff]  ;;  %v183_v23 = vld [vmem:[%s1187_s20 + $0x40] sm:$0xff]  ;;  %v184_v24 = vld [vmem:[%s1187_s20 + $0x48] sm:$0xff]  ;;  %v222_v27 = vpack.c.bf16 %v182_v20, %v181_v19 }
  0x14   : > { %1091 = vmatprep.mubr.msk.bf16.mxu0 %vm256_vm0, %v221_v17  ;;  %v207_v25 = vld [vmem:[%s1187_s20 + $0x100] sm:$0xff]  ;;  %v208_v26 = vld [vmem:[%s1187_s20 + $0x108] sm:$0xff]  ;;  %v234_v28 = vpack.c.bf16 %v206_v22, %v205_v21  ;;  %v223_v29 = vpack.c.bf16 %v184_v24, %v183_v23  ;;  %v185_v31 = vld [vmem:[%s1187_s20 + $0x50] sm:$0xff] }
  0x15   : > { %1115 = vmatprep.mubr.msk.bf16.mxu1 %vm256_vm0, %v233_v18  ;;  %v235_v30 = vpack.c.bf16 %v208_v26, %v207_v25  ;;  %v186_v32 = vld [vmem:[%s1187_s20 + $0x58] sm:$0xff]  ;;  %v209_v33 = vld [vmem:[%s1187_s20 + $0x110] sm:$0xff]  ;;  %v187_v35 = vld [vmem:[%s1187_s20 + $0x60] sm:$0xff] }
  0x16   : > { %v210_v34 = vld [vmem:[%s1187_s20 + $0x118] sm:$0xff]  ;;  %v188_v36 = vld [vmem:[%s1187_s20 + $0x68] sm:$0xff]  ;;  %v211_v37 = vld [vmem:[%s1187_s20 + $0x120] sm:$0xff]  ;;  %v224_v39 = vpack.c.bf16 %v186_v32, %v185_v31 }
  0x17   : > { %v212_v38 = vld [vmem:[%s1187_s20 + $0x128] sm:$0xff]  ;;  %v236_v40 = vpack.c.bf16 %v210_v34, %v209_v33  ;;  %v225_v41 = vpack.c.bf16 %v188_v36, %v187_v35  ;;  %v189_v43 = vld [vmem:[%s1187_s20 + $0x70] sm:$0xff]  ;;  %v190_v44 = vld [vmem:[%s1187_s20 + $0x78] sm:$0xff] }
  0x18   : > { %v237_v42 = vpack.c.bf16 %v212_v38, %v211_v37  ;;  %v213_v45 = vld [vmem:[%s1187_s20 + $0x130] sm:$0xff]  ;;  %v214_v46 = vld [vmem:[%s1187_s20 + $0x138] sm:$0xff]  ;;  %v191_v47 = vld [vmem:[%s1187_s20 + $0x80] sm:$0xff]  ;;  %v226_v51 = vpack.c.bf16 %v190_v44, %v189_v43 }
  0x19   : > { %v192_v48 = vld [vmem:[%s1187_s20 + $0x88] sm:$0xff]  ;;  %v215_v49 = vld [vmem:[%s1187_s20 + $0x140] sm:$0xff]  ;;  %v238_v52 = vpack.c.bf16 %v214_v46, %v213_v45  ;;  %v193_v55 = vld [vmem:[%s1187_s20 + $0x90] sm:$0xff] }
  0x1a   : > { %1092 = vmatmul.mubr.msk.bf16.gmra.mxu0 %vm256_vm0, %v222_v27  ;;  %v216_v50 = vld [vmem:[%s1187_s20 + $0x148] sm:$0xff]  ;;  %v227_v53 = vpack.c.bf16 %v192_v48, %v191_v47  ;;  %v194_v56 = vld [vmem:[%s1187_s20 + $0x98] sm:$0xff]  ;;  %v217_v57 = vld [vmem:[%s1187_s20 + $0x150] sm:$0xff] }
  0x1b   : > { %1116 = vmatmul.mubr.msk.bf16.gmra.mxu1 %vm256_vm0, %v234_v28  ;;  %1095 = vmatprep.mubr.msk.bf16.mxu0 %vm256_vm0, %v223_v29  ;;  %v239_v54 = vpack.c.bf16 %v216_v50, %v215_v49  ;;  %v218_v58 = vld [vmem:[%s1187_s20 + $0x158] sm:$0xff]  ;;  %v195_v59 = vld [vmem:[%s1187_s20 + $0xa0] sm:$0xff]  ;;  %v196_v60 = vld [vmem:[%s1187_s20 + $0xa8] sm:$0xff]  ;;  %v228_v61 = vpack.c.bf16 %v194_v56, %v193_v55 }
  0x1c   : > { %1119 = vmatprep.mubr.msk.bf16.mxu1 %vm256_vm0, %v235_v30  ;;  %v240_v62 = vpack.c.bf16 %v218_v58, %v217_v57  ;;  %v229_v63 = vpack.c.bf16 %v196_v60, %v195_v59  ;;  %v197_v0 = vld [vmem:[%s1187_s20 + $0xb0] sm:$0xff]  ;;  %v198_v1 = vld [vmem:[%s1187_s20 + $0xb8] sm:$0xff]  ;;  %v1258_v3 = vld [vmem:[%s1404_s2] ss:$0 sm:$0xff] }
  0x1d   : > { %v230_v2 = vpack.c.bf16 %v198_v1, %v197_v0 }
  0x22   : > { %1096 = vmatmul.mubr.msk.bf16.gmra.mxu0 %vm256_vm0, %v224_v39 }
  0x23   : > { %1120 = vmatmul.mubr.msk.bf16.gmra.mxu1 %vm256_vm0, %v236_v40  ;;  %1099 = vmatprep.mubr.msk.bf16.mxu0 %vm256_vm0, %v225_v41 }
  0x24   : > { %1123 = vmatprep.mubr.msk.bf16.mxu1 %vm256_vm0, %v237_v42 }
  0x2a   : > { %1100 = vmatmul.mubr.msk.bf16.gmra.mxu0 %vm256_vm0, %v226_v51 }
  0x2b   : > { %1124 = vmatmul.mubr.msk.bf16.gmra.mxu1 %vm256_vm0, %v238_v52  ;;  %1103 = vmatprep.mubr.msk.bf16.mxu0 %vm256_vm0, %v227_v53 }
  0x2c   : > { %1127 = vmatprep.mubr.msk.bf16.mxu1 %vm256_vm0, %v239_v54 }
  0x32   : > { %1104 = vmatmul.mubr.msk.bf16.gmra.mxu0 %vm256_vm0, %v228_v61 }
  0x33   : > { %1128 = vmatmul.mubr.msk.bf16.gmra.mxu1 %vm256_vm0, %v240_v62  ;;  %1107 = vmatprep.mubr.msk.bf16.mxu0 %vm256_vm0, %v229_v63 }
  0x3a   : > { %1108 = vmatmul.mubr.msk.bf16.gmra.mxu0 %vm256_vm0, %v230_v2 }
  0xd2   : > { %v1089_v4 = vpop.f32.mrf.mxu0 }
  0xd3   : > { %v366_v5 = vadd.f32 %v1089_v4, %v1258_v3  ;;  %v1113_v6 = vpop.f32.mrf.mxu1 }
  0xd4   : > { %v462_v7 = vadd.f32 %v1113_v6, %v1258_v3  ;;  %v357_v8 = vpop.f32.mrf.mxu0 }
  0xd5   : > { %vm534_vm1 = vcmp.gt.f32.partialorder %v366_v5, 0.0  ;;  %v578_v9 = vmul.f32 0.2, %v366_v5  ;;  %v358_v10 = vadd.f32 %v1258_v3, %v357_v8  ;;  %v453_v11 = vpop.f32.mrf.mxu1 }
  0xd6   : > { %vm558_vm3 = vcmp.gt.f32.partialorder %v462_v7, 0.0  ;;  %v602_v12 = vmul.f32 0.2, %v462_v7  ;;  %v454_v13 = vadd.f32 %v1258_v3, %v453_v11  ;;  %v1090_v14 = vpop.f32.mrf.mxu0 }
  0xd7   : > { %v622_v15 = vsel %vm534_vm1, %v366_v5, %v578_v9  ;;  %vm532_vm4 = vcmp.gt.f32.partialorder %v358_v10, 0.0  ;;  %v576_v16 = vmul.f32 0.2, %v358_v10  ;;  %v369_v17 = vadd.f32 %v1090_v14, %v1258_v3  ;;  %v1114_v18 = vpop.f32.mrf.mxu1 }
  0xd8   : > { %v1020_v19 = vpack.c.bf16 %v622_v15, %v622_v15  ;;  %v646_v20 = vsel %vm558_vm3, %v462_v7, %v602_v12  ;;  %vm556_vm5 = vcmp.gt.f32.partialorder %v454_v13, 0.0  ;;  %v600_v21 = vmul.f32 0.2, %v454_v13  ;;  %v360_v22 = vpop.f32.mrf.mxu0 }
  0xd9   : > { %v1044_v23 = vpack.c.bf16 %v646_v20, %v646_v20  ;;  %v620_v24 = vsel %vm532_vm4, %v358_v10, %v576_v16  ;;  %vm535_vm6 = vcmp.gt.f32.partialorder %v369_v17, 0.0  ;;  %v579_v25 = vmul.f32 0.2, %v369_v17  ;;  %v456_v26 = vpop.f32.mrf.mxu1 }
  0xda   : > { %843 = vst.msk [vmem:[%s1268_s26 + $0x8] sm:$0xf] %vm840_vm2, %v1020_v19  ;;  %v1018_v27 = vpack.c.bf16 %v620_v24, %v620_v24  ;;  %v644_v28 = vsel %vm556_vm5, %v454_v13, %v600_v21  ;;  %v465_v29 = vadd.f32 %v1114_v18, %v1258_v3  ;;  %v361_v30 = vadd.f32 %v1258_v3, %v360_v22  ;;  %v1093_v31 = vpop.f32.mrf.mxu0 }
  0xdb   : > { %867 = vst.msk [vmem:[%s1268_s26 + $0x68] sm:$0xf] %vm840_vm2, %v1044_v23  ;;  %v1042_v32 = vpack.c.bf16 %v644_v28, %v644_v28  ;;  %v623_v33 = vsel %vm535_vm6, %v369_v17, %v579_v25  ;;  %v457_v34 = vadd.f32 %v1258_v3, %v456_v26  ;;  %v382_v35 = vadd.f32 %v1093_v31, %v1258_v3  ;;  %v1117_v36 = vpop.f32.mrf.mxu1 }
  0xdc   : > { %841 = vst.msk [vmem:[%s1268_s26] sm:$0xf] %vm840_vm2, %v1018_v27  ;;  %v1021_v37 = vpack.c.bf16 %v623_v33, %v623_v33  ;;  %vm559_vm7 = vcmp.gt.f32.partialorder %v465_v29, 0.0  ;;  %v603_v38 = vmul.f32 0.2, %v465_v29  ;;  %vm533_vm8 = vcmp.gt.f32.partialorder %v361_v30, 0.0  ;;  %v373_v39 = vpop.f32.mrf.mxu0 }
  0xdd   : > { %865 = vst.msk [vmem:[%s1268_s26 + $0x60] sm:$0xf] %vm840_vm2, %v1042_v32  ;;  %v577_v40 = vmul.f32 0.2, %v361_v30  ;;  %vm557_vm9 = vcmp.gt.f32.partialorder %v457_v34, 0.0  ;;  %vm538_vm10 = vcmp.gt.f32.partialorder %v382_v35, 0.0  ;;  %v469_v42 = vpop.f32.mrf.mxu1  ;;  %v478_v45 = vadd.f32 %v1117_v36, %v1258_v3 }
  0xde   : > { %v601_v41 = vmul.f32 0.2, %v457_v34  ;;  %844 = vst.msk [vmem:[%s1268_s26 + $0xc] sm:$0xf] %vm840_vm2, %v1021_v37  ;;  %v647_v43 = vsel %vm559_vm7, %v465_v29, %v603_v38  ;;  %v582_v44 = vmul.f32 0.2, %v382_v35  ;;  %v374_v46 = vadd.f32 %v1258_v3, %v373_v39  ;;  %v1094_v47 = vpop.f32.mrf.mxu0 }
  0xdf   : > { %v1045_v48 = vpack.c.bf16 %v647_v43, %v647_v43  ;;  %v621_v49 = vsel %vm533_vm8, %v361_v30, %v577_v40  ;;  %v470_v51 = vadd.f32 %v1258_v3, %v469_v42  ;;  %v1118_v52 = vpop.f32.mrf.mxu1  ;;  %vm562_vm11 = vcmp.gt.f32.partialorder %v478_v45, 0.0 }
  0xe0   : > { %v645_v50 = vsel %vm557_vm9, %v457_v34, %v601_v41  ;;  %v1019_v53 = vpack.c.bf16 %v621_v49, %v621_v49  ;;  %v626_v55 = vsel %vm538_vm10, %v382_v35, %v582_v44  ;;  %v376_v56 = vpop.f32.mrf.mxu0  ;;  %v606_v58 = vmul.f32 0.2, %v478_v45 }
  0xe1   : > { %v1043_v54 = vpack.c.bf16 %v645_v50, %v645_v50  ;;  %868 = vst.msk [vmem:[%s1268_s26 + $0x6c] sm:$0xf] %vm840_vm2, %v1045_v48  ;;  %v1024_v57 = vpack.c.bf16 %v626_v55, %v626_v55  ;;  %vm536_vm12 = vcmp.gt.f32.partialorder %v374_v46, 0.0  ;;  %v580_v59 = vmul.f32 0.2, %v374_v46  ;;  %v472_v60 = vpop.f32.mrf.mxu1 }
  0xe2   : > { %842 = vst.msk [vmem:[%s1268_s26 + $0x4] sm:$0xf] %vm840_vm2, %v1019_v53  ;;  %vm560_vm13 = vcmp.gt.f32.partialorder %v470_v51, 0.0  ;;  %v604_v61 = vmul.f32 0.2, %v470_v51  ;;  %v385_v62 = vadd.f32 %v1094_v47, %v1258_v3  ;;  %v481_v63 = vadd.f32 %v1118_v52, %v1258_v3  ;;  %v1097_v0 = vpop.f32.mrf.mxu0 }
  0xe3   : > { %866 = vst.msk [vmem:[%s1268_s26 + $0x64] sm:$0xf] %vm840_vm2, %v1043_v54  ;;  %847 = vst.msk [vmem:[%s1268_s26 + $0x18] sm:$0xf] %vm840_vm2, %v1024_v57  ;;  %v650_v1 = vsel %vm562_vm11, %v478_v45, %v606_v58  ;;  %v624_v2 = vsel %vm536_vm12, %v374_v46, %v580_v59  ;;  %v377_v4 = vadd.f32 %v1258_v3, %v376_v56  ;;  %v1121_v6 = vpop.f32.mrf.mxu1 }
  0xe4   : > { %v473_v5 = vadd.f32 %v1258_v3, %v472_v60  ;;  %v1048_v7 = vpack.c.bf16 %v650_v1, %v650_v1  ;;  %v1022_v8 = vpack.c.bf16 %v624_v2, %v624_v2  ;;  %v648_v9 = vsel %vm560_vm13, %v470_v51, %v604_v61  ;;  %v389_v10 = vpop.f32.mrf.mxu0 }
  0xe5   : > { %vm539_vm14 = vcmp.gt.f32.partialorder %v385_v62, 0.0  ;;  %v1046_v11 = vpack.c.bf16 %v648_v9, %v648_v9  ;;  %v583_v12 = vmul.f32 0.2, %v385_v62  ;;  %vm563_vm15 = vcmp.gt.f32.partialorder %v481_v63, 0.0  ;;  %v485_v14 = vpop.f32.mrf.mxu1 }
  0xe6   : > { %v607_v13 = vmul.f32 0.2, %v481_v63  ;;  %871 = vst.msk [vmem:[%s1268_s26 + $0x78] sm:$0xf] %vm840_vm2, %v1048_v7  ;;  %845 = vst.msk [vmem:[%s1268_s26 + $0x10] sm:$0xf] %vm840_vm2, %v1022_v8  ;;  %v1098_v17 = vpop.f32.mrf.mxu0  ;;  %v398_v20 = vadd.f32 %v1097_v0, %v1258_v3  ;;  %v494_v21 = vadd.f32 %v1121_v6, %v1258_v3  ;;  %v390_v33 = vadd.f32 %v1258_v3, %v389_v10 }
  0xe7   : > { %vm537_vm0 = vcmp.gt.f32.partialorder %v377_v4, 0.0  ;;  %v581_v15 = vmul.f32 0.2, %v377_v4  ;;  %vm561_vm1 = vcmp.gt.f32.partialorder %v473_v5, 0.0  ;;  %v605_v16 = vmul.f32 0.2, %v473_v5  ;;  %v1122_v22 = vpop.f32.mrf.mxu1 }
  0xe8   : > { %869 = vst.msk [vmem:[%s1268_s26 + $0x70] sm:$0xf] %vm840_vm2, %v1046_v11  ;;  %v627_v18 = vsel %vm539_vm14, %v385_v62, %v583_v12  ;;  %v651_v19 = vsel %vm563_vm15, %v481_v63, %v607_v13  ;;  %v392_v27 = vpop.f32.mrf.mxu0  ;;  %vm542_vm3 = vcmp.gt.f32.partialorder %v398_v20, 0.0  ;;  %v586_v30 = vmul.f32 0.2, %v398_v20 }
  0xe9   : > { %v1025_v23 = vpack.c.bf16 %v627_v18, %v627_v18  ;;  %v1049_v24 = vpack.c.bf16 %v651_v19, %v651_v19  ;;  %v625_v25 = vsel %vm537_vm0, %v377_v4, %v581_v15  ;;  %v649_v26 = vsel %vm561_vm1, %v473_v5, %v605_v16  ;;  %v488_v31 = vpop.f32.mrf.mxu1 }
  0xea   : > { %v1023_v28 = vpack.c.bf16 %v625_v25, %v625_v25  ;;  %v1047_v29 = vpack.c.bf16 %v649_v26, %v649_v26  ;;  %vm566_vm4 = vcmp.gt.f32.partialorder %v494_v21, 0.0  ;;  %v610_v32 = vmul.f32 0.2, %v494_v21  ;;  %v1101_v35 = vpop.f32.mrf.mxu0 }
  0xeb   : > { %848 = vst.msk [vmem:[%s1268_s26 + $0x1c] sm:$0xf] %vm840_vm2, %v1025_v23  ;;  %872 = vst.msk [vmem:[%s1268_s26 + $0x7c] sm:$0xf] %vm840_vm2, %v1049_v24  ;;  %v486_v34 = vadd.f32 %v1258_v3, %v485_v14  ;;  %v630_v36 = vsel %vm542_vm3, %v398_v20, %v586_v30  ;;  %v401_v37 = vadd.f32 %v1098_v17, %v1258_v3  ;;  %v1125_v40 = vpop.f32.mrf.mxu1  ;;  %vm540_vm5 = vcmp.gt.f32.partialorder %v390_v33, 0.0 }
  0xec   : > { %846 = vst.msk [vmem:[%s1268_s26 + $0x14] sm:$0xf] %vm840_vm2, %v1023_v28  ;;  %870 = vst.msk [vmem:[%s1268_s26 + $0x74] sm:$0xf] %vm840_vm2, %v1047_v29  ;;  %v497_v38 = vadd.f32 %v1122_v22, %v1258_v3  ;;  %v393_v39 = vadd.f32 %v1258_v3, %v392_v27  ;;  %v1028_v41 = vpack.c.bf16 %v630_v36, %v630_v36  ;;  %v584_v43 = vmul.f32 0.2, %v390_v33  ;;  %v405_v44 = vpop.f32.mrf.mxu0 }
  0xed   : > { %v654_v42 = vsel %vm566_vm4, %v494_v21, %v610_v32  ;;  %vm564_vm6 = vcmp.gt.f32.partialorder %v486_v34, 0.0  ;;  %v608_v46 = vmul.f32 0.2, %v486_v34  ;;  %vm543_vm7 = vcmp.gt.f32.partialorder %v401_v37, 0.0  ;;  %v501_v47 = vpop.f32.mrf.mxu1 }
  0xee   : > { %v1052_v45 = vpack.c.bf16 %v654_v42, %v654_v42  ;;  %851 = vst.msk [vmem:[%s1268_s26 + $0x28] sm:$0xf] %vm840_vm2, %v1028_v41  ;;  %v628_v48 = vsel %vm540_vm5, %v390_v33, %v584_v43  ;;  %v587_v49 = vmul.f32 0.2, %v401_v37  ;;  %vm567_vm8 = vcmp.gt.f32.partialorder %v497_v38, 0.0  ;;  %v1102_v51 = vpop.f32.mrf.mxu0 }
  0xef   : > { %v611_v50 = vmul.f32 0.2, %v497_v38  ;;  %v1026_v52 = vpack.c.bf16 %v628_v48, %v628_v48  ;;  %v652_v53 = vsel %vm564_vm6, %v486_v34, %v608_v46  ;;  %vm541_vm9 = vcmp.gt.f32.partialorder %v393_v39, 0.0  ;;  %v1126_v55 = vpop.f32.mrf.mxu1 }
  0xf0   : > { %875 = vst.msk [vmem:[%s1268_s26 + $0x88] sm:$0xf] %vm840_vm2, %v1052_v45  ;;  %v585_v54 = vmul.f32 0.2, %v393_v39  ;;  %v1050_v56 = vpack.c.bf16 %v652_v53, %v652_v53  ;;  %v631_v57 = vsel %vm543_vm7, %v401_v37, %v587_v49  ;;  %v489_v59 = vadd.f32 %v1258_v3, %v488_v31  ;;  %v408_v60 = vpop.f32.mrf.mxu0 }
  0xf1   : > { %v655_v58 = vsel %vm567_vm8, %v497_v38, %v611_v50  ;;  %849 = vst.msk [vmem:[%s1268_s26 + $0x20] sm:$0xf] %vm840_vm2, %v1026_v52  ;;  %v1029_v61 = vpack.c.bf16 %v631_v57, %v631_v57  ;;  %v414_v0 = vadd.f32 %v1101_v35, %v1258_v3  ;;  %v504_v1 = vpop.f32.mrf.mxu1  ;;  %v510_v5 = vadd.f32 %v1125_v40, %v1258_v3 }
  0xf2   : > { %v1053_v62 = vpack.c.bf16 %v655_v58, %v655_v58  ;;  %v629_v63 = vsel %vm541_vm9, %v393_v39, %v585_v54  ;;  %873 = vst.msk [vmem:[%s1268_s26 + $0x80] sm:$0xf] %vm840_vm2, %v1050_v56  ;;  %vm565_vm10 = vcmp.gt.f32.partialorder %v489_v59, 0.0  ;;  %v609_v4 = vmul.f32 0.2, %v489_v59  ;;  %v1105_v6 = vpop.f32.mrf.mxu0 }
  0xf3   : > { %v1027_v2 = vpack.c.bf16 %v629_v63, %v629_v63  ;;  %852 = vst.msk [vmem:[%s1268_s26 + $0x2c] sm:$0xf] %vm840_vm2, %v1029_v61  ;;  %vm546_vm11 = vcmp.gt.f32.partialorder %v414_v0, 0.0  ;;  %v590_v7 = vmul.f32 0.2, %v414_v0  ;;  %v406_v8 = vadd.f32 %v1258_v3, %v405_v44  ;;  %v1129_v10 = vpop.f32.mrf.mxu1 }
  0xf4   : > { %876 = vst.msk [vmem:[%s1268_s26 + $0x8c] sm:$0xf] %vm840_vm2, %v1053_v62  ;;  %v502_v9 = vadd.f32 %v1258_v3, %v501_v47  ;;  %v653_v11 = vsel %vm565_vm10, %v489_v59, %v609_v4  ;;  %vm570_vm12 = vcmp.gt.f32.partialorder %v510_v5, 0.0  ;;  %v614_v12 = vmul.f32 0.2, %v510_v5  ;;  %v421_v14 = vpop.f32.mrf.mxu0 }
  0xf5   : > { %850 = vst.msk [vmem:[%s1268_s26 + $0x24] sm:$0xf] %vm840_vm2, %v1027_v2  ;;  %v417_v13 = vadd.f32 %v1102_v51, %v1258_v3  ;;  %v1051_v15 = vpack.c.bf16 %v653_v11, %v653_v11  ;;  %v634_v16 = vsel %vm546_vm11, %v414_v0, %v590_v7  ;;  %vm544_vm13 = vcmp.gt.f32.partialorder %v406_v8, 0.0  ;;  %v517_v21 = vpop.f32.mrf.mxu1 }
  0xf6   : > { %v588_v17 = vmul.f32 0.2, %v406_v8  ;;  %v1032_v18 = vpack.c.bf16 %v634_v16, %v634_v16  ;;  %v658_v19 = vsel %vm570_vm12, %v510_v5, %v614_v12  ;;  %vm568_vm14 = vcmp.gt.f32.partialorder %v502_v9, 0.0  ;;  %v1106_v22 = vpop.f32.mrf.mxu0 }
  0xf7   : > { %v612_v20 = vmul.f32 0.2, %v502_v9  ;;  %874 = vst.msk [vmem:[%s1268_s26 + $0x84] sm:$0xf] %vm840_vm2, %v1051_v15  ;;  %v1056_v23 = vpack.c.bf16 %v658_v19, %v658_v19  ;;  %vm547_vm15 = vcmp.gt.f32.partialorder %v417_v13, 0.0  ;;  %v513_v28 = vadd.f32 %v1126_v55, %v1258_v3  ;;  %v1130_v37 = vpop.f32.mrf.mxu1 }
  0xf8   : > { %v632_v24 = vsel %vm544_vm13, %v406_v8, %v588_v17  ;;  %v591_v25 = vmul.f32 0.2, %v417_v13  ;;  %855 = vst.msk [vmem:[%s1268_s26 + $0x38] sm:$0xf] %vm840_vm2, %v1032_v18  ;;  %v409_v29 = vadd.f32 %v1258_v3, %v408_v60  ;;  %v424_v30 = vpop.f32.mrf.mxu0  ;;  %v505_v33 = vadd.f32 %v1258_v3, %v504_v1 }
  0xf9   : > { %v1030_v26 = vpack.c.bf16 %v632_v24, %v632_v24  ;;  %v656_v27 = vsel %vm568_vm14, %v502_v9, %v612_v20  ;;  %879 = vst.msk [vmem:[%s1268_s26 + $0x98] sm:$0xf] %vm840_vm2, %v1056_v23  ;;  %v430_v34 = vadd.f32 %v1105_v6, %v1258_v3  ;;  %vm571_vm0 = vcmp.gt.f32.partialorder %v513_v28, 0.0  ;;  %v520_v53 = vpop.f32.mrf.mxu1 }
  0xfa   : > { %v1054_v31 = vpack.c.bf16 %v656_v27, %v656_v27  ;;  %v635_v32 = vsel %vm547_vm15, %v417_v13, %v591_v25  ;;  %v615_v36 = vmul.f32 0.2, %v513_v28  ;;  %vm545_vm1 = vcmp.gt.f32.partialorder %v409_v29, 0.0  ;;  %v1109_v38 = vpop.f32.mrf.mxu0 }
  0xfb   : > { %853 = vst.msk [vmem:[%s1268_s26 + $0x30] sm:$0xf] %vm840_vm2, %v1030_v26  ;;  %v1033_v35 = vpack.c.bf16 %v635_v32, %v635_v32  ;;  %v589_v39 = vmul.f32 0.2, %v409_v29  ;;  %vm569_vm3 = vcmp.gt.f32.partialorder %v505_v33, 0.0  ;;  %vm550_vm4 = vcmp.gt.f32.partialorder %v430_v34, 0.0 }
  0xfc   : > { %877 = vst.msk [vmem:[%s1268_s26 + $0x90] sm:$0xf] %vm840_vm2, %v1054_v31  ;;  %v613_v40 = vmul.f32 0.2, %v505_v33  ;;  %v659_v41 = vsel %vm571_vm0, %v513_v28, %v615_v36  ;;  %v594_v42 = vmul.f32 0.2, %v430_v34  ;;  %v526_v43 = vadd.f32 %v1129_v10, %v1258_v3  ;;  %v437_v49 = vpop.f32.mrf.mxu0 }
  0xfd   : > { %856 = vst.msk [vmem:[%s1268_s26 + $0x3c] sm:$0xf] %vm840_vm2, %v1033_v35  ;;  %v422_v44 = vadd.f32 %v1258_v3, %v421_v14  ;;  %v1057_v45 = vpack.c.bf16 %v659_v41, %v659_v41  ;;  %v633_v46 = vsel %vm545_vm1, %v409_v29, %v589_v39  ;;  %v518_v48 = vadd.f32 %v1258_v3, %v517_v21 }
  0xfe   : > { %v657_v47 = vsel %vm569_vm3, %v505_v33, %v613_v40  ;;  %v1031_v50 = vpack.c.bf16 %v633_v46, %v633_v46  ;;  %v638_v52 = vsel %vm550_vm4, %v430_v34, %v594_v42  ;;  %vm574_vm5 = vcmp.gt.f32.partialorder %v526_v43, 0.0  ;;  %v1110_v0 = vpop.f32.mrf.mxu0 }
  0xff   : > { %v1055_v51 = vpack.c.bf16 %v657_v47, %v657_v47  ;;  %880 = vst.msk [vmem:[%s1268_s26 + $0x9c] sm:$0xf] %vm840_vm2, %v1057_v45  ;;  %v1036_v54 = vpack.c.bf16 %v638_v52, %v638_v52  ;;  %v618_v55 = vmul.f32 0.2, %v526_v43  ;;  %vm548_vm6 = vcmp.gt.f32.partialorder %v422_v44, 0.0 }
 0x100   : > { %v592_v56 = vmul.f32 0.2, %v422_v44  ;;  %854 = vst.msk [vmem:[%s1268_s26 + $0x34] sm:$0xf] %vm840_vm2, %v1031_v50  ;;  %vm572_vm7 = vcmp.gt.f32.partialorder %v518_v48, 0.0  ;;  %v433_v58 = vadd.f32 %v1106_v22, %v1258_v3  ;;  %v529_v59 = vadd.f32 %v1130_v37, %v1258_v3  ;;  %v440_v14 = vpop.f32.mrf.mxu0 }
 0x101   : > { %878 = vst.msk [vmem:[%s1268_s26 + $0x94] sm:$0xf] %vm840_vm2, %v1055_v51  ;;  %v616_v57 = vmul.f32 0.2, %v518_v48  ;;  %859 = vst.msk [vmem:[%s1268_s26 + $0x48] sm:$0xf] %vm840_vm2, %v1036_v54  ;;  %v662_v60 = vsel %vm574_vm5, %v526_v43, %v618_v55  ;;  %v425_v62 = vadd.f32 %v1258_v3, %v424_v30  ;;  %v521_v63 = vadd.f32 %v1258_v3, %v520_v53 }
 0x102   : > { %v636_v61 = vsel %vm548_vm6, %v422_v44, %v592_v56  ;;  %v1060_v1 = vpack.c.bf16 %v662_v60, %v662_v60  ;;  %vm551_vm8 = vcmp.gt.f32.partialorder %v433_v58, 0.0  ;;  %v595_v6 = vmul.f32 0.2, %v433_v58 }
 0x103   : > { %v1034_v2 = vpack.c.bf16 %v636_v61, %v636_v61  ;;  %v660_v4 = vsel %vm572_vm7, %v518_v48, %v616_v57  ;;  %vm575_vm9 = vcmp.gt.f32.partialorder %v529_v59, 0.0  ;;  %v619_v7 = vmul.f32 0.2, %v529_v59 }
 0x104   : > { %v1058_v5 = vpack.c.bf16 %v660_v4, %v660_v4  ;;  %883 = vst.msk [vmem:[%s1268_s26 + $0xa8] sm:$0xf] %vm840_vm2, %v1060_v1  ;;  %vm549_vm10 = vcmp.gt.f32.partialorder %v425_v62, 0.0  ;;  %v593_v8 = vmul.f32 0.2, %v425_v62  ;;  %vm573_vm11 = vcmp.gt.f32.partialorder %v521_v63, 0.0 }
 0x105   : > { %857 = vst.msk [vmem:[%s1268_s26 + $0x40] sm:$0xf] %vm840_vm2, %v1034_v2  ;;  %v617_v9 = vmul.f32 0.2, %v521_v63  ;;  %v639_v10 = vsel %vm551_vm8, %v433_v58, %v595_v6  ;;  %v663_v11 = vsel %vm575_vm9, %v529_v59, %v619_v7  ;;  %v446_v12 = vadd.f32 %v1109_v38, %v1258_v3 }
 0x106   : > { %881 = vst.msk [vmem:[%s1268_s26 + $0xa0] sm:$0xf] %vm840_vm2, %v1058_v5  ;;  %v438_v13 = vadd.f32 %v1258_v3, %v437_v49  ;;  %v1037_v15 = vpack.c.bf16 %v639_v10, %v639_v10  ;;  %v1061_v16 = vpack.c.bf16 %v663_v11, %v663_v11  ;;  %v637_v17 = vsel %vm549_vm10, %v425_v62, %v593_v8 }
 0x107   : > { %v661_v18 = vsel %vm573_vm11, %v521_v63, %v617_v9  ;;  %v1035_v19 = vpack.c.bf16 %v637_v17, %v637_v17  ;;  %vm554_vm12 = vcmp.gt.f32.partialorder %v446_v12, 0.0  ;;  %v598_v21 = vmul.f32 0.2, %v446_v12 }
 0x108   : > { %v1059_v20 = vpack.c.bf16 %v661_v18, %v661_v18  ;;  %860 = vst.msk [vmem:[%s1268_s26 + $0x4c] sm:$0xf] %vm840_vm2, %v1037_v15  ;;  %884 = vst.msk [vmem:[%s1268_s26 + $0xac] sm:$0xf] %vm840_vm2, %v1061_v16  ;;  %vm552_vm13 = vcmp.gt.f32.partialorder %v438_v13, 0.0  ;;  %v449_v23 = vadd.f32 %v1110_v0, %v1258_v3  ;;  %v441_v24 = vadd.f32 %v1258_v3, %v440_v14 }
 0x109   : > { %v596_v22 = vmul.f32 0.2, %v438_v13  ;;  %858 = vst.msk [vmem:[%s1268_s26 + $0x44] sm:$0xf] %vm840_vm2, %v1035_v19  ;;  %v642_v25 = vsel %vm554_vm12, %v446_v12, %v598_v21 }
 0x10a   : > { %882 = vst.msk [vmem:[%s1268_s26 + $0xa4] sm:$0xf] %vm840_vm2, %v1059_v20  ;;  %v1040_v26 = vpack.c.bf16 %v642_v25, %v642_v25  ;;  %vm555_vm14 = vcmp.gt.f32.partialorder %v449_v23, 0.0  ;;  %v599_v28 = vmul.f32 0.2, %v449_v23  ;;  %vm553_vm15 = vcmp.gt.f32.partialorder %v441_v24, 0.0 }
 0x10b   : > { %v640_v27 = vsel %vm552_vm13, %v438_v13, %v596_v22  ;;  %v597_v30 = vmul.f32 0.2, %v441_v24 }
 0x10c   : > { %v1038_v29 = vpack.c.bf16 %v640_v27, %v640_v27  ;;  %863 = vst.msk [vmem:[%s1268_s26 + $0x58] sm:$0xf] %vm840_vm2, %v1040_v26  ;;  %v643_v31 = vsel %vm555_vm14, %v449_v23, %v599_v28 }
 0x10d   : > { %v1041_v3 = vpack.c.bf16 %v643_v31, %v643_v31  ;;  %v641_v32 = vsel %vm553_vm15, %v441_v24, %v597_v30 }
 0x10e   : > { %861 = vst.msk [vmem:[%s1268_s26 + $0x50] sm:$0xf] %vm840_vm2, %v1038_v29  ;;  %v1039_v33 = vpack.c.bf16 %v641_v32, %v641_v32 }
 0x10f   : > { %864 = vst.msk [vmem:[%s1268_s26 + $0x5c] sm:$0xf] %vm840_vm2, %v1041_v3 }
 0x110   : > { %862 = vst.msk [vmem:[%s1268_s26 + $0x54] sm:$0xf] %vm840_vm2, %v1039_v33 }
 0x111 PF: > { %s13_s12 = sadd.s32 1, %s1148_s12  }
 0x112   : > { %p10_p4 = scmp.ge.s32.totalorder %s13_s12, 10  }
 0x114   :  { %12 = sbr.rel (!%p10_p4) target bundleno = 1 (0x1), region = 62 }

// kernel: discriminator_forward.5
= control target key start
LH: loop header
LB: loop body
LE: loop exit
PB: predicated region body
PF: predicated region fallthrough
CT: control target
= control target key end

     0   :  { %s1422_s12 = smov 0   ;;  %s1649_s0 = inlined_call_operand.vmem [shape: bf16[768,128], index: 0, kind: input, shape index: {}]   ;;  %s1650_s1 = inlined_call_operand.vmem [shape: bf16[128,32], index: 1, kind: input, shape index: {}]   ;;  %s1651_s2 = inlined_call_operand.vmem [shape: f32[1,32], index: 2, kind: input, shape index: {}]   ;;  %s1652_s3 = inlined_call_operand.vmem [shape: bf16[768,32], index: 3, kind: output, shape index: {}]  }
   0x1 LB: > { %s1104_s13 = sadd.s32 4294967295, %s1400_s12   ;;  %p1108_p0 = scmp.ge.s32.totalorder %s1400_s12, 1  ;;  %s1400_s12 = sphi %s1422_s12, %s13_s12  }
   0x2   : > { %p138_p1 = scmp.lt.s32.totalorder %s1400_s12, 3 }
   0x4   : > { %p139_p2 = pnand %p1108_p0, %p138_p1 }
   0x5   : > { %s162_s16 = smul.u32 (!%p139_p2), 48, %s1104_s13 }
   0x6   : > { %142 = sbr.rel (%p139_p2) target bundleno = 303 (0x12f), region = 32 }
   0x7   : > { %p163_p3 = scmp.lt.s32.totalorder (!%p139_p2), %s162_s16, 95 }
   0xb   : > { %v1362_v0 = vld [vmem:[%s1650_s1 + $0x38] sm:$0xff]   ;;  %v1363_v1 = vld [vmem:[%s1650_s1 + $0x30] sm:$0xff]   ;;  %v1364_v2 = vld [vmem:[%s1650_s1 + $0x28] sm:$0xff]   ;;  %s1654_s16 = smov (!%p163_p3, %s162_s16), 95  ;;  %vm999_vm2 = vcmask 257024  }
   0xc   : > { %1274 = vmatprep.subr.bf16.mxu0 %v1362_v0  ;;  %1338 = vmatprep.subr.bf16.mxu1 %v1362_v0  ;;  %s1109_s21 = sshll.u32 %s1654_s16, 2  ;;  %v1365_v3 = vld [vmem:[%s1650_s1 + $0x20] sm:$0xff]   ;;  %v1366_v6 = vld [vmem:[%s1650_s1 + $0x18] sm:$0xff]   ;;  %v1367_v7 = vld [vmem:[%s1650_s1 + $0x10] sm:$0xff]  }
   0xd   : > { %1275 = vmatpush3.bf16.msra.mxu0 %v1362_v0  ;;  %1346 = vmatpush3.bf16.msra.mxu1 %v1362_v0  ;;  %s1450_s26 = scalar_lea.vmem %s1649_s0, %s1109_s21  ;;  %v1368_v8 = vld [vmem:[%s1650_s1 + $0x8] sm:$0xff]   ;;  %v1369_v9 = vld [vmem:[%s1650_s1] sm:$0xff]   ;;  %s1502_s13 = scalar_lea.vmem %s1652_s3, %s1109_s21 }
   0xe   : > { %1276 = vmatprep.subr.bf16.mxu0 %v1363_v1  ;;  %1339 = vmatprep.subr.bf16.mxu1 %v1363_v1  ;;  %v1370_v4 = vld [vmem:[%s1450_s26] sm:$0xff]   ;;  %v1372_v10 = vld [vmem:[%s1450_s26 + $0x8] sm:$0xff]   ;;  %v1374_v12 = vld [vmem:[%s1450_s26 + $0x10] sm:$0xff]  }
   0xf   : > { %v1371_v5 = vld [vmem:[%s1450_s26 + $0x60] sm:$0xff]   ;;  %1290 = vmatprep.mubr.bf16.mxu0 %v1370_v4  ;;  %v1373_v11 = vld [vmem:[%s1450_s26 + $0x68] sm:$0xff]   ;;  %v1375_v13 = vld [vmem:[%s1450_s26 + $0x70] sm:$0xff]  }
  0x10   : > { %1314 = vmatprep.mubr.bf16.mxu1 %v1371_v5  ;;  %v1376_v14 = vld [vmem:[%s1450_s26 + $0x18] sm:$0xff]   ;;  %v1378_v16 = vld [vmem:[%s1450_s26 + $0x20] sm:$0xff]   ;;  %v1380_v18 = vld [vmem:[%s1450_s26 + $0x28] sm:$0xff]  }
  0x11   : > { %1277 = vmatpush3.bf16.msra.mxu0 %v1363_v1  ;;  %1347 = vmatpush3.bf16.msra.mxu1 %v1363_v1  ;;  %v1377_v15 = vld [vmem:[%s1450_s26 + $0x78] sm:$0xff]   ;;  %v1379_v17 = vld [vmem:[%s1450_s26 + $0x80] sm:$0xff]   ;;  %v1381_v19 = vld [vmem:[%s1450_s26 + $0x88] sm:$0xff]  }
  0x12   : > { %1278 = vmatprep.subr.bf16.mxu0 %v1364_v2  ;;  %1340 = vmatprep.subr.bf16.mxu1 %v1364_v2  ;;  %v1382_v20 = vld [vmem:[%s1450_s26 + $0x30] sm:$0xff]   ;;  %v1384_v22 = vld [vmem:[%s1450_s26 + $0x38] sm:$0xff]   ;;  %v1386_v24 = vld [vmem:[%s1450_s26 + $0x40] sm:$0xff]  }
  0x13   : > { %v1383_v21 = vld [vmem:[%s1450_s26 + $0x90] sm:$0xff]   ;;  %v1385_v23 = vld [vmem:[%s1450_s26 + $0x98] sm:$0xff]   ;;  %v1387_v25 = vld [vmem:[%s1450_s26 + $0xa0] sm:$0xff]  }
  0x14   : > { %v1388_v26 = vld [vmem:[%s1450_s26 + $0x48] sm:$0xff]   ;;  %v1390_v28 = vld [vmem:[%s1450_s26 + $0x50] sm:$0xff]   ;;  %v1392_v30 = vld [vmem:[%s1450_s26 + $0x58] sm:$0xff]  }
  0x15   : > { %1279 = vmatpush3.bf16.msra.mxu0 %v1364_v2  ;;  %1348 = vmatpush3.bf16.msra.mxu1 %v1364_v2  ;;  %v1389_v27 = vld [vmem:[%s1450_s26 + $0xa8] sm:$0xff]   ;;  %v1391_v29 = vld [vmem:[%s1450_s26 + $0xb0] sm:$0xff]   ;;  %v1393_v31 = vld [vmem:[%s1450_s26 + $0xb8] sm:$0xff]  }
  0x16   : > { %1280 = vmatprep.subr.bf16.mxu0 %v1365_v3  ;;  %1341 = vmatprep.subr.bf16.mxu1 %v1365_v3  ;;  %v1491_v32 = vld [vmem:[%s1651_s2] ss:$0 sm:$0xff] }
  0x19   : > { %1281 = vmatpush3.bf16.msra.mxu0 %v1365_v3  ;;  %1349 = vmatpush3.bf16.msra.mxu1 %v1365_v3 }
  0x1a   : > { %1282 = vmatprep.subr.bf16.mxu0 %v1366_v6  ;;  %1342 = vmatprep.subr.bf16.mxu1 %v1366_v6 }
  0x1d   : > { %1283 = vmatpush3.bf16.msra.mxu0 %v1366_v6  ;;  %1350 = vmatpush3.bf16.msra.mxu1 %v1366_v6 }
  0x1e   : > { %1284 = vmatprep.subr.bf16.mxu0 %v1367_v7  ;;  %1343 = vmatprep.subr.bf16.mxu1 %v1367_v7 }
  0x21   : > { %1285 = vmatpush3.bf16.msra.mxu0 %v1367_v7  ;;  %1351 = vmatpush3.bf16.msra.mxu1 %v1367_v7 }
  0x22   : > { %1286 = vmatprep.subr.bf16.mxu0 %v1368_v8  ;;  %1344 = vmatprep.subr.bf16.mxu1 %v1368_v8 }
  0x25   : > { %1287 = vmatpush3.bf16.msra.mxu0 %v1368_v8  ;;  %1352 = vmatpush3.bf16.msra.mxu1 %v1368_v8 }
  0x26   : > { %1288 = vmatprep.subr.bf16.mxu0 %v1369_v9  ;;  %1345 = vmatprep.subr.bf16.mxu1 %v1369_v9 }
  0x29   : > { %1289 = vmatpush3.bf16.msra.mxu0 %v1369_v9  ;;  %1353 = vmatpush3.bf16.msra.mxu1 %v1369_v9 }
  0x2c   : > { %1291 = vmatmul.mubr.bf16.vlgmr.msra.gmra.mxu0 %v1372_v10  ;;  %1315 = vmatmul.mubr.bf16.vlgmr.msra.gmra.mxu1 %v1373_v11 }
  0x2d   : > { %1294 = vmatprep.mubr.bf16.mxu0 %v1374_v12  ;;  %1318 = vmatprep.mubr.bf16.mxu1 %v1375_v13 }
  0x34   : > { %1295 = vmatmul.mubr.bf16.gmra.mxu0 %v1376_v14  ;;  %1319 = vmatmul.mubr.bf16.gmra.mxu1 %v1377_v15 }
  0x35   : > { %1298 = vmatprep.mubr.bf16.mxu0 %v1378_v16  ;;  %1322 = vmatprep.mubr.bf16.mxu1 %v1379_v17 }
  0x3c   : > { %1299 = vmatmul.mubr.bf16.gmra.mxu0 %v1380_v18  ;;  %1323 = vmatmul.mubr.bf16.gmra.mxu1 %v1381_v19 }
  0x3d   : > { %1302 = vmatprep.mubr.bf16.mxu0 %v1382_v20  ;;  %1326 = vmatprep.mubr.bf16.mxu1 %v1383_v21 }
  0x44   : > { %1303 = vmatmul.mubr.bf16.gmra.mxu0 %v1384_v22  ;;  %1327 = vmatmul.mubr.bf16.gmra.mxu1 %v1385_v23 }
  0x45   : > { %1306 = vmatprep.mubr.bf16.mxu0 %v1386_v24  ;;  %1330 = vmatprep.mubr.bf16.mxu1 %v1387_v25 }
  0x4c   : > { %1307 = vmatmul.mubr.bf16.gmra.mxu0 %v1388_v26  ;;  %1331 = vmatmul.mubr.bf16.gmra.mxu1 %v1389_v27 }
  0x4d   : > { %1310 = vmatprep.mubr.bf16.mxu0 %v1390_v28  ;;  %1334 = vmatprep.mubr.bf16.mxu1 %v1391_v29 }
  0x54   : > { %1311 = vmatmul.mubr.bf16.gmra.mxu0 %v1392_v30  ;;  %1335 = vmatmul.mubr.bf16.gmra.mxu1 %v1393_v31 }
  0xec   : > { %v1292_v33 = vpop.f32.mrf.mxu0  ;;  %v1316_v34 = vpop.f32.mrf.mxu1 }
  0xed   : > { %v481_v35 = vadd.f32 %v1292_v33, %v1491_v32  ;;  %v577_v36 = vadd.f32 %v1316_v34, %v1491_v32 }
  0xee   : > { %v472_v37 = vpop.f32.mrf.mxu0  ;;  %v568_v38 = vpop.f32.mrf.mxu1 }
  0xef   : > { %vm665_vm0 = vcmp.gt.f32.partialorder %v481_v35, 0.0  ;;  %v713_v39 = vmul.f32 0.2, %v481_v35  ;;  %vm689_vm1 = vcmp.gt.f32.partialorder %v577_v36, 0.0  ;;  %v737_v40 = vmul.f32 0.2, %v577_v36 }
  0xf0   : > { %v473_v41 = vadd.f32 %v1491_v32, %v472_v37  ;;  %v569_v42 = vadd.f32 %v1491_v32, %v568_v38  ;;  %v1293_v43 = vpop.f32.mrf.mxu0  ;;  %v1317_v44 = vpop.f32.mrf.mxu1 }
  0xf1   : > { %v761_v45 = vsel %vm665_vm0, %v481_v35, %v713_v39  ;;  %v785_v46 = vsel %vm689_vm1, %v577_v36, %v737_v40  ;;  %v484_v47 = vadd.f32 %v1293_v43, %v1491_v32  ;;  %v580_v48 = vadd.f32 %v1317_v44, %v1491_v32 }
  0xf2   : > { %v1196_v49 = vpack.c.bf16 %v761_v45, %v761_v45  ;;  %v1220_v50 = vpack.c.bf16 %v785_v46, %v785_v46  ;;  %vm663_vm3 = vcmp.gt.f32.partialorder %v473_v41, 0.0  ;;  %v711_v51 = vmul.f32 0.2, %v473_v41  ;;  %v475_v52 = vpop.f32.mrf.mxu0  ;;  %v571_v53 = vpop.f32.mrf.mxu1 }
  0xf3   : > { %vm687_vm4 = vcmp.gt.f32.partialorder %v569_v42, 0.0  ;;  %v735_v54 = vmul.f32 0.2, %v569_v42  ;;  %vm666_vm5 = vcmp.gt.f32.partialorder %v484_v47, 0.0  ;;  %v714_v55 = vmul.f32 0.2, %v484_v47 }
  0xf4   : > { %1002 = vst.msk [vmem:[%s1502_s13 + $0x8] sm:$0xf] %vm999_vm2, %v1196_v49  ;;  %1026 = vst.msk [vmem:[%s1502_s13 + $0x68] sm:$0xf] %vm999_vm2, %v1220_v50  ;;  %v759_v56 = vsel %vm663_vm3, %v473_v41, %v711_v51  ;;  %vm690_vm6 = vcmp.gt.f32.partialorder %v580_v48, 0.0  ;;  %v476_v58 = vadd.f32 %v1491_v32, %v475_v52  ;;  %v1296_v59 = vpop.f32.mrf.mxu0  ;;  %v1320_v60 = vpop.f32.mrf.mxu1  ;;  %v572_v0 = vadd.f32 %v1491_v32, %v571_v53 }
  0xf5   : > { %v738_v57 = vmul.f32 0.2, %v580_v48  ;;  %v1194_v61 = vpack.c.bf16 %v759_v56, %v759_v56  ;;  %v783_v62 = vsel %vm687_vm4, %v569_v42, %v735_v54  ;;  %v762_v63 = vsel %vm666_vm5, %v484_v47, %v714_v55 }
  0xf6   : > { %v1218_v1 = vpack.c.bf16 %v783_v62, %v783_v62  ;;  %v1197_v2 = vpack.c.bf16 %v762_v63, %v762_v63  ;;  %vm664_vm7 = vcmp.gt.f32.partialorder %v476_v58, 0.0  ;;  %v488_v4 = vpop.f32.mrf.mxu0  ;;  %v584_v5 = vpop.f32.mrf.mxu1  ;;  %v712_v7 = vmul.f32 0.2, %v476_v58 }
  0xf7   : > { %v786_v3 = vsel %vm690_vm6, %v580_v48, %v738_v57  ;;  %1000 = vst.msk [vmem:[%s1502_s13] sm:$0xf] %vm999_vm2, %v1194_v61  ;;  %vm688_vm8 = vcmp.gt.f32.partialorder %v572_v0, 0.0  ;;  %v736_v8 = vmul.f32 0.2, %v572_v0  ;;  %v497_v9 = vadd.f32 %v1296_v59, %v1491_v32 }
  0xf8   : > { %v1221_v6 = vpack.c.bf16 %v786_v3, %v786_v3  ;;  %1024 = vst.msk [vmem:[%s1502_s13 + $0x60] sm:$0xf] %vm999_vm2, %v1218_v1  ;;  %1003 = vst.msk [vmem:[%s1502_s13 + $0xc] sm:$0xf] %vm999_vm2, %v1197_v2  ;;  %v593_v10 = vadd.f32 %v1320_v60, %v1491_v32  ;;  %v489_v11 = vadd.f32 %v1491_v32, %v488_v4  ;;  %v1297_v13 = vpop.f32.mrf.mxu0  ;;  %v1321_v14 = vpop.f32.mrf.mxu1 }
  0xf9   : > { %v585_v12 = vadd.f32 %v1491_v32, %v584_v5  ;;  %v760_v15 = vsel %vm664_vm7, %v476_v58, %v712_v7  ;;  %v784_v16 = vsel %vm688_vm8, %v572_v0, %v736_v8  ;;  %v500_v17 = vadd.f32 %v1297_v13, %v1491_v32 }
  0xfa   : > { %1027 = vst.msk [vmem:[%s1502_s13 + $0x6c] sm:$0xf] %vm999_vm2, %v1221_v6  ;;  %v596_v18 = vadd.f32 %v1321_v14, %v1491_v32  ;;  %v1195_v19 = vpack.c.bf16 %v760_v15, %v760_v15  ;;  %v1219_v20 = vpack.c.bf16 %v784_v16, %v784_v16  ;;  %vm669_vm9 = vcmp.gt.f32.partialorder %v497_v9, 0.0  ;;  %v491_v22 = vpop.f32.mrf.mxu0  ;;  %v587_v23 = vpop.f32.mrf.mxu1 }
  0xfb   : > { %v717_v21 = vmul.f32 0.2, %v497_v9  ;;  %vm693_vm10 = vcmp.gt.f32.partialorder %v593_v10, 0.0  ;;  %v741_v24 = vmul.f32 0.2, %v593_v10  ;;  %vm667_vm11 = vcmp.gt.f32.partialorder %v489_v11, 0.0 }
  0xfc   : > { %v715_v25 = vmul.f32 0.2, %v489_v11  ;;  %1001 = vst.msk [vmem:[%s1502_s13 + $0x4] sm:$0xf] %vm999_vm2, %v1195_v19  ;;  %1025 = vst.msk [vmem:[%s1502_s13 + $0x64] sm:$0xf] %vm999_vm2, %v1219_v20  ;;  %v1300_v28 = vpop.f32.mrf.mxu0  ;;  %v1324_v29 = vpop.f32.mrf.mxu1  ;;  %v492_v43 = vadd.f32 %v1491_v32, %v491_v22  ;;  %v588_v45 = vadd.f32 %v1491_v32, %v587_v23 }
  0xfd   : > { %v765_v26 = vsel %vm669_vm9, %v497_v9, %v717_v21  ;;  %vm691_vm12 = vcmp.gt.f32.partialorder %v585_v12, 0.0  ;;  %v739_v27 = vmul.f32 0.2, %v585_v12  ;;  %vm670_vm13 = vcmp.gt.f32.partialorder %v500_v17, 0.0 }
  0xfe   : > { %v1200_v30 = vpack.c.bf16 %v765_v26, %v765_v26  ;;  %v789_v31 = vsel %vm693_vm10, %v593_v10, %v741_v24  ;;  %v763_v33 = vsel %vm667_vm11, %v489_v11, %v715_v25  ;;  %v718_v34 = vmul.f32 0.2, %v500_v17  ;;  %v504_v38 = vpop.f32.mrf.mxu0  ;;  %v600_v39 = vpop.f32.mrf.mxu1 }
  0xff   : > { %v1224_v35 = vpack.c.bf16 %v789_v31, %v789_v31  ;;  %v1198_v36 = vpack.c.bf16 %v763_v33, %v763_v33  ;;  %v787_v37 = vsel %vm691_vm12, %v585_v12, %v739_v27  ;;  %vm694_vm14 = vcmp.gt.f32.partialorder %v596_v18, 0.0 }
 0x100   : > { %1006 = vst.msk [vmem:[%s1502_s13 + $0x18] sm:$0xf] %vm999_vm2, %v1200_v30  ;;  %v1222_v40 = vpack.c.bf16 %v787_v37, %v787_v37  ;;  %v766_v41 = vsel %vm670_vm13, %v500_v17, %v718_v34  ;;  %v742_v42 = vmul.f32 0.2, %v596_v18  ;;  %v513_v46 = vadd.f32 %v1300_v28, %v1491_v32  ;;  %v1301_v48 = vpop.f32.mrf.mxu0  ;;  %v1325_v49 = vpop.f32.mrf.mxu1 }
 0x101   : > { %1030 = vst.msk [vmem:[%s1502_s13 + $0x78] sm:$0xf] %vm999_vm2, %v1224_v35  ;;  %1004 = vst.msk [vmem:[%s1502_s13 + $0x10] sm:$0xf] %vm999_vm2, %v1198_v36  ;;  %v1201_v44 = vpack.c.bf16 %v766_v41, %v766_v41  ;;  %v609_v47 = vadd.f32 %v1324_v29, %v1491_v32  ;;  %vm668_vm15 = vcmp.gt.f32.partialorder %v492_v43, 0.0  ;;  %v505_v52 = vadd.f32 %v1491_v32, %v504_v38 }
 0x102   : > { %1028 = vst.msk [vmem:[%s1502_s13 + $0x70] sm:$0xf] %vm999_vm2, %v1222_v40  ;;  %v790_v50 = vsel %vm694_vm14, %v596_v18, %v742_v42  ;;  %v716_v51 = vmul.f32 0.2, %v492_v43  ;;  %vm692_vm0 = vcmp.gt.f32.partialorder %v588_v45, 0.0  ;;  %vm673_vm1 = vcmp.gt.f32.partialorder %v513_v46, 0.0  ;;  %v507_v55 = vpop.f32.mrf.mxu0  ;;  %v603_v56 = vpop.f32.mrf.mxu1 }
 0x103   : > { %1007 = vst.msk [vmem:[%s1502_s13 + $0x1c] sm:$0xf] %vm999_vm2, %v1201_v44  ;;  %v1225_v53 = vpack.c.bf16 %v790_v50, %v790_v50  ;;  %v740_v54 = vmul.f32 0.2, %v588_v45  ;;  %v721_v58 = vmul.f32 0.2, %v513_v46  ;;  %v601_v4 = vadd.f32 %v1491_v32, %v600_v39 }
 0x104   : > { %v764_v57 = vsel %vm668_vm15, %v492_v43, %v716_v51  ;;  %vm697_vm3 = vcmp.gt.f32.partialorder %v609_v47, 0.0  ;;  %v745_v59 = vmul.f32 0.2, %v609_v47  ;;  %vm671_vm4 = vcmp.gt.f32.partialorder %v505_v52, 0.0  ;;  %v1304_v63 = vpop.f32.mrf.mxu0  ;;  %v1328_v0 = vpop.f32.mrf.mxu1 }
 0x105   : > { %1031 = vst.msk [vmem:[%s1502_s13 + $0x7c] sm:$0xf] %vm999_vm2, %v1225_v53  ;;  %v1199_v60 = vpack.c.bf16 %v764_v57, %v764_v57  ;;  %v788_v61 = vsel %vm692_vm0, %v588_v45, %v740_v54  ;;  %v719_v62 = vmul.f32 0.2, %v505_v52  ;;  %v769_v2 = vsel %vm673_vm1, %v513_v46, %v721_v58 }
 0x106   : > { %v1223_v1 = vpack.c.bf16 %v788_v61, %v788_v61  ;;  %v793_v3 = vsel %vm697_vm3, %v609_v47, %v745_v59  ;;  %v1204_v5 = vpack.c.bf16 %v769_v2, %v769_v2  ;;  %v516_v8 = vadd.f32 %v1301_v48, %v1491_v32  ;;  %v520_v9 = vpop.f32.mrf.mxu0  ;;  %v616_v10 = vpop.f32.mrf.mxu1 }
 0x107   : > { %1005 = vst.msk [vmem:[%s1502_s13 + $0x14] sm:$0xf] %vm999_vm2, %v1199_v60  ;;  %v1228_v6 = vpack.c.bf16 %v793_v3, %v793_v3  ;;  %v767_v7 = vsel %vm671_vm4, %v505_v52, %v719_v62  ;;  %vm695_vm5 = vcmp.gt.f32.partialorder %v601_v4, 0.0  ;;  %v743_v12 = vmul.f32 0.2, %v601_v4 }
 0x108   : > { %1029 = vst.msk [vmem:[%s1502_s13 + $0x74] sm:$0xf] %vm999_vm2, %v1223_v1  ;;  %v1202_v11 = vpack.c.bf16 %v767_v7, %v767_v7  ;;  %v612_v13 = vadd.f32 %v1325_v49, %v1491_v32  ;;  %1010 = vst.msk [vmem:[%s1502_s13 + $0x28] sm:$0xf] %vm999_vm2, %v1204_v5  ;;  %vm674_vm6 = vcmp.gt.f32.partialorder %v516_v8, 0.0  ;;  %v508_v15 = vadd.f32 %v1491_v32, %v507_v55  ;;  %v1305_v17 = vpop.f32.mrf.mxu0  ;;  %v1329_v18 = vpop.f32.mrf.mxu1 }
 0x109   : > { %1034 = vst.msk [vmem:[%s1502_s13 + $0x88] sm:$0xf] %vm999_vm2, %v1228_v6  ;;  %v722_v14 = vmul.f32 0.2, %v516_v8  ;;  %v604_v16 = vadd.f32 %v1491_v32, %v603_v56  ;;  %v791_v19 = vsel %vm695_vm5, %v601_v4, %v743_v12  ;;  %v529_v21 = vadd.f32 %v1304_v63, %v1491_v32 }
 0x10a   : > { %1008 = vst.msk [vmem:[%s1502_s13 + $0x20] sm:$0xf] %vm999_vm2, %v1202_v11  ;;  %vm698_vm7 = vcmp.gt.f32.partialorder %v612_v13, 0.0  ;;  %v746_v20 = vmul.f32 0.2, %v612_v13  ;;  %v1226_v22 = vpack.c.bf16 %v791_v19, %v791_v19  ;;  %vm672_vm8 = vcmp.gt.f32.partialorder %v508_v15, 0.0  ;;  %v523_v25 = vpop.f32.mrf.mxu0  ;;  %v619_v26 = vpop.f32.mrf.mxu1 }
 0x10b   : > { %v770_v23 = vsel %vm674_vm6, %v516_v8, %v722_v14  ;;  %v720_v24 = vmul.f32 0.2, %v508_v15  ;;  %vm696_vm9 = vcmp.gt.f32.partialorder %v604_v16, 0.0  ;;  %v744_v29 = vmul.f32 0.2, %v604_v16 }
 0x10c   : > { %v1205_v27 = vpack.c.bf16 %v770_v23, %v770_v23  ;;  %v794_v28 = vsel %vm698_vm7, %v612_v13, %v746_v20  ;;  %1032 = vst.msk [vmem:[%s1502_s13 + $0x80] sm:$0xf] %vm999_vm2, %v1226_v22  ;;  %vm677_vm10 = vcmp.gt.f32.partialorder %v529_v21, 0.0  ;;  %v725_v33 = vmul.f32 0.2, %v529_v21  ;;  %v1308_v34 = vpop.f32.mrf.mxu0  ;;  %v1332_v35 = vpop.f32.mrf.mxu1 }
 0x10d   : > { %v1229_v30 = vpack.c.bf16 %v794_v28, %v794_v28  ;;  %v768_v31 = vsel %vm672_vm8, %v508_v15, %v720_v24  ;;  %v792_v37 = vsel %vm696_vm9, %v604_v16, %v744_v29  ;;  %v625_v38 = vadd.f32 %v1328_v0, %v1491_v32 }
 0x10e   : > { %1011 = vst.msk [vmem:[%s1502_s13 + $0x2c] sm:$0xf] %vm999_vm2, %v1205_v27  ;;  %v1203_v36 = vpack.c.bf16 %v768_v31, %v768_v31  ;;  %v521_v39 = vadd.f32 %v1491_v32, %v520_v9  ;;  %v1227_v40 = vpack.c.bf16 %v792_v37, %v792_v37  ;;  %v773_v41 = vsel %vm677_vm10, %v529_v21, %v725_v33  ;;  %v536_v44 = vpop.f32.mrf.mxu0  ;;  %v632_v45 = vpop.f32.mrf.mxu1 }
 0x10f   : > { %1035 = vst.msk [vmem:[%s1502_s13 + $0x8c] sm:$0xf] %vm999_vm2, %v1229_v30  ;;  %v617_v42 = vadd.f32 %v1491_v32, %v616_v10  ;;  %v532_v43 = vadd.f32 %v1305_v17, %v1491_v32  ;;  %v1208_v46 = vpack.c.bf16 %v773_v41, %v773_v41  ;;  %vm701_vm11 = vcmp.gt.f32.partialorder %v625_v38, 0.0 }
 0x110   : > { %1009 = vst.msk [vmem:[%s1502_s13 + $0x24] sm:$0xf] %vm999_vm2, %v1203_v36  ;;  %v749_v47 = vmul.f32 0.2, %v625_v38  ;;  %vm675_vm12 = vcmp.gt.f32.partialorder %v521_v39, 0.0  ;;  %v1309_v50 = vpop.f32.mrf.mxu0  ;;  %v1333_v51 = vpop.f32.mrf.mxu1  ;;  %v628_v54 = vadd.f32 %v1329_v18, %v1491_v32  ;;  %v524_v55 = vadd.f32 %v1491_v32, %v523_v25 }
 0x111   : > { %1033 = vst.msk [vmem:[%s1502_s13 + $0x84] sm:$0xf] %vm999_vm2, %v1227_v40  ;;  %v723_v48 = vmul.f32 0.2, %v521_v39  ;;  %vm699_vm13 = vcmp.gt.f32.partialorder %v617_v42, 0.0  ;;  %vm678_vm14 = vcmp.gt.f32.partialorder %v532_v43, 0.0  ;;  %v620_v59 = vadd.f32 %v1491_v32, %v619_v26 }
 0x112   : > { %v747_v49 = vmul.f32 0.2, %v617_v42  ;;  %1014 = vst.msk [vmem:[%s1502_s13 + $0x38] sm:$0xf] %vm999_vm2, %v1208_v46  ;;  %v797_v52 = vsel %vm701_vm11, %v625_v38, %v749_v47  ;;  %v726_v53 = vmul.f32 0.2, %v532_v43  ;;  %v539_v63 = vpop.f32.mrf.mxu0  ;;  %v635_v0 = vpop.f32.mrf.mxu1  ;;  %v545_v5 = vadd.f32 %v1308_v34, %v1491_v32 }
 0x113   : > { %v1232_v56 = vpack.c.bf16 %v797_v52, %v797_v52  ;;  %v771_v57 = vsel %vm675_vm12, %v521_v39, %v723_v48  ;;  %vm702_vm15 = vcmp.gt.f32.partialorder %v628_v54, 0.0  ;;  %v750_v2 = vmul.f32 0.2, %v628_v54 }
 0x114   : > { %v795_v58 = vsel %vm699_vm13, %v617_v42, %v747_v49  ;;  %v1206_v60 = vpack.c.bf16 %v771_v57, %v771_v57  ;;  %v774_v62 = vsel %vm678_vm14, %v532_v43, %v726_v53  ;;  %vm676_vm0 = vcmp.gt.f32.partialorder %v524_v55, 0.0  ;;  %v1312_v14 = vpop.f32.mrf.mxu0  ;;  %v1336_v15 = vpop.f32.mrf.mxu1 }
 0x115   : > { %v1230_v61 = vpack.c.bf16 %v795_v58, %v795_v58  ;;  %1038 = vst.msk [vmem:[%s1502_s13 + $0x98] sm:$0xf] %vm999_vm2, %v1232_v56  ;;  %v1209_v1 = vpack.c.bf16 %v774_v62, %v774_v62  ;;  %v724_v3 = vmul.f32 0.2, %v524_v55  ;;  %vm700_vm1 = vcmp.gt.f32.partialorder %v620_v59, 0.0 }
 0x116   : > { %1012 = vst.msk [vmem:[%s1502_s13 + $0x30] sm:$0xf] %vm999_vm2, %v1206_v60  ;;  %v748_v4 = vmul.f32 0.2, %v620_v59  ;;  %v641_v6 = vadd.f32 %v1332_v35, %v1491_v32  ;;  %v798_v7 = vsel %vm702_vm15, %v628_v54, %v750_v2  ;;  %v537_v9 = vadd.f32 %v1491_v32, %v536_v44  ;;  %v552_v29 = vpop.f32.mrf.mxu0  ;;  %v648_v30 = vpop.f32.mrf.mxu1 }
 0x117   : > { %1036 = vst.msk [vmem:[%s1502_s13 + $0x90] sm:$0xf] %vm999_vm2, %v1230_v61  ;;  %1015 = vst.msk [vmem:[%s1502_s13 + $0x3c] sm:$0xf] %vm999_vm2, %v1209_v1  ;;  %v772_v8 = vsel %vm676_vm0, %v524_v55, %v724_v3  ;;  %v633_v10 = vadd.f32 %v1491_v32, %v632_v45  ;;  %v1233_v11 = vpack.c.bf16 %v798_v7, %v798_v7  ;;  %vm681_vm3 = vcmp.gt.f32.partialorder %v545_v5, 0.0 }
 0x118   : > { %v1207_v12 = vpack.c.bf16 %v772_v8, %v772_v8  ;;  %v796_v13 = vsel %vm700_vm1, %v620_v59, %v748_v4  ;;  %v729_v17 = vmul.f32 0.2, %v545_v5  ;;  %vm705_vm4 = vcmp.gt.f32.partialorder %v641_v6, 0.0  ;;  %v1313_v45 = vpop.f32.mrf.mxu0  ;;  %v1337_v46 = vpop.f32.mrf.mxu1 }
 0x119   : > { %v1231_v16 = vpack.c.bf16 %v796_v13, %v796_v13  ;;  %v753_v18 = vmul.f32 0.2, %v641_v6  ;;  %1039 = vst.msk [vmem:[%s1502_s13 + $0x9c] sm:$0xf] %vm999_vm2, %v1233_v11  ;;  %vm679_vm5 = vcmp.gt.f32.partialorder %v537_v9, 0.0  ;;  %vm703_vm6 = vcmp.gt.f32.partialorder %v633_v10, 0.0 }
 0x11a   : > { %1013 = vst.msk [vmem:[%s1502_s13 + $0x34] sm:$0xf] %vm999_vm2, %v1207_v12  ;;  %v727_v19 = vmul.f32 0.2, %v537_v9  ;;  %v751_v20 = vmul.f32 0.2, %v633_v10  ;;  %v777_v21 = vsel %vm681_vm3, %v545_v5, %v729_v17  ;;  %v548_v23 = vadd.f32 %v1309_v50, %v1491_v32  ;;  %v555_v59 = vpop.f32.mrf.mxu0  ;;  %v651_v60 = vpop.f32.mrf.mxu1 }
 0x11b   : > { %1037 = vst.msk [vmem:[%s1502_s13 + $0x94] sm:$0xf] %vm999_vm2, %v1231_v16  ;;  %v801_v22 = vsel %vm705_vm4, %v641_v6, %v753_v18  ;;  %v644_v24 = vadd.f32 %v1333_v51, %v1491_v32  ;;  %v1212_v25 = vpack.c.bf16 %v777_v21, %v777_v21  ;;  %v540_v36 = vadd.f32 %v1491_v32, %v539_v63 }
 0x11c   : > { %v1236_v26 = vpack.c.bf16 %v801_v22, %v801_v22  ;;  %v775_v27 = vsel %vm679_vm5, %v537_v9, %v727_v19  ;;  %v799_v28 = vsel %vm703_vm6, %v633_v10, %v751_v20  ;;  %vm682_vm7 = vcmp.gt.f32.partialorder %v548_v23, 0.0 }
 0x11d   : > { %v1210_v31 = vpack.c.bf16 %v775_v27, %v775_v27  ;;  %v1234_v33 = vpack.c.bf16 %v799_v28, %v799_v28  ;;  %v730_v34 = vmul.f32 0.2, %v548_v23  ;;  %1018 = vst.msk [vmem:[%s1502_s13 + $0x48] sm:$0xf] %vm999_vm2, %v1212_v25  ;;  %vm706_vm8 = vcmp.gt.f32.partialorder %v644_v24, 0.0 }
 0x11e   : > { %1042 = vst.msk [vmem:[%s1502_s13 + $0xa8] sm:$0xf] %vm999_vm2, %v1236_v26  ;;  %v754_v35 = vmul.f32 0.2, %v644_v24  ;;  %v636_v37 = vadd.f32 %v1491_v32, %v635_v0  ;;  %v561_v39 = vadd.f32 %v1312_v14, %v1491_v32  ;;  %v657_v40 = vadd.f32 %v1336_v15, %v1491_v32 }
 0x11f   : > { %1016 = vst.msk [vmem:[%s1502_s13 + $0x40] sm:$0xf] %vm999_vm2, %v1210_v31  ;;  %1040 = vst.msk [vmem:[%s1502_s13 + $0xa0] sm:$0xf] %vm999_vm2, %v1234_v33  ;;  %v778_v38 = vsel %vm682_vm7, %v548_v23, %v730_v34  ;;  %v553_v41 = vadd.f32 %v1491_v32, %v552_v29  ;;  %vm680_vm9 = vcmp.gt.f32.partialorder %v540_v36, 0.0  ;;  %v649_v58 = vadd.f32 %v1491_v32, %v648_v30 }
 0x120   : > { %v1213_v42 = vpack.c.bf16 %v778_v38, %v778_v38  ;;  %v802_v43 = vsel %vm706_vm8, %v644_v24, %v754_v35  ;;  %v728_v44 = vmul.f32 0.2, %v540_v36  ;;  %vm704_vm10 = vcmp.gt.f32.partialorder %v636_v37, 0.0 }
 0x121   : > { %v1237_v47 = vpack.c.bf16 %v802_v43, %v802_v43  ;;  %v752_v48 = vmul.f32 0.2, %v636_v37  ;;  %vm685_vm11 = vcmp.gt.f32.partialorder %v561_v39, 0.0  ;;  %v733_v50 = vmul.f32 0.2, %v561_v39 }
 0x122   : > { %1019 = vst.msk [vmem:[%s1502_s13 + $0x4c] sm:$0xf] %vm999_vm2, %v1213_v42  ;;  %v776_v49 = vsel %vm680_vm9, %v540_v36, %v728_v44  ;;  %vm709_vm12 = vcmp.gt.f32.partialorder %v657_v40, 0.0  ;;  %v757_v51 = vmul.f32 0.2, %v657_v40  ;;  %vm683_vm13 = vcmp.gt.f32.partialorder %v553_v41, 0.0 }
 0x123   : > { %1043 = vst.msk [vmem:[%s1502_s13 + $0xac] sm:$0xf] %vm999_vm2, %v1237_v47  ;;  %v1211_v52 = vpack.c.bf16 %v776_v49, %v776_v49  ;;  %v800_v53 = vsel %vm704_vm10, %v636_v37, %v752_v48  ;;  %v731_v54 = vmul.f32 0.2, %v553_v41  ;;  %v781_v56 = vsel %vm685_vm11, %v561_v39, %v733_v50 }
 0x124   : > { %v1235_v55 = vpack.c.bf16 %v800_v53, %v800_v53  ;;  %v805_v57 = vsel %vm709_vm12, %v657_v40, %v757_v51  ;;  %v1216_v61 = vpack.c.bf16 %v781_v56, %v781_v56  ;;  %v564_v0 = vadd.f32 %v1313_v45, %v1491_v32 }
 0x125   : > { %1017 = vst.msk [vmem:[%s1502_s13 + $0x44] sm:$0xf] %vm999_vm2, %v1211_v52  ;;  %v1240_v62 = vpack.c.bf16 %v805_v57, %v805_v57  ;;  %v779_v63 = vsel %vm683_vm13, %v553_v41, %v731_v54  ;;  %vm707_vm14 = vcmp.gt.f32.partialorder %v649_v58, 0.0  ;;  %v755_v2 = vmul.f32 0.2, %v649_v58 }
 0x126   : > { %1041 = vst.msk [vmem:[%s1502_s13 + $0xa4] sm:$0xf] %vm999_vm2, %v1235_v55  ;;  %v1214_v1 = vpack.c.bf16 %v779_v63, %v779_v63  ;;  %v660_v3 = vadd.f32 %v1337_v46, %v1491_v32  ;;  %1022 = vst.msk [vmem:[%s1502_s13 + $0x58] sm:$0xf] %vm999_vm2, %v1216_v61  ;;  %vm686_vm15 = vcmp.gt.f32.partialorder %v564_v0, 0.0  ;;  %v556_v5 = vadd.f32 %v1491_v32, %v555_v59 }
 0x127   : > { %1046 = vst.msk [vmem:[%s1502_s13 + $0xb8] sm:$0xf] %vm999_vm2, %v1240_v62  ;;  %v734_v4 = vmul.f32 0.2, %v564_v0  ;;  %v652_v6 = vadd.f32 %v1491_v32, %v651_v60  ;;  %v803_v7 = vsel %vm707_vm14, %v649_v58, %v755_v2 }
 0x128   : > { %1020 = vst.msk [vmem:[%s1502_s13 + $0x50] sm:$0xf] %vm999_vm2, %v1214_v1  ;;  %vm710_vm0 = vcmp.gt.f32.partialorder %v660_v3, 0.0  ;;  %v758_v8 = vmul.f32 0.2, %v660_v3  ;;  %v1238_v9 = vpack.c.bf16 %v803_v7, %v803_v7  ;;  %vm684_vm1 = vcmp.gt.f32.partialorder %v556_v5, 0.0 }
 0x129   : > { %v782_v10 = vsel %vm686_vm15, %v564_v0, %v734_v4  ;;  %v732_v11 = vmul.f32 0.2, %v556_v5  ;;  %vm708_vm3 = vcmp.gt.f32.partialorder %v652_v6, 0.0  ;;  %v756_v14 = vmul.f32 0.2, %v652_v6 }
 0x12a   : > { %v1217_v12 = vpack.c.bf16 %v782_v10, %v782_v10  ;;  %v806_v13 = vsel %vm710_vm0, %v660_v3, %v758_v8  ;;  %1044 = vst.msk [vmem:[%s1502_s13 + $0xb0] sm:$0xf] %vm999_vm2, %v1238_v9 }
 0x12b   : > { %v1241_v32 = vpack.c.bf16 %v806_v13, %v806_v13  ;;  %v780_v15 = vsel %vm684_vm1, %v556_v5, %v732_v11  ;;  %v804_v17 = vsel %vm708_vm3, %v652_v6, %v756_v14 }
 0x12c   : > { %1023 = vst.msk [vmem:[%s1502_s13 + $0x5c] sm:$0xf] %vm999_vm2, %v1217_v12  ;;  %v1215_v16 = vpack.c.bf16 %v780_v15, %v780_v15  ;;  %v1239_v18 = vpack.c.bf16 %v804_v17, %v804_v17 }
 0x12d   : > { %1047 = vst.msk [vmem:[%s1502_s13 + $0xbc] sm:$0xf] %vm999_vm2, %v1241_v32 }
 0x12e   : > { %1021 = vst.msk [vmem:[%s1502_s13 + $0x54] sm:$0xf] %vm999_vm2, %v1215_v16  ;;  %1045 = vst.msk [vmem:[%s1502_s13 + $0xb4] sm:$0xf] %vm999_vm2, %v1239_v18 }
 0x12f PF: > { %s13_s12 = sadd.s32 1, %s1400_s12  }
 0x130   : > { %p10_p4 = scmp.ge.s32.totalorder %s13_s12, 4  }
 0x132   :  { %12 = sbr.rel (!%p10_p4) target bundleno = 1 (0x1), region = 62 }

// kernel: discriminator_forward.6
= control target key start
LH: loop header
LB: loop body
LE: loop exit
PB: predicated region body
PF: predicated region fallthrough
CT: control target
= control target key end

     0   :  { %vm509_vm0 = vcmask 523264   ;;  %s2452_s1 = inlined_call_operand.vmem [shape: bf16[256,64], index: 1, kind: input, shape index: {}]   ;;  %s2453_s0 = inlined_call_operand.vmem [shape: bf16[256,256], index: 0, kind: input, shape index: {}]   ;;  %s2454_s2 = inlined_call_operand.vmem [shape: f32[1,64], index: 2, kind: input, shape index: {}]   ;;  %s2455_s3 = inlined_call_operand.vmem [shape: f32[1,64], index: 3, kind: input, shape index: {}]   ;;  %s2456_s4 = inlined_call_operand.vmem [shape: f32[1,64], index: 4, kind: input, shape index: {}]   ;;  %s2457_s5 = inlined_call_operand.vmem [shape: bf16[256,64], index: 5, kind: output, shape index: {}]  }
   0x1   :  { %v1299_v0 = vld [vmem:[%s2452_s1 + $0x78] sm:$0xff]   ;;  %v1301_v2 = vld [vmem:[%s2452_s1 + $0x70] sm:$0xff]   ;;  %v1303_v4 = vld [vmem:[%s2452_s1 + $0x68] sm:$0xff]  }
   0x2   :  { %v1300_v1 = vld [vmem:[%s2452_s1 + $0x38] sm:$0xff]   ;;  %1171 = vmatprep.subr.bf16.mxu0 %v1299_v0  ;;  %1283 = vmatprep.subr.bf16.mxu1 %v1299_v0  ;;  %v1302_v3 = vld [vmem:[%s2452_s1 + $0x30] sm:$0xff]   ;;  %v1304_v5 = vld [vmem:[%s2452_s1 + $0x28] sm:$0xff]  }
   0x3   :  { %1172 = vmatpush3.bf16.msra.mxu0 %v1300_v1  ;;  %1291 = vmatpush3.bf16.msra.mxu1 %v1300_v1  ;;  %v1305_v6 = vld [vmem:[%s2452_s1 + $0x60] sm:$0xff]   ;;  %v1307_v8 = vld [vmem:[%s2452_s1 + $0x58] sm:$0xff]   ;;  %v1309_v10 = vld [vmem:[%s2452_s1 + $0x50] sm:$0xff]  }
   0x4   :  { %1173 = vmatprep.subr.bf16.mxu0 %v1301_v2  ;;  %1284 = vmatprep.subr.bf16.mxu1 %v1301_v2  ;;  %v1306_v7 = vld [vmem:[%s2452_s1 + $0x20] sm:$0xff]   ;;  %v1308_v9 = vld [vmem:[%s2452_s1 + $0x18] sm:$0xff]   ;;  %v1310_v12 = vld [vmem:[%s2452_s1 + $0x10] sm:$0xff]  }
   0x5   :  { %v1317_v11 = vld [vmem:[%s2453_s0 + $0x4] ss:$8 sps:$4 sm:$0xff]   ;;  %v1315_v18 = vld [vmem:[%s2453_s0] ss:$8 sps:$4 sm:$0xff]   ;;  %v1318_v19 = vld [vmem:[%s2453_s0 + $0x14] ss:$8 sps:$4 sm:$0xff]  }
   0x6   :  { %380 = vmatprep.mubr.bf16.mxu0 %v1317_v11  ;;  %v1311_v13 = vld [vmem:[%s2452_s1 + $0x48] sm:$0xff]   ;;  %v1313_v16 = vld [vmem:[%s2452_s1 + $0x40] sm:$0xff]   ;;  %v1333_v21 = vld [vmem:[%s2453_s0 + $0x94] ss:$8 sps:$4 sm:$0xff]  }
   0x7   :  { %1174 = vmatpush3.bf16.msra.mxu0 %v1302_v3  ;;  %1292 = vmatpush3.bf16.msra.mxu1 %v1302_v3  ;;  %v1329_v14 = vld [vmem:[%s2453_s0 + $0x84] ss:$8 sps:$4 sm:$0xff]   ;;  %v1327_v20 = vld [vmem:[%s2453_s0 + $0x80] ss:$8 sps:$4 sm:$0xff]   ;;  %v1320_v22 = vld [vmem:[%s2453_s0 + $0x10] ss:$8 sps:$4 sm:$0xff]  }
   0x8   :  { %1175 = vmatprep.subr.bf16.mxu0 %v1303_v4  ;;  %1285 = vmatprep.subr.bf16.mxu1 %v1303_v4  ;;  %v1312_v15 = vld [vmem:[%s2452_s1 + $0x8] sm:$0xff]   ;;  %v1314_v17 = vld [vmem:[%s2452_s1] sm:$0xff]   ;;  %v1335_v24 = vld [vmem:[%s2453_s0 + $0x90] ss:$8 sps:$4 sm:$0xff]  }
   0x9   :  { %444 = vmatprep.mubr.bf16.mxu1 %v1329_v14  ;;  %v1321_v23 = vld [vmem:[%s2453_s0 + $0x24] ss:$8 sps:$4 sm:$0xff]   ;;  %v1323_v26 = vld [vmem:[%s2453_s0 + $0x20] ss:$8 sps:$4 sm:$0xff]   ;;  %v1324_v27 = vld [vmem:[%s2453_s0 + $0x34] ss:$8 sps:$4 sm:$0xff]  }
   0xa   :  { %v1339_v25 = vld [vmem:[%s2453_s0 + $0xa4] ss:$8 sps:$4 sm:$0xff]   ;;  %v1341_v28 = vld [vmem:[%s2453_s0 + $0xa0] ss:$8 sps:$4 sm:$0xff]   ;;  %v1345_v29 = vld [vmem:[%s2453_s0 + $0xb4] ss:$8 sps:$4 sm:$0xff]  }
   0xb   :  { %1176 = vmatpush3.bf16.msra.mxu0 %v1304_v5  ;;  %1293 = vmatpush3.bf16.msra.mxu1 %v1304_v5  ;;  %v1326_v30 = vld [vmem:[%s2453_s0 + $0x30] ss:$8 sps:$4 sm:$0xff]   ;;  %v1330_v31 = vld [vmem:[%s2453_s0 + $0x44] ss:$8 sps:$4 sm:$0xff]   ;;  %v1332_v34 = vld [vmem:[%s2453_s0 + $0x40] ss:$8 sps:$4 sm:$0xff]  }
   0xc   :  { %1177 = vmatprep.subr.bf16.mxu0 %v1305_v6  ;;  %1286 = vmatprep.subr.bf16.mxu1 %v1305_v6  ;;  %v1347_v32 = vld [vmem:[%s2453_s0 + $0xb0] ss:$8 sps:$4 sm:$0xff]   ;;  %v1351_v33 = vld [vmem:[%s2453_s0 + $0xc4] ss:$8 sps:$4 sm:$0xff]   ;;  %v1336_v35 = vld [vmem:[%s2453_s0 + $0x54] ss:$8 sps:$4 sm:$0xff]  }
   0xd   :  { %v1353_v36 = vld [vmem:[%s2453_s0 + $0xc0] ss:$8 sps:$4 sm:$0xff]   ;;  %v1354_v37 = vld [vmem:[%s2453_s0 + $0xd4] ss:$8 sps:$4 sm:$0xff]   ;;  %v1338_v38 = vld [vmem:[%s2453_s0 + $0x50] ss:$8 sps:$4 sm:$0xff]  }
   0xe   :  { %v1342_v39 = vld [vmem:[%s2453_s0 + $0x64] ss:$8 sps:$4 sm:$0xff]   ;;  %v1356_v40 = vld [vmem:[%s2453_s0 + $0xd0] ss:$8 sps:$4 sm:$0xff]   ;;  %v1344_v42 = vld [vmem:[%s2453_s0 + $0x60] ss:$8 sps:$4 sm:$0xff]  }
   0xf   :  { %1178 = vmatpush3.bf16.msra.mxu0 %v1306_v7  ;;  %1294 = vmatpush3.bf16.msra.mxu1 %v1306_v7  ;;  %v1357_v41 = vld [vmem:[%s2453_s0 + $0xe4] ss:$8 sps:$4 sm:$0xff]   ;;  %v1348_v43 = vld [vmem:[%s2453_s0 + $0x74] ss:$8 sps:$4 sm:$0xff]   ;;  %v1359_v44 = vld [vmem:[%s2453_s0 + $0xe0] ss:$8 sps:$4 sm:$0xff]  }
  0x10   :  { %1179 = vmatprep.subr.bf16.mxu0 %v1307_v8  ;;  %1287 = vmatprep.subr.bf16.mxu1 %v1307_v8  ;;  %v1360_v45 = vld [vmem:[%s2453_s0 + $0xf4] ss:$8 sps:$4 sm:$0xff]   ;;  %v1350_v46 = vld [vmem:[%s2453_s0 + $0x70] ss:$8 sps:$4 sm:$0xff]  }
  0x11   :  { %v1362_v47 = vld [vmem:[%s2453_s0 + $0xf0] ss:$8 sps:$4 sm:$0xff]  }
  0x13   :  { %1180 = vmatpush3.bf16.msra.mxu0 %v1308_v9  ;;  %1295 = vmatpush3.bf16.msra.mxu1 %v1308_v9 }
  0x14   :  { %1181 = vmatprep.subr.bf16.mxu0 %v1309_v10  ;;  %1288 = vmatprep.subr.bf16.mxu1 %v1309_v10 }
  0x17   :  { %1182 = vmatpush3.bf16.msra.mxu0 %v1310_v12  ;;  %1296 = vmatpush3.bf16.msra.mxu1 %v1310_v12 }
  0x18   :  { %1183 = vmatprep.subr.bf16.mxu0 %v1311_v13  ;;  %1289 = vmatprep.subr.bf16.mxu1 %v1311_v13 }
  0x1b   :  { %1184 = vmatpush3.bf16.msra.mxu0 %v1312_v15  ;;  %1297 = vmatpush3.bf16.msra.mxu1 %v1312_v15 }
  0x1c   :  { %1185 = vmatprep.subr.bf16.mxu0 %v1313_v16  ;;  %1290 = vmatprep.subr.bf16.mxu1 %v1313_v16 }
  0x1f   :  { %1186 = vmatpush3.bf16.msra.mxu0 %v1314_v17  ;;  %1298 = vmatpush3.bf16.msra.mxu1 %v1314_v17 }
  0x22   :  { %381 = vmatmul.mubr.bf16.vlgmr.msra.gmra.mxu0 %v1315_v18  ;;  %445 = vmatmul.mubr.bf16.vlgmr.msra.gmra.mxu1 %v1327_v20 }
  0x23   :  { %388 = vmatprep.mubr.bf16.mxu0 %v1318_v19  ;;  %452 = vmatprep.mubr.bf16.mxu1 %v1333_v21  ;;  %v1574_v19 = vld [vmem:[%s2454_s2] ss:$0 sm:$0xff] }
  0x2a   :  { %389 = vmatmul.mubr.bf16.gmra.mxu0 %v1320_v22  ;;  %453 = vmatmul.mubr.bf16.gmra.mxu1 %v1335_v24 }
  0x2b   :  { %396 = vmatprep.mubr.bf16.mxu0 %v1321_v23  ;;  %460 = vmatprep.mubr.bf16.mxu1 %v1339_v25 }
  0x32   :  { %397 = vmatmul.mubr.bf16.gmra.mxu0 %v1323_v26  ;;  %461 = vmatmul.mubr.bf16.gmra.mxu1 %v1341_v28 }
  0x33   :  { %404 = vmatprep.mubr.bf16.mxu0 %v1324_v27  ;;  %468 = vmatprep.mubr.bf16.mxu1 %v1345_v29 }
  0x3a   :  { %405 = vmatmul.mubr.bf16.gmra.mxu0 %v1326_v30  ;;  %469 = vmatmul.mubr.bf16.gmra.mxu1 %v1347_v32 }
  0x3b   :  { %412 = vmatprep.mubr.bf16.mxu0 %v1330_v31  ;;  %476 = vmatprep.mubr.bf16.mxu1 %v1351_v33 }
  0x42   :  { %413 = vmatmul.mubr.bf16.gmra.mxu0 %v1332_v34  ;;  %477 = vmatmul.mubr.bf16.gmra.mxu1 %v1353_v36 }
  0x43   :  { %420 = vmatprep.mubr.bf16.mxu0 %v1336_v35  ;;  %484 = vmatprep.mubr.bf16.mxu1 %v1354_v37 }
  0x4a   :  { %421 = vmatmul.mubr.bf16.gmra.mxu0 %v1338_v38  ;;  %485 = vmatmul.mubr.bf16.gmra.mxu1 %v1356_v40 }
  0x4b   :  { %428 = vmatprep.mubr.bf16.mxu0 %v1342_v39  ;;  %492 = vmatprep.mubr.bf16.mxu1 %v1357_v41 }
  0x52   :  { %429 = vmatmul.mubr.bf16.gmra.mxu0 %v1344_v42  ;;  %493 = vmatmul.mubr.bf16.gmra.mxu1 %v1359_v44 }
  0x53   :  { %436 = vmatprep.mubr.bf16.mxu0 %v1348_v43  ;;  %500 = vmatprep.mubr.bf16.mxu1 %v1360_v45 }
  0x5a   :  { %437 = vmatmul.mubr.bf16.gmra.mxu0 %v1350_v46  ;;  %501 = vmatmul.mubr.bf16.gmra.mxu1 %v1362_v47 }
  0xe2   :  { %v1187_v48 = vpop.f32.mrf.mxu0  ;;  %v1539_v49 = vpop.f32.mrf.mxu1 }
  0xe4   :  { %v1188_v50 = vpop.f32.mrf.mxu0  ;;  %v1541_v51 = vpop.f32.mrf.mxu1 }
  0xe5   :  { %v1189_v16 = vadd.f32 %v1188_v50, %v1187_v48 }
  0xe6   :  { %v1190_v52 = vpop.f32.mrf.mxu0  ;;  %v1543_v53 = vpop.f32.mrf.mxu1 }
  0xe7   :  { %v1582_v25 = vadd.f32 %v1189_v16, %v1574_v19 }
  0xe8   :  { %v1191_v54 = vpop.f32.mrf.mxu0  ;;  %v1545_v55 = vpop.f32.mrf.mxu1 }
  0xe9   :  { %v1192_v13 = vadd.f32 %v1191_v54, %v1190_v52  ;;  %v510_v35 = vsel %vm509_vm0, %v1582_v25, 0.0 }
  0xea   :  { %v1193_v56 = vpop.f32.mrf.mxu0  ;;  %v1547_v57 = vpop.f32.mrf.mxu1 }
  0xeb   :  { %v1577_v21 = vadd.f32 %v1192_v13, %v1574_v19 }
  0xec   :  { %v1194_v58 = vpop.f32.mrf.mxu0  ;;  %v1549_v59 = vpop.f32.mrf.mxu1 }
  0xed   :  { %v1195_v17 = vadd.f32 %v1194_v58, %v1193_v56  ;;  %v511_v30 = vsel %vm509_vm0, %v1577_v21, 0.0 }
  0xee   :  { %v1196_v60 = vpop.f32.mrf.mxu0  ;;  %v1551_v61 = vpop.f32.mrf.mxu1  ;;  %v512_v39 = vadd.f32 %v511_v30, %v510_v35 }
  0xef   :  { %v1585_v26 = vadd.f32 %v1195_v17, %v1574_v19 }
  0xf0   :  { %v1197_v62 = vpop.f32.mrf.mxu0  ;;  %v1553_v63 = vpop.f32.mrf.mxu1 }
  0xf1   :  { %v1198_v22 = vadd.f32 %v1197_v62, %v1196_v60  ;;  %v513_v36 = vsel %vm509_vm0, %v1585_v26, 0.0 }
  0xf2   :  { %v1199_v0 = vpop.f32.mrf.mxu0  ;;  %v1555_v1 = vpop.f32.mrf.mxu1  ;;  %v514_v45 = vadd.f32 %v513_v36, %v512_v39 }
  0xf3   :  { %v1592_v31 = vadd.f32 %v1198_v22, %v1574_v19 }
  0xf4   :  { %v1200_v2 = vpop.f32.mrf.mxu0  ;;  %v1557_v3 = vpop.f32.mrf.mxu1 }
  0xf5   :  { %v1201_v27 = vadd.f32 %v1200_v2, %v1199_v0  ;;  %v515_v42 = vsel %vm509_vm0, %v1592_v31, 0.0 }
  0xf6   :  { %v1202_v4 = vpop.f32.mrf.mxu0  ;;  %v1559_v5 = vpop.f32.mrf.mxu1  ;;  %v516_v52 = vadd.f32 %v515_v42, %v514_v45 }
  0xf7   :  { %v1601_v37 = vadd.f32 %v1201_v27, %v1574_v19 }
  0xf8   :  { %v1203_v6 = vpop.f32.mrf.mxu0  ;;  %v1561_v7 = vpop.f32.mrf.mxu1 }
  0xf9   :  { %v1204_v32 = vadd.f32 %v1203_v6, %v1202_v4  ;;  %v517_v47 = vsel %vm509_vm0, %v1601_v37, 0.0 }
  0xfa   :  { %v1205_v8 = vpop.f32.mrf.mxu0  ;;  %v1563_v9 = vpop.f32.mrf.mxu1  ;;  %v518_v0 = vadd.f32 %v517_v47, %v516_v52 }
  0xfb   :  { %v1608_v43 = vadd.f32 %v1204_v32, %v1574_v19 }
  0xfc   :  { %v1206_v10 = vpop.f32.mrf.mxu0  ;;  %v1565_v11 = vpop.f32.mrf.mxu1 }
  0xfd   :  { %v1207_v38 = vadd.f32 %v1206_v10, %v1205_v8  ;;  %v519_v58 = vsel %vm509_vm0, %v1608_v43, 0.0 }
  0xfe   :  { %v1208_v12 = vpop.f32.mrf.mxu0  ;;  %v1567_v14 = vpop.f32.mrf.mxu1  ;;  %v520_v10 = vadd.f32 %v519_v58, %v518_v0 }
  0xff   :  { %v1613_v48 = vadd.f32 %v1207_v38, %v1574_v19 }
 0x100   :  { %v1209_v15 = vpop.f32.mrf.mxu0  ;;  %v1569_v18 = vpop.f32.mrf.mxu1 }
 0x101   :  { %v1210_v44 = vadd.f32 %v1209_v15, %v1208_v12  ;;  %v521_v4 = vsel %vm509_vm0, %v1613_v48, 0.0 }
 0x102   :  { %v1211_v20 = vpop.f32.mrf.mxu0  ;;  %v1579_v23 = vpop.f32.mrf.mxu1 }
 0x103   :  { %v1620_v60 = vadd.f32 %v1210_v44, %v1574_v19 }
 0x104   :  { %v1212_v24 = vpop.f32.mrf.mxu0  ;;  %v1587_v28 = vpop.f32.mrf.mxu1 }
 0x105   :  { %v1213_v50 = vadd.f32 %v1212_v24, %v1211_v20  ;;  %v523_v15 = vsel %vm509_vm0, %v1620_v60, 0.0  ;;  %v522_v20 = vadd.f32 %v521_v4, %v520_v10  ;;  %v1237_v10 = vadd.f32 %v1541_v51, %v1539_v49 }
 0x106   :  { %v1214_v29 = vpop.f32.mrf.mxu0  ;;  %v1594_v33 = vpop.f32.mrf.mxu1  ;;  %v1243_v49 = vadd.f32 %v1549_v59, %v1547_v57  ;;  %v1249_v59 = vadd.f32 %v1557_v3, %v1555_v1  ;;  %v1255_v1 = vadd.f32 %v1565_v11, %v1563_v9  ;;  %v1261_v9 = vadd.f32 %v1587_v28, %v1579_v23 }
 0x107   :  { %v1625_v6 = vadd.f32 %v1213_v50, %v1574_v19  ;;  %v524_v30 = vadd.f32 %v523_v15, %v522_v20 }
 0x108   :  { %v1215_v34 = vpop.f32.mrf.mxu0  ;;  %v1603_v41 = vpop.f32.mrf.mxu1  ;;  %v1687_v57 = vadd.f32 %v1243_v49, %v1574_v19 }
 0x109   :  { %v1216_v62 = vadd.f32 %v1215_v34, %v1214_v29  ;;  %v525_v24 = vsel %vm509_vm0, %v1625_v6, 0.0 }
 0x10a   :  { %v1217_v40 = vpop.f32.mrf.mxu0  ;;  %v1615_v56 = vpop.f32.mrf.mxu1  ;;  %v526_v38 = vadd.f32 %v525_v24, %v524_v30 }
 0x10b   :  { %v1632_v16 = vadd.f32 %v1216_v62, %v1574_v19 }
 0x10c   :  { %v1218_v46 = vpop.f32.mrf.mxu0  ;;  %v1627_v13 = vpop.f32.mrf.mxu1 }
 0x10d   :  { %v1219_v8 = vadd.f32 %v1218_v46, %v1217_v40  ;;  %v527_v35 = vsel %vm509_vm0, %v1632_v16, 0.0  ;;  %v1267_v23 = vadd.f32 %v1627_v13, %v1615_v56 }
 0x10e   :  { %v1220_v54 = vpop.f32.mrf.mxu0  ;;  %v1639_v34 = vpop.f32.mrf.mxu1  ;;  %v528_v45 = vadd.f32 %v527_v35, %v526_v38  ;;  %v1670_v35 = vadd.f32 %v1237_v10, %v1574_v19 }
 0x10f   :  { %v1637_v27 = vadd.f32 %v1219_v8, %v1574_v19 }
 0x110   :  { %v1221_v2 = vpop.f32.mrf.mxu0  ;;  %v1269_v47 = vpop.f32.mrf.mxu1 }
 0x111   :  { %v1222_v17 = vadd.f32 %v1221_v2, %v1220_v54  ;;  %v529_v40 = vsel %vm509_vm0, %v1637_v27, 0.0 }
 0x112   :  { %v1223_v12 = vpop.f32.mrf.mxu0  ;;  %v530_v54 = vadd.f32 %v529_v40, %v528_v45  ;;  %v1271_v8 = vpop.f32.mrf.mxu1  ;;  %v541_v45 = vsel %vm509_vm0, %v1670_v35, 0.0 }
 0x113   :  { %v1644_v36 = vadd.f32 %v1222_v17, %v1574_v19 }
 0x114   :  { %v1224_v22 = vpop.f32.mrf.mxu0 }
 0x115   :  { %v1225_v29 = vadd.f32 %v1224_v22, %v1223_v12  ;;  %v531_v50 = vsel %vm509_vm0, %v1644_v36, 0.0  ;;  %v1240_v22 = vadd.f32 %v1545_v55, %v1543_v53  ;;  %v1246_v53 = vadd.f32 %v1553_v63, %v1551_v61 }
 0x116   :  { %v1226_v32 = vpop.f32.mrf.mxu0  ;;  %v532_v2 = vadd.f32 %v531_v50, %v530_v54  ;;  %v1252_v63 = vadd.f32 %v1561_v7, %v1559_v5  ;;  %v1258_v5 = vadd.f32 %v1569_v18, %v1567_v14  ;;  %v1264_v14 = vadd.f32 %v1603_v41, %v1594_v33 }
 0x117   :  { %v1649_v42 = vadd.f32 %v1225_v29, %v1574_v19  ;;  %v1694_v61 = vadd.f32 %v1246_v53, %v1574_v19  ;;  %v1270_v33 = vadd.f32 %v1269_v47, %v1639_v34 }
 0x118   :  { %v1227_v39 = vpop.f32.mrf.mxu0 }
 0x119   :  { %v1228_v44 = vadd.f32 %v1227_v39, %v1226_v32  ;;  %v533_v62 = vsel %vm509_vm0, %v1649_v42, 0.0  ;;  %v1272_v32 = vpop.f32.mrf.mxu1  ;;  %v1678_v39 = vadd.f32 %v1240_v22, %v1574_v19  ;;  %v1722_v22 = vadd.f32 %v1258_v5, %v1574_v19 }
 0x11a   :  { %v1229_v46 = vpop.f32.mrf.mxu0  ;;  %v534_v17 = vadd.f32 %v533_v62, %v532_v2  ;;  %v545_v62 = vsel %vm509_vm0, %v1687_v57, 0.0  ;;  %v547_v2 = vsel %vm509_vm0, %v1694_v61, 0.0  ;;  %v1747_v13 = vadd.f32 %v1270_v33, %v1574_v19 }
 0x11b   :  { %v1654_v52 = vadd.f32 %v1228_v44, %v1574_v19  ;;  %v1274_v44 = vpop.f32.mrf.mxu1  ;;  %v543_v50 = vsel %vm509_vm0, %v1678_v39, 0.0  ;;  %v555_v49 = vsel %vm509_vm0, %v1722_v22, 0.0 }
 0x11c   :  { %v1230_v58 = vpop.f32.mrf.mxu0 }
 0x11d   :  { %v1231_v0 = vadd.f32 %v1230_v58, %v1229_v46  ;;  %v535_v12 = vsel %vm509_vm0, %v1654_v52, 0.0  ;;  %v1275_v58 = vpop.f32.mrf.mxu1 }
 0x11e   :  { %v1232_v4 = vpop.f32.mrf.mxu0  ;;  %v536_v30 = vadd.f32 %v535_v12, %v534_v17  ;;  %v1715_v17 = vadd.f32 %v1255_v1, %v1574_v19 }
 0x11f   :  { %v1663_v15 = vadd.f32 %v1231_v0, %v1574_v19  ;;  %v1701_v0 = vadd.f32 %v1249_v59, %v1574_v19  ;;  %v1277_v10 = vpop.f32.mrf.mxu1 }
 0x120   :  { %v1233_v20 = vpop.f32.mrf.mxu0 }
 0x121   :  { %v537_v24 = vsel %vm509_vm0, %v1663_v15, 0.0  ;;  %v1234_v29 = vadd.f32 %v1233_v20, %v1232_v4  ;;  %v1708_v4 = vadd.f32 %v1252_v63, %v1574_v19  ;;  %v549_v12 = vsel %vm509_vm0, %v1701_v0, 0.0 }
 0x122   :  { %v538_v38 = vadd.f32 %v537_v24, %v536_v30  ;;  %v1278_v24 = vpop.f32.mrf.mxu1  ;;  %v1729_v30 = vadd.f32 %v1261_v9, %v1574_v19 }
 0x123   :  { %v1675_v51 = vadd.f32 %v1234_v29, %v1574_v19  ;;  %v551_v20 = vsel %vm509_vm0, %v1708_v4, 0.0  ;;  %v553_v29 = vsel %vm509_vm0, %v1715_v17, 0.0 }
 0x124   :  { %v1280_v53 = vpop.f32.mrf.mxu1 }
 0x125   :  { %v539_v55 = vsel %vm509_vm0, %v1675_v51, 0.0 }
 0x126   :  { %v540_v40 = vadd.f32 %v539_v55, %v538_v38  ;;  %v1736_v38 = vadd.f32 %v1264_v14, %v1574_v19  ;;  %v557_v55 = vsel %vm509_vm0, %v1729_v30, 0.0  ;;  %v1281_v63 = vpop.f32.mrf.mxu1 }
 0x127   :  { %v1282_v1 = vadd.f32 %v1281_v63, %v1280_v53 }
 0x128   :  { %v542_v46 = vadd.f32 %v541_v45, %v540_v40  ;;  %v1742_v40 = vadd.f32 %v1267_v23, %v1574_v19  ;;  %v1273_v45 = vadd.f32 %v1272_v32, %v1271_v8  ;;  %v559_v56 = vsel %vm509_vm0, %v1736_v38, 0.0 }
 0x129   :  { %v563_v8 = vsel %vm509_vm0, %v1747_v13, 0.0 }
 0x12a   :  { %v544_v54 = vadd.f32 %v543_v50, %v542_v46  ;;  %v1276_v46 = vadd.f32 %v1275_v58, %v1274_v44  ;;  %v561_v34 = vsel %vm509_vm0, %v1742_v40, 0.0  ;;  %v1752_v47 = vadd.f32 %v1273_v45, %v1574_v19 }
 0x12c   :  { %v546_v3 = vadd.f32 %v545_v62, %v544_v54  ;;  %v1279_v54 = vadd.f32 %v1278_v24, %v1277_v10  ;;  %v1757_v32 = vadd.f32 %v1276_v46, %v1574_v19  ;;  %v565_v44 = vsel %vm509_vm0, %v1752_v47, 0.0 }
 0x12e   :  { %v548_v7 = vadd.f32 %v547_v2, %v546_v3  ;;  %v1762_v58 = vadd.f32 %v1279_v54, %v1574_v19  ;;  %v567_v5 = vsel %vm509_vm0, %v1757_v32, 0.0 }
 0x130   :  { %v550_v11 = vadd.f32 %v549_v12, %v548_v7  ;;  %v1767_v7 = vadd.f32 %v1282_v1, %v1574_v19  ;;  %v569_v12 = vsel %vm509_vm0, %v1762_v58, 0.0 }
 0x132   :  { %v552_v18 = vadd.f32 %v551_v20, %v550_v11  ;;  %v571_v11 = vsel %vm509_vm0, %v1767_v7, 0.0 }
 0x134   :  { %v554_v28 = vadd.f32 %v553_v29, %v552_v18 }
 0x136   :  { %v556_v41 = vadd.f32 %v555_v49, %v554_v28 }
 0x138   :  { %v558_v59 = vadd.f32 %v557_v55, %v556_v41 }
 0x13a   :  { %v560_v50 = vadd.f32 %v559_v56, %v558_v59 }
 0x13c   :  { %v562_v62 = vadd.f32 %v561_v34, %v560_v50 }
 0x13e   :  { %v564_v3 = vadd.f32 %v563_v8, %v562_v62 }
 0x140   :  { %v566_v2 = vadd.f32 %v565_v44, %v564_v3 }
 0x142   :  { %v568_v10 = vadd.f32 %v567_v5, %v566_v2 }
 0x144   :  { %v570_v9 = vadd.f32 %v569_v12, %v568_v10 }
 0x146   :  { %v572_v20 = vadd.f32 %v571_v11, %v570_v9 }
 0x148   :  { %v573_v14 = vrot.slane %v572_v20, 4 }
 0x14a   :  { %v574_v18 = vadd.f32 %v573_v14, %v572_v20 }
 0x14c   :  { %v575_v24 = vrot.slane %v574_v18, 2 }
 0x14e   :  { %v576_v29 = vadd.f32 %v575_v24, %v574_v18 }
 0x150   :  { %v577_v23 = vrot.slane %v576_v29, 1 }
 0x152   :  { %v578_v28 = vadd.f32 %v577_v23, %v576_v29 }
 0x154   :  { %v1773_v49 = vmul.f32 0.00390625, %v578_v28 }
 0x156   :  { %v1777_v19 = vsub.f32 %v1582_v25, %v1773_v49  ;;  %v1781_v33 = vsub.f32 %v1577_v21, %v1773_v49  ;;  %v1785_v41 = vsub.f32 %v1585_v26, %v1773_v49  ;;  %v1789_v53 = vsub.f32 %v1592_v31, %v1773_v49 }
 0x157   :  { %v1797_v25 = vsub.f32 %v1601_v37, %v1773_v49  ;;  %v1803_v26 = vsub.f32 %v1608_v43, %v1773_v49  ;;  %v1811_v50 = vsub.f32 %v1613_v48, %v1773_v49  ;;  %v1818_v43 = vsub.f32 %v1620_v60, %v1773_v49 }
 0x158   :  { %v613_v55 = vmul.f32 %v1777_v19, %v1777_v19  ;;  %v614_v45 = vmul.f32 %v1781_v33, %v1781_v33  ;;  %v615_v21 = vmul.f32 %v1785_v41, %v1785_v41  ;;  %v616_v31 = vmul.f32 %v1789_v53, %v1789_v53 }
 0x159   :  { %v617_v37 = vmul.f32 %v1797_v25, %v1797_v25  ;;  %v618_v54 = vmul.f32 %v1803_v26, %v1803_v26  ;;  %v1825_v48 = vsub.f32 %v1625_v6, %v1773_v49  ;;  %v619_v1 = vmul.f32 %v1811_v50, %v1811_v50 }
 0x15a   :  { %v645_v59 = vsel %vm509_vm0, %v613_v55, 0.0  ;;  %v646_v56 = vsel %vm509_vm0, %v614_v45, 0.0  ;;  %v648_v63 = vsel %vm509_vm0, %v615_v21, 0.0  ;;  %v650_v62 = vsel %vm509_vm0, %v616_v31, 0.0 }
 0x15b   :  { %v647_v46 = vadd.f32 %v646_v56, %v645_v59  ;;  %v652_v3 = vsel %vm509_vm0, %v617_v37, 0.0  ;;  %v1832_v60 = vsub.f32 %v1632_v16, %v1773_v49  ;;  %v620_v2 = vmul.f32 %v1818_v43, %v1818_v43 }
 0x15c   :  { %v654_v5 = vsel %vm509_vm0, %v618_v54, 0.0  ;;  %v1839_v6 = vsub.f32 %v1637_v27, %v1773_v49  ;;  %v621_v12 = vmul.f32 %v1825_v48, %v1825_v48  ;;  %v656_v9 = vsel %vm509_vm0, %v619_v1, 0.0 }
 0x15d   :  { %v649_v34 = vadd.f32 %v648_v63, %v647_v46  ;;  %v1846_v16 = vsub.f32 %v1644_v36, %v1773_v49  ;;  %v622_v20 = vmul.f32 %v1832_v60, %v1832_v60  ;;  %v658_v14 = vsel %vm509_vm0, %v620_v2, 0.0 }
 0x15e   :  { %v1853_v27 = vsub.f32 %v1649_v42, %v1773_v49  ;;  %v623_v24 = vmul.f32 %v1839_v6, %v1839_v6  ;;  %v660_v29 = vsel %vm509_vm0, %v621_v12, 0.0  ;;  %v1860_v36 = vsub.f32 %v1654_v52, %v1773_v49 }
 0x15f   :  { %v651_v8 = vadd.f32 %v650_v62, %v649_v34  ;;  %v624_v28 = vmul.f32 %v1846_v16, %v1846_v16  ;;  %v662_v55 = vsel %vm509_vm0, %v622_v20, 0.0  ;;  %v1867_v42 = vsub.f32 %v1663_v15, %v1773_v49 }
 0x160   :  { %v625_v21 = vmul.f32 %v1853_v27, %v1853_v27  ;;  %v664_v31 = vsel %vm509_vm0, %v623_v24, 0.0  ;;  %v1874_v52 = vsub.f32 %v1675_v51, %v1773_v49  ;;  %v626_v56 = vmul.f32 %v1860_v36, %v1860_v36 }
 0x161   :  { %v653_v44 = vadd.f32 %v652_v3, %v651_v8  ;;  %v666_v46 = vsel %vm509_vm0, %v624_v28, 0.0  ;;  %v1881_v15 = vsub.f32 %v1670_v35, %v1773_v49  ;;  %v627_v63 = vmul.f32 %v1867_v42, %v1867_v42 }
 0x162   :  { %v668_v34 = vsel %vm509_vm0, %v625_v21, 0.0  ;;  %v1888_v51 = vsub.f32 %v1678_v39, %v1773_v49  ;;  %v628_v62 = vmul.f32 %v1874_v52, %v1874_v52  ;;  %v670_v8 = vsel %vm509_vm0, %v626_v56, 0.0 }
 0x163   :  { %v655_v10 = vadd.f32 %v654_v5, %v653_v44  ;;  %v1895_v35 = vsub.f32 %v1687_v57, %v1773_v49  ;;  %v629_v3 = vmul.f32 %v1881_v15, %v1881_v15  ;;  %v672_v44 = vsel %vm509_vm0, %v627_v63, 0.0 }
 0x164   :  { %v1902_v39 = vsub.f32 %v1694_v61, %v1773_v49  ;;  %v630_v5 = vmul.f32 %v1888_v51, %v1888_v51  ;;  %v1909_v57 = vsub.f32 %v1701_v0, %v1773_v49  ;;  %v1916_v61 = vsub.f32 %v1708_v4, %v1773_v49 }
 0x165   :  { %v657_v11 = vadd.f32 %v656_v9, %v655_v10  ;;  %v674_v10 = vsel %vm509_vm0, %v628_v62, 0.0  ;;  %v631_v9 = vmul.f32 %v1895_v35, %v1895_v35  ;;  %v1923_v0 = vsub.f32 %v1715_v17, %v1773_v49 }
 0x166   :  { %v1930_v4 = vsub.f32 %v1722_v22, %v1773_v49  ;;  %v1937_v17 = vsub.f32 %v1729_v30, %v1773_v49  ;;  %v1944_v22 = vsub.f32 %v1736_v38, %v1773_v49  ;;  %v1951_v30 = vsub.f32 %v1742_v40, %v1773_v49 }
 0x167   :  { %v659_v18 = vadd.f32 %v658_v14, %v657_v11  ;;  %v676_v11 = vsel %vm509_vm0, %v629_v3, 0.0  ;;  %v632_v14 = vmul.f32 %v1902_v39, %v1902_v39  ;;  %v1958_v38 = vsub.f32 %v1747_v13, %v1773_v49 }
 0x168   :  { %v1965_v40 = vsub.f32 %v1752_v47, %v1773_v49  ;;  %v610_v13 = vsub.f32 %v1757_v32, %v1773_v49 }
 0x169   :  { %v661_v23 = vadd.f32 %v660_v29, %v659_v18  ;;  %v678_v18 = vsel %vm509_vm0, %v630_v5, 0.0  ;;  %v633_v29 = vmul.f32 %v1909_v57, %v1909_v57 }
 0x16a   :  { %v641_v47 = vmul.f32 %v1965_v40, %v1965_v40 }
 0x16b   :  { %v663_v45 = vadd.f32 %v662_v55, %v661_v23  ;;  %v680_v23 = vsel %vm509_vm0, %v631_v9, 0.0  ;;  %v634_v55 = vmul.f32 %v1916_v61, %v1916_v61 }
 0x16d   :  { %v665_v59 = vadd.f32 %v664_v31, %v663_v45  ;;  %v682_v45 = vsel %vm509_vm0, %v632_v14, 0.0  ;;  %v635_v31 = vmul.f32 %v1923_v0, %v1923_v0 }
 0x16f   :  { %v667_v37 = vadd.f32 %v666_v46, %v665_v59  ;;  %v684_v59 = vsel %vm509_vm0, %v633_v29, 0.0  ;;  %v636_v46 = vmul.f32 %v1930_v4, %v1930_v4 }
 0x171   :  { %v669_v54 = vadd.f32 %v668_v34, %v667_v37  ;;  %v686_v37 = vsel %vm509_vm0, %v634_v55, 0.0  ;;  %v637_v34 = vmul.f32 %v1937_v17, %v1937_v17 }
 0x173   :  { %v671_v1 = vadd.f32 %v670_v8, %v669_v54  ;;  %v688_v54 = vsel %vm509_vm0, %v635_v31, 0.0  ;;  %v638_v8 = vmul.f32 %v1944_v22, %v1944_v22 }
 0x175   :  { %v673_v2 = vadd.f32 %v672_v44, %v671_v1  ;;  %v690_v1 = vsel %vm509_vm0, %v636_v46, 0.0  ;;  %v639_v44 = vmul.f32 %v1951_v30, %v1951_v30 }
 0x177   :  { %v675_v12 = vadd.f32 %v674_v10, %v673_v2  ;;  %v692_v2 = vsel %vm509_vm0, %v637_v34, 0.0  ;;  %v640_v10 = vmul.f32 %v1958_v38, %v1958_v38 }
 0x179   :  { %v677_v20 = vadd.f32 %v676_v11, %v675_v12  ;;  %v694_v12 = vsel %vm509_vm0, %v638_v8, 0.0  ;;  %v611_v11 = vsub.f32 %v1762_v58, %v1773_v49  ;;  %v698_v32 = vsel %vm509_vm0, %v640_v10, 0.0 }
 0x17b   :  { %v679_v24 = vadd.f32 %v678_v18, %v677_v20  ;;  %v696_v20 = vsel %vm509_vm0, %v639_v44, 0.0  ;;  %v612_v18 = vsub.f32 %v1767_v7, %v1773_v49  ;;  %v715_v44 = vld [vmem:[%s2455_s3] sm:$0x1] }
 0x17d   :  { %v681_v28 = vadd.f32 %v680_v23, %v679_v24  ;;  %v642_v24 = vmul.f32 %v610_v13, %v610_v13  ;;  %v643_v23 = vmul.f32 %v611_v11, %v611_v11 }
 0x17f   :  { %v683_v21 = vadd.f32 %v682_v45, %v681_v28  ;;  %v700_v28 = vsel %vm509_vm0, %v641_v47, 0.0  ;;  %v644_v45 = vmul.f32 %v612_v18, %v612_v18  ;;  %v702_v58 = vsel %vm509_vm0, %v642_v24, 0.0 }
 0x180   :  { %v704_v31 = vsel %vm509_vm0, %v643_v23, 0.0 }
 0x181   :  { %v685_v56 = vadd.f32 %v684_v59, %v683_v21 }
 0x183   :  { %v687_v63 = vadd.f32 %v686_v37, %v685_v56  ;;  %v706_v56 = vsel %vm509_vm0, %v644_v45, 0.0 }
 0x185   :  { %v689_v62 = vadd.f32 %v688_v54, %v687_v63 }
 0x187   :  { %v691_v3 = vadd.f32 %v690_v1, %v689_v62  ;;  %v720_v1 = vlaneseq }
 0x189   :  { %v693_v5 = vadd.f32 %v692_v2, %v691_v3  ;;  %v721_v3 = vshrl.u32 %v720_v1, 7 }
 0x18b   :  { %v695_v9 = vadd.f32 %v694_v12, %v693_v5  ;;  %v722_v10 = vsub.s32 0, %v721_v3 }
 0x18d   :  { %v697_v14 = vadd.f32 %v696_v20, %v695_v9 }
 0x18f   :  { %v699_v29 = vadd.f32 %v698_v32, %v697_v14 }
 0x191   :  { %v701_v55 = vadd.f32 %v700_v28, %v699_v29 }
 0x193   :  { %v703_v21 = vadd.f32 %v702_v58, %v701_v55 }
 0x195   :  { %v705_v59 = vadd.f32 %v704_v31, %v703_v21 }
 0x197   :  { %v707_v46 = vadd.f32 %v706_v56, %v705_v59 }
 0x199   :  { %v708_v37 = vrot.slane %v707_v46, 4 }
 0x19b   :  { %v709_v7 = vadd.f32 %v708_v37, %v707_v46 }
 0x19d   :  { %v710_v49 = vrot.slane %v709_v7, 2 }
 0x19f   :  { %v711_v63 = vadd.f32 %v710_v49, %v709_v7 }
 0x1a1   :  { %v712_v34 = vrot.slane %v711_v63, 1 }
 0x1a3   :  { %v713_v54 = vadd.f32 %v712_v34, %v711_v63 }
 0x1a5   :  { %v714_v62 = vmul.f32 0.00390625, %v713_v54 }
 0x1a7   :  { %v716_v8 = vadd.f32 1e-05, %v714_v62 }
 0x1a9   :  { %1363 = vrsqrt.f32 %v716_v8 }
 0x1b6   :  { %v1364_v2 = vpop.eup %1363 }
 0x1b7   :  { %v718_v5 = vmul.f32 %v1364_v2, %v715_v44 }
 0x1b9   :  { %v723_v12 = vrot.slane %v718_v5, %v722_v10 }
 0x1bb   :  { %v746_v9 = vmul.f32 %v723_v12, %v1916_v61  ;;  %v747_v47 = vmul.f32 %v723_v12, %v1923_v0  ;;  %v725_v20 = vmul.f32 %v723_v12, %v1777_v19  ;;  %v726_v14 = vmul.f32 %v723_v12, %v1781_v33 }
 0x1bc   :  { %v727_v24 = vmul.f32 %v723_v12, %v1785_v41  ;;  %v754_v32 = vmul.f32 %v723_v12, %v610_v13  ;;  %v1995_v29 = vmul.f32 %v723_v12, %v611_v11  ;;  %v1997_v23 = vmul.f32 %v723_v12, %v612_v18 }
 0x1bd   :  { %v728_v28 = vmul.f32 %v723_v12, %v1789_v53  ;;  %v729_v55 = vmul.f32 %v723_v12, %v1797_v25  ;;  %v730_v45 = vmul.f32 %v723_v12, %v1803_v26  ;;  %v731_v61 = vmul.f32 %v723_v12, %v1811_v50 }
 0x1be   :  { %v732_v0 = vmul.f32 %v723_v12, %v1818_v43  ;;  %v733_v19 = vmul.f32 %v723_v12, %v1825_v48  ;;  %v734_v33 = vmul.f32 %v723_v12, %v1832_v60  ;;  %v735_v41 = vmul.f32 %v723_v12, %v1839_v6  ;;  %v1106_v60 = vld [vmem:[%s2456_s4] ss:$0 sm:$0xff] }
 0x1bf   :  { %v736_v13 = vmul.f32 %v723_v12, %v1846_v16  ;;  %v737_v11 = vmul.f32 %v723_v12, %v1853_v27  ;;  %v738_v53 = vmul.f32 %v723_v12, %v1860_v36  ;;  %v739_v25 = vmul.f32 %v723_v12, %v1867_v42 }
 0x1c0   :  { %v740_v26 = vmul.f32 %v723_v12, %v1874_v52  ;;  %v741_v50 = vmul.f32 %v723_v12, %v1881_v15  ;;  %v742_v43 = vmul.f32 %v723_v12, %v1888_v51  ;;  %v743_v48 = vmul.f32 %v723_v12, %v1895_v35 }
 0x1c1   :  { %v744_v6 = vmul.f32 %v723_v12, %v1902_v39  ;;  %v745_v16 = vmul.f32 %v723_v12, %v1909_v57  ;;  %v748_v27 = vmul.f32 %v723_v12, %v1930_v4  ;;  %v749_v36 = vmul.f32 %v723_v12, %v1937_v17 }
 0x1c2   :  { %v750_v42 = vmul.f32 %v723_v12, %v1944_v22  ;;  %v751_v52 = vmul.f32 %v723_v12, %v1951_v30  ;;  %v752_v15 = vmul.f32 %v723_v12, %v1958_v38  ;;  %v753_v51 = vmul.f32 %v723_v12, %v1965_v40 }
 0x1c3   :  { %v2026_v35 = vadd.f32 %v1106_v60, %v725_v20  ;;  %v2028_v18 = vadd.f32 %v1106_v60, %v726_v14  ;;  %v2030_v58 = vadd.f32 %v1106_v60, %v727_v24  ;;  %v2032_v39 = vadd.f32 %v1106_v60, %v728_v28 }
 0x1c4   :  { %v2034_v57 = vadd.f32 %v1106_v60, %v729_v55  ;;  %v2036_v4 = vadd.f32 %v1106_v60, %v730_v45  ;;  %v2038_v17 = vadd.f32 %v1106_v60, %v731_v61  ;;  %v2040_v22 = vadd.f32 %v1106_v60, %v732_v0 }
 0x1c5   :  { %v2042_v30 = vadd.f32 %v1106_v60, %v733_v19  ;;  %v2044_v38 = vadd.f32 %v1106_v60, %v734_v33  ;;  %v2046_v40 = vadd.f32 %v1106_v60, %v735_v41  ;;  %v2048_v21 = vadd.f32 %v1106_v60, %v736_v13 }
 0x1c6   :  { %v2050_v31 = vadd.f32 %v1106_v60, %v737_v11  ;;  %v2052_v59 = vadd.f32 %v1106_v60, %v738_v53  ;;  %v2054_v56 = vadd.f32 %v1106_v60, %v739_v25  ;;  %v2056_v46 = vadd.f32 %v1106_v60, %v740_v26 }
 0x1c7   :  { %v2058_v37 = vadd.f32 %v1106_v60, %v741_v50  ;;  %v2060_v7 = vadd.f32 %v1106_v60, %v742_v43  ;;  %v2062_v49 = vadd.f32 %v1106_v60, %v743_v48  ;;  %v2064_v63 = vadd.f32 %v1106_v60, %v744_v6 }
 0x1c8   :  { %v2066_v34 = vadd.f32 %v1106_v60, %v745_v16  ;;  %v2068_v54 = vadd.f32 %v1106_v60, %v746_v9  ;;  %v2070_v62 = vadd.f32 %v1106_v60, %v747_v47  ;;  %v2072_v8 = vadd.f32 %v1106_v60, %v748_v27 }
 0x1c9   :  { %v2074_v1 = vadd.f32 %v1106_v60, %v749_v36  ;;  %v2076_v3 = vadd.f32 %v1106_v60, %v750_v42  ;;  %v2078_v44 = vadd.f32 %v1106_v60, %v751_v52  ;;  %v2080_v2 = vadd.f32 %v1106_v60, %v752_v15 }
 0x1ca   :  { %v2082_v5 = vadd.f32 %v1106_v60, %v753_v51  ;;  %v2084_v10 = vadd.f32 %v1106_v60, %v754_v32  ;;  %vm796_vm1 = vcmp.gt.f32.partialorder %v2026_v35, 0.0  ;;  %vm797_vm2 = vcmp.gt.f32.partialorder %v2028_v18, 0.0 }
 0x1cb   :  { %vm798_vm3 = vcmp.gt.f32.partialorder %v2030_v58, 0.0  ;;  %vm799_vm4 = vcmp.gt.f32.partialorder %v2032_v39, 0.0  ;;  %vm800_vm5 = vcmp.gt.f32.partialorder %v2034_v57, 0.0  ;;  %vm801_vm6 = vcmp.gt.f32.partialorder %v2036_v4, 0.0 }
 0x1cc   :  { %vm802_vm7 = vcmp.gt.f32.partialorder %v2038_v17, 0.0  ;;  %vm803_vm8 = vcmp.gt.f32.partialorder %v2040_v22, 0.0  ;;  %vm804_vm9 = vcmp.gt.f32.partialorder %v2042_v30, 0.0  ;;  %v2097_v12 = vadd.f32 %v1106_v60, %v1995_v29 }
 0x1cd   :  { %v828_v9 = vmul.f32 0.2, %v2026_v35  ;;  %v829_v47 = vmul.f32 0.2, %v2028_v18  ;;  %v830_v20 = vmul.f32 0.2, %v2030_v58  ;;  %v2107_v14 = vadd.f32 %v1106_v60, %v1997_v23 }
 0x1ce   :  { %vm811_vm0 = vcmp.gt.f32.partialorder %v2056_v46, 0.0  ;;  %vm812_vm11 = vcmp.gt.f32.partialorder %v2058_v37, 0.0  ;;  %v831_v24 = vmul.f32 0.2, %v2032_v39  ;;  %v832_v32 = vmul.f32 0.2, %v2034_v57 }
 0x1cf   :  { %v833_v29 = vmul.f32 0.2, %v2036_v4  ;;  %vm817_vm15 = vcmp.gt.f32.partialorder %v2068_v54, 0.0  ;;  %v834_v23 = vmul.f32 0.2, %v2038_v17  ;;  %v2126_v45 = vsel %vm796_vm1, %v2026_v35, %v828_v9 }
 0x1d0   :  { %v835_v28 = vmul.f32 0.2, %v2040_v22  ;;  %v836_v55 = vmul.f32 0.2, %v2042_v30  ;;  %vm821_vm10 = vcmp.gt.f32.partialorder %v2076_v3, 0.0  ;;  %v2138_v33 = vsel %vm797_vm2, %v2028_v18, %v829_v47 }
 0x1d1   :  { %v837_v61 = vmul.f32 0.2, %v2044_v38  ;;  %v838_v0 = vmul.f32 0.2, %v2046_v40  ;;  %v839_v19 = vmul.f32 0.2, %v2048_v21  ;;  %v2150_v53 = vsel %vm798_vm3, %v2030_v58, %v830_v20 }
 0x1d2   :  { %vm823_vm12 = vcmp.gt.f32.partialorder %v2080_v2, 0.0  ;;  %vm824_vm14 = vcmp.gt.f32.partialorder %v2082_v5, 0.0  ;;  %vm825_vm13 = vcmp.gt.f32.partialorder %v2084_v10, 0.0  ;;  %v840_v41 = vmul.f32 0.2, %v2050_v31 }
 0x1d3   :  { %v841_v13 = vmul.f32 0.2, %v2052_v59  ;;  %v842_v11 = vmul.f32 0.2, %v2054_v56  ;;  %vm826_vm2 = vcmp.gt.f32.partialorder %v2097_v12, 0.0  ;;  %vm827_vm1 = vcmp.gt.f32.partialorder %v2107_v14, 0.0 }
 0x1d4   :  { %v843_v25 = vmul.f32 0.2, %v2056_v46  ;;  %v844_v26 = vmul.f32 0.2, %v2058_v37  ;;  %v845_v50 = vmul.f32 0.2, %v2060_v7  ;;  %v2160_v43 = vsel %vm799_vm4, %v2032_v39, %v831_v24 }
 0x1d5   :  { %v846_v48 = vmul.f32 0.2, %v2062_v49  ;;  %v847_v60 = vmul.f32 0.2, %v2064_v63  ;;  %v848_v6 = vmul.f32 0.2, %v2066_v34  ;;  %v864_v16 = vsel %vm800_vm5, %v2034_v57, %v832_v32 }
 0x1d6   :  { %v849_v27 = vmul.f32 0.2, %v2068_v54  ;;  %v850_v36 = vmul.f32 0.2, %v2070_v62  ;;  %v851_v42 = vmul.f32 0.2, %v2072_v8  ;;  %v865_v52 = vsel %vm801_vm6, %v2036_v4, %v833_v29 }
 0x1d7   :  { %vm1020_vm3 = vcmask 519168   ;;  %v852_v15 = vmul.f32 0.2, %v2074_v1  ;;  %v853_v51 = vmul.f32 0.2, %v2076_v3  ;;  %v866_v18 = vsel %vm802_vm7, %v2038_v17, %v834_v23 }
 0x1d8   :  { %v854_v35 = vmul.f32 0.2, %v2078_v44  ;;  %v855_v58 = vmul.f32 0.2, %v2080_v2  ;;  %v856_v39 = vmul.f32 0.2, %v2082_v5  ;;  %v867_v4 = vsel %vm803_vm8, %v2040_v22, %v835_v28 }
 0x1d9   :  { %v857_v57 = vmul.f32 0.2, %v2084_v10  ;;  %v858_v9 = vmul.f32 0.2, %v2097_v12  ;;  %v859_v47 = vmul.f32 0.2, %v2107_v14  ;;  %v868_v20 = vsel %vm804_vm9, %v2042_v30, %v836_v55 }
 0x1da   :  { %vm2458_vm4 = vcmp.gt.f32.partialorder %v2044_v38, 0.0  ;;  %vm2459_vm5 = vcmp.gt.f32.partialorder %v2046_v40, 0.0  ;;  %vm2460_vm6 = vcmp.gt.f32.partialorder %v2048_v21, 0.0  ;;  %vm2461_vm7 = vcmp.gt.f32.partialorder %v2050_v31, 0.0 }
 0x1db   :  { %v869_v17 = vsel %vm2458_vm4, %v2044_v38, %v837_v61  ;;  %v870_v24 = vsel %vm2459_vm5, %v2046_v40, %v838_v0  ;;  %v871_v22 = vsel %vm2460_vm6, %v2048_v21, %v839_v19  ;;  %v872_v32 = vsel %vm2461_vm7, %v2050_v31, %v840_v41 }
 0x1dc   :  { %vm2462_vm8 = vcmp.gt.f32.partialorder %v2052_v59, 0.0  ;;  %vm2463_vm9 = vcmp.gt.f32.partialorder %v2054_v56, 0.0  ;;  %v875_v40 = vsel %vm811_vm0, %v2056_v46, %v843_v25  ;;  %v876_v21 = vsel %vm812_vm11, %v2058_v37, %v844_v26 }
 0x1dd   :  { %v873_v30 = vsel %vm2462_vm8, %v2052_v59, %v841_v13  ;;  %v874_v38 = vsel %vm2463_vm9, %v2054_v56, %v842_v11  ;;  %vm2464_vm4 = vcmp.gt.f32.partialorder %v2060_v7, 0.0  ;;  %vm2465_vm5 = vcmp.gt.f32.partialorder %v2062_v49, 0.0 }
 0x1de   :  { %v877_v31 = vsel %vm2464_vm4, %v2060_v7, %v845_v50  ;;  %v2221_v59 = vsel %vm2465_vm5, %v2062_v49, %v846_v48  ;;  %vm2466_vm6 = vcmp.gt.f32.partialorder %v2064_v63, 0.0  ;;  %vm2467_vm0 = vcmp.gt.f32.partialorder %v2066_v34, 0.0 }
 0x1df   :  { %v2226_v56 = vsel %vm2466_vm6, %v2064_v63, %v847_v60  ;;  %v2231_v46 = vsel %vm2467_vm0, %v2066_v34, %v848_v6  ;;  %v2236_v37 = vsel %vm817_vm15, %v2068_v54, %v849_v27  ;;  %vm2468_vm11 = vcmp.gt.f32.partialorder %v2070_v62, 0.0 }
 0x1e0   :  { %v2241_v7 = vsel %vm2468_vm11, %v2070_v62, %v850_v36  ;;  %vm2469_vm7 = vcmp.gt.f32.partialorder %v2072_v8, 0.0  ;;  %vm2470_vm8 = vcmp.gt.f32.partialorder %v2074_v1, 0.0  ;;  %v2256_v34 = vsel %vm821_vm10, %v2076_v3, %v853_v51 }
 0x1e1   :  { %v2246_v49 = vsel %vm2469_vm7, %v2072_v8, %v851_v42  ;;  %v2251_v63 = vsel %vm2470_vm8, %v2074_v1, %v852_v15  ;;  %vm2471_vm15 = vcmp.gt.f32.partialorder %v2078_v44, 0.0  ;;  %v2266_v62 = vsel %vm823_vm12, %v2080_v2, %v855_v58 }
 0x1e2   :  { %v2261_v54 = vsel %vm2471_vm15, %v2078_v44, %v854_v35  ;;  %v2271_v8 = vsel %vm824_vm14, %v2082_v5, %v856_v39  ;;  %v2276_v1 = vsel %vm825_vm13, %v2084_v10, %v857_v57  ;;  %v2281_v3 = vsel %vm826_vm2, %v2097_v12, %v858_v9 }
 0x1e3   :  { %v2286_v44 = vsel %vm827_vm1, %v2107_v14, %v859_v47  ;;  %v1139_v2 = vpack.c.bf16 %v2126_v45, %v2126_v45  ;;  %v1140_v5 = vpack.c.bf16 %v2138_v33, %v2138_v33  ;;  %v1141_v10 = vpack.c.bf16 %v2150_v53, %v2150_v53 }
 0x1e4   :  { %v1142_v29 = vpack.c.bf16 %v2160_v43, %v2160_v43  ;;  %v1143_v23 = vpack.c.bf16 %v864_v16, %v864_v16  ;;  %v1144_v12 = vpack.c.bf16 %v865_v52, %v865_v52  ;;  %v1145_v28 = vpack.c.bf16 %v866_v18, %v866_v18 }
 0x1e5   :  { %v1146_v55 = vpack.c.bf16 %v867_v4, %v867_v4  ;;  %v1147_v61 = vpack.c.bf16 %v868_v20, %v868_v20  ;;  %v1148_v0 = vpack.c.bf16 %v869_v17, %v869_v17  ;;  %1021 = vst.msk [vmem:[%s2457_s5] sm:$0xf] %vm1020_vm3, %v1139_v2  ;;  %1022 = vst.msk [vmem:[%s2457_s5 + $0x4] sm:$0xf] %vm1020_vm3, %v1140_v5 }
 0x1e6   :  { %v1149_v14 = vpack.c.bf16 %v870_v24, %v870_v24  ;;  %v1150_v45 = vpack.c.bf16 %v871_v22, %v871_v22  ;;  %v1151_v19 = vpack.c.bf16 %v872_v32, %v872_v32  ;;  %v1152_v33 = vpack.c.bf16 %v873_v30, %v873_v30  ;;  %1023 = vst.msk [vmem:[%s2457_s5 + $0x8] sm:$0xf] %vm1020_vm3, %v1141_v10 }
 0x1e7   :  { %1024 = vst.msk [vmem:[%s2457_s5 + $0xc] sm:$0xf] %vm1020_vm3, %v1142_v29  ;;  %1025 = vst.msk [vmem:[%s2457_s5 + $0x10] sm:$0xf] %vm1020_vm3, %v1143_v23  ;;  %v1153_v41 = vpack.c.bf16 %v874_v38, %v874_v38  ;;  %v1154_v13 = vpack.c.bf16 %v875_v40, %v875_v40  ;;  %v1155_v11 = vpack.c.bf16 %v876_v21, %v876_v21 }
 0x1e8   :  { %1026 = vst.msk [vmem:[%s2457_s5 + $0x14] sm:$0xf] %vm1020_vm3, %v1144_v12  ;;  %v1156_v53 = vpack.c.bf16 %v877_v31, %v877_v31  ;;  %1027 = vst.msk [vmem:[%s2457_s5 + $0x18] sm:$0xf] %vm1020_vm3, %v1145_v28  ;;  %v1157_v25 = vpack.c.bf16 %v2221_v59, %v2221_v59  ;;  %v1158_v26 = vpack.c.bf16 %v2226_v56, %v2226_v56 }
 0x1e9   :  { %1028 = vst.msk [vmem:[%s2457_s5 + $0x1c] sm:$0xf] %vm1020_vm3, %v1146_v55  ;;  %1029 = vst.msk [vmem:[%s2457_s5 + $0x20] sm:$0xf] %vm1020_vm3, %v1147_v61  ;;  %v1159_v50 = vpack.c.bf16 %v2231_v46, %v2231_v46  ;;  %v1160_v43 = vpack.c.bf16 %v2236_v37, %v2236_v37  ;;  %v1161_v48 = vpack.c.bf16 %v2241_v7, %v2241_v7 }
 0x1ea   :  { %1030 = vst.msk [vmem:[%s2457_s5 + $0x24] sm:$0xf] %vm1020_vm3, %v1148_v0  ;;  %1031 = vst.msk [vmem:[%s2457_s5 + $0x28] sm:$0xf] %vm1020_vm3, %v1149_v14  ;;  %v1162_v60 = vpack.c.bf16 %v2246_v49, %v2246_v49  ;;  %v1163_v6 = vpack.c.bf16 %v2251_v63, %v2251_v63  ;;  %v1164_v16 = vpack.c.bf16 %v2256_v34, %v2256_v34 }
 0x1eb   :  { %1032 = vst.msk [vmem:[%s2457_s5 + $0x2c] sm:$0xf] %vm1020_vm3, %v1150_v45  ;;  %1033 = vst.msk [vmem:[%s2457_s5 + $0x30] sm:$0xf] %vm1020_vm3, %v1151_v19  ;;  %v1165_v27 = vpack.c.bf16 %v2261_v54, %v2261_v54  ;;  %v1166_v36 = vpack.c.bf16 %v2266_v62, %v2266_v62  ;;  %v1167_v42 = vpack.c.bf16 %v2271_v8, %v2271_v8 }
 0x1ec   :  { %1034 = vst.msk [vmem:[%s2457_s5 + $0x34] sm:$0xf] %vm1020_vm3, %v1152_v33  ;;  %1035 = vst.msk [vmem:[%s2457_s5 + $0x38] sm:$0xf] %vm1020_vm3, %v1153_v41  ;;  %v1168_v52 = vpack.c.bf16 %v2276_v1, %v2276_v1  ;;  %v1169_v15 = vpack.c.bf16 %v2281_v3, %v2281_v3  ;;  %v1170_v51 = vpack.c.bf16 %v2286_v44, %v2286_v44 }
 0x1ed   :  { %1036 = vst.msk [vmem:[%s2457_s5 + $0x3c] sm:$0xf] %vm1020_vm3, %v1154_v13  ;;  %1037 = vst.msk [vmem:[%s2457_s5 + $0x40] sm:$0xf] %vm1020_vm3, %v1155_v11 }
 0x1ee   :  { %1038 = vst.msk [vmem:[%s2457_s5 + $0x44] sm:$0xf] %vm1020_vm3, %v1156_v53  ;;  %1039 = vst.msk [vmem:[%s2457_s5 + $0x48] sm:$0xf] %vm1020_vm3, %v1157_v25 }
 0x1ef   :  { %1040 = vst.msk [vmem:[%s2457_s5 + $0x4c] sm:$0xf] %vm1020_vm3, %v1158_v26  ;;  %1041 = vst.msk [vmem:[%s2457_s5 + $0x50] sm:$0xf] %vm1020_vm3, %v1159_v50 }
 0x1f0   :  { %1042 = vst.msk [vmem:[%s2457_s5 + $0x54] sm:$0xf] %vm1020_vm3, %v1160_v43  ;;  %1043 = vst.msk [vmem:[%s2457_s5 + $0x58] sm:$0xf] %vm1020_vm3, %v1161_v48 }
 0x1f1   :  { %1044 = vst.msk [vmem:[%s2457_s5 + $0x5c] sm:$0xf] %vm1020_vm3, %v1162_v60  ;;  %1045 = vst.msk [vmem:[%s2457_s5 + $0x60] sm:$0xf] %vm1020_vm3, %v1163_v6 }
 0x1f2   :  { %1046 = vst.msk [vmem:[%s2457_s5 + $0x64] sm:$0xf] %vm1020_vm3, %v1164_v16  ;;  %1047 = vst.msk [vmem:[%s2457_s5 + $0x68] sm:$0xf] %vm1020_vm3, %v1165_v27 }
 0x1f3   :  { %1048 = vst.msk [vmem:[%s2457_s5 + $0x6c] sm:$0xf] %vm1020_vm3, %v1166_v36  ;;  %1049 = vst.msk [vmem:[%s2457_s5 + $0x70] sm:$0xf] %vm1020_vm3, %v1167_v42 }
 0x1f4   :  { %1050 = vst.msk [vmem:[%s2457_s5 + $0x74] sm:$0xf] %vm1020_vm3, %v1168_v52  ;;  %1051 = vst.msk [vmem:[%s2457_s5 + $0x78] sm:$0xf] %vm1020_vm3, %v1169_v15 }
 0x1f5   :  { %1052 = vst.msk [vmem:[%s2457_s5 + $0x7c] sm:$0xf] %vm1020_vm3, %v1170_v51 }

// kernel: discriminator_forward.7
= control target key start
LH: loop header
LB: loop body
LE: loop exit
PB: predicated region body
PF: predicated region fallthrough
CT: control target
= control target key end

     0   :  { %s13635_s1 = inlined_call_operand.vmem [shape: bf16[2048,1024], index: 1, kind: input, shape index: {}]   ;;  %s13636_s0 = inlined_call_operand.vmem [shape: bf16[8,2048], index: 0, kind: input, shape index: {}]   ;;  %s13637_s2 = inlined_call_operand.vmem [shape: f32[1,1024], index: 2, kind: input, shape index: {}]   ;;  %s13638_s5 = inlined_call_operand.vmem [shape: bf16[1024,128], index: 5, kind: input, shape index: {}]   ;;  %s13639_s4 = inlined_call_operand.vmem [shape: f32[1,1024], index: 4, kind: input, shape index: {}]   ;;  %s13640_s3 = inlined_call_operand.vmem [shape: f32[1,1024], index: 3, kind: input, shape index: {}]   ;;  %s13641_s6 = inlined_call_operand.vmem [shape: f32[1,128], index: 6, kind: input, shape index: {}]   ;;  %s13642_s7 = inlined_call_operand.vmem [shape: f32[8,128], index: 7, kind: output, shape index: {}]  }
   0x1   :  { %v91_v0 = vld [vmem:[%s13635_s1 + $0x1c0] sm:$0xff]  ;;  %v10046_v54 = vld [vmem:[%s13636_s0 + $0x8] sm:$0xff] }
   0x2   :  { %v95_v1 = vld [vmem:[%s13635_s1 + $0x1e0] sm:$0xff]  ;;  %v10060_v59 = vcombine.high %v10046_v54, %v10046_v54 }
   0x3   :  { %v219_v2 = vld [vmem:[%s13635_s1 + $0x5c0] sm:$0xff]  ;;  %v8688_v3 = vcombine.high %v91_v0, %v95_v1  ;;  %v8687_v5 = vcombine.low %v91_v0, %v95_v1 }
   0x4   :  { %v223_v4 = vld [vmem:[%s13635_s1 + $0x5e0] sm:$0xff]  ;;  %6350 = vmatprep.mubr.bf16.mxu1 %v10060_v59 }
   0x5   :  { %v83_v6 = vld [vmem:[%s13635_s1 + $0x180] sm:$0xff]  ;;  %v8816_v8 = vcombine.high %v219_v2, %v223_v4  ;;  %v8815_v9 = vcombine.low %v219_v2, %v223_v4  ;;  %6277 = vmatprep.subr.bf16.mxu0 %v8688_v3 }
   0x6   :  { %v87_v7 = vld [vmem:[%s13635_s1 + $0x1a0] sm:$0xff]  ;;  %6278 = vmatpush1.bf16.msra.mxu0 %v8687_v5 }
   0x7   :  { %v8680_v10 = vcombine.high %v83_v6, %v87_v7  ;;  %v211_v11 = vld [vmem:[%s13635_s1 + $0x580] sm:$0xff]  ;;  %6318 = vmatprep.subr.bf16.mxu1 %v8816_v8  ;;  %v8679_v18 = vcombine.low %v83_v6, %v87_v7 }
   0x8   :  { %v215_v12 = vld [vmem:[%s13635_s1 + $0x5a0] sm:$0xff]  ;;  %6319 = vmatpush1.bf16.msra.mxu1 %v8815_v9 }
   0x9   :  { %v75_v13 = vld [vmem:[%s13635_s1 + $0x140] sm:$0xff]  ;;  %v8808_v14 = vcombine.high %v211_v11, %v215_v12  ;;  %6279 = vmatprep.subr.bf16.mxu0 %v8680_v10  ;;  %v8807_v19 = vcombine.low %v211_v11, %v215_v12 }
   0xa   :  { %v79_v15 = vld [vmem:[%s13635_s1 + $0x160] sm:$0xff]  ;;  %6280 = vmatpush1.bf16.msra.mxu0 %v8679_v18 }
   0xb   :  { %v203_v16 = vld [vmem:[%s13635_s1 + $0x540] sm:$0xff]  ;;  %v8672_v20 = vcombine.high %v75_v13, %v79_v15  ;;  %6320 = vmatprep.subr.bf16.mxu1 %v8808_v14  ;;  %v8671_v26 = vcombine.low %v75_v13, %v79_v15 }
   0xc   :  { %v207_v17 = vld [vmem:[%s13635_s1 + $0x560] sm:$0xff]  ;;  %6321 = vmatpush1.bf16.msra.mxu1 %v8807_v19 }
   0xd   :  { %v8800_v21 = vcombine.high %v203_v16, %v207_v17  ;;  %v67_v22 = vld [vmem:[%s13635_s1 + $0x100] sm:$0xff]  ;;  %6281 = vmatprep.subr.bf16.mxu0 %v8672_v20  ;;  %v8799_v27 = vcombine.low %v203_v16, %v207_v17 }
   0xe   :  { %v71_v23 = vld [vmem:[%s13635_s1 + $0x120] sm:$0xff]  ;;  %6282 = vmatpush1.bf16.msra.mxu0 %v8671_v26 }
   0xf   :  { %v195_v24 = vld [vmem:[%s13635_s1 + $0x500] sm:$0xff]  ;;  %v8664_v28 = vcombine.high %v67_v22, %v71_v23  ;;  %6322 = vmatprep.subr.bf16.mxu1 %v8800_v21  ;;  %v8663_v34 = vcombine.low %v67_v22, %v71_v23 }
  0x10   :  { %v199_v25 = vld [vmem:[%s13635_s1 + $0x520] sm:$0xff]  ;;  %6323 = vmatpush1.bf16.msra.mxu1 %v8799_v27 }
  0x11   :  { %v8792_v29 = vcombine.high %v195_v24, %v199_v25  ;;  %v59_v30 = vld [vmem:[%s13635_s1 + $0xc0] sm:$0xff]  ;;  %6283 = vmatprep.subr.bf16.mxu0 %v8664_v28  ;;  %v8791_v35 = vcombine.low %v195_v24, %v199_v25 }
  0x12   :  { %v63_v31 = vld [vmem:[%s13635_s1 + $0xe0] sm:$0xff]  ;;  %6284 = vmatpush1.bf16.msra.mxu0 %v8663_v34 }
  0x13   :  { %v187_v32 = vld [vmem:[%s13635_s1 + $0x4c0] sm:$0xff]  ;;  %v8656_v36 = vcombine.high %v59_v30, %v63_v31  ;;  %6324 = vmatprep.subr.bf16.mxu1 %v8792_v29  ;;  %v8655_v42 = vcombine.low %v59_v30, %v63_v31 }
  0x14   :  { %v191_v33 = vld [vmem:[%s13635_s1 + $0x4e0] sm:$0xff]  ;;  %6325 = vmatpush1.bf16.msra.mxu1 %v8791_v35 }
  0x15   :  { %v8784_v37 = vcombine.high %v187_v32, %v191_v33  ;;  %v51_v38 = vld [vmem:[%s13635_s1 + $0x80] sm:$0xff]  ;;  %6285 = vmatprep.subr.bf16.mxu0 %v8656_v36  ;;  %v8783_v43 = vcombine.low %v187_v32, %v191_v33 }
  0x16   :  { %v55_v39 = vld [vmem:[%s13635_s1 + $0xa0] sm:$0xff]  ;;  %6286 = vmatpush1.bf16.msra.mxu0 %v8655_v42 }
  0x17   :  { %v179_v40 = vld [vmem:[%s13635_s1 + $0x480] sm:$0xff]  ;;  %v8648_v44 = vcombine.high %v51_v38, %v55_v39  ;;  %6326 = vmatprep.subr.bf16.mxu1 %v8784_v37  ;;  %v8647_v50 = vcombine.low %v51_v38, %v55_v39 }
  0x18   :  { %v183_v41 = vld [vmem:[%s13635_s1 + $0x4a0] sm:$0xff]  ;;  %6327 = vmatpush1.bf16.msra.mxu1 %v8783_v43 }
  0x19   :  { %v8776_v45 = vcombine.high %v179_v40, %v183_v41  ;;  %v43_v46 = vld [vmem:[%s13635_s1 + $0x40] sm:$0xff]  ;;  %6287 = vmatprep.subr.bf16.mxu0 %v8648_v44  ;;  %v8775_v51 = vcombine.low %v179_v40, %v183_v41 }
  0x1a   :  { %v47_v47 = vld [vmem:[%s13635_s1 + $0x60] sm:$0xff]  ;;  %6288 = vmatpush1.bf16.msra.mxu0 %v8647_v50 }
  0x1b   :  { %v171_v48 = vld [vmem:[%s13635_s1 + $0x440] sm:$0xff]  ;;  %v8640_v52 = vcombine.high %v43_v46, %v47_v47  ;;  %6328 = vmatprep.subr.bf16.mxu1 %v8776_v45  ;;  %v8639_v62 = vcombine.low %v43_v46, %v47_v47 }
  0x1c   :  { %v175_v49 = vld [vmem:[%s13635_s1 + $0x460] sm:$0xff]  ;;  %6329 = vmatpush1.bf16.msra.mxu1 %v8775_v51 }
  0x1d   :  { %v10041_v53 = vld [vmem:[%s13636_s0] sm:$0xff]  ;;  %v8768_v55 = vcombine.high %v171_v48, %v175_v49  ;;  %6289 = vmatprep.subr.bf16.mxu0 %v8640_v52  ;;  %v8767_v63 = vcombine.low %v171_v48, %v175_v49 }
  0x1e   :  { %v35_v56 = vld [vmem:[%s13635_s1] sm:$0xff]  ;;  %v10056_v58 = vcombine.high %v10041_v53, %v10041_v53  ;;  %6290 = vmatpush1.bf16.msra.mxu0 %v8639_v62 }
  0x1f   :  { %v39_v57 = vld [vmem:[%s13635_s1 + $0x20] sm:$0xff]  ;;  %6330 = vmatprep.subr.bf16.mxu1 %v8768_v55 }
  0x20   :  { %v163_v60 = vld [vmem:[%s13635_s1 + $0x400] sm:$0xff]  ;;  %6309 = vmatprep.mubr.bf16.mxu0 %v10056_v58  ;;  %v8632_v0 = vcombine.high %v35_v56, %v39_v57  ;;  %v8631_v6 = vcombine.low %v35_v56, %v39_v57  ;;  %6331 = vmatpush1.bf16.msra.mxu1 %v8767_v63 }
  0x21   :  { %v167_v61 = vld [vmem:[%s13635_s1 + $0x420] sm:$0xff] }
  0x22   :  { %v8760_v1 = vcombine.high %v163_v60, %v167_v61  ;;  %v155_v2 = vld [vmem:[%s13635_s1 + $0x3c0] sm:$0xff]  ;;  %6291 = vmatprep.subr.bf16.mxu0 %v8632_v0  ;;  %v8759_v7 = vcombine.low %v163_v60, %v167_v61 }
  0x23   :  { %v159_v3 = vld [vmem:[%s13635_s1 + $0x3e0] sm:$0xff]  ;;  %6292 = vmatpush1.bf16.msra.mxu0 %v8631_v6 }
  0x24   :  { %v283_v4 = vld [vmem:[%s13635_s1 + $0x7c0] sm:$0xff]  ;;  %v8752_v8 = vcombine.high %v155_v2, %v159_v3  ;;  %6332 = vmatprep.subr.bf16.mxu1 %v8760_v1  ;;  %v8751_v14 = vcombine.low %v155_v2, %v159_v3 }
  0x25   :  { %v287_v5 = vld [vmem:[%s13635_s1 + $0x7e0] sm:$0xff]  ;;  %6333 = vmatpush1.bf16.msra.mxu1 %v8759_v7 }
  0x26   :  { %v8880_v9 = vcombine.high %v283_v4, %v287_v5  ;;  %v147_v10 = vld [vmem:[%s13635_s1 + $0x380] sm:$0xff]  ;;  %6293 = vmatprep.subr.bf16.mxu0 %v8752_v8  ;;  %v8879_v15 = vcombine.low %v283_v4, %v287_v5 }
  0x27   :  { %v151_v11 = vld [vmem:[%s13635_s1 + $0x3a0] sm:$0xff]  ;;  %6294 = vmatpush2.bf16.msra.mxu0 %v8751_v14 }
  0x28   :  { %v275_v12 = vld [vmem:[%s13635_s1 + $0x780] sm:$0xff]  ;;  %v8744_v16 = vcombine.high %v147_v10, %v151_v11  ;;  %6334 = vmatprep.subr.bf16.mxu1 %v8880_v9  ;;  %v8743_v22 = vcombine.low %v147_v10, %v151_v11 }
  0x29   :  { %v279_v13 = vld [vmem:[%s13635_s1 + $0x7a0] sm:$0xff]  ;;  %6335 = vmatpush2.bf16.msra.mxu1 %v8879_v15 }
  0x2a   :  { %v8872_v17 = vcombine.high %v275_v12, %v279_v13  ;;  %v139_v18 = vld [vmem:[%s13635_s1 + $0x340] sm:$0xff]  ;;  %6295 = vmatprep.subr.bf16.mxu0 %v8744_v16  ;;  %v8871_v23 = vcombine.low %v275_v12, %v279_v13  ;;  %v10186_v16 = vcombine.low %v10041_v53, %v10041_v53 }
  0x2b   :  { %v143_v19 = vld [vmem:[%s13635_s1 + $0x360] sm:$0xff]  ;;  %6296 = vmatpush2.bf16.msra.mxu0 %v8743_v22 }
  0x2c   :  { %v267_v20 = vld [vmem:[%s13635_s1 + $0x740] sm:$0xff]  ;;  %v8736_v24 = vcombine.high %v139_v18, %v143_v19  ;;  %6336 = vmatprep.subr.bf16.mxu1 %v8872_v17  ;;  %v8735_v30 = vcombine.low %v139_v18, %v143_v19  ;;  %v10197_v19 = vld [vmem:[%s13636_s0 + $0x10] sm:$0xff] }
  0x2d   :  { %v271_v21 = vld [vmem:[%s13635_s1 + $0x760] sm:$0xff]  ;;  %6337 = vmatpush2.bf16.msra.mxu1 %v8871_v23 }
  0x2e   :  { %v8864_v25 = vcombine.high %v267_v20, %v271_v21  ;;  %v131_v26 = vld [vmem:[%s13635_s1 + $0x300] sm:$0xff]  ;;  %6297 = vmatprep.subr.bf16.mxu0 %v8736_v24  ;;  %v8863_v31 = vcombine.low %v267_v20, %v271_v21  ;;  %v10201_v20 = vcombine.low %v10046_v54, %v10046_v54  ;;  %v10206_v21 = vld [vmem:[%s13636_s0 + $0x18] sm:$0xff] }
  0x2f   :  { %v135_v27 = vld [vmem:[%s13635_s1 + $0x320] sm:$0xff]  ;;  %6298 = vmatpush2.bf16.msra.mxu0 %v8735_v30 }
  0x30   :  { %v259_v28 = vld [vmem:[%s13635_s1 + $0x700] sm:$0xff]  ;;  %v8728_v32 = vcombine.high %v131_v26, %v135_v27  ;;  %6338 = vmatprep.subr.bf16.mxu1 %v8864_v25  ;;  %v8727_v38 = vcombine.low %v131_v26, %v135_v27  ;;  %v10216_v26 = vcombine.high %v10197_v19, %v10197_v19 }
  0x31   :  { %v263_v29 = vld [vmem:[%s13635_s1 + $0x720] sm:$0xff]  ;;  %6339 = vmatpush2.bf16.msra.mxu1 %v8863_v31 }
  0x32   :  { %v8856_v33 = vcombine.high %v259_v28, %v263_v29  ;;  %v123_v34 = vld [vmem:[%s13635_s1 + $0x2c0] sm:$0xff]  ;;  %6299 = vmatprep.subr.bf16.mxu0 %v8728_v32  ;;  %v8855_v39 = vcombine.low %v259_v28, %v263_v29  ;;  %v10227_v29 = vcombine.high %v10206_v21, %v10206_v21 }
  0x33   :  { %v127_v35 = vld [vmem:[%s13635_s1 + $0x2e0] sm:$0xff]  ;;  %6300 = vmatpush2.bf16.msra.mxu0 %v8727_v38 }
  0x34   :  { %v251_v36 = vld [vmem:[%s13635_s1 + $0x6c0] sm:$0xff]  ;;  %v8720_v40 = vcombine.high %v123_v34, %v127_v35  ;;  %6340 = vmatprep.subr.bf16.mxu1 %v8856_v33  ;;  %v8719_v46 = vcombine.low %v123_v34, %v127_v35 }
  0x35   :  { %v255_v37 = vld [vmem:[%s13635_s1 + $0x6e0] sm:$0xff]  ;;  %6341 = vmatpush2.bf16.msra.mxu1 %v8855_v39 }
  0x36   :  { %v8848_v41 = vcombine.high %v251_v36, %v255_v37  ;;  %v115_v42 = vld [vmem:[%s13635_s1 + $0x280] sm:$0xff]  ;;  %6301 = vmatprep.subr.bf16.mxu0 %v8720_v40  ;;  %v8847_v47 = vcombine.low %v251_v36, %v255_v37 }
  0x37   :  { %v119_v43 = vld [vmem:[%s13635_s1 + $0x2a0] sm:$0xff]  ;;  %6302 = vmatpush2.bf16.msra.mxu0 %v8719_v46 }
  0x38   :  { %v243_v44 = vld [vmem:[%s13635_s1 + $0x680] sm:$0xff]  ;;  %v8712_v48 = vcombine.high %v115_v42, %v119_v43  ;;  %6342 = vmatprep.subr.bf16.mxu1 %v8848_v41  ;;  %v8711_v56 = vcombine.low %v115_v42, %v119_v43 }
  0x39   :  { %v247_v45 = vld [vmem:[%s13635_s1 + $0x6a0] sm:$0xff]  ;;  %6343 = vmatpush2.bf16.msra.mxu1 %v8847_v47 }
  0x3a   :  { %v8840_v49 = vcombine.high %v243_v44, %v247_v45  ;;  %v107_v50 = vld [vmem:[%s13635_s1 + $0x240] sm:$0xff]  ;;  %6303 = vmatprep.subr.bf16.mxu0 %v8712_v48  ;;  %v8839_v57 = vcombine.low %v243_v44, %v247_v45 }
  0x3b   :  { %v111_v51 = vld [vmem:[%s13635_s1 + $0x260] sm:$0xff]  ;;  %6304 = vmatpush2.bf16.msra.mxu0 %v8711_v56 }
  0x3c   :  { %v235_v52 = vld [vmem:[%s13635_s1 + $0x640] sm:$0xff]  ;;  %v8704_v60 = vcombine.high %v107_v50, %v111_v51  ;;  %6344 = vmatprep.subr.bf16.mxu1 %v8840_v49  ;;  %v8703_v2 = vcombine.low %v107_v50, %v111_v51 }
  0x3d   :  { %v239_v55 = vld [vmem:[%s13635_s1 + $0x660] sm:$0xff]  ;;  %6345 = vmatpush2.bf16.msra.mxu1 %v8839_v57 }
  0x3e   :  { %v8832_v61 = vcombine.high %v235_v52, %v239_v55  ;;  %v99_v62 = vld [vmem:[%s13635_s1 + $0x200] sm:$0xff]  ;;  %6305 = vmatprep.subr.bf16.mxu0 %v8704_v60  ;;  %v8831_v3 = vcombine.low %v235_v52, %v239_v55 }
  0x3f   :  { %v103_v63 = vld [vmem:[%s13635_s1 + $0x220] sm:$0xff]  ;;  %6306 = vmatpush2.bf16.msra.mxu0 %v8703_v2 }
  0x40   :  { %v227_v0 = vld [vmem:[%s13635_s1 + $0x600] sm:$0xff]  ;;  %v8696_v4 = vcombine.high %v99_v62, %v103_v63  ;;  %6346 = vmatprep.subr.bf16.mxu1 %v8832_v61  ;;  %v8695_v10 = vcombine.low %v99_v62, %v103_v63 }
  0x41   :  { %v231_v1 = vld [vmem:[%s13635_s1 + $0x620] sm:$0xff]  ;;  %6347 = vmatpush2.bf16.msra.mxu1 %v8831_v3 }
  0x42   :  { %v8824_v5 = vcombine.high %v227_v0, %v231_v1  ;;  %v347_v6 = vld [vmem:[%s13635_s1 + $0x9c0] sm:$0xff]  ;;  %6307 = vmatprep.subr.bf16.mxu0 %v8696_v4  ;;  %v8823_v11 = vcombine.low %v227_v0, %v231_v1 }
  0x43   :  { %v351_v7 = vld [vmem:[%s13635_s1 + $0x9e0] sm:$0xff]  ;;  %6308 = vmatpush2.bf16.msra.mxu0 %v8695_v10 }
  0x44   :  { %v475_v8 = vld [vmem:[%s13635_s1 + $0xdc0] sm:$0xff]  ;;  %v8944_v12 = vcombine.high %v347_v6, %v351_v7  ;;  %6348 = vmatprep.subr.bf16.mxu1 %v8824_v5  ;;  %v8943_v53 = vcombine.low %v347_v6, %v351_v7 }
  0x45   :  { %v479_v9 = vld [vmem:[%s13635_s1 + $0xde0] sm:$0xff]  ;;  %6349 = vmatpush2.bf16.msra.mxu1 %v8823_v11 }
  0x46   :  { %v9072_v13 = vcombine.high %v475_v8, %v479_v9  ;;  %v339_v14 = vld [vmem:[%s13635_s1 + $0x980] sm:$0xff]  ;;  %6359 = vmatprep.subr.bf16.mxu0 %v8944_v12  ;;  %v9071_v22 = vcombine.low %v475_v8, %v479_v9  ;;  %6310 = vmatmul.mubr.bf16.vlgmr.msra.gmra.mxu0 %v10186_v16 }
  0x47   :  { %v343_v15 = vld [vmem:[%s13635_s1 + $0x9a0] sm:$0xff]  ;;  %6360 = vmatpush1.bf16.msra.mxu0 %v8943_v53  ;;  %6391 = vmatprep.mubr.bf16.mxu0 %v10216_v26 }
  0x48   :  { %v467_v17 = vld [vmem:[%s13635_s1 + $0xd80] sm:$0xff]  ;;  %v8936_v23 = vcombine.high %v339_v14, %v343_v15  ;;  %6400 = vmatprep.subr.bf16.mxu1 %v9072_v13  ;;  %6351 = vmatmul.mubr.bf16.vlgmr.msra.gmra.mxu1 %v10201_v20  ;;  %v8935_v30 = vcombine.low %v339_v14, %v343_v15 }
  0x49   :  { %v471_v18 = vld [vmem:[%s13635_s1 + $0xda0] sm:$0xff]  ;;  %6401 = vmatpush1.bf16.msra.mxu1 %v9071_v22  ;;  %6432 = vmatprep.mubr.bf16.mxu1 %v10227_v29 }
  0x4a   :  { %v9064_v24 = vcombine.high %v467_v17, %v471_v18  ;;  %v331_v25 = vld [vmem:[%s13635_s1 + $0x940] sm:$0xff]  ;;  %6361 = vmatprep.subr.bf16.mxu0 %v8936_v23  ;;  %v9063_v31 = vcombine.low %v467_v17, %v471_v18 }
  0x4b   :  { %v335_v54 = vld [vmem:[%s13635_s1 + $0x960] sm:$0xff]  ;;  %6362 = vmatpush1.bf16.msra.mxu0 %v8935_v30 }
  0x4c   :  { %v459_v27 = vld [vmem:[%s13635_s1 + $0xd40] sm:$0xff]  ;;  %v8928_v32 = vcombine.high %v331_v25, %v335_v54  ;;  %6402 = vmatprep.subr.bf16.mxu1 %v9064_v24  ;;  %v8927_v38 = vcombine.low %v331_v25, %v335_v54 }
  0x4d   :  { %v463_v28 = vld [vmem:[%s13635_s1 + $0xd60] sm:$0xff]  ;;  %6403 = vmatpush1.bf16.msra.mxu1 %v9063_v31 }
  0x4e   :  { %v9056_v33 = vcombine.high %v459_v27, %v463_v28  ;;  %v323_v34 = vld [vmem:[%s13635_s1 + $0x900] sm:$0xff]  ;;  %6363 = vmatprep.subr.bf16.mxu0 %v8928_v32  ;;  %v9055_v39 = vcombine.low %v459_v27, %v463_v28 }
  0x4f   :  { %v327_v35 = vld [vmem:[%s13635_s1 + $0x920] sm:$0xff]  ;;  %6364 = vmatpush1.bf16.msra.mxu0 %v8927_v38 }
  0x50   :  { %v451_v36 = vld [vmem:[%s13635_s1 + $0xd00] sm:$0xff]  ;;  %v8920_v40 = vcombine.high %v323_v34, %v327_v35  ;;  %6404 = vmatprep.subr.bf16.mxu1 %v9056_v33  ;;  %v8919_v46 = vcombine.low %v323_v34, %v327_v35 }
  0x51   :  { %v455_v37 = vld [vmem:[%s13635_s1 + $0xd20] sm:$0xff]  ;;  %6405 = vmatpush1.bf16.msra.mxu1 %v9055_v39 }
  0x52   :  { %v9048_v41 = vcombine.high %v451_v36, %v455_v37  ;;  %v315_v42 = vld [vmem:[%s13635_s1 + $0x8c0] sm:$0xff]  ;;  %6365 = vmatprep.subr.bf16.mxu0 %v8920_v40  ;;  %v9047_v47 = vcombine.low %v451_v36, %v455_v37 }
  0x53   :  { %v319_v43 = vld [vmem:[%s13635_s1 + $0x8e0] sm:$0xff]  ;;  %6366 = vmatpush1.bf16.msra.mxu0 %v8919_v46 }
  0x54   :  { %v443_v44 = vld [vmem:[%s13635_s1 + $0xcc0] sm:$0xff]  ;;  %v8912_v48 = vcombine.high %v315_v42, %v319_v43  ;;  %6406 = vmatprep.subr.bf16.mxu1 %v9048_v41  ;;  %v8911_v56 = vcombine.low %v315_v42, %v319_v43 }
  0x55   :  { %v447_v45 = vld [vmem:[%s13635_s1 + $0xce0] sm:$0xff]  ;;  %6407 = vmatpush1.bf16.msra.mxu1 %v9047_v47 }
  0x56   :  { %v9040_v49 = vcombine.high %v443_v44, %v447_v45  ;;  %v307_v50 = vld [vmem:[%s13635_s1 + $0x880] sm:$0xff]  ;;  %6367 = vmatprep.subr.bf16.mxu0 %v8912_v48  ;;  %v9039_v57 = vcombine.low %v443_v44, %v447_v45 }
  0x57   :  { %v311_v51 = vld [vmem:[%s13635_s1 + $0x8a0] sm:$0xff]  ;;  %6368 = vmatpush1.bf16.msra.mxu0 %v8911_v56 }
  0x58   :  { %v435_v52 = vld [vmem:[%s13635_s1 + $0xc80] sm:$0xff]  ;;  %v8904_v60 = vcombine.high %v307_v50, %v311_v51  ;;  %6408 = vmatprep.subr.bf16.mxu1 %v9040_v49  ;;  %v8903_v2 = vcombine.low %v307_v50, %v311_v51 }
  0x59   :  { %v439_v55 = vld [vmem:[%s13635_s1 + $0xca0] sm:$0xff]  ;;  %6409 = vmatpush1.bf16.msra.mxu1 %v9039_v57 }
  0x5a   :  { %v9032_v61 = vcombine.high %v435_v52, %v439_v55  ;;  %v299_v62 = vld [vmem:[%s13635_s1 + $0x840] sm:$0xff]  ;;  %6369 = vmatprep.subr.bf16.mxu0 %v8904_v60  ;;  %v9031_v3 = vcombine.low %v435_v52, %v439_v55 }
  0x5b   :  { %v303_v63 = vld [vmem:[%s13635_s1 + $0x860] sm:$0xff]  ;;  %6370 = vmatpush1.bf16.msra.mxu0 %v8903_v2 }
  0x5c   :  { %v427_v0 = vld [vmem:[%s13635_s1 + $0xc40] sm:$0xff]  ;;  %v8896_v4 = vcombine.high %v299_v62, %v303_v63  ;;  %6410 = vmatprep.subr.bf16.mxu1 %v9032_v61  ;;  %v8895_v10 = vcombine.low %v299_v62, %v303_v63 }
  0x5d   :  { %v431_v1 = vld [vmem:[%s13635_s1 + $0xc60] sm:$0xff]  ;;  %6411 = vmatpush1.bf16.msra.mxu1 %v9031_v3 }
  0x5e   :  { %v9024_v5 = vcombine.high %v427_v0, %v431_v1  ;;  %v291_v6 = vld [vmem:[%s13635_s1 + $0x800] sm:$0xff]  ;;  %6371 = vmatprep.subr.bf16.mxu0 %v8896_v4  ;;  %v9023_v11 = vcombine.low %v427_v0, %v431_v1 }
  0x5f   :  { %v295_v7 = vld [vmem:[%s13635_s1 + $0x820] sm:$0xff]  ;;  %6372 = vmatpush1.bf16.msra.mxu0 %v8895_v10 }
  0x60   :  { %v419_v8 = vld [vmem:[%s13635_s1 + $0xc00] sm:$0xff]  ;;  %v8888_v12 = vcombine.high %v291_v6, %v295_v7  ;;  %6412 = vmatprep.subr.bf16.mxu1 %v9024_v5  ;;  %v8887_v53 = vcombine.low %v291_v6, %v295_v7 }
  0x61   :  { %v423_v9 = vld [vmem:[%s13635_s1 + $0xc20] sm:$0xff]  ;;  %6413 = vmatpush1.bf16.msra.mxu1 %v9023_v11 }
  0x62   :  { %v9016_v13 = vcombine.high %v419_v8, %v423_v9  ;;  %v411_v14 = vld [vmem:[%s13635_s1 + $0xbc0] sm:$0xff]  ;;  %6373 = vmatprep.subr.bf16.mxu0 %v8888_v12  ;;  %v9015_v22 = vcombine.low %v419_v8, %v423_v9 }
  0x63   :  { %v415_v15 = vld [vmem:[%s13635_s1 + $0xbe0] sm:$0xff]  ;;  %6374 = vmatpush1.bf16.msra.mxu0 %v8887_v53 }
  0x64   :  { %v539_v17 = vld [vmem:[%s13635_s1 + $0xfc0] sm:$0xff]  ;;  %v9008_v23 = vcombine.high %v411_v14, %v415_v15  ;;  %6414 = vmatprep.subr.bf16.mxu1 %v9016_v13  ;;  %v9007_v30 = vcombine.low %v411_v14, %v415_v15 }
  0x65   :  { %v543_v18 = vld [vmem:[%s13635_s1 + $0xfe0] sm:$0xff]  ;;  %6415 = vmatpush1.bf16.msra.mxu1 %v9015_v22 }
  0x66   :  { %v9136_v24 = vcombine.high %v539_v17, %v543_v18  ;;  %v403_v25 = vld [vmem:[%s13635_s1 + $0xb80] sm:$0xff]  ;;  %6375 = vmatprep.subr.bf16.mxu0 %v9008_v23  ;;  %v9135_v31 = vcombine.low %v539_v17, %v543_v18 }
  0x67   :  { %v407_v54 = vld [vmem:[%s13635_s1 + $0xba0] sm:$0xff]  ;;  %6376 = vmatpush2.bf16.msra.mxu0 %v9007_v30 }
  0x68   :  { %v531_v27 = vld [vmem:[%s13635_s1 + $0xf80] sm:$0xff]  ;;  %v9000_v32 = vcombine.high %v403_v25, %v407_v54  ;;  %6416 = vmatprep.subr.bf16.mxu1 %v9136_v24  ;;  %v8999_v38 = vcombine.low %v403_v25, %v407_v54 }
  0x69   :  { %v535_v28 = vld [vmem:[%s13635_s1 + $0xfa0] sm:$0xff]  ;;  %6417 = vmatpush2.bf16.msra.mxu1 %v9135_v31 }
  0x6a   :  { %v9128_v33 = vcombine.high %v531_v27, %v535_v28  ;;  %v395_v34 = vld [vmem:[%s13635_s1 + $0xb40] sm:$0xff]  ;;  %6377 = vmatprep.subr.bf16.mxu0 %v9000_v32  ;;  %v9127_v39 = vcombine.low %v531_v27, %v535_v28 }
  0x6b   :  { %v399_v35 = vld [vmem:[%s13635_s1 + $0xb60] sm:$0xff]  ;;  %6378 = vmatpush2.bf16.msra.mxu0 %v8999_v38 }
  0x6c   :  { %v523_v36 = vld [vmem:[%s13635_s1 + $0xf40] sm:$0xff]  ;;  %v8992_v40 = vcombine.high %v395_v34, %v399_v35  ;;  %6418 = vmatprep.subr.bf16.mxu1 %v9128_v33  ;;  %v8991_v46 = vcombine.low %v395_v34, %v399_v35 }
  0x6d   :  { %v527_v37 = vld [vmem:[%s13635_s1 + $0xf60] sm:$0xff]  ;;  %6419 = vmatpush2.bf16.msra.mxu1 %v9127_v39 }
  0x6e   :  { %v9120_v41 = vcombine.high %v523_v36, %v527_v37  ;;  %v387_v42 = vld [vmem:[%s13635_s1 + $0xb00] sm:$0xff]  ;;  %6379 = vmatprep.subr.bf16.mxu0 %v8992_v40  ;;  %v9119_v47 = vcombine.low %v523_v36, %v527_v37  ;;  %v10408_v36 = vcombine.low %v10197_v19, %v10197_v19  ;;  %v10423_v40 = vcombine.low %v10206_v21, %v10206_v21 }
  0x6f   :  { %v391_v43 = vld [vmem:[%s13635_s1 + $0xb20] sm:$0xff]  ;;  %6380 = vmatpush2.bf16.msra.mxu0 %v8991_v46 }
  0x70   :  { %v515_v44 = vld [vmem:[%s13635_s1 + $0xf00] sm:$0xff]  ;;  %v8984_v48 = vcombine.high %v387_v42, %v391_v43  ;;  %6420 = vmatprep.subr.bf16.mxu1 %v9120_v41  ;;  %v8983_v56 = vcombine.low %v387_v42, %v391_v43  ;;  %v10428_v41 = vld [vmem:[%s13636_s0 + $0x28] sm:$0xff] }
  0x71   :  { %v519_v45 = vld [vmem:[%s13635_s1 + $0xf20] sm:$0xff]  ;;  %6421 = vmatpush2.bf16.msra.mxu1 %v9119_v47 }
  0x72   :  { %v9112_v49 = vcombine.high %v515_v44, %v519_v45  ;;  %v379_v50 = vld [vmem:[%s13635_s1 + $0xac0] sm:$0xff]  ;;  %6381 = vmatprep.subr.bf16.mxu0 %v8984_v48  ;;  %v9111_v57 = vcombine.low %v515_v44, %v519_v45 }
  0x73   :  { %v383_v51 = vld [vmem:[%s13635_s1 + $0xae0] sm:$0xff]  ;;  %6382 = vmatpush2.bf16.msra.mxu0 %v8983_v56 }
  0x74   :  { %v507_v52 = vld [vmem:[%s13635_s1 + $0xec0] sm:$0xff]  ;;  %v8976_v60 = vcombine.high %v379_v50, %v383_v51  ;;  %6422 = vmatprep.subr.bf16.mxu1 %v9112_v49  ;;  %v8975_v2 = vcombine.low %v379_v50, %v383_v51  ;;  %v10449_v49 = vcombine.high %v10428_v41, %v10428_v41 }
  0x75   :  { %v511_v55 = vld [vmem:[%s13635_s1 + $0xee0] sm:$0xff]  ;;  %6423 = vmatpush2.bf16.msra.mxu1 %v9111_v57 }
  0x76   :  { %v9104_v61 = vcombine.high %v507_v52, %v511_v55  ;;  %v371_v62 = vld [vmem:[%s13635_s1 + $0xa80] sm:$0xff]  ;;  %6383 = vmatprep.subr.bf16.mxu0 %v8976_v60  ;;  %v9103_v3 = vcombine.low %v507_v52, %v511_v55 }
  0x77   :  { %v375_v63 = vld [vmem:[%s13635_s1 + $0xaa0] sm:$0xff]  ;;  %6384 = vmatpush2.bf16.msra.mxu0 %v8975_v2 }
  0x78   :  { %v499_v0 = vld [vmem:[%s13635_s1 + $0xe80] sm:$0xff]  ;;  %v8968_v4 = vcombine.high %v371_v62, %v375_v63  ;;  %6424 = vmatprep.subr.bf16.mxu1 %v9104_v61  ;;  %v8967_v10 = vcombine.low %v371_v62, %v375_v63 }
  0x79   :  { %v503_v1 = vld [vmem:[%s13635_s1 + $0xea0] sm:$0xff]  ;;  %6425 = vmatpush2.bf16.msra.mxu1 %v9103_v3 }
  0x7a   :  { %v9096_v5 = vcombine.high %v499_v0, %v503_v1  ;;  %v363_v6 = vld [vmem:[%s13635_s1 + $0xa40] sm:$0xff]  ;;  %6385 = vmatprep.subr.bf16.mxu0 %v8968_v4  ;;  %v9095_v11 = vcombine.low %v499_v0, %v503_v1 }
  0x7b   :  { %v367_v7 = vld [vmem:[%s13635_s1 + $0xa60] sm:$0xff]  ;;  %6386 = vmatpush2.bf16.msra.mxu0 %v8967_v10 }
  0x7c   :  { %v491_v8 = vld [vmem:[%s13635_s1 + $0xe40] sm:$0xff]  ;;  %v8960_v12 = vcombine.high %v363_v6, %v367_v7  ;;  %6426 = vmatprep.subr.bf16.mxu1 %v9096_v5  ;;  %v8959_v53 = vcombine.low %v363_v6, %v367_v7 }
  0x7d   :  { %v495_v9 = vld [vmem:[%s13635_s1 + $0xe60] sm:$0xff]  ;;  %6427 = vmatpush2.bf16.msra.mxu1 %v9095_v11 }
  0x7e   :  { %v9088_v13 = vcombine.high %v491_v8, %v495_v9  ;;  %v355_v14 = vld [vmem:[%s13635_s1 + $0xa00] sm:$0xff]  ;;  %6387 = vmatprep.subr.bf16.mxu0 %v8960_v12  ;;  %v9087_v22 = vcombine.low %v491_v8, %v495_v9 }
  0x7f   :  { %v359_v15 = vld [vmem:[%s13635_s1 + $0xa20] sm:$0xff]  ;;  %6388 = vmatpush2.bf16.msra.mxu0 %v8959_v53 }
  0x80   :  { %v483_v17 = vld [vmem:[%s13635_s1 + $0xe00] sm:$0xff]  ;;  %v8952_v23 = vcombine.high %v355_v14, %v359_v15  ;;  %6428 = vmatprep.subr.bf16.mxu1 %v9088_v13  ;;  %v8951_v30 = vcombine.low %v355_v14, %v359_v15 }
  0x81   :  { %v487_v18 = vld [vmem:[%s13635_s1 + $0xe20] sm:$0xff]  ;;  %6429 = vmatpush2.bf16.msra.mxu1 %v9087_v22 }
  0x82   :  { %v9080_v24 = vcombine.high %v483_v17, %v487_v18  ;;  %v603_v25 = vld [vmem:[%s13635_s1 + $0x11c0] sm:$0xff]  ;;  %6389 = vmatprep.subr.bf16.mxu0 %v8952_v23  ;;  %v9079_v31 = vcombine.low %v483_v17, %v487_v18 }
  0x83   :  { %v607_v54 = vld [vmem:[%s13635_s1 + $0x11e0] sm:$0xff]  ;;  %6390 = vmatpush2.bf16.msra.mxu0 %v8951_v30 }
  0x84   :  { %v731_v27 = vld [vmem:[%s13635_s1 + $0x15c0] sm:$0xff]  ;;  %v9200_v32 = vcombine.high %v603_v25, %v607_v54  ;;  %6430 = vmatprep.subr.bf16.mxu1 %v9080_v24  ;;  %v9199_v19 = vcombine.low %v603_v25, %v607_v54 }
  0x85   :  { %v735_v28 = vld [vmem:[%s13635_s1 + $0x15e0] sm:$0xff]  ;;  %6431 = vmatpush2.bf16.msra.mxu1 %v9079_v31 }
  0x86   :  { %v9328_v33 = vcombine.high %v731_v27, %v735_v28  ;;  %v595_v34 = vld [vmem:[%s13635_s1 + $0x1180] sm:$0xff]  ;;  %6441 = vmatprep.subr.bf16.mxu0 %v9200_v32  ;;  %v9327_v42 = vcombine.low %v731_v27, %v735_v28  ;;  %6392 = vmatmul.mubr.bf16.vlgmr.msra.gmra.mxu0 %v10408_v36 }
  0x87   :  { %v599_v35 = vld [vmem:[%s13635_s1 + $0x11a0] sm:$0xff]  ;;  %6442 = vmatpush1.bf16.msra.mxu0 %v9199_v19 }
  0x88   :  { %v723_v37 = vld [vmem:[%s13635_s1 + $0x1580] sm:$0xff]  ;;  %v9192_v43 = vcombine.high %v595_v34, %v599_v35  ;;  %6482 = vmatprep.subr.bf16.mxu1 %v9328_v33  ;;  %6433 = vmatmul.mubr.bf16.vlgmr.msra.gmra.mxu1 %v10423_v40  ;;  %v9191_v50 = vcombine.low %v595_v34, %v599_v35 }
  0x89   :  { %v727_v38 = vld [vmem:[%s13635_s1 + $0x15a0] sm:$0xff]  ;;  %6483 = vmatpush1.bf16.msra.mxu1 %v9327_v42  ;;  %6514 = vmatprep.mubr.bf16.mxu1 %v10449_v49 }
  0x8a   :  { %v10419_v39 = vld [vmem:[%s13636_s0 + $0x20] sm:$0xff]  ;;  %v9320_v44 = vcombine.high %v723_v37, %v727_v38  ;;  %6443 = vmatprep.subr.bf16.mxu0 %v9192_v43  ;;  %v9319_v51 = vcombine.low %v723_v37, %v727_v38 }
  0x8b   :  { %v587_v45 = vld [vmem:[%s13635_s1 + $0x1140] sm:$0xff]  ;;  %v10438_v46 = vcombine.high %v10419_v39, %v10419_v39  ;;  %6444 = vmatpush1.bf16.msra.mxu0 %v9191_v50 }
  0x8c   :  { %v591_v21 = vld [vmem:[%s13635_s1 + $0x1160] sm:$0xff]  ;;  %6484 = vmatprep.subr.bf16.mxu1 %v9320_v44 }
  0x8d   :  { %v715_v47 = vld [vmem:[%s13635_s1 + $0x1540] sm:$0xff]  ;;  %v9184_v52 = vcombine.high %v587_v45, %v591_v21  ;;  %6473 = vmatprep.mubr.bf16.mxu0 %v10438_v46  ;;  %v9183_v62 = vcombine.low %v587_v45, %v591_v21  ;;  %6485 = vmatpush1.bf16.msra.mxu1 %v9319_v51 }
  0x8e   :  { %v719_v48 = vld [vmem:[%s13635_s1 + $0x1560] sm:$0xff] }
  0x8f   :  { %v9312_v55 = vcombine.high %v715_v47, %v719_v48  ;;  %v579_v56 = vld [vmem:[%s13635_s1 + $0x1100] sm:$0xff]  ;;  %6445 = vmatprep.subr.bf16.mxu0 %v9184_v52  ;;  %v9311_v63 = vcombine.low %v715_v47, %v719_v48 }
  0x90   :  { %v583_v57 = vld [vmem:[%s13635_s1 + $0x1120] sm:$0xff]  ;;  %6446 = vmatpush1.bf16.msra.mxu0 %v9183_v62 }
  0x91   :  { %v707_v60 = vld [vmem:[%s13635_s1 + $0x1500] sm:$0xff]  ;;  %v9176_v0 = vcombine.high %v579_v56, %v583_v57  ;;  %6486 = vmatprep.subr.bf16.mxu1 %v9312_v55  ;;  %v9175_v6 = vcombine.low %v579_v56, %v583_v57 }
  0x92   :  { %v711_v61 = vld [vmem:[%s13635_s1 + $0x1520] sm:$0xff]  ;;  %6487 = vmatpush1.bf16.msra.mxu1 %v9311_v63 }
  0x93   :  { %v9304_v1 = vcombine.high %v707_v60, %v711_v61  ;;  %v571_v2 = vld [vmem:[%s13635_s1 + $0x10c0] sm:$0xff]  ;;  %6447 = vmatprep.subr.bf16.mxu0 %v9176_v0  ;;  %v9303_v7 = vcombine.low %v707_v60, %v711_v61 }
  0x94   :  { %v575_v3 = vld [vmem:[%s13635_s1 + $0x10e0] sm:$0xff]  ;;  %6448 = vmatpush1.bf16.msra.mxu0 %v9175_v6 }
  0x95   :  { %v699_v4 = vld [vmem:[%s13635_s1 + $0x14c0] sm:$0xff]  ;;  %v9168_v8 = vcombine.high %v571_v2, %v575_v3  ;;  %6488 = vmatprep.subr.bf16.mxu1 %v9304_v1  ;;  %v9167_v14 = vcombine.low %v571_v2, %v575_v3 }
  0x96   :  { %v703_v5 = vld [vmem:[%s13635_s1 + $0x14e0] sm:$0xff]  ;;  %6489 = vmatpush1.bf16.msra.mxu1 %v9303_v7 }
  0x97   :  { %v9296_v9 = vcombine.high %v699_v4, %v703_v5  ;;  %v563_v10 = vld [vmem:[%s13635_s1 + $0x1080] sm:$0xff]  ;;  %6449 = vmatprep.subr.bf16.mxu0 %v9168_v8  ;;  %v9295_v15 = vcombine.low %v699_v4, %v703_v5 }
  0x98   :  { %v567_v11 = vld [vmem:[%s13635_s1 + $0x10a0] sm:$0xff]  ;;  %6450 = vmatpush1.bf16.msra.mxu0 %v9167_v14 }
  0x99   :  { %v691_v12 = vld [vmem:[%s13635_s1 + $0x1480] sm:$0xff]  ;;  %v9160_v17 = vcombine.high %v563_v10, %v567_v11  ;;  %6490 = vmatprep.subr.bf16.mxu1 %v9296_v9  ;;  %v9159_v25 = vcombine.low %v563_v10, %v567_v11 }
  0x9a   :  { %v695_v13 = vld [vmem:[%s13635_s1 + $0x14a0] sm:$0xff]  ;;  %6491 = vmatpush1.bf16.msra.mxu1 %v9295_v15 }
  0x9b   :  { %v9288_v18 = vcombine.high %v691_v12, %v695_v13  ;;  %v555_v53 = vld [vmem:[%s13635_s1 + $0x1040] sm:$0xff]  ;;  %6451 = vmatprep.subr.bf16.mxu0 %v9160_v17  ;;  %v9287_v54 = vcombine.low %v691_v12, %v695_v13 }
  0x9c   :  { %v559_v22 = vld [vmem:[%s13635_s1 + $0x1060] sm:$0xff]  ;;  %6452 = vmatpush1.bf16.msra.mxu0 %v9159_v25 }
  0x9d   :  { %v683_v23 = vld [vmem:[%s13635_s1 + $0x1440] sm:$0xff]  ;;  %v9152_v27 = vcombine.high %v555_v53, %v559_v22  ;;  %6492 = vmatprep.subr.bf16.mxu1 %v9288_v18  ;;  %v9151_v34 = vcombine.low %v555_v53, %v559_v22 }
  0x9e   :  { %v687_v24 = vld [vmem:[%s13635_s1 + $0x1460] sm:$0xff]  ;;  %6493 = vmatpush1.bf16.msra.mxu1 %v9287_v54 }
  0x9f   :  { %v9280_v28 = vcombine.high %v683_v23, %v687_v24  ;;  %v547_v30 = vld [vmem:[%s13635_s1 + $0x1000] sm:$0xff]  ;;  %6453 = vmatprep.subr.bf16.mxu0 %v9152_v27  ;;  %v9279_v35 = vcombine.low %v683_v23, %v687_v24 }
  0xa0   :  { %v551_v31 = vld [vmem:[%s13635_s1 + $0x1020] sm:$0xff]  ;;  %6454 = vmatpush1.bf16.msra.mxu0 %v9151_v34 }
  0xa1   :  { %v675_v32 = vld [vmem:[%s13635_s1 + $0x1400] sm:$0xff]  ;;  %v9144_v37 = vcombine.high %v547_v30, %v551_v31  ;;  %6494 = vmatprep.subr.bf16.mxu1 %v9280_v28  ;;  %v9143_v45 = vcombine.low %v547_v30, %v551_v31 }
  0xa2   :  { %v679_v33 = vld [vmem:[%s13635_s1 + $0x1420] sm:$0xff]  ;;  %6495 = vmatpush1.bf16.msra.mxu1 %v9279_v35 }
  0xa3   :  { %v9272_v38 = vcombine.high %v675_v32, %v679_v33  ;;  %v667_v19 = vld [vmem:[%s13635_s1 + $0x13c0] sm:$0xff]  ;;  %6455 = vmatprep.subr.bf16.mxu0 %v9144_v37  ;;  %v9271_v21 = vcombine.low %v675_v32, %v679_v33 }
  0xa4   :  { %v671_v42 = vld [vmem:[%s13635_s1 + $0x13e0] sm:$0xff]  ;;  %6456 = vmatpush1.bf16.msra.mxu0 %v9143_v45 }
  0xa5   :  { %v795_v43 = vld [vmem:[%s13635_s1 + $0x17c0] sm:$0xff]  ;;  %v9264_v47 = vcombine.high %v667_v19, %v671_v42  ;;  %6496 = vmatprep.subr.bf16.mxu1 %v9272_v38  ;;  %v9263_v56 = vcombine.low %v667_v19, %v671_v42 }
  0xa6   :  { %v799_v44 = vld [vmem:[%s13635_s1 + $0x17e0] sm:$0xff]  ;;  %6497 = vmatpush1.bf16.msra.mxu1 %v9271_v21 }
  0xa7   :  { %v9392_v48 = vcombine.high %v795_v43, %v799_v44  ;;  %v659_v50 = vld [vmem:[%s13635_s1 + $0x1380] sm:$0xff]  ;;  %6457 = vmatprep.subr.bf16.mxu0 %v9264_v47  ;;  %v9391_v57 = vcombine.low %v795_v43, %v799_v44 }
  0xa8   :  { %v663_v51 = vld [vmem:[%s13635_s1 + $0x13a0] sm:$0xff]  ;;  %6458 = vmatpush2.bf16.msra.mxu0 %v9263_v56 }
  0xa9   :  { %v787_v52 = vld [vmem:[%s13635_s1 + $0x1780] sm:$0xff]  ;;  %v9256_v60 = vcombine.high %v659_v50, %v663_v51  ;;  %6498 = vmatprep.subr.bf16.mxu1 %v9392_v48  ;;  %v9255_v2 = vcombine.low %v659_v50, %v663_v51 }
  0xaa   :  { %v791_v55 = vld [vmem:[%s13635_s1 + $0x17a0] sm:$0xff]  ;;  %6499 = vmatpush2.bf16.msra.mxu1 %v9391_v57 }
  0xab   :  { %v9384_v61 = vcombine.high %v787_v52, %v791_v55  ;;  %v651_v62 = vld [vmem:[%s13635_s1 + $0x1340] sm:$0xff]  ;;  %6459 = vmatprep.subr.bf16.mxu0 %v9256_v60  ;;  %v9383_v3 = vcombine.low %v787_v52, %v791_v55 }
  0xac   :  { %v655_v63 = vld [vmem:[%s13635_s1 + $0x1360] sm:$0xff]  ;;  %6460 = vmatpush2.bf16.msra.mxu0 %v9255_v2 }
  0xad   :  { %v779_v0 = vld [vmem:[%s13635_s1 + $0x1740] sm:$0xff]  ;;  %v9248_v4 = vcombine.high %v651_v62, %v655_v63  ;;  %6500 = vmatprep.subr.bf16.mxu1 %v9384_v61  ;;  %v9247_v10 = vcombine.low %v651_v62, %v655_v63 }
  0xae   :  { %v783_v1 = vld [vmem:[%s13635_s1 + $0x1760] sm:$0xff]  ;;  %6501 = vmatpush2.bf16.msra.mxu1 %v9383_v3 }
  0xaf   :  { %v9376_v5 = vcombine.high %v779_v0, %v783_v1  ;;  %v643_v6 = vld [vmem:[%s13635_s1 + $0x1300] sm:$0xff]  ;;  %6461 = vmatprep.subr.bf16.mxu0 %v9248_v4  ;;  %v9375_v11 = vcombine.low %v779_v0, %v783_v1  ;;  %v10630_v4 = vcombine.low %v10419_v39, %v10419_v39 }
  0xb0   :  { %v647_v7 = vld [vmem:[%s13635_s1 + $0x1320] sm:$0xff]  ;;  %6462 = vmatpush2.bf16.msra.mxu0 %v9247_v10 }
  0xb1   :  { %v771_v8 = vld [vmem:[%s13635_s1 + $0x1700] sm:$0xff]  ;;  %v9240_v12 = vcombine.high %v643_v6, %v647_v7  ;;  %6502 = vmatprep.subr.bf16.mxu1 %v9376_v5  ;;  %v9239_v53 = vcombine.low %v643_v6, %v647_v7  ;;  %v10641_v7 = vld [vmem:[%s13636_s0 + $0x30] sm:$0xff] }
  0xb2   :  { %v775_v9 = vld [vmem:[%s13635_s1 + $0x1720] sm:$0xff]  ;;  %6503 = vmatpush2.bf16.msra.mxu1 %v9375_v11 }
  0xb3   :  { %v9368_v13 = vcombine.high %v771_v8, %v775_v9  ;;  %v635_v14 = vld [vmem:[%s13635_s1 + $0x12c0] sm:$0xff]  ;;  %6463 = vmatprep.subr.bf16.mxu0 %v9240_v12  ;;  %v9367_v22 = vcombine.low %v771_v8, %v775_v9  ;;  %v10645_v8 = vcombine.low %v10428_v41, %v10428_v41  ;;  %v10650_v9 = vld [vmem:[%s13636_s0 + $0x38] sm:$0xff] }
  0xb4   :  { %v639_v15 = vld [vmem:[%s13635_s1 + $0x12e0] sm:$0xff]  ;;  %6464 = vmatpush2.bf16.msra.mxu0 %v9239_v53 }
  0xb5   :  { %v763_v17 = vld [vmem:[%s13635_s1 + $0x16c0] sm:$0xff]  ;;  %v9232_v23 = vcombine.high %v635_v14, %v639_v15  ;;  %6504 = vmatprep.subr.bf16.mxu1 %v9368_v13  ;;  %v9231_v30 = vcombine.low %v635_v14, %v639_v15  ;;  %v10660_v14 = vcombine.high %v10641_v7, %v10641_v7 }
  0xb6   :  { %v767_v18 = vld [vmem:[%s13635_s1 + $0x16e0] sm:$0xff]  ;;  %6505 = vmatpush2.bf16.msra.mxu1 %v9367_v22 }
  0xb7   :  { %v9360_v24 = vcombine.high %v763_v17, %v767_v18  ;;  %v627_v25 = vld [vmem:[%s13635_s1 + $0x1280] sm:$0xff]  ;;  %6465 = vmatprep.subr.bf16.mxu0 %v9232_v23  ;;  %v9359_v31 = vcombine.low %v763_v17, %v767_v18  ;;  %v10671_v18 = vcombine.high %v10650_v9, %v10650_v9 }
  0xb8   :  { %v631_v54 = vld [vmem:[%s13635_s1 + $0x12a0] sm:$0xff]  ;;  %6466 = vmatpush2.bf16.msra.mxu0 %v9231_v30 }
  0xb9   :  { %v755_v27 = vld [vmem:[%s13635_s1 + $0x1680] sm:$0xff]  ;;  %v9224_v32 = vcombine.high %v627_v25, %v631_v54  ;;  %6506 = vmatprep.subr.bf16.mxu1 %v9360_v24  ;;  %v9223_v19 = vcombine.low %v627_v25, %v631_v54 }
  0xba   :  { %v759_v28 = vld [vmem:[%s13635_s1 + $0x16a0] sm:$0xff]  ;;  %6507 = vmatpush2.bf16.msra.mxu1 %v9359_v31 }
  0xbb   :  { %v9352_v33 = vcombine.high %v755_v27, %v759_v28  ;;  %v619_v34 = vld [vmem:[%s13635_s1 + $0x1240] sm:$0xff]  ;;  %6467 = vmatprep.subr.bf16.mxu0 %v9224_v32  ;;  %v9351_v42 = vcombine.low %v755_v27, %v759_v28 }
  0xbc   :  { %v623_v35 = vld [vmem:[%s13635_s1 + $0x1260] sm:$0xff]  ;;  %6468 = vmatpush2.bf16.msra.mxu0 %v9223_v19 }
  0xbd   :  { %v747_v37 = vld [vmem:[%s13635_s1 + $0x1640] sm:$0xff]  ;;  %v9216_v43 = vcombine.high %v619_v34, %v623_v35  ;;  %6508 = vmatprep.subr.bf16.mxu1 %v9352_v33  ;;  %v9215_v50 = vcombine.low %v619_v34, %v623_v35 }
  0xbe   :  { %v751_v38 = vld [vmem:[%s13635_s1 + $0x1660] sm:$0xff]  ;;  %6509 = vmatpush2.bf16.msra.mxu1 %v9351_v42 }
  0xbf   :  { %v9344_v44 = vcombine.high %v747_v37, %v751_v38  ;;  %v611_v45 = vld [vmem:[%s13635_s1 + $0x1200] sm:$0xff]  ;;  %6469 = vmatprep.subr.bf16.mxu0 %v9216_v43  ;;  %v9343_v51 = vcombine.low %v747_v37, %v751_v38 }
  0xc0   :  { %v615_v21 = vld [vmem:[%s13635_s1 + $0x1220] sm:$0xff]  ;;  %6470 = vmatpush2.bf16.msra.mxu0 %v9215_v50 }
  0xc1   :  { %v739_v47 = vld [vmem:[%s13635_s1 + $0x1600] sm:$0xff]  ;;  %v9208_v52 = vcombine.high %v611_v45, %v615_v21  ;;  %6510 = vmatprep.subr.bf16.mxu1 %v9344_v44  ;;  %v9207_v62 = vcombine.low %v611_v45, %v615_v21 }
  0xc2   :  { %v743_v48 = vld [vmem:[%s13635_s1 + $0x1620] sm:$0xff]  ;;  %6511 = vmatpush2.bf16.msra.mxu1 %v9343_v51 }
  0xc3   :  { %v9336_v55 = vcombine.high %v739_v47, %v743_v48  ;;  %v859_v56 = vld [vmem:[%s13635_s1 + $0x19c0] sm:$0xff]  ;;  %6471 = vmatprep.subr.bf16.mxu0 %v9208_v52  ;;  %v9335_v63 = vcombine.low %v739_v47, %v743_v48 }
  0xc4   :  { %v863_v57 = vld [vmem:[%s13635_s1 + $0x19e0] sm:$0xff]  ;;  %6472 = vmatpush2.bf16.msra.mxu0 %v9207_v62 }
  0xc5   :  { %v987_v60 = vld [vmem:[%s13635_s1 + $0x1dc0] sm:$0xff]  ;;  %v9456_v0 = vcombine.high %v859_v56, %v863_v57  ;;  %6512 = vmatprep.subr.bf16.mxu1 %v9336_v55  ;;  %v9455_v39 = vcombine.low %v859_v56, %v863_v57 }
  0xc6   :  { %v991_v61 = vld [vmem:[%s13635_s1 + $0x1de0] sm:$0xff]  ;;  %6513 = vmatpush2.bf16.msra.mxu1 %v9335_v63 }
  0xc7   :  { %v9584_v1 = vcombine.high %v987_v60, %v991_v61  ;;  %v851_v2 = vld [vmem:[%s13635_s1 + $0x1980] sm:$0xff]  ;;  %6523 = vmatprep.subr.bf16.mxu0 %v9456_v0  ;;  %v9583_v10 = vcombine.low %v987_v60, %v991_v61  ;;  %6474 = vmatmul.mubr.bf16.vlgmr.msra.gmra.mxu0 %v10630_v4 }
  0xc8   :  { %v855_v3 = vld [vmem:[%s13635_s1 + $0x19a0] sm:$0xff]  ;;  %6524 = vmatpush1.bf16.msra.mxu0 %v9455_v39  ;;  %6555 = vmatprep.mubr.bf16.mxu0 %v10660_v14 }
  0xc9   :  { %v979_v5 = vld [vmem:[%s13635_s1 + $0x1d80] sm:$0xff]  ;;  %v9448_v11 = vcombine.high %v851_v2, %v855_v3  ;;  %6564 = vmatprep.subr.bf16.mxu1 %v9584_v1  ;;  %6515 = vmatmul.mubr.bf16.vlgmr.msra.gmra.mxu1 %v10645_v8  ;;  %v9447_v53 = vcombine.low %v851_v2, %v855_v3 }
  0xca   :  { %v983_v6 = vld [vmem:[%s13635_s1 + $0x1da0] sm:$0xff]  ;;  %6565 = vmatpush1.bf16.msra.mxu1 %v9583_v10  ;;  %6596 = vmatprep.mubr.bf16.mxu1 %v10671_v18 }
  0xcb   :  { %v9576_v12 = vcombine.high %v979_v5, %v983_v6  ;;  %v843_v13 = vld [vmem:[%s13635_s1 + $0x1940] sm:$0xff]  ;;  %6525 = vmatprep.subr.bf16.mxu0 %v9448_v11  ;;  %v9575_v22 = vcombine.low %v979_v5, %v983_v6 }
  0xcc   :  { %v847_v41 = vld [vmem:[%s13635_s1 + $0x1960] sm:$0xff]  ;;  %6526 = vmatpush1.bf16.msra.mxu0 %v9447_v53 }
  0xcd   :  { %v971_v15 = vld [vmem:[%s13635_s1 + $0x1d40] sm:$0xff]  ;;  %v9440_v23 = vcombine.high %v843_v13, %v847_v41  ;;  %6566 = vmatprep.subr.bf16.mxu1 %v9576_v12  ;;  %v9439_v30 = vcombine.low %v843_v13, %v847_v41 }
  0xce   :  { %v975_v17 = vld [vmem:[%s13635_s1 + $0x1d60] sm:$0xff]  ;;  %6567 = vmatpush1.bf16.msra.mxu1 %v9575_v22 }
  0xcf   :  { %v9568_v24 = vcombine.high %v971_v15, %v975_v17  ;;  %v835_v25 = vld [vmem:[%s13635_s1 + $0x1900] sm:$0xff]  ;;  %6527 = vmatprep.subr.bf16.mxu0 %v9440_v23  ;;  %v9567_v31 = vcombine.low %v971_v15, %v975_v17 }
  0xd0   :  { %v839_v54 = vld [vmem:[%s13635_s1 + $0x1920] sm:$0xff]  ;;  %6528 = vmatpush1.bf16.msra.mxu0 %v9439_v30 }
  0xd1   :  { %v963_v27 = vld [vmem:[%s13635_s1 + $0x1d00] sm:$0xff]  ;;  %v9432_v32 = vcombine.high %v835_v25, %v839_v54  ;;  %6568 = vmatprep.subr.bf16.mxu1 %v9568_v24  ;;  %v9431_v19 = vcombine.low %v835_v25, %v839_v54 }
  0xd2   :  { %v967_v28 = vld [vmem:[%s13635_s1 + $0x1d20] sm:$0xff]  ;;  %6569 = vmatpush1.bf16.msra.mxu1 %v9567_v31 }
  0xd3   :  { %v9560_v33 = vcombine.high %v963_v27, %v967_v28  ;;  %v827_v34 = vld [vmem:[%s13635_s1 + $0x18c0] sm:$0xff]  ;;  %6529 = vmatprep.subr.bf16.mxu0 %v9432_v32  ;;  %v9559_v42 = vcombine.low %v963_v27, %v967_v28 }
  0xd4   :  { %v831_v35 = vld [vmem:[%s13635_s1 + $0x18e0] sm:$0xff]  ;;  %6530 = vmatpush1.bf16.msra.mxu0 %v9431_v19 }
  0xd5   :  { %v955_v37 = vld [vmem:[%s13635_s1 + $0x1cc0] sm:$0xff]  ;;  %v9424_v43 = vcombine.high %v827_v34, %v831_v35  ;;  %6570 = vmatprep.subr.bf16.mxu1 %v9560_v33  ;;  %v9423_v50 = vcombine.low %v827_v34, %v831_v35 }
  0xd6   :  { %v959_v38 = vld [vmem:[%s13635_s1 + $0x1ce0] sm:$0xff]  ;;  %6571 = vmatpush1.bf16.msra.mxu1 %v9559_v42 }
  0xd7   :  { %v9552_v44 = vcombine.high %v955_v37, %v959_v38  ;;  %v819_v45 = vld [vmem:[%s13635_s1 + $0x1880] sm:$0xff]  ;;  %6531 = vmatprep.subr.bf16.mxu0 %v9424_v43  ;;  %v9551_v51 = vcombine.low %v955_v37, %v959_v38 }
  0xd8   :  { %v823_v21 = vld [vmem:[%s13635_s1 + $0x18a0] sm:$0xff]  ;;  %6532 = vmatpush1.bf16.msra.mxu0 %v9423_v50 }
  0xd9   :  { %v947_v47 = vld [vmem:[%s13635_s1 + $0x1c80] sm:$0xff]  ;;  %v9416_v52 = vcombine.high %v819_v45, %v823_v21  ;;  %6572 = vmatprep.subr.bf16.mxu1 %v9552_v44  ;;  %v9415_v62 = vcombine.low %v819_v45, %v823_v21 }
  0xda   :  { %v951_v48 = vld [vmem:[%s13635_s1 + $0x1ca0] sm:$0xff]  ;;  %6573 = vmatpush1.bf16.msra.mxu1 %v9551_v51 }
  0xdb   :  { %v9544_v55 = vcombine.high %v947_v47, %v951_v48  ;;  %v811_v56 = vld [vmem:[%s13635_s1 + $0x1840] sm:$0xff]  ;;  %6533 = vmatprep.subr.bf16.mxu0 %v9416_v52  ;;  %v9543_v63 = vcombine.low %v947_v47, %v951_v48 }
  0xdc   :  { %v815_v57 = vld [vmem:[%s13635_s1 + $0x1860] sm:$0xff]  ;;  %6534 = vmatpush1.bf16.msra.mxu0 %v9415_v62 }
  0xdd   :  { %v939_v60 = vld [vmem:[%s13635_s1 + $0x1c40] sm:$0xff]  ;;  %v9408_v0 = vcombine.high %v811_v56, %v815_v57  ;;  %6574 = vmatprep.subr.bf16.mxu1 %v9544_v55  ;;  %v9407_v39 = vcombine.low %v811_v56, %v815_v57 }
  0xde   :  { %v943_v61 = vld [vmem:[%s13635_s1 + $0x1c60] sm:$0xff]  ;;  %6575 = vmatpush1.bf16.msra.mxu1 %v9543_v63 }
  0xdf   :  { %v9536_v1 = vcombine.high %v939_v60, %v943_v61  ;;  %v803_v2 = vld [vmem:[%s13635_s1 + $0x1800] sm:$0xff]  ;;  %6535 = vmatprep.subr.bf16.mxu0 %v9408_v0  ;;  %v9535_v10 = vcombine.low %v939_v60, %v943_v61 }
  0xe0   :  { %v807_v3 = vld [vmem:[%s13635_s1 + $0x1820] sm:$0xff]  ;;  %6536 = vmatpush1.bf16.msra.mxu0 %v9407_v39 }
  0xe1   :  { %v931_v5 = vld [vmem:[%s13635_s1 + $0x1c00] sm:$0xff]  ;;  %v9400_v11 = vcombine.high %v803_v2, %v807_v3  ;;  %6576 = vmatprep.subr.bf16.mxu1 %v9536_v1  ;;  %v9399_v53 = vcombine.low %v803_v2, %v807_v3 }
  0xe2   :  { %v935_v6 = vld [vmem:[%s13635_s1 + $0x1c20] sm:$0xff]  ;;  %6577 = vmatpush1.bf16.msra.mxu1 %v9535_v10 }
  0xe3   :  { %v9528_v12 = vcombine.high %v931_v5, %v935_v6  ;;  %v923_v13 = vld [vmem:[%s13635_s1 + $0x1bc0] sm:$0xff]  ;;  %6537 = vmatprep.subr.bf16.mxu0 %v9400_v11  ;;  %v9527_v22 = vcombine.low %v931_v5, %v935_v6 }
  0xe4   :  { %v927_v41 = vld [vmem:[%s13635_s1 + $0x1be0] sm:$0xff]  ;;  %6538 = vmatpush1.bf16.msra.mxu0 %v9399_v53 }
  0xe5   :  { %v1051_v15 = vld [vmem:[%s13635_s1 + $0x1fc0] sm:$0xff]  ;;  %v9520_v23 = vcombine.high %v923_v13, %v927_v41  ;;  %6578 = vmatprep.subr.bf16.mxu1 %v9528_v12  ;;  %v9519_v30 = vcombine.low %v923_v13, %v927_v41 }
  0xe6   :  { %v1055_v17 = vld [vmem:[%s13635_s1 + $0x1fe0] sm:$0xff]  ;;  %6579 = vmatpush1.bf16.msra.mxu1 %v9527_v22  ;;  %v1061_v22 = vlaneseq }
  0xe7   :  { %v9648_v24 = vcombine.high %v1051_v15, %v1055_v17  ;;  %v915_v25 = vld [vmem:[%s13635_s1 + $0x1b80] sm:$0xff]  ;;  %6539 = vmatprep.subr.bf16.mxu0 %v9520_v23  ;;  %v9647_v31 = vcombine.low %v1051_v15, %v1055_v17 }
  0xe8   :  { %v919_v54 = vld [vmem:[%s13635_s1 + $0x1ba0] sm:$0xff]  ;;  %6540 = vmatpush2.bf16.msra.mxu0 %v9519_v30 }
  0xe9   :  { %v1043_v27 = vld [vmem:[%s13635_s1 + $0x1f80] sm:$0xff]  ;;  %v9512_v32 = vcombine.high %v915_v25, %v919_v54  ;;  %6580 = vmatprep.subr.bf16.mxu1 %v9648_v24  ;;  %v9511_v19 = vcombine.low %v915_v25, %v919_v54 }
  0xea   :  { %v1047_v28 = vld [vmem:[%s13635_s1 + $0x1fa0] sm:$0xff]  ;;  %6581 = vmatpush2.bf16.msra.mxu1 %v9647_v31 }
  0xeb   :  { %v9640_v33 = vcombine.high %v1043_v27, %v1047_v28  ;;  %v907_v34 = vld [vmem:[%s13635_s1 + $0x1b40] sm:$0xff]  ;;  %6541 = vmatprep.subr.bf16.mxu0 %v9512_v32  ;;  %v9639_v42 = vcombine.low %v1043_v27, %v1047_v28  ;;  %v10832_v32 = vshrl.u32 %v1061_v22, 7 }
  0xec   :  { %v911_v35 = vld [vmem:[%s13635_s1 + $0x1b60] sm:$0xff]  ;;  %6542 = vmatpush2.bf16.msra.mxu0 %v9511_v19  ;;  %v220_v19 = vld [vmem:[%s13635_s1 + $0x5c8] sm:$0xff] }
  0xed   :  { %v1035_v37 = vld [vmem:[%s13635_s1 + $0x1f40] sm:$0xff]  ;;  %v9504_v43 = vcombine.high %v907_v34, %v911_v35  ;;  %6582 = vmatprep.subr.bf16.mxu1 %v9640_v33  ;;  %v9503_v50 = vcombine.low %v907_v34, %v911_v35 }
  0xee   :  { %v1039_v38 = vld [vmem:[%s13635_s1 + $0x1f60] sm:$0xff]  ;;  %6583 = vmatpush2.bf16.msra.mxu1 %v9639_v42  ;;  %v224_v42 = vld [vmem:[%s13635_s1 + $0x5e8] sm:$0xff] }
  0xef   :  { %v9632_v44 = vcombine.high %v1035_v37, %v1039_v38  ;;  %v899_v45 = vld [vmem:[%s13635_s1 + $0x1b00] sm:$0xff]  ;;  %6543 = vmatprep.subr.bf16.mxu0 %v9504_v43  ;;  %v9631_v51 = vcombine.low %v1035_v37, %v1039_v38  ;;  %v92_v37 = vld [vmem:[%s13635_s1 + $0x1c8] sm:$0xff] }
  0xf0   :  { %v903_v21 = vld [vmem:[%s13635_s1 + $0x1b20] sm:$0xff]  ;;  %6544 = vmatpush2.bf16.msra.mxu0 %v9503_v50  ;;  %v96_v38 = vld [vmem:[%s13635_s1 + $0x1e8] sm:$0xff]  ;;  %v10853_v50 = vsub.s32 1, %v10832_v32 }
  0xf1   :  { %v1027_v47 = vld [vmem:[%s13635_s1 + $0x1f00] sm:$0xff]  ;;  %v9496_v52 = vcombine.high %v899_v45, %v903_v21  ;;  %6584 = vmatprep.subr.bf16.mxu1 %v9632_v44  ;;  %v9495_v62 = vcombine.low %v899_v45, %v903_v21  ;;  %v10847_v44 = vsub.s32 0, %v10832_v32 }
  0xf2   :  { %v1031_v48 = vld [vmem:[%s13635_s1 + $0x1f20] sm:$0xff]  ;;  %6585 = vmatpush2.bf16.msra.mxu1 %v9631_v51  ;;  %v84_v51 = vld [vmem:[%s13635_s1 + $0x188] sm:$0xff] }
  0xf3   :  { %v9624_v55 = vcombine.high %v1027_v47, %v1031_v48  ;;  %v891_v56 = vld [vmem:[%s13635_s1 + $0x1ac0] sm:$0xff]  ;;  %6545 = vmatprep.subr.bf16.mxu0 %v9496_v52  ;;  %v9623_v63 = vcombine.low %v1027_v47, %v1031_v48  ;;  %v8690_v47 = vcombine.high %v92_v37, %v96_v38  ;;  %v8818_v48 = vcombine.high %v220_v19, %v224_v42  ;;  %v88_v52 = vld [vmem:[%s13635_s1 + $0x1a8] sm:$0xff] }
  0xf4   :  { %v895_v57 = vld [vmem:[%s13635_s1 + $0x1ae0] sm:$0xff]  ;;  %6546 = vmatpush2.bf16.msra.mxu0 %v9495_v62  ;;  %v8689_v62 = vcombine.low %v92_v37, %v96_v38 }
  0xf5   :  { %v1019_v60 = vld [vmem:[%s13635_s1 + $0x1ec0] sm:$0xff]  ;;  %v9488_v0 = vcombine.high %v891_v56, %v895_v57  ;;  %6586 = vmatprep.subr.bf16.mxu1 %v9624_v55  ;;  %v9487_v39 = vcombine.low %v891_v56, %v895_v57  ;;  %v10863_v55 = vcombine.low %v10641_v7, %v10641_v7  ;;  %v212_v56 = vld [vmem:[%s13635_s1 + $0x588] sm:$0xff]  ;;  %v8817_v7 = vcombine.low %v220_v19, %v224_v42 }
  0xf6   :  { %v1023_v61 = vld [vmem:[%s13635_s1 + $0x1ee0] sm:$0xff]  ;;  %6587 = vmatpush2.bf16.msra.mxu1 %v9623_v63  ;;  %v216_v57 = vld [vmem:[%s13635_s1 + $0x5a8] sm:$0xff]  ;;  %v8682_v63 = vcombine.high %v84_v51, %v88_v52 }
  0xf7   :  { %v9616_v1 = vcombine.high %v1019_v60, %v1023_v61  ;;  %v883_v2 = vld [vmem:[%s13635_s1 + $0x1a80] sm:$0xff]  ;;  %6547 = vmatprep.subr.bf16.mxu0 %v9488_v0  ;;  %v9615_v10 = vcombine.low %v1019_v60, %v1023_v61  ;;  %v10874_v61 = vcombine.low %v10650_v9, %v10650_v9  ;;  %v204_v9 = vld [vmem:[%s13635_s1 + $0x548] sm:$0xff] }
  0xf8   :  { %v887_v3 = vld [vmem:[%s13635_s1 + $0x1aa0] sm:$0xff]  ;;  %6548 = vmatpush2.bf16.msra.mxu0 %v9487_v39  ;;  %v60_v19 = vld [vmem:[%s13635_s1 + $0xc8] sm:$0xff] }
  0xf9   :  { %v1011_v5 = vld [vmem:[%s13635_s1 + $0x1e80] sm:$0xff]  ;;  %v9480_v11 = vcombine.high %v883_v2, %v887_v3  ;;  %6588 = vmatprep.subr.bf16.mxu1 %v9616_v1  ;;  %v9479_v53 = vcombine.low %v883_v2, %v887_v3  ;;  %v8810_v1 = vcombine.high %v212_v56, %v216_v57  ;;  %v76_v2 = vld [vmem:[%s13635_s1 + $0x148] sm:$0xff] }
  0xfa   :  { %v1015_v6 = vld [vmem:[%s13635_s1 + $0x1ea0] sm:$0xff]  ;;  %6589 = vmatpush2.bf16.msra.mxu1 %v9615_v10  ;;  %v80_v3 = vld [vmem:[%s13635_s1 + $0x168] sm:$0xff] }
  0xfb   :  { %v9608_v12 = vcombine.high %v1011_v5, %v1015_v6  ;;  %v875_v13 = vld [vmem:[%s13635_s1 + $0x1a40] sm:$0xff]  ;;  %6549 = vmatprep.subr.bf16.mxu0 %v9480_v11  ;;  %v9607_v23 = vcombine.low %v1011_v5, %v1015_v6  ;;  %v208_v6 = vld [vmem:[%s13635_s1 + $0x568] sm:$0xff]  ;;  %v8681_v11 = vcombine.low %v84_v51, %v88_v52 }
  0xfc   :  { %v879_v41 = vld [vmem:[%s13635_s1 + $0x1a60] sm:$0xff]  ;;  %6550 = vmatpush2.bf16.msra.mxu0 %v9479_v53  ;;  %v8802_v22 = vcombine.high %v204_v9, %v208_v6  ;;  %v64_v42 = vld [vmem:[%s13635_s1 + $0xe8] sm:$0xff] }
  0xfd   :  { %v1003_v15 = vld [vmem:[%s13635_s1 + $0x1e40] sm:$0xff]  ;;  %v9472_v24 = vcombine.high %v875_v13, %v879_v41  ;;  %6590 = vmatprep.subr.bf16.mxu1 %v9608_v12  ;;  %v9471_v31 = vcombine.low %v875_v13, %v879_v41  ;;  %v8809_v13 = vcombine.low %v212_v56, %v216_v57  ;;  %v8674_v41 = vcombine.high %v76_v2, %v80_v3  ;;  %v52_v52 = vld [vmem:[%s13635_s1 + $0x88] sm:$0xff] }
  0xfe   :  { %v1007_v17 = vld [vmem:[%s13635_s1 + $0x1e60] sm:$0xff]  ;;  %6591 = vmatpush2.bf16.msra.mxu1 %v9607_v23  ;;  %v68_v23 = vld [vmem:[%s13635_s1 + $0x108] sm:$0xff] }
  0xff   :  { %v9600_v25 = vcombine.high %v1003_v15, %v1007_v17  ;;  %v867_v54 = vld [vmem:[%s13635_s1 + $0x1a00] sm:$0xff]  ;;  %6551 = vmatprep.subr.bf16.mxu0 %v9472_v24  ;;  %v9599_v33 = vcombine.low %v1003_v15, %v1007_v17  ;;  %v72_v24 = vld [vmem:[%s13635_s1 + $0x128] sm:$0xff] }
 0x100   :  { %v871_v27 = vld [vmem:[%s13635_s1 + $0x1a20] sm:$0xff]  ;;  %6552 = vmatpush2.bf16.msra.mxu0 %v9471_v31  ;;  %v8673_v31 = vcombine.low %v76_v2, %v80_v3  ;;  %v56_v56 = vld [vmem:[%s13635_s1 + $0xa8] sm:$0xff] }
 0x101   :  { %v995_v28 = vld [vmem:[%s13635_s1 + $0x1e00] sm:$0xff]  ;;  %v9464_v34 = vcombine.high %v867_v54, %v871_v27  ;;  %6592 = vmatprep.subr.bf16.mxu1 %v9600_v25  ;;  %v9463_v43 = vcombine.low %v867_v54, %v871_v27  ;;  %v196_v54 = vld [vmem:[%s13635_s1 + $0x508] sm:$0xff] }
 0x102   :  { %v999_v30 = vld [vmem:[%s13635_s1 + $0x1e20] sm:$0xff]  ;;  %6593 = vmatpush2.bf16.msra.mxu1 %v9599_v33  ;;  %v200_v27 = vld [vmem:[%s13635_s1 + $0x528] sm:$0xff] }
 0x103   :  { %v9592_v35 = vcombine.high %v995_v28, %v999_v30  ;;  %6553 = vmatprep.subr.bf16.mxu0 %v9464_v34  ;;  %v9591_v45 = vcombine.low %v995_v28, %v999_v30  ;;  %v1059_v21 = vld [vmem:[%s13637_s2] sm:$0xff]  ;;  %v8801_v34 = vcombine.low %v204_v9, %v208_v6  ;;  %v8794_v38 = vcombine.high %v196_v54, %v200_v27  ;;  %v180_v57 = vld [vmem:[%s13635_s1 + $0x488] sm:$0xff] }
 0x104   :  { %6554 = vmatpush2.bf16.msra.mxu0 %v9463_v43  ;;  %v1064_v60 = vrot.slane %v1059_v21, %v10847_v44  ;;  %v1068_v0 = vrot.slane %v1059_v21, %v10853_v50  ;;  %v188_v43 = vld [vmem:[%s13635_s1 + $0x4c8] sm:$0xff]  ;;  %v8665_v21 = vcombine.low %v68_v23, %v72_v24  ;;  %v8649_v9 = vcombine.low %v52_v52, %v56_v56 }
 0x105   :  { %6594 = vmatprep.subr.bf16.mxu1 %v9592_v35  ;;  %6605 = vmatprep.subr.bf16.mxu0 %v8690_v47  ;;  %v8666_v35 = vcombine.high %v68_v23, %v72_v24  ;;  %v8793_v47 = vcombine.low %v196_v54, %v200_v27  ;;  %v48_v2 = vld [vmem:[%s13635_s1 + $0x68] sm:$0xff] }
 0x106   :  { %6595 = vmatpush2.bf16.msra.mxu1 %v9591_v45  ;;  %v6311_v5 = vpop.f32.mrf.mxu0  ;;  %v192_v45 = vld [vmem:[%s13635_s1 + $0x4e8] sm:$0xff] }
 0x107   :  { %6646 = vmatprep.subr.bf16.mxu1 %v8818_v48  ;;  %6556 = vmatmul.mubr.bf16.vlgmr.msra.gmra.mxu0 %v10863_v55  ;;  %v6312_v39 = vadd.f32 %v6311_v5, %v1064_v60  ;;  %v8658_v48 = vcombine.high %v60_v19, %v64_v42  ;;  %v8786_v51 = vcombine.high %v188_v43, %v192_v45  ;;  %v184_v60 = vld [vmem:[%s13635_s1 + $0x4a8] sm:$0xff] }
 0x108   :  { %v6352_v10 = vpop.f32.mrf.mxu1  ;;  %6606 = vmatpush1.bf16.msra.mxu0 %v8689_v62  ;;  %v6313_v12 = vpop.f32.mrf.mxu0  ;;  %6637 = vmatprep.mubr.bf16.mxu0 %v10056_v58  ;;  %v8657_v62 = vcombine.low %v60_v19, %v64_v42  ;;  %v172_v3 = vld [vmem:[%s13635_s1 + $0x448] sm:$0xff]  ;;  %v8777_v6 = vcombine.low %v180_v57, %v184_v60 }
 0x109   :  { %6597 = vmatmul.mubr.bf16.vlgmr.msra.gmra.mxu1 %v10874_v61  ;;  %6607 = vmatprep.subr.bf16.mxu0 %v8682_v63  ;;  %v10891_v15 = vadd.f32 %v6352_v10, %v6312_v39  ;;  %v6314_v17 = vadd.f32 %v6313_v12, %v1068_v0  ;;  %v8650_v63 = vcombine.high %v52_v52, %v56_v56  ;;  %v176_v5 = vld [vmem:[%s13635_s1 + $0x468] sm:$0xff] }
 0x10a   :  { %6647 = vmatpush1.bf16.msra.mxu1 %v8817_v7  ;;  %v6354_v53 = vpop.f32.mrf.mxu1  ;;  %v6315_v25 = vpop.f32.mrf.mxu0  ;;  %6678 = vmatprep.mubr.bf16.mxu1 %v10060_v59  ;;  %v8785_v7 = vcombine.low %v188_v43, %v192_v45  ;;  %v8778_v0 = vcombine.high %v180_v57, %v184_v60  ;;  %v8770_v10 = vcombine.high %v172_v3, %v176_v5  ;;  %v40_v12 = vld [vmem:[%s13635_s1 + $0x28] sm:$0xff] }
 0x10b   :  { %6648 = vmatprep.subr.bf16.mxu1 %v8810_v1  ;;  %v10907_v28 = vadd.f32 %v6354_v53, %v6314_v17  ;;  %v44_v1 = vld [vmem:[%s13635_s1 + $0x48] sm:$0xff]  ;;  %v8769_v53 = vcombine.low %v172_v3, %v176_v5 }
 0x10c   :  { %v6356_v30 = vpop.f32.mrf.mxu1  ;;  %6608 = vmatpush1.bf16.msra.mxu0 %v8681_v11  ;;  %v6316_v33 = vpop.f32.mrf.mxu0  ;;  %v8642_v39 = vcombine.high %v44_v1, %v48_v2  ;;  %v36_v11 = vld [vmem:[%s13635_s1 + $0x8] sm:$0xff]  ;;  %v8641_v17 = vcombine.low %v44_v1, %v48_v2 }
 0x10d   :  { %6609 = vmatprep.subr.bf16.mxu0 %v8674_v41  ;;  %v168_v41 = vld [vmem:[%s13635_s1 + $0x428] sm:$0xff]  ;;  %v8633_v30 = vcombine.low %v36_v11, %v40_v12 }
 0x10e   :  { %6649 = vmatpush1.bf16.msra.mxu1 %v8809_v13  ;;  %v6357_v37 = vpop.f32.mrf.mxu1  ;;  %v164_v13 = vld [vmem:[%s13635_s1 + $0x408] sm:$0xff] }
 0x10f   :  { %6650 = vmatprep.subr.bf16.mxu1 %v8802_v22  ;;  %v8634_v22 = vcombine.high %v36_v11, %v40_v12  ;;  %v8762_v23 = vcombine.high %v164_v13, %v168_v41  ;;  %v156_v24 = vld [vmem:[%s13635_s1 + $0x3c8] sm:$0xff] }
 0x110   :  { %6610 = vmatpush1.bf16.msra.mxu0 %v8673_v31  ;;  %v160_v25 = vld [vmem:[%s13635_s1 + $0x3e8] sm:$0xff]  ;;  %v8761_v31 = vcombine.low %v164_v13, %v168_v41 }
 0x111   :  { %6611 = vmatprep.subr.bf16.mxu0 %v8666_v35  ;;  %v284_v54 = vld [vmem:[%s13635_s1 + $0x7c8] sm:$0xff]  ;;  %v8754_v33 = vcombine.high %v156_v24, %v160_v25  ;;  %v8753_v42 = vcombine.low %v156_v24, %v160_v25 }
 0x112   :  { %6651 = vmatpush1.bf16.msra.mxu1 %v8801_v34  ;;  %v288_v27 = vld [vmem:[%s13635_s1 + $0x7e8] sm:$0xff] }
 0x113   :  { %6652 = vmatprep.subr.bf16.mxu1 %v8794_v38  ;;  %v8882_v34 = vcombine.high %v284_v54, %v288_v27  ;;  %v148_v35 = vld [vmem:[%s13635_s1 + $0x388] sm:$0xff]  ;;  %v8881_v43 = vcombine.low %v284_v54, %v288_v27 }
 0x114   :  { %6612 = vmatpush1.bf16.msra.mxu0 %v8665_v21  ;;  %v152_v37 = vld [vmem:[%s13635_s1 + $0x3a8] sm:$0xff] }
 0x115   :  { %6613 = vmatprep.subr.bf16.mxu0 %v8658_v48  ;;  %v276_v38 = vld [vmem:[%s13635_s1 + $0x788] sm:$0xff]  ;;  %v8746_v45 = vcombine.high %v148_v35, %v152_v37  ;;  %v8745_v56 = vcombine.low %v148_v35, %v152_v37 }
 0x116   :  { %6653 = vmatpush1.bf16.msra.mxu1 %v8793_v47  ;;  %v280_v19 = vld [vmem:[%s13635_s1 + $0x7a8] sm:$0xff] }
 0x117   :  { %6654 = vmatprep.subr.bf16.mxu1 %v8786_v51  ;;  %v8874_v21 = vcombine.high %v276_v38, %v280_v19  ;;  %v140_v47 = vld [vmem:[%s13635_s1 + $0x348] sm:$0xff]  ;;  %v8873_v57 = vcombine.low %v276_v38, %v280_v19 }
 0x118   :  { %6614 = vmatpush1.bf16.msra.mxu0 %v8657_v62  ;;  %v144_v48 = vld [vmem:[%s13635_s1 + $0x368] sm:$0xff] }
 0x119   :  { %6615 = vmatprep.subr.bf16.mxu0 %v8650_v63  ;;  %v268_v51 = vld [vmem:[%s13635_s1 + $0x748] sm:$0xff]  ;;  %v8738_v60 = vcombine.high %v140_v47, %v144_v48  ;;  %v8737_v2 = vcombine.low %v140_v47, %v144_v48 }
 0x11a   :  { %6655 = vmatpush1.bf16.msra.mxu1 %v8785_v7  ;;  %v272_v52 = vld [vmem:[%s13635_s1 + $0x768] sm:$0xff] }
 0x11b   :  { %6656 = vmatprep.subr.bf16.mxu1 %v8778_v0  ;;  %v8866_v62 = vcombine.high %v268_v51, %v272_v52  ;;  %v132_v7 = vld [vmem:[%s13635_s1 + $0x308] sm:$0xff]  ;;  %v8865_v3 = vcombine.low %v268_v51, %v272_v52 }
 0x11c   :  { %6616 = vmatpush1.bf16.msra.mxu0 %v8649_v9  ;;  %v136_v63 = vld [vmem:[%s13635_s1 + $0x328] sm:$0xff] }
 0x11d   :  { %6617 = vmatprep.subr.bf16.mxu0 %v8642_v39  ;;  %v260_v0 = vld [vmem:[%s13635_s1 + $0x708] sm:$0xff]  ;;  %v8730_v5 = vcombine.high %v132_v7, %v136_v63  ;;  %v8729_v12 = vcombine.low %v132_v7, %v136_v63 }
 0x11e   :  { %6657 = vmatpush1.bf16.msra.mxu1 %v8777_v6  ;;  %v264_v1 = vld [vmem:[%s13635_s1 + $0x728] sm:$0xff] }
 0x11f   :  { %6658 = vmatprep.subr.bf16.mxu1 %v8770_v10  ;;  %v8858_v9 = vcombine.high %v260_v0, %v264_v1  ;;  %v124_v6 = vld [vmem:[%s13635_s1 + $0x2c8] sm:$0xff]  ;;  %v8857_v13 = vcombine.low %v260_v0, %v264_v1 }
 0x120   :  { %6618 = vmatpush1.bf16.msra.mxu0 %v8641_v17  ;;  %v128_v39 = vld [vmem:[%s13635_s1 + $0x2e8] sm:$0xff] }
 0x121   :  { %6619 = vmatprep.subr.bf16.mxu0 %v8634_v22  ;;  %v252_v10 = vld [vmem:[%s13635_s1 + $0x6c8] sm:$0xff]  ;;  %v8722_v41 = vcombine.high %v124_v6, %v128_v39  ;;  %v8721_v25 = vcombine.low %v124_v6, %v128_v39 }
 0x122   :  { %6659 = vmatpush1.bf16.msra.mxu1 %v8769_v53  ;;  %v256_v11 = vld [vmem:[%s13635_s1 + $0x6e8] sm:$0xff] }
 0x123   :  { %6660 = vmatprep.subr.bf16.mxu1 %v8762_v23  ;;  %v8850_v17 = vcombine.high %v252_v10, %v256_v11  ;;  %v116_v53 = vld [vmem:[%s13635_s1 + $0x288] sm:$0xff]  ;;  %v8849_v54 = vcombine.low %v252_v10, %v256_v11 }
 0x124   :  { %6620 = vmatpush1.bf16.msra.mxu0 %v8633_v30  ;;  %v120_v22 = vld [vmem:[%s13635_s1 + $0x2a8] sm:$0xff] }
 0x125   :  { %6621 = vmatprep.subr.bf16.mxu0 %v8754_v33  ;;  %v244_v23 = vld [vmem:[%s13635_s1 + $0x688] sm:$0xff]  ;;  %v8714_v27 = vcombine.high %v116_v53, %v120_v22  ;;  %v8713_v37 = vcombine.low %v116_v53, %v120_v22 }
 0x126   :  { %6661 = vmatpush1.bf16.msra.mxu1 %v8761_v31  ;;  %v248_v24 = vld [vmem:[%s13635_s1 + $0x6a8] sm:$0xff] }
 0x127   :  { %6662 = vmatprep.subr.bf16.mxu1 %v8882_v34  ;;  %v8842_v30 = vcombine.high %v244_v23, %v248_v24  ;;  %v108_v31 = vld [vmem:[%s13635_s1 + $0x248] sm:$0xff]  ;;  %v8841_v38 = vcombine.low %v244_v23, %v248_v24 }
 0x128   :  { %6622 = vmatpush2.bf16.msra.mxu0 %v8753_v42  ;;  %v112_v33 = vld [vmem:[%s13635_s1 + $0x268] sm:$0xff] }
 0x129   :  { %6623 = vmatprep.subr.bf16.mxu0 %v8746_v45  ;;  %v236_v34 = vld [vmem:[%s13635_s1 + $0x648] sm:$0xff]  ;;  %v8706_v19 = vcombine.high %v108_v31, %v112_v33  ;;  %v8705_v48 = vcombine.low %v108_v31, %v112_v33 }
 0x12a   :  { %6663 = vmatpush2.bf16.msra.mxu1 %v8881_v43  ;;  %v240_v35 = vld [vmem:[%s13635_s1 + $0x668] sm:$0xff] }
 0x12b   :  { %6664 = vmatprep.subr.bf16.mxu1 %v8874_v21  ;;  %v8834_v42 = vcombine.high %v236_v34, %v240_v35  ;;  %v100_v43 = vld [vmem:[%s13635_s1 + $0x208] sm:$0xff]  ;;  %v8833_v51 = vcombine.low %v236_v34, %v240_v35 }
 0x12c   :  { %6624 = vmatpush2.bf16.msra.mxu0 %v8745_v56  ;;  %v104_v45 = vld [vmem:[%s13635_s1 + $0x228] sm:$0xff] }
 0x12d   :  { %6625 = vmatprep.subr.bf16.mxu0 %v8738_v60  ;;  %v228_v21 = vld [vmem:[%s13635_s1 + $0x608] sm:$0xff]  ;;  %v8698_v52 = vcombine.high %v100_v43, %v104_v45  ;;  %v8697_v63 = vcombine.low %v100_v43, %v104_v45 }
 0x12e   :  { %6665 = vmatpush2.bf16.msra.mxu1 %v8873_v57  ;;  %v232_v47 = vld [vmem:[%s13635_s1 + $0x628] sm:$0xff] }
 0x12f   :  { %6666 = vmatprep.subr.bf16.mxu1 %v8866_v62  ;;  %v8826_v56 = vcombine.high %v228_v21, %v232_v47  ;;  %v348_v57 = vld [vmem:[%s13635_s1 + $0x9c8] sm:$0xff]  ;;  %v8825_v0 = vcombine.low %v228_v21, %v232_v47 }
 0x130   :  { %6626 = vmatpush2.bf16.msra.mxu0 %v8737_v2  ;;  %v352_v60 = vld [vmem:[%s13635_s1 + $0x9e8] sm:$0xff] }
 0x131   :  { %6627 = vmatprep.subr.bf16.mxu0 %v8730_v5  ;;  %v476_v62 = vld [vmem:[%s13635_s1 + $0xdc8] sm:$0xff]  ;;  %v8946_v1 = vcombine.high %v348_v57, %v352_v60  ;;  %v8945_v39 = vcombine.low %v348_v57, %v352_v60 }
 0x132   :  { %6667 = vmatpush2.bf16.msra.mxu1 %v8865_v3  ;;  %v480_v7 = vld [vmem:[%s13635_s1 + $0xde8] sm:$0xff] }
 0x133   :  { %6668 = vmatprep.subr.bf16.mxu1 %v8858_v9  ;;  %v9074_v2 = vcombine.high %v476_v62, %v480_v7  ;;  %v340_v3 = vld [vmem:[%s13635_s1 + $0x988] sm:$0xff]  ;;  %v9073_v10 = vcombine.low %v476_v62, %v480_v7 }
 0x134   :  { %6628 = vmatpush2.bf16.msra.mxu0 %v8729_v12  ;;  %v344_v5 = vld [vmem:[%s13635_s1 + $0x9a8] sm:$0xff] }
 0x135   :  { %6629 = vmatprep.subr.bf16.mxu0 %v8722_v41  ;;  %v468_v9 = vld [vmem:[%s13635_s1 + $0xd88] sm:$0xff]  ;;  %v8938_v11 = vcombine.high %v340_v3, %v344_v5 }
 0x136   :  { %6669 = vmatpush2.bf16.msra.mxu1 %v8857_v13  ;;  %v472_v6 = vld [vmem:[%s13635_s1 + $0xda8] sm:$0xff] }
 0x137   :  { %6670 = vmatprep.subr.bf16.mxu1 %v8850_v17  ;;  %v9066_v12 = vcombine.high %v468_v9, %v472_v6  ;;  %v332_v13 = vld [vmem:[%s13635_s1 + $0x948] sm:$0xff] }
 0x138   :  { %6630 = vmatpush2.bf16.msra.mxu0 %v8721_v25  ;;  %v336_v41 = vld [vmem:[%s13635_s1 + $0x968] sm:$0xff]  ;;  %v8937_v25 = vcombine.low %v340_v3, %v344_v5 }
 0x139   :  { %6631 = vmatprep.subr.bf16.mxu0 %v8714_v27  ;;  %v460_v53 = vld [vmem:[%s13635_s1 + $0xd48] sm:$0xff]  ;;  %v9065_v27 = vcombine.low %v468_v9, %v472_v6  ;;  %v8929_v45 = vcombine.low %v332_v13, %v336_v41 }
 0x13a   :  { %6671 = vmatpush2.bf16.msra.mxu1 %v8849_v54  ;;  %v464_v22 = vld [vmem:[%s13635_s1 + $0xd68] sm:$0xff] }
 0x13b   :  { %6672 = vmatprep.subr.bf16.mxu1 %v8842_v30  ;;  %v8930_v30 = vcombine.high %v332_v13, %v336_v41  ;;  %v9058_v35 = vcombine.high %v460_v53, %v464_v22  ;;  %v9057_v47 = vcombine.low %v460_v53, %v464_v22  ;;  %v320_v57 = vld [vmem:[%s13635_s1 + $0x8e8] sm:$0xff] }
 0x13c   :  { %6632 = vmatpush2.bf16.msra.mxu0 %v8713_v37  ;;  %v328_v37 = vld [vmem:[%s13635_s1 + $0x928] sm:$0xff] }
 0x13d   :  { %6633 = vmatprep.subr.bf16.mxu0 %v8706_v19  ;;  %v452_v19 = vld [vmem:[%s13635_s1 + $0xd08] sm:$0xff] }
 0x13e   :  { %6673 = vmatpush2.bf16.msra.mxu1 %v8841_v38  ;;  %v444_v60 = vld [vmem:[%s13635_s1 + $0xcc8] sm:$0xff] }
 0x13f   :  { %6674 = vmatprep.subr.bf16.mxu1 %v8834_v42  ;;  %v448_v62 = vld [vmem:[%s13635_s1 + $0xce8] sm:$0xff] }
 0x140   :  { %6634 = vmatpush2.bf16.msra.mxu0 %v8705_v48  ;;  %v312_v3 = vld [vmem:[%s13635_s1 + $0x8a8] sm:$0xff] }
 0x141   :  { %6635 = vmatprep.subr.bf16.mxu0 %v8698_v52  ;;  %v436_v5 = vld [vmem:[%s13635_s1 + $0xc88] sm:$0xff] }
 0x142   :  { %6675 = vmatpush2.bf16.msra.mxu1 %v8833_v51  ;;  %v440_v9 = vld [vmem:[%s13635_s1 + $0xca8] sm:$0xff] }
 0x143   :  { %6676 = vmatprep.subr.bf16.mxu1 %v8826_v56  ;;  %v316_v56 = vld [vmem:[%s13635_s1 + $0x8c8] sm:$0xff]  ;;  %v9033_v22 = vcombine.low %v436_v5, %v440_v9 }
 0x144   :  { %6636 = vmatpush2.bf16.msra.mxu0 %v8697_v63  ;;  %v8913_v6 = vcombine.low %v316_v56, %v320_v57  ;;  %v304_v13 = vld [vmem:[%s13635_s1 + $0x868] sm:$0xff] }
 0x145   :  { %6687 = vmatprep.subr.bf16.mxu0 %v8946_v1  ;;  %v9042_v1 = vcombine.high %v444_v60, %v448_v62  ;;  %v428_v41 = vld [vmem:[%s13635_s1 + $0xc48] sm:$0xff] }
 0x146   :  { %6677 = vmatpush2.bf16.msra.mxu1 %v8825_v0  ;;  %v6393_v17 = vpop.f32.mrf.mxu0  ;;  %v8914_v0 = vcombine.high %v316_v56, %v320_v57  ;;  %v536_v56 = vld [vmem:[%s13635_s1 + $0xfa8] sm:$0xff] }
 0x147   :  { %6728 = vmatprep.subr.bf16.mxu1 %v9074_v2  ;;  %6638 = vmatmul.mubr.bf16.vlgmr.msra.gmra.mxu0 %v10186_v16  ;;  %v6394_v23 = vadd.f32 %v6393_v17, %v10891_v15  ;;  %v324_v15 = vld [vmem:[%s13635_s1 + $0x908] sm:$0xff] }
 0x148   :  { %v6434_v24 = vpop.f32.mrf.mxu1  ;;  %6688 = vmatpush1.bf16.msra.mxu0 %v8945_v39  ;;  %v6395_v54 = vpop.f32.mrf.mxu0  ;;  %6719 = vmatprep.mubr.bf16.mxu0 %v10216_v26  ;;  %v8922_v48 = vcombine.high %v324_v15, %v328_v37  ;;  %v8921_v7 = vcombine.low %v324_v15, %v328_v37  ;;  %v308_v2 = vld [vmem:[%s13635_s1 + $0x888] sm:$0xff]  ;;  %v9041_v39 = vcombine.low %v444_v60, %v448_v62 }
 0x149   :  { %6679 = vmatmul.mubr.bf16.vlgmr.msra.gmra.mxu1 %v10201_v20  ;;  %6689 = vmatprep.subr.bf16.mxu0 %v8938_v11  ;;  %v11092_v31 = vadd.f32 %v6434_v24, %v6394_v23  ;;  %v6396_v33 = vadd.f32 %v6395_v54, %v10907_v28  ;;  %v456_v28 = vld [vmem:[%s13635_s1 + $0xd28] sm:$0xff]  ;;  %v9034_v11 = vcombine.high %v436_v5, %v440_v9 }
 0x14a   :  { %6729 = vmatpush1.bf16.msra.mxu1 %v9073_v10  ;;  %v6436_v34 = vpop.f32.mrf.mxu1  ;;  %v6397_v38 = vpop.f32.mrf.mxu0  ;;  %6760 = vmatprep.mubr.bf16.mxu1 %v10227_v29  ;;  %v9050_v52 = vcombine.high %v452_v19, %v456_v28  ;;  %v9049_v63 = vcombine.low %v452_v19, %v456_v28  ;;  %v8906_v10 = vcombine.high %v308_v2, %v312_v3  ;;  %v432_v17 = vld [vmem:[%s13635_s1 + $0xc68] sm:$0xff] }
 0x14b   :  { %6730 = vmatprep.subr.bf16.mxu1 %v9066_v12  ;;  %v11109_v42 = vadd.f32 %v6436_v34, %v6396_v33  ;;  %v300_v12 = vld [vmem:[%s13635_s1 + $0x848] sm:$0xff]  ;;  %v8905_v53 = vcombine.low %v308_v2, %v312_v3  ;;  %v9026_v24 = vcombine.high %v428_v41, %v432_v17  ;;  %v9025_v34 = vcombine.low %v428_v41, %v432_v17 }
 0x14c   :  { %v6438_v43 = vpop.f32.mrf.mxu1  ;;  %6690 = vmatpush1.bf16.msra.mxu0 %v8937_v25  ;;  %v6398_v21 = vpop.f32.mrf.mxu0  ;;  %v8898_v23 = vcombine.high %v300_v12, %v304_v13  ;;  %v292_v25 = vld [vmem:[%s13635_s1 + $0x808] sm:$0xff]  ;;  %v8897_v33 = vcombine.low %v300_v12, %v304_v13 }
 0x14d   :  { %6691 = vmatprep.subr.bf16.mxu0 %v8930_v30  ;;  %v296_v54 = vld [vmem:[%s13635_s1 + $0x828] sm:$0xff] }
 0x14e   :  { %6731 = vmatpush1.bf16.msra.mxu1 %v9065_v27  ;;  %v6439_v51 = vpop.f32.mrf.mxu1  ;;  %v420_v27 = vld [vmem:[%s13635_s1 + $0xc08] sm:$0xff]  ;;  %v8889_v43 = vcombine.low %v292_v25, %v296_v54 }
 0x14f   :  { %6732 = vmatprep.subr.bf16.mxu1 %v9058_v35  ;;  %v424_v30 = vld [vmem:[%s13635_s1 + $0xc28] sm:$0xff]  ;;  %v8890_v35 = vcombine.high %v292_v25, %v296_v54 }
 0x150   :  { %6692 = vmatpush1.bf16.msra.mxu0 %v8929_v45  ;;  %v9018_v15 = vcombine.high %v420_v27, %v424_v30  ;;  %v412_v37 = vld [vmem:[%s13635_s1 + $0xbc8] sm:$0xff]  ;;  %v9017_v45 = vcombine.low %v420_v27, %v424_v30 }
 0x151   :  { %6693 = vmatprep.subr.bf16.mxu0 %v8922_v48  ;;  %v416_v38 = vld [vmem:[%s13635_s1 + $0xbe8] sm:$0xff] }
 0x152   :  { %6733 = vmatpush1.bf16.msra.mxu1 %v9057_v47  ;;  %v540_v19 = vld [vmem:[%s13635_s1 + $0xfc8] sm:$0xff]  ;;  %v9010_v21 = vcombine.high %v412_v37, %v416_v38  ;;  %v9009_v57 = vcombine.low %v412_v37, %v416_v38 }
 0x153   :  { %6734 = vmatprep.subr.bf16.mxu1 %v9050_v52  ;;  %v544_v28 = vld [vmem:[%s13635_s1 + $0xfe8] sm:$0xff] }
 0x154   :  { %6694 = vmatpush1.bf16.msra.mxu0 %v8921_v7  ;;  %v9138_v47 = vcombine.high %v540_v19, %v544_v28  ;;  %v404_v48 = vld [vmem:[%s13635_s1 + $0xb88] sm:$0xff]  ;;  %v9137_v60 = vcombine.low %v540_v19, %v544_v28 }
 0x155   :  { %6695 = vmatprep.subr.bf16.mxu0 %v8914_v0  ;;  %v408_v51 = vld [vmem:[%s13635_s1 + $0xba8] sm:$0xff] }
 0x156   :  { %6735 = vmatpush1.bf16.msra.mxu1 %v9049_v63  ;;  %v532_v52 = vld [vmem:[%s13635_s1 + $0xf88] sm:$0xff]  ;;  %v9002_v62 = vcombine.high %v404_v48, %v408_v51  ;;  %v9001_v3 = vcombine.low %v404_v48, %v408_v51 }
 0x157   :  { %6736 = vmatprep.subr.bf16.mxu1 %v9042_v1  ;;  %v9130_v7 = vcombine.high %v532_v52, %v536_v56  ;;  %v396_v63 = vld [vmem:[%s13635_s1 + $0xb48] sm:$0xff]  ;;  %v9129_v5 = vcombine.low %v532_v52, %v536_v56 }
 0x158   :  { %6696 = vmatpush1.bf16.msra.mxu0 %v8913_v6  ;;  %v400_v0 = vld [vmem:[%s13635_s1 + $0xb68] sm:$0xff] }
 0x159   :  { %6697 = vmatprep.subr.bf16.mxu0 %v8906_v10  ;;  %v524_v1 = vld [vmem:[%s13635_s1 + $0xf48] sm:$0xff]  ;;  %v8994_v9 = vcombine.high %v396_v63, %v400_v0  ;;  %v8993_v13 = vcombine.low %v396_v63, %v400_v0 }
 0x15a   :  { %6737 = vmatpush1.bf16.msra.mxu1 %v9041_v39  ;;  %v528_v2 = vld [vmem:[%s13635_s1 + $0xf68] sm:$0xff] }
 0x15b   :  { %6738 = vmatprep.subr.bf16.mxu1 %v9034_v11  ;;  %v9122_v6 = vcombine.high %v524_v1, %v528_v2  ;;  %v388_v39 = vld [vmem:[%s13635_s1 + $0xb08] sm:$0xff]  ;;  %v9121_v41 = vcombine.low %v524_v1, %v528_v2 }
 0x15c   :  { %6698 = vmatpush1.bf16.msra.mxu0 %v8905_v53  ;;  %v392_v10 = vld [vmem:[%s13635_s1 + $0xb28] sm:$0xff] }
 0x15d   :  { %6699 = vmatprep.subr.bf16.mxu0 %v8898_v23  ;;  %v516_v11 = vld [vmem:[%s13635_s1 + $0xf08] sm:$0xff]  ;;  %v8986_v17 = vcombine.high %v388_v39, %v392_v10  ;;  %v8985_v54 = vcombine.low %v388_v39, %v392_v10 }
 0x15e   :  { %6739 = vmatpush1.bf16.msra.mxu1 %v9033_v22  ;;  %v520_v12 = vld [vmem:[%s13635_s1 + $0xf28] sm:$0xff] }
 0x15f   :  { %6740 = vmatprep.subr.bf16.mxu1 %v9026_v24  ;;  %v9114_v53 = vcombine.high %v516_v11, %v520_v12  ;;  %v380_v22 = vld [vmem:[%s13635_s1 + $0xac8] sm:$0xff]  ;;  %v9113_v27 = vcombine.low %v516_v11, %v520_v12 }
 0x160   :  { %6700 = vmatpush1.bf16.msra.mxu0 %v8897_v33  ;;  %v384_v23 = vld [vmem:[%s13635_s1 + $0xae8] sm:$0xff] }
 0x161   :  { %6701 = vmatprep.subr.bf16.mxu0 %v8890_v35  ;;  %v508_v24 = vld [vmem:[%s13635_s1 + $0xec8] sm:$0xff]  ;;  %v8978_v30 = vcombine.high %v380_v22, %v384_v23  ;;  %v8977_v38 = vcombine.low %v380_v22, %v384_v23 }
 0x162   :  { %6741 = vmatpush1.bf16.msra.mxu1 %v9025_v34  ;;  %v512_v25 = vld [vmem:[%s13635_s1 + $0xee8] sm:$0xff] }
 0x163   :  { %6742 = vmatprep.subr.bf16.mxu1 %v9018_v15  ;;  %v9106_v33 = vcombine.high %v508_v24, %v512_v25  ;;  %v372_v34 = vld [vmem:[%s13635_s1 + $0xa88] sm:$0xff]  ;;  %v9105_v19 = vcombine.low %v508_v24, %v512_v25 }
 0x164   :  { %6702 = vmatpush1.bf16.msra.mxu0 %v8889_v43  ;;  %v376_v35 = vld [vmem:[%s13635_s1 + $0xaa8] sm:$0xff] }
 0x165   :  { %6703 = vmatprep.subr.bf16.mxu0 %v9010_v21  ;;  %v500_v15 = vld [vmem:[%s13635_s1 + $0xe88] sm:$0xff]  ;;  %v8970_v28 = vcombine.high %v372_v34, %v376_v35  ;;  %v8969_v51 = vcombine.low %v372_v34, %v376_v35 }
 0x166   :  { %6743 = vmatpush1.bf16.msra.mxu1 %v9017_v45  ;;  %v504_v37 = vld [vmem:[%s13635_s1 + $0xea8] sm:$0xff] }
 0x167   :  { %6744 = vmatprep.subr.bf16.mxu1 %v9138_v47  ;;  %v9098_v43 = vcombine.high %v500_v15, %v504_v37  ;;  %v364_v45 = vld [vmem:[%s13635_s1 + $0xa48] sm:$0xff]  ;;  %v9097_v52 = vcombine.low %v500_v15, %v504_v37 }
 0x168   :  { %6704 = vmatpush2.bf16.msra.mxu0 %v9009_v57  ;;  %v368_v21 = vld [vmem:[%s13635_s1 + $0xa68] sm:$0xff] }
 0x169   :  { %6705 = vmatprep.subr.bf16.mxu0 %v9002_v62  ;;  %v492_v47 = vld [vmem:[%s13635_s1 + $0xe48] sm:$0xff]  ;;  %v8962_v56 = vcombine.high %v364_v45, %v368_v21  ;;  %v8961_v0 = vcombine.low %v364_v45, %v368_v21 }
 0x16a   :  { %6745 = vmatpush2.bf16.msra.mxu1 %v9137_v60  ;;  %v496_v48 = vld [vmem:[%s13635_s1 + $0xe68] sm:$0xff] }
 0x16b   :  { %6746 = vmatprep.subr.bf16.mxu1 %v9130_v7  ;;  %v9090_v57 = vcombine.high %v492_v47, %v496_v48  ;;  %v356_v60 = vld [vmem:[%s13635_s1 + $0xa08] sm:$0xff]  ;;  %v9089_v1 = vcombine.low %v492_v47, %v496_v48 }
 0x16c   :  { %6706 = vmatpush2.bf16.msra.mxu0 %v9001_v3  ;;  %v360_v62 = vld [vmem:[%s13635_s1 + $0xa28] sm:$0xff] }
 0x16d   :  { %6707 = vmatprep.subr.bf16.mxu0 %v8994_v9  ;;  %v484_v7 = vld [vmem:[%s13635_s1 + $0xe08] sm:$0xff]  ;;  %v8954_v2 = vcombine.high %v356_v60, %v360_v62  ;;  %v8953_v10 = vcombine.low %v356_v60, %v360_v62 }
 0x16e   :  { %6747 = vmatpush2.bf16.msra.mxu1 %v9129_v5  ;;  %v488_v63 = vld [vmem:[%s13635_s1 + $0xe28] sm:$0xff] }
 0x16f   :  { %6748 = vmatprep.subr.bf16.mxu1 %v9122_v6  ;;  %v9082_v3 = vcombine.high %v484_v7, %v488_v63  ;;  %v604_v5 = vld [vmem:[%s13635_s1 + $0x11c8] sm:$0xff]  ;;  %v9081_v11 = vcombine.low %v484_v7, %v488_v63 }
 0x170   :  { %6708 = vmatpush2.bf16.msra.mxu0 %v8993_v13  ;;  %v608_v9 = vld [vmem:[%s13635_s1 + $0x11e8] sm:$0xff] }
 0x171   :  { %6709 = vmatprep.subr.bf16.mxu0 %v8986_v17  ;;  %v732_v6 = vld [vmem:[%s13635_s1 + $0x15c8] sm:$0xff]  ;;  %v9202_v12 = vcombine.high %v604_v5, %v608_v9  ;;  %v9201_v23 = vcombine.low %v604_v5, %v608_v9 }
 0x172   :  { %6749 = vmatpush2.bf16.msra.mxu1 %v9121_v41  ;;  %v736_v39 = vld [vmem:[%s13635_s1 + $0x15e8] sm:$0xff] }
 0x173   :  { %6750 = vmatprep.subr.bf16.mxu1 %v9114_v53  ;;  %v9330_v13 = vcombine.high %v732_v6, %v736_v39  ;;  %v596_v41 = vld [vmem:[%s13635_s1 + $0x1188] sm:$0xff]  ;;  %v9329_v24 = vcombine.low %v732_v6, %v736_v39 }
 0x174   :  { %6710 = vmatpush2.bf16.msra.mxu0 %v8985_v54  ;;  %v600_v17 = vld [vmem:[%s13635_s1 + $0x11a8] sm:$0xff] }
 0x175   :  { %6711 = vmatprep.subr.bf16.mxu0 %v8978_v30  ;;  %v724_v53 = vld [vmem:[%s13635_s1 + $0x1588] sm:$0xff]  ;;  %v9194_v25 = vcombine.high %v596_v41, %v600_v17 }
 0x176   :  { %6751 = vmatpush2.bf16.msra.mxu1 %v9113_v27  ;;  %v728_v22 = vld [vmem:[%s13635_s1 + $0x15a8] sm:$0xff] }
 0x177   :  { %6752 = vmatprep.subr.bf16.mxu1 %v9106_v33  ;;  %v9322_v54 = vcombine.high %v724_v53, %v728_v22  ;;  %v588_v27 = vld [vmem:[%s13635_s1 + $0x1148] sm:$0xff] }
 0x178   :  { %6712 = vmatpush2.bf16.msra.mxu0 %v8977_v38  ;;  %v592_v30 = vld [vmem:[%s13635_s1 + $0x1168] sm:$0xff]  ;;  %v9193_v38 = vcombine.low %v596_v41, %v600_v17 }
 0x179   :  { %6713 = vmatprep.subr.bf16.mxu0 %v8970_v28  ;;  %v716_v34 = vld [vmem:[%s13635_s1 + $0x1548] sm:$0xff]  ;;  %v9321_v28 = vcombine.low %v724_v53, %v728_v22  ;;  %v9185_v62 = vcombine.low %v588_v27, %v592_v30 }
 0x17a   :  { %6753 = vmatpush2.bf16.msra.mxu1 %v9105_v19  ;;  %v720_v35 = vld [vmem:[%s13635_s1 + $0x1568] sm:$0xff] }
 0x17b   :  { %6754 = vmatprep.subr.bf16.mxu1 %v9098_v43  ;;  %v9186_v43 = vcombine.high %v588_v27, %v592_v30  ;;  %v9314_v48 = vcombine.high %v716_v34, %v720_v35  ;;  %v9313_v63 = vcombine.low %v716_v34, %v720_v35  ;;  %v576_v5 = vld [vmem:[%s13635_s1 + $0x10e8] sm:$0xff] }
 0x17c   :  { %6714 = vmatpush2.bf16.msra.mxu0 %v8969_v51  ;;  %v584_v51 = vld [vmem:[%s13635_s1 + $0x1128] sm:$0xff] }
 0x17d   :  { %6715 = vmatprep.subr.bf16.mxu0 %v8962_v56  ;;  %v708_v56 = vld [vmem:[%s13635_s1 + $0x1508] sm:$0xff] }
 0x17e   :  { %6755 = vmatpush2.bf16.msra.mxu1 %v9097_v52  ;;  %v700_v9 = vld [vmem:[%s13635_s1 + $0x14c8] sm:$0xff] }
 0x17f   :  { %6756 = vmatprep.subr.bf16.mxu1 %v9090_v57  ;;  %v704_v6 = vld [vmem:[%s13635_s1 + $0x14e8] sm:$0xff] }
 0x180   :  { %6716 = vmatpush2.bf16.msra.mxu0 %v8961_v0  ;;  %v568_v41 = vld [vmem:[%s13635_s1 + $0x10a8] sm:$0xff] }
 0x181   :  { %6717 = vmatprep.subr.bf16.mxu0 %v8954_v2  ;;  %v692_v17 = vld [vmem:[%s13635_s1 + $0x1488] sm:$0xff] }
 0x182   :  { %6757 = vmatpush2.bf16.msra.mxu1 %v9089_v1  ;;  %v696_v53 = vld [vmem:[%s13635_s1 + $0x14a8] sm:$0xff] }
 0x183   :  { %6758 = vmatprep.subr.bf16.mxu1 %v9082_v3  ;;  %v572_v3 = vld [vmem:[%s13635_s1 + $0x10c8] sm:$0xff]  ;;  %v9289_v35 = vcombine.low %v692_v17, %v696_v53 }
 0x184   :  { %6718 = vmatpush2.bf16.msra.mxu0 %v8953_v10  ;;  %v9169_v22 = vcombine.low %v572_v3, %v576_v5  ;;  %v560_v27 = vld [vmem:[%s13635_s1 + $0x1068] sm:$0xff] }
 0x185   :  { %6769 = vmatprep.subr.bf16.mxu0 %v9202_v12  ;;  %v9298_v12 = vcombine.high %v700_v9, %v704_v6  ;;  %v684_v30 = vld [vmem:[%s13635_s1 + $0x1448] sm:$0xff] }
 0x186   :  { %6759 = vmatpush2.bf16.msra.mxu1 %v9081_v11  ;;  %v9170_v11 = vcombine.high %v572_v3, %v576_v5  ;;  %v792_v3 = vld [vmem:[%s13635_s1 + $0x17a8] sm:$0xff] }
 0x187   :  { %6810 = vmatprep.subr.bf16.mxu1 %v9330_v13  ;;  %v6475_v33 = vpop.f32.mrf.mxu0  ;;  %6720 = vmatmul.mubr.bf16.vlgmr.msra.gmra.mxu0 %v10408_v36  ;;  %v564_v13 = vld [vmem:[%s13635_s1 + $0x1088] sm:$0xff] }
 0x188   :  { %v6476_v15 = vadd.f32 %v6475_v33, %v11092_v31  ;;  %6770 = vmatpush1.bf16.msra.mxu0 %v9201_v23  ;;  %v580_v31 = vld [vmem:[%s13635_s1 + $0x1108] sm:$0xff]  ;;  %6801 = vmatprep.mubr.bf16.mxu0 %v10438_v46  ;;  %v9297_v23 = vcombine.low %v700_v9, %v704_v6  ;;  %v9161_v34 = vcombine.low %v564_v13, %v568_v41 }
 0x189   :  { %v6516_v37 = vpop.f32.mrf.mxu1  ;;  %6761 = vmatmul.mubr.bf16.vlgmr.msra.gmra.mxu1 %v10423_v40  ;;  %v6477_v19 = vpop.f32.mrf.mxu0  ;;  %6771 = vmatprep.subr.bf16.mxu0 %v9194_v25  ;;  %v9178_v0 = vcombine.high %v580_v31, %v584_v51  ;;  %v9177_v39 = vcombine.low %v580_v31, %v584_v51  ;;  %v9290_v25 = vcombine.high %v692_v17, %v696_v53  ;;  %v688_v33 = vld [vmem:[%s13635_s1 + $0x1468] sm:$0xff] }
 0x18a   :  { %6811 = vmatpush1.bf16.msra.mxu1 %v9329_v24  ;;  %v11294_v45 = vadd.f32 %v6516_v37, %v6476_v15  ;;  %v6478_v21 = vadd.f32 %v6477_v19, %v11109_v42  ;;  %v712_v42 = vld [vmem:[%s13635_s1 + $0x1528] sm:$0xff]  ;;  %6842 = vmatprep.mubr.bf16.mxu1 %v10449_v49  ;;  %v9162_v24 = vcombine.high %v564_v13, %v568_v41 }
 0x18b   :  { %v6518_v47 = vpop.f32.mrf.mxu1  ;;  %6812 = vmatprep.subr.bf16.mxu1 %v9322_v54  ;;  %v6479_v52 = vpop.f32.mrf.mxu0  ;;  %v9306_v2 = vcombine.high %v708_v56, %v712_v42  ;;  %v9305_v10 = vcombine.low %v708_v56, %v712_v42  ;;  %v556_v54 = vld [vmem:[%s13635_s1 + $0x1048] sm:$0xff]  ;;  %v9282_v37 = vcombine.high %v684_v30, %v688_v33 }
 0x18c   :  { %v11311_v57 = vadd.f32 %v6518_v47, %v6478_v21  ;;  %6772 = vmatpush1.bf16.msra.mxu0 %v9193_v38  ;;  %v9154_v15 = vcombine.high %v556_v54, %v560_v27  ;;  %v548_v38 = vld [vmem:[%s13635_s1 + $0x1008] sm:$0xff]  ;;  %v9153_v21 = vcombine.low %v556_v54, %v560_v27  ;;  %v9281_v47 = vcombine.low %v684_v30, %v688_v33 }
 0x18d   :  { %v6520_v60 = vpop.f32.mrf.mxu1  ;;  %v6480_v7 = vpop.f32.mrf.mxu0  ;;  %6773 = vmatprep.subr.bf16.mxu0 %v9186_v43  ;;  %v552_v19 = vld [vmem:[%s13635_s1 + $0x1028] sm:$0xff] }
 0x18e   :  { %6813 = vmatpush1.bf16.msra.mxu1 %v9321_v28  ;;  %v676_v28 = vld [vmem:[%s13635_s1 + $0x1408] sm:$0xff]  ;;  %v9145_v60 = vcombine.low %v548_v38, %v552_v19 }
 0x18f   :  { %v6521_v1 = vpop.f32.mrf.mxu1  ;;  %6814 = vmatprep.subr.bf16.mxu1 %v9314_v48  ;;  %v680_v43 = vld [vmem:[%s13635_s1 + $0x1428] sm:$0xff]  ;;  %v9146_v48 = vcombine.high %v548_v38, %v552_v19 }
 0x190   :  { %6774 = vmatpush1.bf16.msra.mxu0 %v9185_v62  ;;  %v9274_v31 = vcombine.high %v676_v28, %v680_v43  ;;  %v668_v51 = vld [vmem:[%s13635_s1 + $0x13c8] sm:$0xff]  ;;  %v9273_v62 = vcombine.low %v676_v28, %v680_v43 }
 0x191   :  { %6775 = vmatprep.subr.bf16.mxu0 %v9178_v0  ;;  %v672_v52 = vld [vmem:[%s13635_s1 + $0x13e8] sm:$0xff] }
 0x192   :  { %6815 = vmatpush1.bf16.msra.mxu1 %v9313_v63  ;;  %v796_v56 = vld [vmem:[%s13635_s1 + $0x17c8] sm:$0xff]  ;;  %v9266_v7 = vcombine.high %v668_v51, %v672_v52  ;;  %v9265_v5 = vcombine.low %v668_v51, %v672_v52 }
 0x193   :  { %6816 = vmatprep.subr.bf16.mxu1 %v9306_v2  ;;  %v800_v42 = vld [vmem:[%s13635_s1 + $0x17e8] sm:$0xff] }
 0x194   :  { %6776 = vmatpush1.bf16.msra.mxu0 %v9177_v39  ;;  %v9394_v63 = vcombine.high %v796_v56, %v800_v42  ;;  %v660_v0 = vld [vmem:[%s13635_s1 + $0x1388] sm:$0xff]  ;;  %v9393_v9 = vcombine.low %v796_v56, %v800_v42 }
 0x195   :  { %6777 = vmatprep.subr.bf16.mxu0 %v9170_v11  ;;  %v664_v1 = vld [vmem:[%s13635_s1 + $0x13a8] sm:$0xff] }
 0x196   :  { %6817 = vmatpush1.bf16.msra.mxu1 %v9305_v10  ;;  %v788_v2 = vld [vmem:[%s13635_s1 + $0x1788] sm:$0xff]  ;;  %v9258_v6 = vcombine.high %v660_v0, %v664_v1  ;;  %v9257_v41 = vcombine.low %v660_v0, %v664_v1 }
 0x197   :  { %6818 = vmatprep.subr.bf16.mxu1 %v9298_v12  ;;  %v9386_v39 = vcombine.high %v788_v2, %v792_v3  ;;  %v652_v10 = vld [vmem:[%s13635_s1 + $0x1348] sm:$0xff]  ;;  %v9385_v17 = vcombine.low %v788_v2, %v792_v3 }
 0x198   :  { %6778 = vmatpush1.bf16.msra.mxu0 %v9169_v22  ;;  %v656_v11 = vld [vmem:[%s13635_s1 + $0x1368] sm:$0xff] }
 0x199   :  { %6779 = vmatprep.subr.bf16.mxu0 %v9162_v24  ;;  %v780_v12 = vld [vmem:[%s13635_s1 + $0x1748] sm:$0xff]  ;;  %v9250_v53 = vcombine.high %v652_v10, %v656_v11  ;;  %v9249_v27 = vcombine.low %v652_v10, %v656_v11 }
 0x19a   :  { %6819 = vmatpush1.bf16.msra.mxu1 %v9297_v23  ;;  %v784_v13 = vld [vmem:[%s13635_s1 + $0x1768] sm:$0xff] }
 0x19b   :  { %6820 = vmatprep.subr.bf16.mxu1 %v9290_v25  ;;  %v9378_v22 = vcombine.high %v780_v12, %v784_v13  ;;  %v644_v23 = vld [vmem:[%s13635_s1 + $0x1308] sm:$0xff]  ;;  %v9377_v30 = vcombine.low %v780_v12, %v784_v13 }
 0x19c   :  { %6780 = vmatpush1.bf16.msra.mxu0 %v9161_v34  ;;  %v648_v24 = vld [vmem:[%s13635_s1 + $0x1328] sm:$0xff] }
 0x19d   :  { %6781 = vmatprep.subr.bf16.mxu0 %v9154_v15  ;;  %v772_v25 = vld [vmem:[%s13635_s1 + $0x1708] sm:$0xff]  ;;  %v9242_v33 = vcombine.high %v644_v23, %v648_v24  ;;  %v9241_v19 = vcombine.low %v644_v23, %v648_v24 }
 0x19e   :  { %6821 = vmatpush1.bf16.msra.mxu1 %v9289_v35  ;;  %v776_v54 = vld [vmem:[%s13635_s1 + $0x1728] sm:$0xff] }
 0x19f   :  { %6822 = vmatprep.subr.bf16.mxu1 %v9282_v37  ;;  %v9370_v34 = vcombine.high %v772_v25, %v776_v54  ;;  %v636_v35 = vld [vmem:[%s13635_s1 + $0x12c8] sm:$0xff]  ;;  %v9369_v28 = vcombine.low %v772_v25, %v776_v54 }
 0x1a0   :  { %6782 = vmatpush1.bf16.msra.mxu0 %v9153_v21  ;;  %v640_v15 = vld [vmem:[%s13635_s1 + $0x12e8] sm:$0xff] }
 0x1a1   :  { %6783 = vmatprep.subr.bf16.mxu0 %v9146_v48  ;;  %v764_v37 = vld [vmem:[%s13635_s1 + $0x16c8] sm:$0xff]  ;;  %v9234_v43 = vcombine.high %v636_v35, %v640_v15  ;;  %v9233_v52 = vcombine.low %v636_v35, %v640_v15 }
 0x1a2   :  { %6823 = vmatpush1.bf16.msra.mxu1 %v9281_v47  ;;  %v768_v38 = vld [vmem:[%s13635_s1 + $0x16e8] sm:$0xff] }
 0x1a3   :  { %6824 = vmatprep.subr.bf16.mxu1 %v9274_v31  ;;  %v9362_v21 = vcombine.high %v764_v37, %v768_v38  ;;  %v628_v47 = vld [vmem:[%s13635_s1 + $0x1288] sm:$0xff]  ;;  %v9361_v56 = vcombine.low %v764_v37, %v768_v38 }
 0x1a4   :  { %6784 = vmatpush1.bf16.msra.mxu0 %v9145_v60  ;;  %v632_v48 = vld [vmem:[%s13635_s1 + $0x12a8] sm:$0xff] }
 0x1a5   :  { %6785 = vmatprep.subr.bf16.mxu0 %v9266_v7  ;;  %v756_v31 = vld [vmem:[%s13635_s1 + $0x1688] sm:$0xff]  ;;  %v9226_v42 = vcombine.high %v628_v47, %v632_v48  ;;  %v9225_v1 = vcombine.low %v628_v47, %v632_v48 }
 0x1a6   :  { %6825 = vmatpush1.bf16.msra.mxu1 %v9273_v62  ;;  %v760_v51 = vld [vmem:[%s13635_s1 + $0x16a8] sm:$0xff] }
 0x1a7   :  { %6826 = vmatprep.subr.bf16.mxu1 %v9394_v63  ;;  %v9354_v60 = vcombine.high %v756_v31, %v760_v51  ;;  %v620_v62 = vld [vmem:[%s13635_s1 + $0x1248] sm:$0xff]  ;;  %v9353_v2 = vcombine.low %v756_v31, %v760_v51 }
 0x1a8   :  { %6786 = vmatpush2.bf16.msra.mxu0 %v9265_v5  ;;  %v624_v7 = vld [vmem:[%s13635_s1 + $0x1268] sm:$0xff] }
 0x1a9   :  { %6787 = vmatprep.subr.bf16.mxu0 %v9258_v6  ;;  %v748_v63 = vld [vmem:[%s13635_s1 + $0x1648] sm:$0xff]  ;;  %v9218_v3 = vcombine.high %v620_v62, %v624_v7  ;;  %v9217_v11 = vcombine.low %v620_v62, %v624_v7 }
 0x1aa   :  { %6827 = vmatpush2.bf16.msra.mxu1 %v9393_v9  ;;  %v752_v0 = vld [vmem:[%s13635_s1 + $0x1668] sm:$0xff] }
 0x1ab   :  { %6828 = vmatprep.subr.bf16.mxu1 %v9386_v39  ;;  %v9346_v5 = vcombine.high %v748_v63, %v752_v0  ;;  %v612_v9 = vld [vmem:[%s13635_s1 + $0x1208] sm:$0xff]  ;;  %v9345_v12 = vcombine.low %v748_v63, %v752_v0 }
 0x1ac   :  { %6788 = vmatpush2.bf16.msra.mxu0 %v9257_v41  ;;  %v616_v6 = vld [vmem:[%s13635_s1 + $0x1228] sm:$0xff] }
 0x1ad   :  { %6789 = vmatprep.subr.bf16.mxu0 %v9250_v53  ;;  %v740_v39 = vld [vmem:[%s13635_s1 + $0x1608] sm:$0xff]  ;;  %v9210_v13 = vcombine.high %v612_v9, %v616_v6  ;;  %v9209_v24 = vcombine.low %v612_v9, %v616_v6 }
 0x1ae   :  { %6829 = vmatpush2.bf16.msra.mxu1 %v9385_v17  ;;  %v744_v10 = vld [vmem:[%s13635_s1 + $0x1628] sm:$0xff] }
 0x1af   :  { %6830 = vmatprep.subr.bf16.mxu1 %v9378_v22  ;;  %v9338_v41 = vcombine.high %v740_v39, %v744_v10  ;;  %v860_v17 = vld [vmem:[%s13635_s1 + $0x19c8] sm:$0xff]  ;;  %v9337_v25 = vcombine.low %v740_v39, %v744_v10 }
 0x1b0   :  { %6790 = vmatpush2.bf16.msra.mxu0 %v9249_v27  ;;  %v864_v53 = vld [vmem:[%s13635_s1 + $0x19e8] sm:$0xff] }
 0x1b1   :  { %6791 = vmatprep.subr.bf16.mxu0 %v9242_v33  ;;  %v988_v22 = vld [vmem:[%s13635_s1 + $0x1dc8] sm:$0xff]  ;;  %v9458_v54 = vcombine.high %v860_v17, %v864_v53  ;;  %v9457_v15 = vcombine.low %v860_v17, %v864_v53 }
 0x1b2   :  { %6831 = vmatpush2.bf16.msra.mxu1 %v9377_v30  ;;  %v992_v23 = vld [vmem:[%s13635_s1 + $0x1de8] sm:$0xff] }
 0x1b3   :  { %6832 = vmatprep.subr.bf16.mxu1 %v9370_v34  ;;  %v9586_v27 = vcombine.high %v988_v22, %v992_v23  ;;  %v852_v30 = vld [vmem:[%s13635_s1 + $0x1988] sm:$0xff]  ;;  %v9585_v37 = vcombine.low %v988_v22, %v992_v23 }
 0x1b4   :  { %6792 = vmatpush2.bf16.msra.mxu0 %v9241_v19  ;;  %v856_v33 = vld [vmem:[%s13635_s1 + $0x19a8] sm:$0xff] }
 0x1b5   :  { %6793 = vmatprep.subr.bf16.mxu0 %v9234_v43  ;;  %v980_v34 = vld [vmem:[%s13635_s1 + $0x1d88] sm:$0xff]  ;;  %v9450_v38 = vcombine.high %v852_v30, %v856_v33 }
 0x1b6   :  { %6833 = vmatpush2.bf16.msra.mxu1 %v9369_v28  ;;  %v984_v35 = vld [vmem:[%s13635_s1 + $0x1da8] sm:$0xff] }
 0x1b7   :  { %6834 = vmatprep.subr.bf16.mxu1 %v9362_v21  ;;  %v9578_v19 = vcombine.high %v980_v34, %v984_v35  ;;  %v844_v28 = vld [vmem:[%s13635_s1 + $0x1948] sm:$0xff] }
 0x1b8   :  { %6794 = vmatpush2.bf16.msra.mxu0 %v9233_v52  ;;  %v848_v43 = vld [vmem:[%s13635_s1 + $0x1968] sm:$0xff]  ;;  %v9449_v52 = vcombine.low %v852_v30, %v856_v33 }
 0x1b9   :  { %6795 = vmatprep.subr.bf16.mxu0 %v9226_v42  ;;  %v972_v47 = vld [vmem:[%s13635_s1 + $0x1d48] sm:$0xff]  ;;  %v9577_v42 = vcombine.low %v980_v34, %v984_v35  ;;  %v9441_v39 = vcombine.low %v844_v28, %v848_v43 }
 0x1ba   :  { %6835 = vmatpush2.bf16.msra.mxu1 %v9361_v56  ;;  %v976_v48 = vld [vmem:[%s13635_s1 + $0x1d68] sm:$0xff] }
 0x1bb   :  { %6836 = vmatprep.subr.bf16.mxu1 %v9354_v60  ;;  %v9442_v60 = vcombine.high %v844_v28, %v848_v43  ;;  %v9570_v0 = vcombine.high %v972_v47, %v976_v48  ;;  %v828_v22 = vld [vmem:[%s13635_s1 + $0x18c8] sm:$0xff] }
 0x1bc   :  { %6796 = vmatpush2.bf16.msra.mxu0 %v9225_v1  ;;  %v840_v1 = vld [vmem:[%s13635_s1 + $0x1928] sm:$0xff] }
 0x1bd   :  { %6797 = vmatprep.subr.bf16.mxu0 %v9218_v3  ;;  %v964_v3 = vld [vmem:[%s13635_s1 + $0x1d08] sm:$0xff] }
 0x1be   :  { %6837 = vmatpush2.bf16.msra.mxu1 %v9353_v2  ;;  %v832_v23 = vld [vmem:[%s13635_s1 + $0x18e8] sm:$0xff] }
 0x1bf   :  { %6838 = vmatprep.subr.bf16.mxu1 %v9346_v5  ;;  %v9426_v34 = vcombine.high %v828_v22, %v832_v23  ;;  %v948_v28 = vld [vmem:[%s13635_s1 + $0x1c88] sm:$0xff] }
 0x1c0   :  { %6798 = vmatpush2.bf16.msra.mxu0 %v9217_v11  ;;  %v9569_v11 = vcombine.low %v972_v47, %v976_v48  ;;  %v952_v43 = vld [vmem:[%s13635_s1 + $0x1ca8] sm:$0xff]  ;;  %v9425_v48 = vcombine.low %v828_v22, %v832_v23 }
 0x1c1   :  { %6799 = vmatprep.subr.bf16.mxu0 %v9210_v13 }
 0x1c2   :  { %6839 = vmatpush2.bf16.msra.mxu1 %v9345_v12 }
 0x1c3   :  { %6840 = vmatprep.subr.bf16.mxu1 %v9338_v41 }
 0x1c4   :  { %6800 = vmatpush2.bf16.msra.mxu0 %v9209_v24  ;;  %v956_v24 = vld [vmem:[%s13635_s1 + $0x1cc8] sm:$0xff] }
 0x1c5   :  { %6851 = vmatprep.subr.bf16.mxu0 %v9458_v54 }
 0x1c6   :  { %6841 = vmatpush2.bf16.msra.mxu1 %v9337_v25  ;;  %v960_v25 = vld [vmem:[%s13635_s1 + $0x1ce8] sm:$0xff] }
 0x1c7   :  { %6892 = vmatprep.subr.bf16.mxu1 %v9586_v27  ;;  %v6557_v21 = vpop.f32.mrf.mxu0  ;;  %6802 = vmatmul.mubr.bf16.vlgmr.msra.gmra.mxu0 %v10630_v4 }
 0x1c8   :  { %v6558_v31 = vadd.f32 %v6557_v21, %v11294_v45  ;;  %6852 = vmatpush1.bf16.msra.mxu0 %v9457_v15  ;;  %v836_v45 = vld [vmem:[%s13635_s1 + $0x1908] sm:$0xff]  ;;  %6883 = vmatprep.mubr.bf16.mxu0 %v10660_v14 }
 0x1c9   :  { %v6598_v51 = vpop.f32.mrf.mxu1  ;;  %6843 = vmatmul.mubr.bf16.vlgmr.msra.gmra.mxu1 %v10645_v8  ;;  %v6559_v56 = vpop.f32.mrf.mxu0  ;;  %6853 = vmatprep.subr.bf16.mxu0 %v9450_v38  ;;  %v9434_v12 = vcombine.high %v836_v45, %v840_v1  ;;  %v9433_v30 = vcombine.low %v836_v45, %v840_v1  ;;  %v820_v38 = vld [vmem:[%s13635_s1 + $0x1888] sm:$0xff] }
 0x1ca   :  { %6893 = vmatpush1.bf16.msra.mxu1 %v9585_v37  ;;  %v11496_v62 = vadd.f32 %v6598_v51, %v6558_v31  ;;  %v6560_v7 = vadd.f32 %v6559_v56, %v11311_v57  ;;  %v968_v57 = vld [vmem:[%s13635_s1 + $0x1d28] sm:$0xff]  ;;  %6924 = vmatprep.mubr.bf16.mxu1 %v10671_v18  ;;  %v9554_v37 = vcombine.high %v956_v24, %v960_v25 }
 0x1cb   :  { %v6600_v63 = vpop.f32.mrf.mxu1  ;;  %6894 = vmatprep.subr.bf16.mxu1 %v9578_v19  ;;  %v6561_v2 = vpop.f32.mrf.mxu0  ;;  %v9562_v53 = vcombine.high %v964_v3, %v968_v57  ;;  %v9561_v33 = vcombine.low %v964_v3, %v968_v57  ;;  %v824_v19 = vld [vmem:[%s13635_s1 + $0x18a8] sm:$0xff]  ;;  %v9553_v31 = vcombine.low %v956_v24, %v960_v25  ;;  %v9545_v3 = vcombine.low %v948_v28, %v952_v43 }
 0x1cc   :  { %v7589_v5 = vrot.slane %v11496_v62, 4  ;;  %v11514_v9 = vadd.f32 %v6600_v63, %v6560_v7  ;;  %6854 = vmatpush1.bf16.msra.mxu0 %v9449_v52  ;;  %v9418_v51 = vcombine.high %v820_v38, %v824_v19  ;;  %v816_v7 = vld [vmem:[%s13635_s1 + $0x1868] sm:$0xff]  ;;  %v9417_v2 = vcombine.low %v820_v38, %v824_v19 }
 0x1cd   :  { %v6602_v6 = vpop.f32.mrf.mxu1  ;;  %v6562_v10 = vpop.f32.mrf.mxu0  ;;  %6855 = vmatprep.subr.bf16.mxu0 %v9442_v60  ;;  %v812_v60 = vld [vmem:[%s13635_s1 + $0x1848] sm:$0xff] }
 0x1ce   :  { %6895 = vmatpush1.bf16.msra.mxu1 %v9577_v42  ;;  %v7590_v13 = vadd.f32 %v7589_v5, %v11496_v62  ;;  %v7595_v41 = vrot.slane %v11514_v9, 4  ;;  %v9546_v42 = vcombine.high %v948_v28, %v952_v43  ;;  %v940_v63 = vld [vmem:[%s13635_s1 + $0x1c48] sm:$0xff]  ;;  %v9410_v57 = vcombine.high %v812_v60, %v816_v7 }
 0x1cf   :  { %v6603_v17 = vpop.f32.mrf.mxu1  ;;  %6896 = vmatprep.subr.bf16.mxu1 %v9570_v0  ;;  %v944_v0 = vld [vmem:[%s13635_s1 + $0x1c68] sm:$0xff] }
 0x1d0   :  { %v7591_v54 = vrot.slane %v7590_v13, 2  ;;  %v7596_v27 = vadd.f32 %v7595_v41, %v11514_v9  ;;  %6856 = vmatpush1.bf16.msra.mxu0 %v9441_v39  ;;  %v9538_v39 = vcombine.high %v940_v63, %v944_v0  ;;  %v804_v10 = vld [vmem:[%s13635_s1 + $0x1808] sm:$0xff]  ;;  %v9409_v17 = vcombine.low %v812_v60, %v816_v7 }
 0x1d1   :  { %6857 = vmatprep.subr.bf16.mxu0 %v9434_v12  ;;  %v932_v12 = vld [vmem:[%s13635_s1 + $0x1c08] sm:$0xff] }
 0x1d2   :  { %6897 = vmatpush1.bf16.msra.mxu1 %v9569_v11  ;;  %v7592_v35 = vadd.f32 %v7591_v54, %v7590_v13  ;;  %v7597_v15 = vrot.slane %v7596_v27, 2  ;;  %v808_v11 = vld [vmem:[%s13635_s1 + $0x1828] sm:$0xff] }
 0x1d3   :  { %6898 = vmatprep.subr.bf16.mxu1 %v9562_v53  ;;  %v9537_v53 = vcombine.low %v940_v63, %v944_v0  ;;  %v9402_v22 = vcombine.high %v804_v10, %v808_v11  ;;  %v924_v54 = vld [vmem:[%s13635_s1 + $0x1bc8] sm:$0xff] }
 0x1d4   :  { %v7593_v21 = vrot.slane %v7592_v35, 1  ;;  %v7598_v47 = vadd.f32 %v7597_v15, %v7596_v27  ;;  %6858 = vmatpush1.bf16.msra.mxu0 %v9433_v30  ;;  %v1052_v27 = vld [vmem:[%s13635_s1 + $0x1fc8] sm:$0xff] }
 0x1d5   :  { %6859 = vmatprep.subr.bf16.mxu0 %v9426_v34  ;;  %v1056_v30 = vld [vmem:[%s13635_s1 + $0x1fe8] sm:$0xff] }
 0x1d6   :  { %6899 = vmatpush1.bf16.msra.mxu1 %v9561_v33  ;;  %v7594_v52 = vadd.f32 %v7593_v21, %v7592_v35  ;;  %v7599_v56 = vrot.slane %v7598_v47, 1  ;;  %v9401_v35 = vcombine.low %v804_v10, %v808_v11  ;;  %v9650_v28 = vcombine.high %v1052_v27, %v1056_v30  ;;  %v916_v43 = vld [vmem:[%s13635_s1 + $0x1b88] sm:$0xff] }
 0x1d7   :  { %6900 = vmatprep.subr.bf16.mxu1 %v9554_v37  ;;  %v920_v21 = vld [vmem:[%s13635_s1 + $0x1ba8] sm:$0xff] }
 0x1d8   :  { %v7638_v45 = vmul.f32 0.125, %v7594_v52  ;;  %v7600_v1 = vadd.f32 %v7599_v56, %v7598_v47  ;;  %6860 = vmatpush1.bf16.msra.mxu0 %v9425_v48  ;;  %v1044_v47 = vld [vmem:[%s13635_s1 + $0x1f88] sm:$0xff]  ;;  %v9649_v56 = vcombine.low %v1052_v27, %v1056_v30 }
 0x1d9   :  { %6861 = vmatprep.subr.bf16.mxu0 %v9418_v51  ;;  %v1048_v48 = vld [vmem:[%s13635_s1 + $0x1fa8] sm:$0xff] }
 0x1da   :  { %6901 = vmatpush1.bf16.msra.mxu1 %v9553_v31  ;;  %v11556_v5 = vsub.f32 %v11496_v62, %v7638_v45  ;;  %v7639_v6 = vmul.f32 0.125, %v7600_v1  ;;  %v936_v62 = vld [vmem:[%s13635_s1 + $0x1c28] sm:$0xff]  ;;  %v9642_v63 = vcombine.high %v1044_v47, %v1048_v48 }
 0x1db   :  { %6902 = vmatprep.subr.bf16.mxu1 %v9546_v42  ;;  %v9530_v25 = vcombine.high %v932_v12, %v936_v62  ;;  %v9529_v15 = vcombine.low %v932_v12, %v936_v62  ;;  %v9514_v42 = vcombine.high %v916_v43, %v920_v21  ;;  %v908_v0 = vld [vmem:[%s13635_s1 + $0x1b48] sm:$0xff] }
 0x1dc   :  { %v7654_v13 = vmul.f32 %v11556_v5, %v11556_v5  ;;  %v11573_v41 = vsub.f32 %v11514_v9, %v7639_v6  ;;  %6862 = vmatpush1.bf16.msra.mxu0 %v9417_v2  ;;  %v928_v9 = vld [vmem:[%s13635_s1 + $0x1be8] sm:$0xff]  ;;  %v9513_v6 = vcombine.low %v916_v43, %v920_v21 }
 0x1dd   :  { %6863 = vmatprep.subr.bf16.mxu0 %v9410_v57  ;;  %v9522_v37 = vcombine.high %v924_v54, %v928_v9  ;;  %v9521_v52 = vcombine.low %v924_v54, %v928_v9  ;;  %v912_v45 = vld [vmem:[%s13635_s1 + $0x1b68] sm:$0xff] }
 0x1de   :  { %6903 = vmatpush1.bf16.msra.mxu1 %v9545_v3  ;;  %v7662_v23 = vrot.slane %v7654_v13, 4  ;;  %v7655_v24 = vmul.f32 %v11573_v41, %v11573_v41  ;;  %v1036_v1 = vld [vmem:[%s13635_s1 + $0x1f48] sm:$0xff]  ;;  %v9506_v10 = vcombine.high %v908_v0, %v912_v45 }
 0x1df   :  { %6904 = vmatprep.subr.bf16.mxu1 %v9538_v39  ;;  %v1040_v2 = vld [vmem:[%s13635_s1 + $0x1f68] sm:$0xff]  ;;  %v9641_v39 = vcombine.low %v1044_v47, %v1048_v48 }
 0x1e0   :  { %v7663_v33 = vadd.f32 %v7662_v23, %v7654_v13  ;;  %v7668_v34 = vrot.slane %v7655_v24, 4  ;;  %6864 = vmatpush1.bf16.msra.mxu0 %v9409_v17  ;;  %v9634_v62 = vcombine.high %v1036_v1, %v1040_v2  ;;  %v900_v13 = vld [vmem:[%s13635_s1 + $0x1b08] sm:$0xff]  ;;  %v9633_v54 = vcombine.low %v1036_v1, %v1040_v2 }
 0x1e1   :  { %6865 = vmatprep.subr.bf16.mxu0 %v9402_v22  ;;  %v904_v17 = vld [vmem:[%s13635_s1 + $0x1b28] sm:$0xff] }
 0x1e2   :  { %6905 = vmatpush1.bf16.msra.mxu1 %v9537_v53  ;;  %v7664_v38 = vrot.slane %v7663_v33, 2  ;;  %v7669_v19 = vadd.f32 %v7668_v34, %v7655_v24  ;;  %v1028_v53 = vld [vmem:[%s13635_s1 + $0x1f08] sm:$0xff]  ;;  %v9498_v9 = vcombine.high %v900_v13, %v904_v17 }
 0x1e3   :  { %6906 = vmatprep.subr.bf16.mxu1 %v9530_v25  ;;  %v1032_v22 = vld [vmem:[%s13635_s1 + $0x1f28] sm:$0xff]  ;;  %v9505_v25 = vcombine.low %v908_v0, %v912_v45 }
 0x1e4   :  { %v7665_v31 = vadd.f32 %v7664_v38, %v7663_v33  ;;  %v7670_v51 = vrot.slane %v7669_v19, 2  ;;  %6866 = vmatpush1.bf16.msra.mxu0 %v9401_v35  ;;  %v9626_v30 = vcombine.high %v1028_v53, %v1032_v22  ;;  %v892_v33 = vld [vmem:[%s13635_s1 + $0x1ac8] sm:$0xff]  ;;  %v9625_v38 = vcombine.low %v1028_v53, %v1032_v22  ;;  %v93_v22 = vld [vmem:[%s13635_s1 + $0x1d0] sm:$0xff] }
 0x1e5   :  { %6867 = vmatprep.subr.bf16.mxu0 %v9522_v37  ;;  %v896_v34 = vld [vmem:[%s13635_s1 + $0x1ae8] sm:$0xff]  ;;  %v9497_v37 = vcombine.low %v900_v13, %v904_v17 }
 0x1e6   :  { %6907 = vmatpush1.bf16.msra.mxu1 %v9529_v15  ;;  %v7666_v60 = vrot.slane %v7665_v31, 1  ;;  %v7671_v7 = vadd.f32 %v7670_v51, %v7669_v19  ;;  %v1020_v35 = vld [vmem:[%s13635_s1 + $0x1ec8] sm:$0xff]  ;;  %v9490_v19 = vcombine.high %v892_v33, %v896_v34 }
 0x1e7   :  { %6908 = vmatprep.subr.bf16.mxu1 %v9650_v28  ;;  %v1024_v15 = vld [vmem:[%s13635_s1 + $0x1ee8] sm:$0xff] }
 0x1e8   :  { %v7667_v3 = vadd.f32 %v7666_v60, %v7665_v31  ;;  %v7672_v57 = vrot.slane %v7671_v7, 1  ;;  %6868 = vmatpush2.bf16.msra.mxu0 %v9521_v52  ;;  %v9618_v28 = vcombine.high %v1020_v35, %v1024_v15  ;;  %v884_v43 = vld [vmem:[%s13635_s1 + $0x1a88] sm:$0xff]  ;;  %v9489_v31 = vcombine.low %v892_v33, %v896_v34 }
 0x1e9   :  { %6869 = vmatprep.subr.bf16.mxu0 %v9514_v42  ;;  %v888_v21 = vld [vmem:[%s13635_s1 + $0x1aa8] sm:$0xff]  ;;  %v9617_v51 = vcombine.low %v1020_v35, %v1024_v15  ;;  %v11695_v34 = vsub.s32 3, %v10832_v32  ;;  %v85_v35 = vld [vmem:[%s13635_s1 + $0x190] sm:$0xff] }
 0x1ea   :  { %6909 = vmatpush2.bf16.msra.mxu1 %v9649_v56  ;;  %v7710_v11 = vmul.f32 0.125, %v7667_v3  ;;  %v7673_v12 = vadd.f32 %v7672_v57, %v7671_v7  ;;  %v1012_v47 = vld [vmem:[%s13635_s1 + $0x1e88] sm:$0xff]  ;;  %v9482_v52 = vcombine.high %v884_v43, %v888_v21  ;;  %v9481_v0 = vcombine.low %v884_v43, %v888_v21  ;;  %v89_v15 = vld [vmem:[%s13635_s1 + $0x1b0] sm:$0xff] }
 0x1eb   :  { %6910 = vmatprep.subr.bf16.mxu1 %v9642_v63  ;;  %v1016_v48 = vld [vmem:[%s13635_s1 + $0x1ea8] sm:$0xff] }
 0x1ec   :  { %v7719_v23 = vadd.f32 1e-05, %v7710_v11  ;;  %v7711_v24 = vmul.f32 0.125, %v7673_v12  ;;  %6870 = vmatpush2.bf16.msra.mxu0 %v9513_v6  ;;  %v9610_v56 = vcombine.high %v1012_v47, %v1016_v48  ;;  %v876_v42 = vld [vmem:[%s13635_s1 + $0x1a48] sm:$0xff]  ;;  %v9609_v45 = vcombine.low %v1012_v47, %v1016_v48 }
 0x1ed   :  { %6871 = vmatprep.subr.bf16.mxu0 %v9506_v10  ;;  %v880_v60 = vld [vmem:[%s13635_s1 + $0x1a68] sm:$0xff]  ;;  %v8684_v47 = vcombine.high %v85_v35, %v89_v15 }
 0x1ee   :  { %6911 = vmatpush2.bf16.msra.mxu1 %v9641_v39  ;;  %v7720_v27 = vadd.f32 1e-05, %v7711_v24  ;;  %9890 = vrsqrt.f32 %v7719_v23  ;;  %v1004_v7 = vld [vmem:[%s13635_s1 + $0x1e48] sm:$0xff]  ;;  %v9474_v1 = vcombine.high %v876_v42, %v880_v60  ;;  %v9473_v11 = vcombine.low %v876_v42, %v880_v60  ;;  %v97_v23 = vld [vmem:[%s13635_s1 + $0x1f0] sm:$0xff] }
 0x1ef   :  { %6912 = vmatprep.subr.bf16.mxu1 %v9634_v62  ;;  %v1008_v63 = vld [vmem:[%s13635_s1 + $0x1e68] sm:$0xff]  ;;  %v221_v24 = vld [vmem:[%s13635_s1 + $0x5d0] sm:$0xff]  ;;  %v8691_v43 = vcombine.low %v93_v22, %v97_v23 }
 0x1f0   :  { %9892 = vrsqrt.f32 %v7720_v27  ;;  %6872 = vmatpush2.bf16.msra.mxu0 %v9505_v25  ;;  %v9602_v2 = vcombine.high %v1004_v7, %v1008_v63  ;;  %v868_v3 = vld [vmem:[%s13635_s1 + $0x1a08] sm:$0xff]  ;;  %v9601_v62 = vcombine.low %v1004_v7, %v1008_v63  ;;  %v225_v25 = vld [vmem:[%s13635_s1 + $0x5f0] sm:$0xff] }
 0x1f1   :  { %6873 = vmatprep.subr.bf16.mxu0 %v9498_v9  ;;  %v872_v57 = vld [vmem:[%s13635_s1 + $0x1a28] sm:$0xff]  ;;  %v11692_v9 = vsub.s32 2, %v10832_v32  ;;  %v8820_v33 = vcombine.high %v221_v24, %v225_v25  ;;  %v8819_v21 = vcombine.low %v221_v24, %v225_v25  ;;  %v205_v42 = vld [vmem:[%s13635_s1 + $0x550] sm:$0xff] }
 0x1f2   :  { %6913 = vmatpush2.bf16.msra.mxu1 %v9633_v54  ;;  %v996_v6 = vld [vmem:[%s13635_s1 + $0x1e08] sm:$0xff]  ;;  %v9466_v13 = vcombine.high %v868_v3, %v872_v57  ;;  %v9465_v54 = vcombine.low %v868_v3, %v872_v57  ;;  %v209_v60 = vld [vmem:[%s13635_s1 + $0x570] sm:$0xff] }
 0x1f3   :  { %6914 = vmatprep.subr.bf16.mxu1 %v9626_v30  ;;  %v1000_v39 = vld [vmem:[%s13635_s1 + $0x1e28] sm:$0xff]  ;;  %v8692_v30 = vcombine.high %v93_v22, %v97_v23  ;;  %v201_v22 = vld [vmem:[%s13635_s1 + $0x530] sm:$0xff] }
 0x1f4   :  { %6874 = vmatpush2.bf16.msra.mxu0 %v9497_v37  ;;  %v9594_v53 = vcombine.high %v996_v6, %v1000_v39  ;;  %v9593_v27 = vcombine.low %v996_v6, %v1000_v39  ;;  %v213_v37 = vld [vmem:[%s13635_s1 + $0x590] sm:$0xff]  ;;  %v8804_v39 = vcombine.high %v205_v42, %v209_v60 }
 0x1f5   :  { %6875 = vmatprep.subr.bf16.mxu0 %v9490_v19  ;;  %v9910_v19 = vld [vmem:[%s13637_s2] sm:$0xff] }
 0x1f6   :  { %6915 = vmatpush2.bf16.msra.mxu1 %v9625_v38  ;;  %v217_v38 = vld [vmem:[%s13635_s1 + $0x5b0] sm:$0xff]  ;;  %v1076_v48 = vrot.slane %v9910_v19, %v11695_v34 }
 0x1f7   :  { %6916 = vmatprep.subr.bf16.mxu1 %v9618_v28  ;;  %v1072_v28 = vrot.slane %v9910_v19, %v11692_v9  ;;  %v193_v19 = vld [vmem:[%s13635_s1 + $0x4f0] sm:$0xff] }
 0x1f8   :  { %6876 = vmatpush2.bf16.msra.mxu0 %v9489_v31  ;;  %v8812_v31 = vcombine.high %v213_v37, %v217_v38 }
 0x1f9   :  { %6877 = vmatprep.subr.bf16.mxu0 %v9482_v52  ;;  %v81_v52 = vld [vmem:[%s13635_s1 + $0x170] sm:$0xff] }
 0x1fa   :  { %6917 = vmatpush2.bf16.msra.mxu1 %v9617_v51  ;;  %v77_v51 = vld [vmem:[%s13635_s1 + $0x150] sm:$0xff] }
 0x1fb   :  { %6918 = vmatprep.subr.bf16.mxu1 %v9610_v56  ;;  %v11673_v10 = vpop.eup %9890  ;;  %v8675_v25 = vcombine.low %v77_v51, %v81_v52 }
 0x1fc   :  { %6878 = vmatpush2.bf16.msra.mxu0 %v9481_v0  ;;  %v8683_v0 = vcombine.low %v85_v35, %v89_v15  ;;  %v61_v15 = vld [vmem:[%s13635_s1 + $0xd0] sm:$0xff] }
 0x1fd   :  { %v11675_v12 = vpop.eup %9892  ;;  %6879 = vmatprep.subr.bf16.mxu0 %v9474_v1  ;;  %v8811_v1 = vcombine.low %v213_v37, %v217_v38  ;;  %v65_v37 = vld [vmem:[%s13635_s1 + $0xf0] sm:$0xff] }
 0x1fe   :  { %6919 = vmatpush2.bf16.msra.mxu1 %v9609_v45  ;;  %v7743_v17 = vcombine.low %v11673_v10, %v11675_v12  ;;  %v189_v38 = vld [vmem:[%s13635_s1 + $0x4d0] sm:$0xff]  ;;  %v12540_v10 = vsub.s32 5, %v10832_v32  ;;  %v86_v12 = vld [vmem:[%s13635_s1 + $0x198] sm:$0xff] }
 0x1ff   :  { %6920 = vmatprep.subr.bf16.mxu1 %v9602_v2  ;;  %v8676_v2 = vcombine.high %v77_v51, %v81_v52  ;;  %v181_v51 = vld [vmem:[%s13635_s1 + $0x490] sm:$0xff] }
 0x200   :  { %6880 = vmatpush2.bf16.msra.mxu0 %v9473_v11  ;;  %v69_v11 = vld [vmem:[%s13635_s1 + $0x110] sm:$0xff] }
 0x201   :  { %6881 = vmatprep.subr.bf16.mxu0 %v9466_v13  ;;  %v185_v52 = vld [vmem:[%s13635_s1 + $0x4b0] sm:$0xff] }
 0x202   :  { %6921 = vmatpush2.bf16.msra.mxu1 %v9601_v62  ;;  %v73_v62 = vld [vmem:[%s13635_s1 + $0x130] sm:$0xff] }
 0x203   :  { %6922 = vmatprep.subr.bf16.mxu1 %v9594_v53  ;;  %v197_v53 = vld [vmem:[%s13635_s1 + $0x510] sm:$0xff] }
 0x204   :  { %6882 = vmatpush2.bf16.msra.mxu0 %v9465_v54  ;;  %v8796_v35 = vcombine.high %v197_v53, %v201_v22 }
 0x205   :  { %6933 = vmatprep.subr.bf16.mxu0 %v8692_v30  ;;  %v8668_v30 = vcombine.high %v69_v11, %v73_v62 }
 0x206   :  { %6923 = vmatpush2.bf16.msra.mxu1 %v9593_v27  ;;  %v8803_v27 = vcombine.low %v205_v42, %v209_v60  ;;  %v8787_v42 = vcombine.low %v189_v38, %v193_v19 }
 0x207   :  { %6974 = vmatprep.subr.bf16.mxu1 %v8820_v33  ;;  %v6639_v56 = vpop.f32.mrf.mxu0  ;;  %6884 = vmatmul.mubr.bf16.vlgmr.msra.gmra.mxu0 %v10863_v55 }
 0x208   :  { %v6640_v7 = vadd.f32 %v6639_v56, %v1072_v28  ;;  %6934 = vmatpush1.bf16.msra.mxu0 %v8691_v43  ;;  %6965 = vmatprep.mubr.bf16.mxu0 %v10056_v58  ;;  %v8667_v28 = vcombine.low %v69_v11, %v73_v62  ;;  %v8795_v43 = vcombine.low %v197_v53, %v201_v22  ;;  %v37_v11 = vld [vmem:[%s13635_s1 + $0x10] sm:$0xff] }
 0x209   :  { %v6680_v63 = vpop.f32.mrf.mxu1  ;;  %6925 = vmatmul.mubr.bf16.vlgmr.msra.gmra.mxu1 %v10874_v61  ;;  %v6641_v45 = vpop.f32.mrf.mxu0  ;;  %6935 = vmatprep.subr.bf16.mxu0 %v8684_v47  ;;  %v8788_v47 = vcombine.high %v189_v38, %v193_v19  ;;  %v8659_v56 = vcombine.low %v61_v15, %v65_v37  ;;  %v41_v62 = vld [vmem:[%s13635_s1 + $0x30] sm:$0xff] }
 0x20a   :  { %6975 = vmatpush1.bf16.msra.mxu1 %v8819_v21  ;;  %v11728_v3 = vadd.f32 %v6680_v63, %v6640_v7  ;;  %v6642_v57 = vadd.f32 %v6641_v45, %v1076_v48  ;;  %7006 = vmatprep.mubr.bf16.mxu1 %v10060_v59  ;;  %v8660_v21 = vcombine.high %v61_v15, %v65_v37  ;;  %v53_v48 = vld [vmem:[%s13635_s1 + $0x90] sm:$0xff] }
 0x20b   :  { %v6682_v6 = vpop.f32.mrf.mxu1  ;;  %6976 = vmatprep.subr.bf16.mxu1 %v8812_v31  ;;  %v6643_v13 = vpop.f32.mrf.mxu0  ;;  %v57_v31 = vld [vmem:[%s13635_s1 + $0xb0] sm:$0xff]  ;;  %v8780_v7 = vcombine.high %v181_v51, %v185_v52  ;;  %v8635_v15 = vcombine.low %v37_v11, %v41_v62 }
 0x20c   :  { %v11744_v23 = vadd.f32 %v6682_v6, %v6642_v57  ;;  %6936 = vmatpush1.bf16.msra.mxu0 %v8683_v0  ;;  %v8652_v60 = vcombine.high %v53_v48, %v57_v31  ;;  %v45_v63 = vld [vmem:[%s13635_s1 + $0x50] sm:$0xff]  ;;  %v8779_v57 = vcombine.low %v181_v51, %v185_v52 }
 0x20d   :  { %v6684_v24 = vpop.f32.mrf.mxu1  ;;  %v6644_v54 = vpop.f32.mrf.mxu0  ;;  %6937 = vmatprep.subr.bf16.mxu0 %v8676_v2  ;;  %v49_v0 = vld [vmem:[%s13635_s1 + $0x70] sm:$0xff]  ;;  %v8651_v2 = vcombine.low %v53_v48, %v57_v31 }
 0x20e   :  { %6977 = vmatpush1.bf16.msra.mxu1 %v8811_v1  ;;  %v173_v45 = vld [vmem:[%s13635_s1 + $0x450] sm:$0xff]  ;;  %v8644_v6 = vcombine.high %v45_v63, %v49_v0  ;;  %v8643_v22 = vcombine.low %v45_v63, %v49_v0 }
 0x20f   :  { %v6685_v33 = vpop.f32.mrf.mxu1  ;;  %6978 = vmatprep.subr.bf16.mxu1 %v8804_v39  ;;  %v177_v1 = vld [vmem:[%s13635_s1 + $0x470] sm:$0xff] }
 0x210   :  { %6938 = vmatpush1.bf16.msra.mxu0 %v8675_v25  ;;  %v8772_v39 = vcombine.high %v173_v45, %v177_v1  ;;  %v165_v13 = vld [vmem:[%s13635_s1 + $0x410] sm:$0xff]  ;;  %v8771_v24 = vcombine.low %v173_v45, %v177_v1  ;;  %v8636_v25 = vcombine.high %v37_v11, %v41_v62 }
 0x211   :  { %6939 = vmatprep.subr.bf16.mxu0 %v8668_v30  ;;  %v169_v53 = vld [vmem:[%s13635_s1 + $0x430] sm:$0xff] }
 0x212   :  { %6979 = vmatpush1.bf16.msra.mxu1 %v8803_v27  ;;  %v8764_v54 = vcombine.high %v165_v13, %v169_v53  ;;  %v157_v27 = vld [vmem:[%s13635_s1 + $0x3d0] sm:$0xff]  ;;  %v8763_v37 = vcombine.low %v165_v13, %v169_v53 }
 0x213   :  { %6980 = vmatprep.subr.bf16.mxu1 %v8796_v35  ;;  %v161_v30 = vld [vmem:[%s13635_s1 + $0x3f0] sm:$0xff] }
 0x214   :  { %6940 = vmatpush1.bf16.msra.mxu0 %v8667_v28  ;;  %v285_v33 = vld [vmem:[%s13635_s1 + $0x7d0] sm:$0xff]  ;;  %v8756_v38 = vcombine.high %v157_v27, %v161_v30  ;;  %v8755_v48 = vcombine.low %v157_v27, %v161_v30 }
 0x215   :  { %6941 = vmatprep.subr.bf16.mxu0 %v8660_v21  ;;  %v289_v35 = vld [vmem:[%s13635_s1 + $0x7f0] sm:$0xff] }
 0x216   :  { %6981 = vmatpush1.bf16.msra.mxu1 %v8795_v43  ;;  %v8884_v19 = vcombine.high %v285_v33, %v289_v35  ;;  %v149_v28 = vld [vmem:[%s13635_s1 + $0x390] sm:$0xff]  ;;  %v8883_v31 = vcombine.low %v285_v33, %v289_v35 }
 0x217   :  { %6982 = vmatprep.subr.bf16.mxu1 %v8788_v47  ;;  %v153_v43 = vld [vmem:[%s13635_s1 + $0x3b0] sm:$0xff] }
 0x218   :  { %6942 = vmatpush1.bf16.msra.mxu0 %v8659_v56  ;;  %v277_v21 = vld [vmem:[%s13635_s1 + $0x790] sm:$0xff]  ;;  %v8748_v51 = vcombine.high %v149_v28, %v153_v43  ;;  %v8747_v63 = vcombine.low %v149_v28, %v153_v43 }
 0x219   :  { %6943 = vmatprep.subr.bf16.mxu0 %v8652_v60  ;;  %v281_v47 = vld [vmem:[%s13635_s1 + $0x7b0] sm:$0xff] }
 0x21a   :  { %6983 = vmatpush1.bf16.msra.mxu1 %v8787_v42  ;;  %v8876_v52 = vcombine.high %v277_v21, %v281_v47  ;;  %v141_v56 = vld [vmem:[%s13635_s1 + $0x350] sm:$0xff]  ;;  %v8875_v0 = vcombine.low %v277_v21, %v281_v47 }
 0x21b   :  { %6984 = vmatprep.subr.bf16.mxu1 %v8780_v7  ;;  %v145_v42 = vld [vmem:[%s13635_s1 + $0x370] sm:$0xff] }
 0x21c   :  { %6944 = vmatpush1.bf16.msra.mxu0 %v8651_v2  ;;  %v269_v60 = vld [vmem:[%s13635_s1 + $0x750] sm:$0xff]  ;;  %v8740_v45 = vcombine.high %v141_v56, %v145_v42  ;;  %v8739_v11 = vcombine.low %v141_v56, %v145_v42 }
 0x21d   :  { %6945 = vmatprep.subr.bf16.mxu0 %v8644_v6  ;;  %v273_v7 = vld [vmem:[%s13635_s1 + $0x770] sm:$0xff] }
 0x21e   :  { %6985 = vmatpush1.bf16.msra.mxu1 %v8779_v57  ;;  %v8868_v1 = vcombine.high %v269_v60, %v273_v7  ;;  %v133_v2 = vld [vmem:[%s13635_s1 + $0x310] sm:$0xff]  ;;  %v8867_v62 = vcombine.low %v269_v60, %v273_v7 }
 0x21f   :  { %6986 = vmatprep.subr.bf16.mxu1 %v8772_v39  ;;  %v137_v57 = vld [vmem:[%s13635_s1 + $0x330] sm:$0xff] }
 0x220   :  { %6946 = vmatpush1.bf16.msra.mxu0 %v8643_v22  ;;  %v261_v6 = vld [vmem:[%s13635_s1 + $0x710] sm:$0xff]  ;;  %v8732_v13 = vcombine.high %v133_v2, %v137_v57  ;;  %v8731_v27 = vcombine.low %v133_v2, %v137_v57 }
 0x221   :  { %6947 = vmatprep.subr.bf16.mxu0 %v8636_v25  ;;  %v265_v39 = vld [vmem:[%s13635_s1 + $0x730] sm:$0xff] }
 0x222   :  { %6987 = vmatpush1.bf16.msra.mxu1 %v8771_v24  ;;  %v8860_v53 = vcombine.high %v261_v6, %v265_v39  ;;  %v125_v22 = vld [vmem:[%s13635_s1 + $0x2d0] sm:$0xff]  ;;  %v8859_v30 = vcombine.low %v261_v6, %v265_v39 }
 0x223   :  { %6988 = vmatprep.subr.bf16.mxu1 %v8764_v54  ;;  %v129_v24 = vld [vmem:[%s13635_s1 + $0x2f0] sm:$0xff] }
 0x224   :  { %6948 = vmatpush1.bf16.msra.mxu0 %v8635_v15  ;;  %v253_v25 = vld [vmem:[%s13635_s1 + $0x6d0] sm:$0xff]  ;;  %v8724_v33 = vcombine.high %v125_v22, %v129_v24  ;;  %v8723_v28 = vcombine.low %v125_v22, %v129_v24 }
 0x225   :  { %6949 = vmatprep.subr.bf16.mxu0 %v8756_v38  ;;  %v257_v54 = vld [vmem:[%s13635_s1 + $0x6f0] sm:$0xff] }
 0x226   :  { %6989 = vmatpush1.bf16.msra.mxu1 %v8763_v37  ;;  %v8852_v35 = vcombine.high %v253_v25, %v257_v54  ;;  %v117_v15 = vld [vmem:[%s13635_s1 + $0x290] sm:$0xff]  ;;  %v8851_v43 = vcombine.low %v253_v25, %v257_v54 }
 0x227   :  { %6990 = vmatprep.subr.bf16.mxu1 %v8884_v19  ;;  %v121_v37 = vld [vmem:[%s13635_s1 + $0x2b0] sm:$0xff] }
 0x228   :  { %6950 = vmatpush2.bf16.msra.mxu0 %v8755_v48  ;;  %v245_v38 = vld [vmem:[%s13635_s1 + $0x690] sm:$0xff]  ;;  %v8716_v21 = vcombine.high %v117_v15, %v121_v37  ;;  %v8715_v56 = vcombine.low %v117_v15, %v121_v37 }
 0x229   :  { %6951 = vmatprep.subr.bf16.mxu0 %v8748_v51  ;;  %v249_v19 = vld [vmem:[%s13635_s1 + $0x6b0] sm:$0xff] }
 0x22a   :  { %6991 = vmatpush2.bf16.msra.mxu1 %v8883_v31  ;;  %v8844_v47 = vcombine.high %v245_v38, %v249_v19  ;;  %v109_v48 = vld [vmem:[%s13635_s1 + $0x250] sm:$0xff]  ;;  %v8843_v42 = vcombine.low %v245_v38, %v249_v19 }
 0x22b   :  { %6992 = vmatprep.subr.bf16.mxu1 %v8876_v52  ;;  %v113_v31 = vld [vmem:[%s13635_s1 + $0x270] sm:$0xff] }
 0x22c   :  { %6952 = vmatpush2.bf16.msra.mxu0 %v8747_v63  ;;  %v237_v51 = vld [vmem:[%s13635_s1 + $0x650] sm:$0xff]  ;;  %v8708_v60 = vcombine.high %v109_v48, %v113_v31  ;;  %v8707_v2 = vcombine.low %v109_v48, %v113_v31 }
 0x22d   :  { %6953 = vmatprep.subr.bf16.mxu0 %v8740_v45  ;;  %v241_v52 = vld [vmem:[%s13635_s1 + $0x670] sm:$0xff] }
 0x22e   :  { %6993 = vmatpush2.bf16.msra.mxu1 %v8875_v0  ;;  %v8836_v7 = vcombine.high %v237_v51, %v241_v52  ;;  %v101_v63 = vld [vmem:[%s13635_s1 + $0x210] sm:$0xff]  ;;  %v8835_v57 = vcombine.low %v237_v51, %v241_v52 }
 0x22f   :  { %6994 = vmatprep.subr.bf16.mxu1 %v8868_v1  ;;  %v105_v0 = vld [vmem:[%s13635_s1 + $0x230] sm:$0xff] }
 0x230   :  { %6954 = vmatpush2.bf16.msra.mxu0 %v8739_v11  ;;  %v229_v45 = vld [vmem:[%s13635_s1 + $0x610] sm:$0xff]  ;;  %v8700_v6 = vcombine.high %v101_v63, %v105_v0  ;;  %v8699_v22 = vcombine.low %v101_v63, %v105_v0 }
 0x231   :  { %6955 = vmatprep.subr.bf16.mxu0 %v8732_v13  ;;  %v233_v1 = vld [vmem:[%s13635_s1 + $0x630] sm:$0xff] }
 0x232   :  { %6995 = vmatpush2.bf16.msra.mxu1 %v8867_v62  ;;  %v8828_v39 = vcombine.high %v229_v45, %v233_v1  ;;  %v349_v11 = vld [vmem:[%s13635_s1 + $0x9d0] sm:$0xff]  ;;  %v8827_v24 = vcombine.low %v229_v45, %v233_v1 }
 0x233   :  { %6996 = vmatprep.subr.bf16.mxu1 %v8860_v53  ;;  %v353_v62 = vld [vmem:[%s13635_s1 + $0x9f0] sm:$0xff] }
 0x234   :  { %6956 = vmatpush2.bf16.msra.mxu0 %v8731_v27  ;;  %v477_v13 = vld [vmem:[%s13635_s1 + $0xdd0] sm:$0xff]  ;;  %v8948_v25 = vcombine.high %v349_v11, %v353_v62  ;;  %v8947_v15 = vcombine.low %v349_v11, %v353_v62 }
 0x235   :  { %6957 = vmatprep.subr.bf16.mxu0 %v8724_v33  ;;  %v481_v53 = vld [vmem:[%s13635_s1 + $0xdf0] sm:$0xff] }
 0x236   :  { %6997 = vmatpush2.bf16.msra.mxu1 %v8859_v30  ;;  %v9076_v54 = vcombine.high %v477_v13, %v481_v53  ;;  %v341_v27 = vld [vmem:[%s13635_s1 + $0x990] sm:$0xff]  ;;  %v9075_v37 = vcombine.low %v477_v13, %v481_v53 }
 0x237   :  { %6998 = vmatprep.subr.bf16.mxu1 %v8852_v35  ;;  %v345_v30 = vld [vmem:[%s13635_s1 + $0x9b0] sm:$0xff] }
 0x238   :  { %6958 = vmatpush2.bf16.msra.mxu0 %v8723_v28  ;;  %v469_v33 = vld [vmem:[%s13635_s1 + $0xd90] sm:$0xff]  ;;  %v8940_v38 = vcombine.high %v341_v27, %v345_v30  ;;  %v8939_v52 = vcombine.low %v341_v27, %v345_v30 }
 0x239   :  { %6959 = vmatprep.subr.bf16.mxu0 %v8716_v21  ;;  %v473_v35 = vld [vmem:[%s13635_s1 + $0xdb0] sm:$0xff] }
 0x23a   :  { %6999 = vmatpush2.bf16.msra.mxu1 %v8851_v43  ;;  %v9068_v19 = vcombine.high %v469_v33, %v473_v35  ;;  %v333_v28 = vld [vmem:[%s13635_s1 + $0x950] sm:$0xff] }
 0x23b   :  { %7000 = vmatprep.subr.bf16.mxu1 %v8844_v47  ;;  %v337_v43 = vld [vmem:[%s13635_s1 + $0x970] sm:$0xff] }
 0x23c   :  { %6960 = vmatpush2.bf16.msra.mxu0 %v8715_v56  ;;  %v461_v47 = vld [vmem:[%s13635_s1 + $0xd50] sm:$0xff]  ;;  %v8931_v11 = vcombine.low %v333_v28, %v337_v43 }
 0x23d   :  { %6961 = vmatprep.subr.bf16.mxu0 %v8708_v60  ;;  %v465_v48 = vld [vmem:[%s13635_s1 + $0xd70] sm:$0xff]  ;;  %v8932_v60 = vcombine.high %v333_v28, %v337_v43 }
 0x23e   :  { %7001 = vmatpush2.bf16.msra.mxu1 %v8843_v42  ;;  %v9067_v42 = vcombine.low %v469_v33, %v473_v35  ;;  %v9060_v45 = vcombine.high %v461_v47, %v465_v48  ;;  %v329_v1 = vld [vmem:[%s13635_s1 + $0x930] sm:$0xff]  ;;  %v9059_v13 = vcombine.low %v461_v47, %v465_v48 }
 0x23f   :  { %7002 = vmatprep.subr.bf16.mxu1 %v8836_v7  ;;  %v445_v27 = vld [vmem:[%s13635_s1 + $0xcd0] sm:$0xff] }
 0x240   :  { %6962 = vmatpush2.bf16.msra.mxu0 %v8707_v2  ;;  %v449_v30 = vld [vmem:[%s13635_s1 + $0xcf0] sm:$0xff] }
 0x241   :  { %6963 = vmatprep.subr.bf16.mxu0 %v8700_v6  ;;  %v437_v28 = vld [vmem:[%s13635_s1 + $0xc90] sm:$0xff]  ;;  %v9043_v47 = vcombine.low %v445_v27, %v449_v30 }
 0x242   :  { %7003 = vmatpush2.bf16.msra.mxu1 %v8835_v57  ;;  %v453_v57 = vld [vmem:[%s13635_s1 + $0xd10] sm:$0xff] }
 0x243   :  { %7004 = vmatprep.subr.bf16.mxu1 %v8828_v39  ;;  %v441_v43 = vld [vmem:[%s13635_s1 + $0xcb0] sm:$0xff] }
 0x244   :  { %6964 = vmatpush2.bf16.msra.mxu0 %v8699_v22 }
 0x245   :  { %7015 = vmatprep.subr.bf16.mxu0 %v8948_v25  ;;  %v317_v25 = vld [vmem:[%s13635_s1 + $0x8d0] sm:$0xff] }
 0x246   :  { %7005 = vmatpush2.bf16.msra.mxu1 %v8827_v24 }
 0x247   :  { %7056 = vmatprep.subr.bf16.mxu1 %v9076_v54  ;;  %v6721_v21 = vpop.f32.mrf.mxu0  ;;  %6966 = vmatmul.mubr.bf16.vlgmr.msra.gmra.mxu0 %v10186_v16  ;;  %v321_v54 = vld [vmem:[%s13635_s1 + $0x8f0] sm:$0xff] }
 0x248   :  { %v6722_v31 = vadd.f32 %v6721_v21, %v11728_v3  ;;  %7016 = vmatpush1.bf16.msra.mxu0 %v8947_v15  ;;  %v325_v3 = vld [vmem:[%s13635_s1 + $0x910] sm:$0xff]  ;;  %7047 = vmatprep.mubr.bf16.mxu0 %v10216_v26  ;;  %v8916_v15 = vcombine.high %v317_v25, %v321_v54  ;;  %v8915_v21 = vcombine.low %v317_v25, %v321_v54 }
 0x249   :  { %v6762_v51 = vpop.f32.mrf.mxu1  ;;  %7007 = vmatmul.mubr.bf16.vlgmr.msra.gmra.mxu1 %v10201_v20  ;;  %v6723_v56 = vpop.f32.mrf.mxu0  ;;  %7017 = vmatprep.subr.bf16.mxu0 %v8940_v38  ;;  %v8924_v53 = vcombine.high %v325_v3, %v329_v1  ;;  %v8923_v33 = vcombine.low %v325_v3, %v329_v1  ;;  %v309_v38 = vld [vmem:[%s13635_s1 + $0x890] sm:$0xff] }
 0x24a   :  { %7057 = vmatpush1.bf16.msra.mxu1 %v9075_v37  ;;  %v11929_v7 = vadd.f32 %v6762_v51, %v6722_v31  ;;  %v6724_v63 = vadd.f32 %v6723_v56, %v11744_v23  ;;  %v457_v23 = vld [vmem:[%s13635_s1 + $0xd30] sm:$0xff]  ;;  %7088 = vmatprep.mubr.bf16.mxu1 %v10227_v29  ;;  %v9044_v37 = vcombine.high %v445_v27, %v449_v30 }
 0x24b   :  { %v6764_v0 = vpop.f32.mrf.mxu1  ;;  %7058 = vmatprep.subr.bf16.mxu1 %v9068_v19  ;;  %v6725_v2 = vpop.f32.mrf.mxu0  ;;  %v9052_v24 = vcombine.high %v453_v57, %v457_v23  ;;  %v9051_v35 = vcombine.low %v453_v57, %v457_v23  ;;  %v313_v19 = vld [vmem:[%s13635_s1 + $0x8b0] sm:$0xff]  ;;  %v9036_v31 = vcombine.high %v437_v28, %v441_v43 }
 0x24c   :  { %v11946_v6 = vadd.f32 %v6764_v0, %v6724_v63  ;;  %7018 = vmatpush1.bf16.msra.mxu0 %v8939_v52  ;;  %v8908_v48 = vcombine.high %v309_v38, %v313_v19  ;;  %v301_v51 = vld [vmem:[%s13635_s1 + $0x850] sm:$0xff]  ;;  %v9035_v63 = vcombine.low %v437_v28, %v441_v43 }
 0x24d   :  { %v6766_v39 = vpop.f32.mrf.mxu1  ;;  %v6726_v62 = vpop.f32.mrf.mxu0  ;;  %7019 = vmatprep.subr.bf16.mxu0 %v8932_v60  ;;  %v305_v52 = vld [vmem:[%s13635_s1 + $0x870] sm:$0xff]  ;;  %v8907_v60 = vcombine.low %v309_v38, %v313_v19 }
 0x24e   :  { %7059 = vmatpush1.bf16.msra.mxu1 %v9067_v42  ;;  %v429_v56 = vld [vmem:[%s13635_s1 + $0xc50] sm:$0xff]  ;;  %v8900_v0 = vcombine.high %v301_v51, %v305_v52  ;;  %v8899_v23 = vcombine.low %v301_v51, %v305_v52 }
 0x24f   :  { %v6767_v22 = vpop.f32.mrf.mxu1  ;;  %7060 = vmatprep.subr.bf16.mxu1 %v9060_v45  ;;  %v433_v42 = vld [vmem:[%s13635_s1 + $0xc70] sm:$0xff] }
 0x250   :  { %7020 = vmatpush1.bf16.msra.mxu0 %v8931_v11  ;;  %v9028_v45 = vcombine.high %v429_v56, %v433_v42  ;;  %v293_v3 = vld [vmem:[%s13635_s1 + $0x810] sm:$0xff]  ;;  %v9027_v39 = vcombine.low %v429_v56, %v433_v42 }
 0x251   :  { %7021 = vmatprep.subr.bf16.mxu0 %v8924_v53  ;;  %v297_v1 = vld [vmem:[%s13635_s1 + $0x830] sm:$0xff] }
 0x252   :  { %7061 = vmatpush1.bf16.msra.mxu1 %v9059_v13  ;;  %v421_v2 = vld [vmem:[%s13635_s1 + $0xc10] sm:$0xff]  ;;  %v8892_v11 = vcombine.high %v293_v3, %v297_v1  ;;  %v8891_v25 = vcombine.low %v293_v3, %v297_v1 }
 0x253   :  { %7062 = vmatprep.subr.bf16.mxu1 %v9052_v24  ;;  %v425_v57 = vld [vmem:[%s13635_s1 + $0xc30] sm:$0xff] }
 0x254   :  { %7022 = vmatpush1.bf16.msra.mxu0 %v8923_v33  ;;  %v9020_v62 = vcombine.high %v421_v2, %v425_v57  ;;  %v413_v13 = vld [vmem:[%s13635_s1 + $0xbd0] sm:$0xff]  ;;  %v9019_v54 = vcombine.low %v421_v2, %v425_v57 }
 0x255   :  { %7023 = vmatprep.subr.bf16.mxu0 %v8916_v15  ;;  %v417_v53 = vld [vmem:[%s13635_s1 + $0xbf0] sm:$0xff] }
 0x256   :  { %7063 = vmatpush1.bf16.msra.mxu1 %v9051_v35  ;;  %v541_v22 = vld [vmem:[%s13635_s1 + $0xfd0] sm:$0xff]  ;;  %v9012_v27 = vcombine.high %v413_v13, %v417_v53  ;;  %v9011_v38 = vcombine.low %v413_v13, %v417_v53 }
 0x257   :  { %7064 = vmatprep.subr.bf16.mxu1 %v9044_v37  ;;  %v545_v24 = vld [vmem:[%s13635_s1 + $0xff0] sm:$0xff] }
 0x258   :  { %7024 = vmatpush1.bf16.msra.mxu0 %v8915_v21  ;;  %v9140_v30 = vcombine.high %v541_v22, %v545_v24  ;;  %v405_v33 = vld [vmem:[%s13635_s1 + $0xb90] sm:$0xff]  ;;  %v9139_v19 = vcombine.low %v541_v22, %v545_v24 }
 0x259   :  { %7025 = vmatprep.subr.bf16.mxu0 %v8908_v48  ;;  %v409_v35 = vld [vmem:[%s13635_s1 + $0xbb0] sm:$0xff] }
 0x25a   :  { %7065 = vmatpush1.bf16.msra.mxu1 %v9043_v47  ;;  %v533_v15 = vld [vmem:[%s13635_s1 + $0xf90] sm:$0xff]  ;;  %v9004_v28 = vcombine.high %v405_v33, %v409_v35  ;;  %v9003_v51 = vcombine.low %v405_v33, %v409_v35 }
 0x25b   :  { %7066 = vmatprep.subr.bf16.mxu1 %v9036_v31  ;;  %v537_v37 = vld [vmem:[%s13635_s1 + $0xfb0] sm:$0xff] }
 0x25c   :  { %7026 = vmatpush1.bf16.msra.mxu0 %v8907_v60  ;;  %v9132_v43 = vcombine.high %v533_v15, %v537_v37  ;;  %v397_v21 = vld [vmem:[%s13635_s1 + $0xb50] sm:$0xff]  ;;  %v9131_v52 = vcombine.low %v533_v15, %v537_v37 }
 0x25d   :  { %7027 = vmatprep.subr.bf16.mxu0 %v8900_v0  ;;  %v401_v47 = vld [vmem:[%s13635_s1 + $0xb70] sm:$0xff] }
 0x25e   :  { %7067 = vmatpush1.bf16.msra.mxu1 %v9035_v63  ;;  %v525_v48 = vld [vmem:[%s13635_s1 + $0xf50] sm:$0xff]  ;;  %v8996_v56 = vcombine.high %v397_v21, %v401_v47  ;;  %v8995_v3 = vcombine.low %v397_v21, %v401_v47 }
 0x25f   :  { %7068 = vmatprep.subr.bf16.mxu1 %v9028_v45  ;;  %v529_v31 = vld [vmem:[%s13635_s1 + $0xf70] sm:$0xff] }
 0x260   :  { %7028 = vmatpush1.bf16.msra.mxu0 %v8899_v23  ;;  %v9124_v42 = vcombine.high %v525_v48, %v529_v31  ;;  %v389_v60 = vld [vmem:[%s13635_s1 + $0xb10] sm:$0xff]  ;;  %v9123_v1 = vcombine.low %v525_v48, %v529_v31 }
 0x261   :  { %7029 = vmatprep.subr.bf16.mxu0 %v8892_v11  ;;  %v393_v63 = vld [vmem:[%s13635_s1 + $0xb30] sm:$0xff] }
 0x262   :  { %7069 = vmatpush1.bf16.msra.mxu1 %v9027_v39  ;;  %v517_v0 = vld [vmem:[%s13635_s1 + $0xf10] sm:$0xff]  ;;  %v8988_v2 = vcombine.high %v389_v60, %v393_v63  ;;  %v8987_v13 = vcombine.low %v389_v60, %v393_v63 }
 0x263   :  { %7070 = vmatprep.subr.bf16.mxu1 %v9020_v62  ;;  %v521_v45 = vld [vmem:[%s13635_s1 + $0xf30] sm:$0xff] }
 0x264   :  { %7030 = vmatpush1.bf16.msra.mxu0 %v8891_v25  ;;  %v9116_v57 = vcombine.high %v517_v0, %v521_v45  ;;  %v381_v23 = vld [vmem:[%s13635_s1 + $0xad0] sm:$0xff]  ;;  %v9115_v53 = vcombine.low %v517_v0, %v521_v45 }
 0x265   :  { %7031 = vmatprep.subr.bf16.mxu0 %v9012_v27  ;;  %v385_v39 = vld [vmem:[%s13635_s1 + $0xaf0] sm:$0xff] }
 0x266   :  { %7071 = vmatpush1.bf16.msra.mxu1 %v9019_v54  ;;  %v509_v11 = vld [vmem:[%s13635_s1 + $0xed0] sm:$0xff]  ;;  %v8980_v22 = vcombine.high %v381_v23, %v385_v39  ;;  %v8979_v33 = vcombine.low %v381_v23, %v385_v39 }
 0x267   :  { %7072 = vmatprep.subr.bf16.mxu1 %v9140_v30  ;;  %v513_v62 = vld [vmem:[%s13635_s1 + $0xef0] sm:$0xff] }
 0x268   :  { %7032 = vmatpush2.bf16.msra.mxu0 %v9011_v38  ;;  %v9108_v24 = vcombine.high %v509_v11, %v513_v62  ;;  %v373_v25 = vld [vmem:[%s13635_s1 + $0xa90] sm:$0xff]  ;;  %v9107_v35 = vcombine.low %v509_v11, %v513_v62 }
 0x269   :  { %7033 = vmatprep.subr.bf16.mxu0 %v9004_v28  ;;  %v377_v54 = vld [vmem:[%s13635_s1 + $0xab0] sm:$0xff] }
 0x26a   :  { %7073 = vmatpush2.bf16.msra.mxu1 %v9139_v19  ;;  %v501_v27 = vld [vmem:[%s13635_s1 + $0xe90] sm:$0xff]  ;;  %v8972_v15 = vcombine.high %v373_v25, %v377_v54  ;;  %v8971_v21 = vcombine.low %v373_v25, %v377_v54 }
 0x26b   :  { %7074 = vmatprep.subr.bf16.mxu1 %v9132_v43  ;;  %v505_v30 = vld [vmem:[%s13635_s1 + $0xeb0] sm:$0xff] }
 0x26c   :  { %7034 = vmatpush2.bf16.msra.mxu0 %v9003_v51  ;;  %v9100_v37 = vcombine.high %v501_v27, %v505_v30  ;;  %v365_v38 = vld [vmem:[%s13635_s1 + $0xa50] sm:$0xff]  ;;  %v9099_v47 = vcombine.low %v501_v27, %v505_v30 }
 0x26d   :  { %7035 = vmatprep.subr.bf16.mxu0 %v8996_v56  ;;  %v369_v19 = vld [vmem:[%s13635_s1 + $0xa70] sm:$0xff] }
 0x26e   :  { %7075 = vmatpush2.bf16.msra.mxu1 %v9131_v52  ;;  %v493_v28 = vld [vmem:[%s13635_s1 + $0xe50] sm:$0xff]  ;;  %v8964_v48 = vcombine.high %v365_v38, %v369_v19  ;;  %v8963_v60 = vcombine.low %v365_v38, %v369_v19 }
 0x26f   :  { %7076 = vmatprep.subr.bf16.mxu1 %v9124_v42  ;;  %v497_v43 = vld [vmem:[%s13635_s1 + $0xe70] sm:$0xff] }
 0x270   :  { %7036 = vmatpush2.bf16.msra.mxu0 %v8995_v3  ;;  %v9092_v31 = vcombine.high %v493_v28, %v497_v43  ;;  %v357_v51 = vld [vmem:[%s13635_s1 + $0xa10] sm:$0xff]  ;;  %v9091_v63 = vcombine.low %v493_v28, %v497_v43 }
 0x271   :  { %7037 = vmatprep.subr.bf16.mxu0 %v8988_v2  ;;  %v361_v52 = vld [vmem:[%s13635_s1 + $0xa30] sm:$0xff] }
 0x272   :  { %7077 = vmatpush2.bf16.msra.mxu1 %v9123_v1  ;;  %v485_v56 = vld [vmem:[%s13635_s1 + $0xe10] sm:$0xff]  ;;  %v8956_v0 = vcombine.high %v357_v51, %v361_v52  ;;  %v8955_v23 = vcombine.low %v357_v51, %v361_v52 }
 0x273   :  { %7078 = vmatprep.subr.bf16.mxu1 %v9116_v57  ;;  %v489_v42 = vld [vmem:[%s13635_s1 + $0xe30] sm:$0xff] }
 0x274   :  { %7038 = vmatpush2.bf16.msra.mxu0 %v8987_v13  ;;  %v9084_v45 = vcombine.high %v485_v56, %v489_v42  ;;  %v605_v3 = vld [vmem:[%s13635_s1 + $0x11d0] sm:$0xff]  ;;  %v9083_v39 = vcombine.low %v485_v56, %v489_v42 }
 0x275   :  { %7039 = vmatprep.subr.bf16.mxu0 %v8980_v22  ;;  %v609_v1 = vld [vmem:[%s13635_s1 + $0x11f0] sm:$0xff] }
 0x276   :  { %7079 = vmatpush2.bf16.msra.mxu1 %v9115_v53  ;;  %v733_v2 = vld [vmem:[%s13635_s1 + $0x15d0] sm:$0xff]  ;;  %v9204_v11 = vcombine.high %v605_v3, %v609_v1  ;;  %v9203_v25 = vcombine.low %v605_v3, %v609_v1 }
 0x277   :  { %7080 = vmatprep.subr.bf16.mxu1 %v9108_v24  ;;  %v737_v57 = vld [vmem:[%s13635_s1 + $0x15f0] sm:$0xff] }
 0x278   :  { %7040 = vmatpush2.bf16.msra.mxu0 %v8979_v33  ;;  %v9332_v62 = vcombine.high %v733_v2, %v737_v57  ;;  %v597_v13 = vld [vmem:[%s13635_s1 + $0x1190] sm:$0xff]  ;;  %v9331_v54 = vcombine.low %v733_v2, %v737_v57 }
 0x279   :  { %7041 = vmatprep.subr.bf16.mxu0 %v8972_v15  ;;  %v601_v53 = vld [vmem:[%s13635_s1 + $0x11b0] sm:$0xff] }
 0x27a   :  { %7081 = vmatpush2.bf16.msra.mxu1 %v9107_v35  ;;  %v725_v22 = vld [vmem:[%s13635_s1 + $0x1590] sm:$0xff]  ;;  %v9196_v27 = vcombine.high %v597_v13, %v601_v53  ;;  %v9195_v43 = vcombine.low %v597_v13, %v601_v53 }
 0x27b   :  { %7082 = vmatprep.subr.bf16.mxu1 %v9100_v37  ;;  %v729_v24 = vld [vmem:[%s13635_s1 + $0x15b0] sm:$0xff] }
 0x27c   :  { %7042 = vmatpush2.bf16.msra.mxu0 %v8971_v21  ;;  %v9324_v30 = vcombine.high %v725_v22, %v729_v24  ;;  %v589_v33 = vld [vmem:[%s13635_s1 + $0x1150] sm:$0xff] }
 0x27d   :  { %7043 = vmatprep.subr.bf16.mxu0 %v8964_v48  ;;  %v593_v35 = vld [vmem:[%s13635_s1 + $0x1170] sm:$0xff] }
 0x27e   :  { %7083 = vmatpush2.bf16.msra.mxu1 %v9099_v47  ;;  %v717_v37 = vld [vmem:[%s13635_s1 + $0x1550] sm:$0xff]  ;;  %v9323_v47 = vcombine.low %v725_v22, %v729_v24  ;;  %v9188_v48 = vcombine.high %v589_v33, %v593_v35  ;;  %v9187_v3 = vcombine.low %v589_v33, %v593_v35 }
 0x27f   :  { %7084 = vmatprep.subr.bf16.mxu1 %v9092_v31  ;;  %v721_v38 = vld [vmem:[%s13635_s1 + $0x1570] sm:$0xff] }
 0x280   :  { %7044 = vmatpush2.bf16.msra.mxu0 %v8963_v60  ;;  %v9316_v56 = vcombine.high %v717_v37, %v721_v38  ;;  %v585_v42 = vld [vmem:[%s13635_s1 + $0x1130] sm:$0xff]  ;;  %v9315_v2 = vcombine.low %v717_v37, %v721_v38 }
 0x281   :  { %7045 = vmatprep.subr.bf16.mxu0 %v8956_v0  ;;  %v701_v13 = vld [vmem:[%s13635_s1 + $0x14d0] sm:$0xff] }
 0x282   :  { %7085 = vmatpush2.bf16.msra.mxu1 %v9091_v63  ;;  %v709_v63 = vld [vmem:[%s13635_s1 + $0x1510] sm:$0xff] }
 0x283   :  { %7086 = vmatprep.subr.bf16.mxu1 %v9084_v45  ;;  %v705_v53 = vld [vmem:[%s13635_s1 + $0x14f0] sm:$0xff] }
 0x284   :  { %7046 = vmatpush2.bf16.msra.mxu0 %v8955_v23  ;;  %v693_v33 = vld [vmem:[%s13635_s1 + $0x1490] sm:$0xff]  ;;  %v9299_v37 = vcombine.low %v701_v13, %v705_v53 }
 0x285   :  { %7097 = vmatprep.subr.bf16.mxu0 %v9204_v11  ;;  %v573_v11 = vld [vmem:[%s13635_s1 + $0x10d0] sm:$0xff] }
 0x286   :  { %7087 = vmatpush2.bf16.msra.mxu1 %v9083_v39  ;;  %v697_v35 = vld [vmem:[%s13635_s1 + $0x14b0] sm:$0xff] }
 0x287   :  { %7138 = vmatprep.subr.bf16.mxu1 %v9332_v62  ;;  %v6803_v15 = vpop.f32.mrf.mxu0  ;;  %7048 = vmatmul.mubr.bf16.vlgmr.msra.gmra.mxu0 %v10408_v36  ;;  %v577_v62 = vld [vmem:[%s13635_s1 + $0x10f0] sm:$0xff] }
 0x288   :  { %v6804_v19 = vadd.f32 %v6803_v15, %v11929_v7  ;;  %7098 = vmatpush1.bf16.msra.mxu0 %v9203_v25  ;;  %v581_v7 = vld [vmem:[%s13635_s1 + $0x1110] sm:$0xff]  ;;  %7129 = vmatprep.mubr.bf16.mxu0 %v10438_v46  ;;  %v9172_v25 = vcombine.high %v573_v11, %v577_v62  ;;  %v9171_v15 = vcombine.low %v573_v11, %v577_v62 }
 0x289   :  { %v6844_v28 = vpop.f32.mrf.mxu1  ;;  %7089 = vmatmul.mubr.bf16.vlgmr.msra.gmra.mxu1 %v10423_v40  ;;  %v6805_v21 = vpop.f32.mrf.mxu0  ;;  %7099 = vmatprep.subr.bf16.mxu0 %v9196_v27  ;;  %v9180_v57 = vcombine.high %v581_v7, %v585_v42  ;;  %v9179_v22 = vcombine.low %v581_v7, %v585_v42  ;;  %v565_v27 = vld [vmem:[%s13635_s1 + $0x1090] sm:$0xff] }
 0x28a   :  { %7139 = vmatpush1.bf16.msra.mxu1 %v9331_v54  ;;  %v12131_v31 = vadd.f32 %v6844_v28, %v6804_v19  ;;  %v6806_v51 = vadd.f32 %v6805_v21, %v11946_v6  ;;  %v713_v6 = vld [vmem:[%s13635_s1 + $0x1530] sm:$0xff]  ;;  %7170 = vmatprep.mubr.bf16.mxu1 %v10449_v49  ;;  %v9300_v54 = vcombine.high %v701_v13, %v705_v53 }
 0x28b   :  { %v6846_v52 = vpop.f32.mrf.mxu1  ;;  %7140 = vmatprep.subr.bf16.mxu1 %v9324_v30  ;;  %v6807_v60 = vpop.f32.mrf.mxu0  ;;  %v9308_v39 = vcombine.high %v709_v63, %v713_v6  ;;  %v9307_v24 = vcombine.low %v709_v63, %v713_v6  ;;  %v569_v30 = vld [vmem:[%s13635_s1 + $0x10b0] sm:$0xff]  ;;  %v9292_v19 = vcombine.high %v693_v33, %v697_v35 }
 0x28c   :  { %v12148_v0 = vadd.f32 %v6846_v52, %v6806_v51  ;;  %7100 = vmatpush1.bf16.msra.mxu0 %v9195_v43  ;;  %v9164_v38 = vcombine.high %v565_v27, %v569_v30  ;;  %v557_v28 = vld [vmem:[%s13635_s1 + $0x1050] sm:$0xff]  ;;  %v9291_v51 = vcombine.low %v693_v33, %v697_v35 }
 0x28d   :  { %v6848_v45 = vpop.f32.mrf.mxu1  ;;  %v6808_v1 = vpop.f32.mrf.mxu0  ;;  %7101 = vmatprep.subr.bf16.mxu0 %v9188_v48  ;;  %v561_v43 = vld [vmem:[%s13635_s1 + $0x1070] sm:$0xff]  ;;  %v9163_v48 = vcombine.low %v565_v27, %v569_v30 }
 0x28e   :  { %7141 = vmatpush1.bf16.msra.mxu1 %v9323_v47  ;;  %v685_v21 = vld [vmem:[%s13635_s1 + $0x1450] sm:$0xff]  ;;  %v9156_v52 = vcombine.high %v557_v28, %v561_v43  ;;  %v9155_v6 = vcombine.low %v557_v28, %v561_v43 }
 0x28f   :  { %v6849_v23 = vpop.f32.mrf.mxu1  ;;  %7142 = vmatprep.subr.bf16.mxu1 %v9316_v56  ;;  %v689_v47 = vld [vmem:[%s13635_s1 + $0x1470] sm:$0xff] }
 0x290   :  { %7102 = vmatpush1.bf16.msra.mxu0 %v9187_v3  ;;  %v9284_v56 = vcombine.high %v685_v21, %v689_v47  ;;  %v549_v7 = vld [vmem:[%s13635_s1 + $0x1010] sm:$0xff]  ;;  %v9283_v45 = vcombine.low %v685_v21, %v689_v47 }
 0x291   :  { %7103 = vmatprep.subr.bf16.mxu0 %v9180_v57  ;;  %v553_v42 = vld [vmem:[%s13635_s1 + $0x1030] sm:$0xff] }
 0x292   :  { %7143 = vmatpush1.bf16.msra.mxu1 %v9315_v2  ;;  %v677_v60 = vld [vmem:[%s13635_s1 + $0x1410] sm:$0xff]  ;;  %v9148_v3 = vcombine.high %v549_v7, %v553_v42  ;;  %v9147_v11 = vcombine.low %v549_v7, %v553_v42 }
 0x293   :  { %7144 = vmatprep.subr.bf16.mxu1 %v9308_v39  ;;  %v681_v63 = vld [vmem:[%s13635_s1 + $0x1430] sm:$0xff] }
 0x294   :  { %7104 = vmatpush1.bf16.msra.mxu0 %v9179_v22  ;;  %v9276_v1 = vcombine.high %v677_v60, %v681_v63  ;;  %v669_v2 = vld [vmem:[%s13635_s1 + $0x13d0] sm:$0xff]  ;;  %v9275_v62 = vcombine.low %v677_v60, %v681_v63 }
 0x295   :  { %7105 = vmatprep.subr.bf16.mxu0 %v9172_v25  ;;  %v673_v57 = vld [vmem:[%s13635_s1 + $0x13f0] sm:$0xff] }
 0x296   :  { %7145 = vmatpush1.bf16.msra.mxu1 %v9307_v24  ;;  %v797_v23 = vld [vmem:[%s13635_s1 + $0x17d0] sm:$0xff]  ;;  %v9268_v13 = vcombine.high %v669_v2, %v673_v57  ;;  %v9267_v27 = vcombine.low %v669_v2, %v673_v57 }
 0x297   :  { %7146 = vmatprep.subr.bf16.mxu1 %v9300_v54  ;;  %v801_v39 = vld [vmem:[%s13635_s1 + $0x17f0] sm:$0xff] }
 0x298   :  { %7106 = vmatpush1.bf16.msra.mxu0 %v9171_v15  ;;  %v9396_v53 = vcombine.high %v797_v23, %v801_v39  ;;  %v661_v22 = vld [vmem:[%s13635_s1 + $0x1390] sm:$0xff]  ;;  %v9395_v30 = vcombine.low %v797_v23, %v801_v39 }
 0x299   :  { %7107 = vmatprep.subr.bf16.mxu0 %v9164_v38  ;;  %v665_v24 = vld [vmem:[%s13635_s1 + $0x13b0] sm:$0xff] }
 0x29a   :  { %7147 = vmatpush1.bf16.msra.mxu1 %v9299_v37  ;;  %v789_v25 = vld [vmem:[%s13635_s1 + $0x1790] sm:$0xff]  ;;  %v9260_v33 = vcombine.high %v661_v22, %v665_v24  ;;  %v9259_v28 = vcombine.low %v661_v22, %v665_v24 }
 0x29b   :  { %7148 = vmatprep.subr.bf16.mxu1 %v9292_v19  ;;  %v793_v54 = vld [vmem:[%s13635_s1 + $0x17b0] sm:$0xff] }
 0x29c   :  { %7108 = vmatpush1.bf16.msra.mxu0 %v9163_v48  ;;  %v9388_v35 = vcombine.high %v789_v25, %v793_v54  ;;  %v653_v15 = vld [vmem:[%s13635_s1 + $0x1350] sm:$0xff]  ;;  %v9387_v43 = vcombine.low %v789_v25, %v793_v54 }
 0x29d   :  { %7109 = vmatprep.subr.bf16.mxu0 %v9156_v52  ;;  %v657_v37 = vld [vmem:[%s13635_s1 + $0x1370] sm:$0xff] }
 0x29e   :  { %7149 = vmatpush1.bf16.msra.mxu1 %v9291_v51  ;;  %v781_v38 = vld [vmem:[%s13635_s1 + $0x1750] sm:$0xff]  ;;  %v9252_v21 = vcombine.high %v653_v15, %v657_v37  ;;  %v9251_v7 = vcombine.low %v653_v15, %v657_v37 }
 0x29f   :  { %7150 = vmatprep.subr.bf16.mxu1 %v9284_v56  ;;  %v785_v19 = vld [vmem:[%s13635_s1 + $0x1770] sm:$0xff] }
 0x2a0   :  { %7110 = vmatpush1.bf16.msra.mxu0 %v9155_v6  ;;  %v9380_v47 = vcombine.high %v781_v38, %v785_v19  ;;  %v645_v48 = vld [vmem:[%s13635_s1 + $0x1310] sm:$0xff]  ;;  %v9379_v42 = vcombine.low %v781_v38, %v785_v19 }
 0x2a1   :  { %7111 = vmatprep.subr.bf16.mxu0 %v9148_v3  ;;  %v649_v51 = vld [vmem:[%s13635_s1 + $0x1330] sm:$0xff] }
 0x2a2   :  { %7151 = vmatpush1.bf16.msra.mxu1 %v9283_v45  ;;  %v773_v52 = vld [vmem:[%s13635_s1 + $0x1710] sm:$0xff]  ;;  %v9244_v60 = vcombine.high %v645_v48, %v649_v51  ;;  %v9243_v2 = vcombine.low %v645_v48, %v649_v51 }
 0x2a3   :  { %7152 = vmatprep.subr.bf16.mxu1 %v9276_v1  ;;  %v777_v56 = vld [vmem:[%s13635_s1 + $0x1730] sm:$0xff] }
 0x2a4   :  { %7112 = vmatpush1.bf16.msra.mxu0 %v9147_v11  ;;  %v9372_v63 = vcombine.high %v773_v52, %v777_v56  ;;  %v637_v6 = vld [vmem:[%s13635_s1 + $0x12d0] sm:$0xff]  ;;  %v9371_v57 = vcombine.low %v773_v52, %v777_v56 }
 0x2a5   :  { %7113 = vmatprep.subr.bf16.mxu0 %v9268_v13  ;;  %v641_v45 = vld [vmem:[%s13635_s1 + $0x12f0] sm:$0xff] }
 0x2a6   :  { %7153 = vmatpush1.bf16.msra.mxu1 %v9275_v62  ;;  %v765_v3 = vld [vmem:[%s13635_s1 + $0x16d0] sm:$0xff]  ;;  %v9236_v23 = vcombine.high %v637_v6, %v641_v45  ;;  %v9235_v22 = vcombine.low %v637_v6, %v641_v45 }
 0x2a7   :  { %7154 = vmatprep.subr.bf16.mxu1 %v9396_v53  ;;  %v769_v1 = vld [vmem:[%s13635_s1 + $0x16f0] sm:$0xff] }
 0x2a8   :  { %7114 = vmatpush2.bf16.msra.mxu0 %v9267_v27  ;;  %v9364_v39 = vcombine.high %v765_v3, %v769_v1  ;;  %v629_v11 = vld [vmem:[%s13635_s1 + $0x1290] sm:$0xff]  ;;  %v9363_v24 = vcombine.low %v765_v3, %v769_v1 }
 0x2a9   :  { %7115 = vmatprep.subr.bf16.mxu0 %v9260_v33  ;;  %v633_v62 = vld [vmem:[%s13635_s1 + $0x12b0] sm:$0xff] }
 0x2aa   :  { %7155 = vmatpush2.bf16.msra.mxu1 %v9395_v30  ;;  %v757_v13 = vld [vmem:[%s13635_s1 + $0x1690] sm:$0xff]  ;;  %v9228_v25 = vcombine.high %v629_v11, %v633_v62  ;;  %v9227_v15 = vcombine.low %v629_v11, %v633_v62 }
 0x2ab   :  { %7156 = vmatprep.subr.bf16.mxu1 %v9388_v35  ;;  %v761_v53 = vld [vmem:[%s13635_s1 + $0x16b0] sm:$0xff] }
 0x2ac   :  { %7116 = vmatpush2.bf16.msra.mxu0 %v9259_v28  ;;  %v9356_v54 = vcombine.high %v757_v13, %v761_v53  ;;  %v621_v27 = vld [vmem:[%s13635_s1 + $0x1250] sm:$0xff]  ;;  %v9355_v37 = vcombine.low %v757_v13, %v761_v53 }
 0x2ad   :  { %7117 = vmatprep.subr.bf16.mxu0 %v9252_v21  ;;  %v625_v30 = vld [vmem:[%s13635_s1 + $0x1270] sm:$0xff] }
 0x2ae   :  { %7157 = vmatpush2.bf16.msra.mxu1 %v9387_v43  ;;  %v749_v33 = vld [vmem:[%s13635_s1 + $0x1650] sm:$0xff]  ;;  %v9220_v38 = vcombine.high %v621_v27, %v625_v30  ;;  %v9219_v48 = vcombine.low %v621_v27, %v625_v30 }
 0x2af   :  { %7158 = vmatprep.subr.bf16.mxu1 %v9380_v47  ;;  %v753_v35 = vld [vmem:[%s13635_s1 + $0x1670] sm:$0xff] }
 0x2b0   :  { %7118 = vmatpush2.bf16.msra.mxu0 %v9251_v7  ;;  %v9348_v19 = vcombine.high %v749_v33, %v753_v35  ;;  %v613_v28 = vld [vmem:[%s13635_s1 + $0x1210] sm:$0xff]  ;;  %v9347_v51 = vcombine.low %v749_v33, %v753_v35 }
 0x2b1   :  { %7119 = vmatprep.subr.bf16.mxu0 %v9244_v60  ;;  %v617_v43 = vld [vmem:[%s13635_s1 + $0x1230] sm:$0xff] }
 0x2b2   :  { %7159 = vmatpush2.bf16.msra.mxu1 %v9379_v42  ;;  %v741_v21 = vld [vmem:[%s13635_s1 + $0x1610] sm:$0xff]  ;;  %v9212_v52 = vcombine.high %v613_v28, %v617_v43  ;;  %v9211_v6 = vcombine.low %v613_v28, %v617_v43 }
 0x2b3   :  { %7160 = vmatprep.subr.bf16.mxu1 %v9372_v63  ;;  %v745_v47 = vld [vmem:[%s13635_s1 + $0x1630] sm:$0xff] }
 0x2b4   :  { %7120 = vmatpush2.bf16.msra.mxu0 %v9243_v2  ;;  %v9340_v56 = vcombine.high %v741_v21, %v745_v47  ;;  %v861_v7 = vld [vmem:[%s13635_s1 + $0x19d0] sm:$0xff]  ;;  %v9339_v45 = vcombine.low %v741_v21, %v745_v47 }
 0x2b5   :  { %7121 = vmatprep.subr.bf16.mxu0 %v9236_v23  ;;  %v865_v42 = vld [vmem:[%s13635_s1 + $0x19f0] sm:$0xff] }
 0x2b6   :  { %7161 = vmatpush2.bf16.msra.mxu1 %v9371_v57  ;;  %v989_v60 = vld [vmem:[%s13635_s1 + $0x1dd0] sm:$0xff]  ;;  %v9460_v3 = vcombine.high %v861_v7, %v865_v42  ;;  %v9459_v11 = vcombine.low %v861_v7, %v865_v42 }
 0x2b7   :  { %7162 = vmatprep.subr.bf16.mxu1 %v9364_v39  ;;  %v993_v63 = vld [vmem:[%s13635_s1 + $0x1df0] sm:$0xff] }
 0x2b8   :  { %7122 = vmatpush2.bf16.msra.mxu0 %v9235_v22  ;;  %v9588_v1 = vcombine.high %v989_v60, %v993_v63  ;;  %v853_v2 = vld [vmem:[%s13635_s1 + $0x1990] sm:$0xff]  ;;  %v9587_v62 = vcombine.low %v989_v60, %v993_v63 }
 0x2b9   :  { %7123 = vmatprep.subr.bf16.mxu0 %v9228_v25  ;;  %v857_v57 = vld [vmem:[%s13635_s1 + $0x19b0] sm:$0xff] }
 0x2ba   :  { %7163 = vmatpush2.bf16.msra.mxu1 %v9363_v24  ;;  %v981_v23 = vld [vmem:[%s13635_s1 + $0x1d90] sm:$0xff]  ;;  %v9452_v13 = vcombine.high %v853_v2, %v857_v57  ;;  %v9451_v35 = vcombine.low %v853_v2, %v857_v57 }
 0x2bb   :  { %7164 = vmatprep.subr.bf16.mxu1 %v9356_v54  ;;  %v985_v39 = vld [vmem:[%s13635_s1 + $0x1db0] sm:$0xff] }
 0x2bc   :  { %7124 = vmatpush2.bf16.msra.mxu0 %v9227_v15  ;;  %v9580_v53 = vcombine.high %v981_v23, %v985_v39  ;;  %v845_v22 = vld [vmem:[%s13635_s1 + $0x1950] sm:$0xff] }
 0x2bd   :  { %7125 = vmatprep.subr.bf16.mxu0 %v9220_v38  ;;  %v849_v24 = vld [vmem:[%s13635_s1 + $0x1970] sm:$0xff] }
 0x2be   :  { %7165 = vmatpush2.bf16.msra.mxu1 %v9355_v37  ;;  %v973_v54 = vld [vmem:[%s13635_s1 + $0x1d50] sm:$0xff]  ;;  %v9579_v37 = vcombine.low %v981_v23, %v985_v39  ;;  %v9444_v38 = vcombine.high %v845_v22, %v849_v24  ;;  %v9443_v42 = vcombine.low %v845_v22, %v849_v24 }
 0x2bf   :  { %7166 = vmatprep.subr.bf16.mxu1 %v9348_v19  ;;  %v977_v27 = vld [vmem:[%s13635_s1 + $0x1d70] sm:$0xff] }
 0x2c0   :  { %7126 = vmatpush2.bf16.msra.mxu0 %v9219_v48  ;;  %v9572_v21 = vcombine.high %v973_v54, %v977_v27  ;;  %v841_v47 = vld [vmem:[%s13635_s1 + $0x1930] sm:$0xff]  ;;  %v9571_v63 = vcombine.low %v973_v54, %v977_v27 }
 0x2c1   :  { %7127 = vmatprep.subr.bf16.mxu0 %v9212_v52  ;;  %v829_v57 = vld [vmem:[%s13635_s1 + $0x18d0] sm:$0xff] }
 0x2c2   :  { %7167 = vmatpush2.bf16.msra.mxu1 %v9347_v51  ;;  %v965_v51 = vld [vmem:[%s13635_s1 + $0x1d10] sm:$0xff] }
 0x2c3   :  { %7168 = vmatprep.subr.bf16.mxu1 %v9340_v56  ;;  %v833_v23 = vld [vmem:[%s13635_s1 + $0x18f0] sm:$0xff] }
 0x2c4   :  { %7128 = vmatpush2.bf16.msra.mxu0 %v9211_v6  ;;  %v957_v39 = vld [vmem:[%s13635_s1 + $0x1cd0] sm:$0xff]  ;;  %v9428_v24 = vcombine.high %v829_v57, %v833_v23 }
 0x2c5   :  { %7179 = vmatprep.subr.bf16.mxu0 %v9460_v3 }
 0x2c6   :  { %7169 = vmatpush2.bf16.msra.mxu1 %v9339_v45 }
 0x2c7   :  { %7220 = vmatprep.subr.bf16.mxu1 %v9588_v1  ;;  %v6885_v25 = vpop.f32.mrf.mxu0  ;;  %7130 = vmatmul.mubr.bf16.vlgmr.msra.gmra.mxu0 %v10630_v4 }
 0x2c8   :  { %v6886_v30 = vadd.f32 %v6885_v25, %v12131_v31  ;;  %7180 = vmatpush1.bf16.msra.mxu0 %v9459_v11  ;;  %v837_v31 = vld [vmem:[%s13635_s1 + $0x1910] sm:$0xff]  ;;  %7211 = vmatprep.mubr.bf16.mxu0 %v10660_v14 }
 0x2c9   :  { %v6926_v33 = vpop.f32.mrf.mxu1  ;;  %7171 = vmatmul.mubr.bf16.vlgmr.msra.gmra.mxu1 %v10645_v8  ;;  %v6887_v15 = vpop.f32.mrf.mxu0  ;;  %7181 = vmatprep.subr.bf16.mxu0 %v9452_v13  ;;  %v9436_v6 = vcombine.high %v837_v31, %v841_v47  ;;  %v961_v11 = vld [vmem:[%s13635_s1 + $0x1cf0] sm:$0xff] }
 0x2ca   :  { %7221 = vmatpush1.bf16.msra.mxu1 %v9587_v62  ;;  %v12333_v19 = vadd.f32 %v6926_v33, %v6886_v30  ;;  %v6888_v28 = vadd.f32 %v6887_v15, %v12148_v0  ;;  %v969_v0 = vld [vmem:[%s13635_s1 + $0x1d30] sm:$0xff]  ;;  %7252 = vmatprep.mubr.bf16.mxu1 %v10671_v18  ;;  %v9556_v27 = vcombine.high %v957_v39, %v961_v11 }
 0x2cb   :  { %v6928_v43 = vpop.f32.mrf.mxu1  ;;  %7222 = vmatprep.subr.bf16.mxu1 %v9580_v53  ;;  %v6889_v48 = vpop.f32.mrf.mxu0  ;;  %v9564_v2 = vcombine.high %v965_v51, %v969_v0  ;;  %v9435_v53 = vcombine.low %v837_v31, %v841_v47  ;;  %v9563_v22 = vcombine.low %v965_v51, %v969_v0  ;;  %v821_v30 = vld [vmem:[%s13635_s1 + $0x1890] sm:$0xff] }
 0x2cc   :  { %v7601_v52 = vrot.slane %v12333_v19, 4  ;;  %v12351_v56 = vadd.f32 %v6928_v43, %v6888_v28  ;;  %7182 = vmatpush1.bf16.msra.mxu0 %v9451_v35  ;;  %v825_v33 = vld [vmem:[%s13635_s1 + $0x18b0] sm:$0xff]  ;;  %v9427_v28 = vcombine.low %v829_v57, %v833_v23  ;;  %v9555_v43 = vcombine.low %v957_v39, %v961_v11 }
 0x2cd   :  { %v6930_v7 = vpop.f32.mrf.mxu1  ;;  %v6890_v60 = vpop.f32.mrf.mxu0  ;;  %7183 = vmatprep.subr.bf16.mxu0 %v9444_v38  ;;  %v949_v35 = vld [vmem:[%s13635_s1 + $0x1c90] sm:$0xff] }
 0x2ce   :  { %7223 = vmatpush1.bf16.msra.mxu1 %v9579_v37  ;;  %v7602_v45 = vadd.f32 %v7601_v52, %v12333_v19  ;;  %v7607_v3 = vrot.slane %v12351_v56, 4  ;;  %v953_v15 = vld [vmem:[%s13635_s1 + $0x1cb0] sm:$0xff] }
 0x2cf   :  { %v6931_v1 = vpop.f32.mrf.mxu1  ;;  %7224 = vmatprep.subr.bf16.mxu1 %v9572_v21  ;;  %v9420_v21 = vcombine.high %v821_v30, %v825_v33  ;;  %v9548_v48 = vcombine.high %v949_v35, %v953_v15  ;;  %v813_v51 = vld [vmem:[%s13635_s1 + $0x1850] sm:$0xff] }
 0x2d0   :  { %v7603_v62 = vrot.slane %v7602_v45, 2  ;;  %v7608_v13 = vadd.f32 %v7607_v3, %v12351_v56  ;;  %7184 = vmatpush1.bf16.msra.mxu0 %v9443_v42  ;;  %v817_v0 = vld [vmem:[%s13635_s1 + $0x1870] sm:$0xff] }
 0x2d1   :  { %7185 = vmatprep.subr.bf16.mxu0 %v9436_v6  ;;  %v941_v52 = vld [vmem:[%s13635_s1 + $0x1c50] sm:$0xff]  ;;  %v9547_v6 = vcombine.low %v949_v35, %v953_v15 }
 0x2d2   :  { %7225 = vmatpush1.bf16.msra.mxu1 %v9571_v63  ;;  %v7604_v25 = vadd.f32 %v7603_v62, %v7602_v45  ;;  %v7609_v54 = vrot.slane %v7608_v13, 2  ;;  %v945_v7 = vld [vmem:[%s13635_s1 + $0x1c70] sm:$0xff]  ;;  %v9419_v63 = vcombine.low %v821_v30, %v825_v33  ;;  %v9412_v45 = vcombine.high %v813_v51, %v817_v0 }
 0x2d3   :  { %7226 = vmatprep.subr.bf16.mxu1 %v9564_v2  ;;  %v9540_v2 = vcombine.high %v941_v52, %v945_v7  ;;  %v805_v57 = vld [vmem:[%s13635_s1 + $0x1810] sm:$0xff] }
 0x2d4   :  { %v7605_v37 = vrot.slane %v7604_v25, 1  ;;  %v7610_v38 = vadd.f32 %v7609_v54, %v7608_v13  ;;  %7186 = vmatpush1.bf16.msra.mxu0 %v9435_v53  ;;  %v809_v23 = vld [vmem:[%s13635_s1 + $0x1830] sm:$0xff]  ;;  %v9411_v13 = vcombine.low %v813_v51, %v817_v0  ;;  %v9539_v53 = vcombine.low %v941_v52, %v945_v7 }
 0x2d5   :  { %7187 = vmatprep.subr.bf16.mxu0 %v9428_v24  ;;  %v933_v39 = vld [vmem:[%s13635_s1 + $0x1c10] sm:$0xff] }
 0x2d6   :  { %7227 = vmatpush1.bf16.msra.mxu1 %v9563_v22  ;;  %v7606_v31 = vadd.f32 %v7605_v37, %v7604_v25  ;;  %v7611_v47 = vrot.slane %v7610_v38, 1  ;;  %v9404_v22 = vcombine.high %v805_v57, %v809_v23  ;;  %v1053_v30 = vld [vmem:[%s13635_s1 + $0x1fd0] sm:$0xff]  ;;  %v9403_v37 = vcombine.low %v805_v57, %v809_v23 }
 0x2d7   :  { %7228 = vmatprep.subr.bf16.mxu1 %v9556_v27  ;;  %v925_v27 = vld [vmem:[%s13635_s1 + $0x1bd0] sm:$0xff] }
 0x2d8   :  { %v7640_v42 = vmul.f32 0.125, %v7606_v31  ;;  %v7612_v60 = vadd.f32 %v7611_v47, %v7610_v38  ;;  %7188 = vmatpush1.bf16.msra.mxu0 %v9427_v28  ;;  %v1057_v33 = vld [vmem:[%s13635_s1 + $0x1ff0] sm:$0xff] }
 0x2d9   :  { %7189 = vmatprep.subr.bf16.mxu0 %v9420_v21  ;;  %v9652_v31 = vcombine.high %v1053_v30, %v1057_v33  ;;  %v917_v47 = vld [vmem:[%s13635_s1 + $0x1b90] sm:$0xff] }
 0x2da   :  { %7229 = vmatpush1.bf16.msra.mxu1 %v9555_v43  ;;  %v12393_v3 = vsub.f32 %v12333_v19, %v7640_v42  ;;  %v7641_v1 = vmul.f32 0.125, %v7612_v60  ;;  %v937_v19 = vld [vmem:[%s13635_s1 + $0x1c30] sm:$0xff]  ;;  %v9651_v60 = vcombine.low %v1053_v30, %v1057_v33 }
 0x2db   :  { %7230 = vmatprep.subr.bf16.mxu1 %v9548_v48  ;;  %v9532_v54 = vcombine.high %v933_v39, %v937_v19  ;;  %v9531_v38 = vcombine.low %v933_v39, %v937_v19  ;;  %v921_v48 = vld [vmem:[%s13635_s1 + $0x1bb0] sm:$0xff] }
 0x2dc   :  { %v7656_v11 = vmul.f32 %v12393_v3, %v12393_v3  ;;  %v12410_v62 = vsub.f32 %v12351_v56, %v7641_v1  ;;  %7190 = vmatpush1.bf16.msra.mxu0 %v9419_v63  ;;  %v929_v56 = vld [vmem:[%s13635_s1 + $0x1bf0] sm:$0xff]  ;;  %v9516_v63 = vcombine.high %v917_v47, %v921_v48 }
 0x2dd   :  { %7191 = vmatprep.subr.bf16.mxu0 %v9412_v45  ;;  %v9524_v28 = vcombine.high %v925_v27, %v929_v56  ;;  %v1045_v51 = vld [vmem:[%s13635_s1 + $0x1f90] sm:$0xff]  ;;  %v9523_v42 = vcombine.low %v925_v27, %v929_v56 }
 0x2de   :  { %7231 = vmatpush1.bf16.msra.mxu1 %v9547_v6  ;;  %v7674_v24 = vrot.slane %v7656_v11, 4  ;;  %v7657_v25 = vmul.f32 %v12410_v62, %v12410_v62  ;;  %v1049_v0 = vld [vmem:[%s13635_s1 + $0x1fb0] sm:$0xff] }
 0x2df   :  { %7232 = vmatprep.subr.bf16.mxu1 %v9540_v2  ;;  %v9644_v1 = vcombine.high %v1045_v51, %v1049_v0  ;;  %v909_v2 = vld [vmem:[%s13635_s1 + $0x1b50] sm:$0xff] }
 0x2e0   :  { %v7675_v35 = vadd.f32 %v7674_v24, %v7656_v11  ;;  %v7680_v15 = vrot.slane %v7657_v25, 4  ;;  %7192 = vmatpush1.bf16.msra.mxu0 %v9411_v13  ;;  %v913_v57 = vld [vmem:[%s13635_s1 + $0x1b70] sm:$0xff]  ;;  %v9515_v13 = vcombine.low %v917_v47, %v921_v48 }
 0x2e1   :  { %7193 = vmatprep.subr.bf16.mxu0 %v9404_v22  ;;  %v1037_v23 = vld [vmem:[%s13635_s1 + $0x1f50] sm:$0xff]  ;;  %v9508_v22 = vcombine.high %v909_v2, %v913_v57 }
 0x2e2   :  { %7233 = vmatpush1.bf16.msra.mxu1 %v9539_v53  ;;  %v7676_v43 = vrot.slane %v7675_v35, 2  ;;  %v7681_v21 = vadd.f32 %v7680_v15, %v7657_v25  ;;  %v1041_v39 = vld [vmem:[%s13635_s1 + $0x1f70] sm:$0xff]  ;;  %v9643_v53 = vcombine.low %v1045_v51, %v1049_v0 }
 0x2e3   :  { %7234 = vmatprep.subr.bf16.mxu1 %v9532_v54  ;;  %v9636_v54 = vcombine.high %v1037_v23, %v1041_v39  ;;  %v901_v27 = vld [vmem:[%s13635_s1 + $0x1b10] sm:$0xff] }
 0x2e4   :  { %v7677_v52 = vadd.f32 %v7676_v43, %v7675_v35  ;;  %v7682_v7 = vrot.slane %v7681_v21, 2  ;;  %7194 = vmatpush1.bf16.msra.mxu0 %v9403_v37  ;;  %v905_v56 = vld [vmem:[%s13635_s1 + $0x1b30] sm:$0xff]  ;;  %v9507_v37 = vcombine.low %v909_v2, %v913_v57 }
 0x2e5   :  { %7195 = vmatprep.subr.bf16.mxu0 %v9524_v28  ;;  %v1029_v30 = vld [vmem:[%s13635_s1 + $0x1f10] sm:$0xff]  ;;  %v9500_v28 = vcombine.high %v901_v27, %v905_v56  ;;  %v9499_v0 = vcombine.low %v901_v27, %v905_v56 }
 0x2e6   :  { %7235 = vmatpush1.bf16.msra.mxu1 %v9531_v38  ;;  %v7678_v6 = vrot.slane %v7677_v52, 1  ;;  %v7683_v45 = vadd.f32 %v7682_v7, %v7681_v21  ;;  %v1033_v33 = vld [vmem:[%s13635_s1 + $0x1f30] sm:$0xff]  ;;  %v9635_v38 = vcombine.low %v1037_v23, %v1041_v39 }
 0x2e7   :  { %7236 = vmatprep.subr.bf16.mxu1 %v9652_v31  ;;  %v9628_v21 = vcombine.high %v1029_v30, %v1033_v33  ;;  %v893_v31 = vld [vmem:[%s13635_s1 + $0x1ad0] sm:$0xff] }
 0x2e8   :  { %v7679_v19 = vadd.f32 %v7678_v6, %v7677_v52  ;;  %v7684_v11 = vrot.slane %v7683_v45, 1  ;;  %7196 = vmatpush2.bf16.msra.mxu0 %v9523_v42  ;;  %v897_v47 = vld [vmem:[%s13635_s1 + $0x1af0] sm:$0xff]  ;;  %v9627_v52 = vcombine.low %v1029_v30, %v1033_v33 }
 0x2e9   :  { %7197 = vmatprep.subr.bf16.mxu0 %v9516_v63  ;;  %v1021_v48 = vld [vmem:[%s13635_s1 + $0x1ed0] sm:$0xff]  ;;  %v9492_v7 = vcombine.high %v893_v31, %v897_v47  ;;  %v9491_v57 = vcombine.low %v893_v31, %v897_v47 }
 0x2ea   :  { %7237 = vmatpush2.bf16.msra.mxu1 %v9651_v60  ;;  %v7712_v24 = vmul.f32 0.125, %v7679_v19  ;;  %v7685_v25 = vadd.f32 %v7684_v11, %v7683_v45  ;;  %v1025_v51 = vld [vmem:[%s13635_s1 + $0x1ef0] sm:$0xff] }
 0x2eb   :  { %7238 = vmatprep.subr.bf16.mxu1 %v9644_v1  ;;  %v9620_v42 = vcombine.high %v1021_v48, %v1025_v51  ;;  %v885_v60 = vld [vmem:[%s13635_s1 + $0x1a90] sm:$0xff]  ;;  %v9913_v1 = vmov 1966171168   ;;  %v9619_v23 = vcombine.low %v1021_v48, %v1025_v51  ;;  %v94_v51 = vld [vmem:[%s13635_s1 + $0x1d8] sm:$0xff] }
 0x2ec   :  { %v7721_v35 = vadd.f32 1e-05, %v7712_v24  ;;  %v7713_v15 = vmul.f32 0.125, %v7685_v25  ;;  %7198 = vmatpush2.bf16.msra.mxu0 %v9515_v13  ;;  %v889_v63 = vld [vmem:[%s13635_s1 + $0x1ab0] sm:$0xff]  ;;  %v7748_v2 = vunpack.c.l.s4 %v9913_v1 }
 0x2ed   :  { %7199 = vmatprep.subr.bf16.mxu0 %v9508_v22  ;;  %v1013_v6 = vld [vmem:[%s13635_s1 + $0x1e90] sm:$0xff]  ;;  %v9484_v39 = vcombine.high %v885_v60, %v889_v63  ;;  %v9483_v25 = vcombine.low %v885_v60, %v889_v63 }
 0x2ee   :  { %7239 = vmatpush2.bf16.msra.mxu1 %v9643_v53  ;;  %v7722_v43 = vadd.f32 1e-05, %v7713_v15  ;;  %9894 = vrsqrt.f32 %v7721_v35  ;;  %v1017_v45 = vld [vmem:[%s13635_s1 + $0x1eb0] sm:$0xff]  ;;  %v7749_v24 = vunpack.c.0.s8 %v7748_v2 }
 0x2ef   :  { %7240 = vmatprep.subr.bf16.mxu1 %v9636_v54  ;;  %v9612_v19 = vcombine.high %v1013_v6, %v1017_v45  ;;  %v877_v11 = vld [vmem:[%s13635_s1 + $0x1a50] sm:$0xff]  ;;  %v9611_v54 = vcombine.low %v1013_v6, %v1017_v45  ;;  %v12535_v6 = vsub.s32 4, %v10832_v32 }
 0x2f0   :  { %9896 = vrsqrt.f32 %v7722_v43  ;;  %7200 = vmatpush2.bf16.msra.mxu0 %v9507_v37  ;;  %v881_v13 = vld [vmem:[%s13635_s1 + $0x1a70] sm:$0xff] }
 0x2f1   :  { %7201 = vmatprep.subr.bf16.mxu0 %v9500_v28  ;;  %v1005_v53 = vld [vmem:[%s13635_s1 + $0x1e50] sm:$0xff]  ;;  %v9476_v27 = vcombine.high %v877_v11, %v881_v13  ;;  %v9475_v28 = vcombine.low %v877_v11, %v881_v13 }
 0x2f2   :  { %7241 = vmatpush2.bf16.msra.mxu1 %v9635_v38  ;;  %v1009_v22 = vld [vmem:[%s13635_s1 + $0x1e70] sm:$0xff]  ;;  %v12511_v38 = vsub.s32 %v7749_v24, %v10832_v32 }
 0x2f3   :  { %7242 = vmatprep.subr.bf16.mxu1 %v9628_v21  ;;  %v9604_v56 = vcombine.high %v1005_v53, %v1009_v22  ;;  %v869_v30 = vld [vmem:[%s13635_s1 + $0x1a10] sm:$0xff]  ;;  %v9603_v21 = vcombine.low %v1005_v53, %v1009_v22 }
 0x2f4   :  { %7202 = vmatpush2.bf16.msra.mxu0 %v9499_v0  ;;  %v873_v33 = vld [vmem:[%s13635_s1 + $0x1a30] sm:$0xff]  ;;  %v98_v0 = vld [vmem:[%s13635_s1 + $0x1f8] sm:$0xff] }
 0x2f5   :  { %7203 = vmatprep.subr.bf16.mxu0 %v9492_v7  ;;  %v997_v35 = vld [vmem:[%s13635_s1 + $0x1e10] sm:$0xff]  ;;  %v9468_v31 = vcombine.high %v869_v30, %v873_v33  ;;  %v226_v7 = vld [vmem:[%s13635_s1 + $0x5f8] sm:$0xff]  ;;  %v9467_v63 = vcombine.low %v869_v30, %v873_v33  ;;  %v8694_v1 = vcombine.high %v94_v51, %v98_v0  ;;  %v8693_v13 = vcombine.low %v94_v51, %v98_v0 }
 0x2f6   :  { %7243 = vmatpush2.bf16.msra.mxu1 %v9627_v52  ;;  %v1001_v15 = vld [vmem:[%s13635_s1 + $0x1e30] sm:$0xff]  ;;  %v222_v52 = vld [vmem:[%s13635_s1 + $0x5d8] sm:$0xff] }
 0x2f7   :  { %7244 = vmatprep.subr.bf16.mxu1 %v9620_v42  ;;  %v9596_v48 = vcombine.high %v997_v35, %v1001_v15  ;;  %v12529_v42 = vrot.slane %v7743_v17, %v12511_v38  ;;  %v9595_v45 = vcombine.low %v997_v35, %v1001_v15  ;;  %v90_v17 = vld [vmem:[%s13635_s1 + $0x1b8] sm:$0xff]  ;;  %v8821_v53 = vcombine.low %v222_v52, %v226_v7 }
 0x2f8   :  { %7204 = vmatpush2.bf16.msra.mxu0 %v9491_v57  ;;  %v8822_v57 = vcombine.high %v222_v52, %v226_v7  ;;  %v8686_v22 = vcombine.high %v86_v12, %v90_v17  ;;  %v206_v30 = vld [vmem:[%s13635_s1 + $0x558] sm:$0xff] }
 0x2f9   :  { %7205 = vmatprep.subr.bf16.mxu0 %v9484_v39  ;;  %v218_v39 = vld [vmem:[%s13635_s1 + $0x5b8] sm:$0xff] }
 0x2fa   :  { %7245 = vmatpush2.bf16.msra.mxu1 %v9619_v23  ;;  %v214_v23 = vld [vmem:[%s13635_s1 + $0x598] sm:$0xff] }
 0x2fb   :  { %7246 = vmatprep.subr.bf16.mxu1 %v9612_v19  ;;  %v9895_v37 = vpop.eup %9894  ;;  %v9911_v19 = vld [vmem:[%s13637_s2] sm:$0xff]  ;;  %v210_v33 = vld [vmem:[%s13635_s1 + $0x578] sm:$0xff] }
 0x2fc   :  { %7206 = vmatpush2.bf16.msra.mxu0 %v9483_v25  ;;  %v1080_v11 = vrot.slane %v9911_v19, %v12535_v6  ;;  %v1084_v24 = vrot.slane %v9911_v19, %v12540_v10  ;;  %v8814_v25 = vcombine.high %v214_v23, %v218_v39  ;;  %v8806_v51 = vcombine.high %v206_v30, %v210_v33  ;;  %v70_v0 = vld [vmem:[%s13635_s1 + $0x118] sm:$0xff] }
 0x2fd   :  { %v9897_v43 = vpop.eup %9896  ;;  %7207 = vmatprep.subr.bf16.mxu0 %v9476_v27  ;;  %v82_v27 = vld [vmem:[%s13635_s1 + $0x178] sm:$0xff] }
 0x2fe   :  { %7247 = vmatpush2.bf16.msra.mxu1 %v9611_v54  ;;  %v7744_v47 = vcombine.low %v9895_v37, %v9897_v43  ;;  %v78_v54 = vld [vmem:[%s13635_s1 + $0x158] sm:$0xff]  ;;  %v8685_v37 = vcombine.low %v86_v12, %v90_v17  ;;  %v8813_v43 = vcombine.low %v214_v23, %v218_v39 }
 0x2ff   :  { %7248 = vmatprep.subr.bf16.mxu1 %v9604_v56  ;;  %v74_v52 = vld [vmem:[%s13635_s1 + $0x138] sm:$0xff]  ;;  %v8677_v12 = vcombine.low %v78_v54, %v82_v27 }
 0x300   :  { %v12532_v60 = vrot.slane %v7744_v47, %v12511_v38  ;;  %7208 = vmatpush2.bf16.msra.mxu0 %v9475_v28  ;;  %v8670_v23 = vcombine.high %v70_v0, %v74_v52 }
 0x301   :  { %7209 = vmatprep.subr.bf16.mxu0 %v9468_v31 }
 0x302   :  { %7249 = vmatpush2.bf16.msra.mxu1 %v9603_v21  ;;  %v7775_v2 = vcombine.low %v12529_v42, %v12532_v60  ;;  %v8678_v21 = vcombine.high %v78_v54, %v82_v27  ;;  %v54_v27 = vld [vmem:[%s13635_s1 + $0x98] sm:$0xff] }
 0x303   :  { %7250 = vmatprep.subr.bf16.mxu1 %v9596_v48 }
 0x304   :  { %7210 = vmatpush2.bf16.msra.mxu0 %v9467_v63  ;;  %v198_v63 = vld [vmem:[%s13635_s1 + $0x518] sm:$0xff] }
 0x305   :  { %7261 = vmatprep.subr.bf16.mxu0 %v8694_v1 }
 0x306   :  { %7251 = vmatpush2.bf16.msra.mxu1 %v9595_v45  ;;  %v202_v45 = vld [vmem:[%s13635_s1 + $0x538] sm:$0xff] }
 0x307   :  { %7302 = vmatprep.subr.bf16.mxu1 %v8822_v57  ;;  %v6967_v56 = vpop.f32.mrf.mxu0  ;;  %7212 = vmatmul.mubr.bf16.vlgmr.msra.gmra.mxu0 %v10863_v55  ;;  %v8798_v19 = vcombine.high %v198_v63, %v202_v45 }
 0x308   :  { %v6968_v35 = vadd.f32 %v6967_v56, %v1080_v11  ;;  %7262 = vmatpush1.bf16.msra.mxu0 %v8693_v13  ;;  %7293 = vmatprep.mubr.bf16.mxu0 %v10056_v58  ;;  %v8805_v58 = vcombine.low %v206_v30, %v210_v33  ;;  %v62_v11 = vld [vmem:[%s13635_s1 + $0xd8] sm:$0xff] }
 0x309   :  { %v7008_v15 = vpop.f32.mrf.mxu1  ;;  %7253 = vmatmul.mubr.bf16.vlgmr.msra.gmra.mxu1 %v10874_v61  ;;  %v6969_v28 = vpop.f32.mrf.mxu0  ;;  %7263 = vmatprep.subr.bf16.mxu0 %v8686_v22  ;;  %v190_v13 = vld [vmem:[%s13635_s1 + $0x4d8] sm:$0xff]  ;;  %v8669_v22 = vcombine.low %v70_v0, %v74_v52 }
 0x30a   :  { %7303 = vmatpush1.bf16.msra.mxu1 %v8821_v53  ;;  %v12573_v31 = vadd.f32 %v7008_v15, %v6968_v35  ;;  %v6970_v47 = vadd.f32 %v6969_v28, %v1084_v24  ;;  %7334 = vmatprep.mubr.bf16.mxu1 %v10060_v59  ;;  %v66_v59 = vld [vmem:[%s13635_s1 + $0xf8] sm:$0xff]  ;;  %v8797_v24 = vcombine.low %v198_v63, %v202_v45 }
 0x30b   :  { %v7010_v48 = vpop.f32.mrf.mxu1  ;;  %7304 = vmatprep.subr.bf16.mxu1 %v8814_v25  ;;  %v6971_v7 = vpop.f32.mrf.mxu0  ;;  %v194_v53 = vld [vmem:[%s13635_s1 + $0x4f8] sm:$0xff]  ;;  %v8662_v25 = vcombine.high %v62_v11, %v66_v59  ;;  %v8661_v35 = vcombine.low %v62_v11, %v66_v59 }
 0x30c   :  { %v12589_v1 = vadd.f32 %v7010_v48, %v6970_v47  ;;  %7264 = vmatpush1.bf16.msra.mxu0 %v8685_v37  ;;  %v8790_v54 = vcombine.high %v190_v13, %v194_v53  ;;  %v58_v56 = vld [vmem:[%s13635_s1 + $0xb8] sm:$0xff]  ;;  %v8789_v15 = vcombine.low %v190_v13, %v194_v53 }
 0x30d   :  { %v7012_v57 = vpop.f32.mrf.mxu1  ;;  %v6972_v17 = vpop.f32.mrf.mxu0  ;;  %7265 = vmatprep.subr.bf16.mxu0 %v8678_v21  ;;  %v182_v30 = vld [vmem:[%s13635_s1 + $0x498] sm:$0xff]  ;;  %v8654_v37 = vcombine.high %v54_v27, %v58_v56 }
 0x30e   :  { %7305 = vmatpush1.bf16.msra.mxu1 %v8813_v43  ;;  %v186_v33 = vld [vmem:[%s13635_s1 + $0x4b8] sm:$0xff] }
 0x30f   :  { %v7013_v39 = vpop.f32.mrf.mxu1  ;;  %7306 = vmatprep.subr.bf16.mxu1 %v8806_v51  ;;  %v8782_v28 = vcombine.high %v182_v30, %v186_v33  ;;  %v46_v43 = vld [vmem:[%s13635_s1 + $0x58] sm:$0xff]  ;;  %v8653_v51 = vcombine.low %v54_v27, %v58_v56  ;;  %v8781_v0 = vcombine.low %v182_v30, %v186_v33 }
 0x310   :  { %7266 = vmatpush1.bf16.msra.mxu0 %v8677_v12  ;;  %v50_v21 = vld [vmem:[%s13635_s1 + $0x78] sm:$0xff] }
 0x311   :  { %7267 = vmatprep.subr.bf16.mxu0 %v8670_v23  ;;  %v174_v47 = vld [vmem:[%s13635_s1 + $0x458] sm:$0xff]  ;;  %v8646_v52 = vcombine.high %v46_v43, %v50_v21  ;;  %v8645_v17 = vcombine.low %v46_v43, %v50_v21 }
 0x312   :  { %7307 = vmatpush1.bf16.msra.mxu1 %v8805_v58  ;;  %v178_v48 = vld [vmem:[%s13635_s1 + $0x478] sm:$0xff] }
 0x313   :  { %7308 = vmatprep.subr.bf16.mxu1 %v8798_v19  ;;  %v8774_v7 = vcombine.high %v174_v47, %v178_v48  ;;  %v38_v63 = vld [vmem:[%s13635_s1 + $0x18] sm:$0xff]  ;;  %v8773_v58 = vcombine.low %v174_v47, %v178_v48 }
 0x314   :  { %7268 = vmatpush1.bf16.msra.mxu0 %v8669_v22  ;;  %v42_v45 = vld [vmem:[%s13635_s1 + $0x38] sm:$0xff] }
 0x315   :  { %7269 = vmatprep.subr.bf16.mxu0 %v8662_v25  ;;  %v166_v57 = vld [vmem:[%s13635_s1 + $0x418] sm:$0xff]  ;;  %v8638_v23 = vcombine.high %v38_v63, %v42_v45  ;;  %v8637_v53 = vcombine.low %v38_v63, %v42_v45 }
 0x316   :  { %7309 = vmatpush1.bf16.msra.mxu1 %v8797_v24  ;;  %v170_v12 = vld [vmem:[%s13635_s1 + $0x438] sm:$0xff] }
 0x317   :  { %7310 = vmatprep.subr.bf16.mxu1 %v8790_v54  ;;  %v8766_v39 = vcombine.high %v166_v57, %v170_v12  ;;  %v158_v19 = vld [vmem:[%s13635_s1 + $0x3d8] sm:$0xff]  ;;  %v8765_v22 = vcombine.low %v166_v57, %v170_v12 }
 0x318   :  { %7270 = vmatpush1.bf16.msra.mxu0 %v8661_v35  ;;  %v162_v11 = vld [vmem:[%s13635_s1 + $0x3f8] sm:$0xff] }
 0x319   :  { %7271 = vmatprep.subr.bf16.mxu0 %v8654_v37  ;;  %v286_v59 = vld [vmem:[%s13635_s1 + $0x7d8] sm:$0xff]  ;;  %v8758_v24 = vcombine.high %v158_v19, %v162_v11  ;;  %v8757_v33 = vcombine.low %v158_v19, %v162_v11 }
 0x31a   :  { %7311 = vmatpush1.bf16.msra.mxu1 %v8789_v15  ;;  %v290_v13 = vld [vmem:[%s13635_s1 + $0x7f8] sm:$0xff] }
 0x31b   :  { %7312 = vmatprep.subr.bf16.mxu1 %v8782_v28  ;;  %v8886_v25 = vcombine.high %v286_v59, %v290_v13  ;;  %v150_v54 = vld [vmem:[%s13635_s1 + $0x398] sm:$0xff]  ;;  %v8885_v35 = vcombine.low %v286_v59, %v290_v13 }
 0x31c   :  { %7272 = vmatpush1.bf16.msra.mxu0 %v8653_v51  ;;  %v154_v27 = vld [vmem:[%s13635_s1 + $0x3b8] sm:$0xff] }
 0x31d   :  { %7273 = vmatprep.subr.bf16.mxu0 %v8646_v52  ;;  %v278_v56 = vld [vmem:[%s13635_s1 + $0x798] sm:$0xff]  ;;  %v8750_v15 = vcombine.high %v150_v54, %v154_v27  ;;  %v8749_v48 = vcombine.low %v150_v54, %v154_v27 }
 0x31e   :  { %7313 = vmatpush1.bf16.msra.mxu1 %v8781_v0  ;;  %v282_v30 = vld [vmem:[%s13635_s1 + $0x7b8] sm:$0xff] }
 0x31f   :  { %7314 = vmatprep.subr.bf16.mxu1 %v8774_v7  ;;  %v8878_v37 = vcombine.high %v278_v56, %v282_v30  ;;  %v142_v28 = vld [vmem:[%s13635_s1 + $0x358] sm:$0xff]  ;;  %v8877_v51 = vcombine.low %v278_v56, %v282_v30 }
 0x320   :  { %7274 = vmatpush1.bf16.msra.mxu0 %v8645_v17  ;;  %v146_v43 = vld [vmem:[%s13635_s1 + $0x378] sm:$0xff] }
 0x321   :  { %7275 = vmatprep.subr.bf16.mxu0 %v8638_v23  ;;  %v270_v21 = vld [vmem:[%s13635_s1 + $0x758] sm:$0xff]  ;;  %v8742_v0 = vcombine.high %v142_v28, %v146_v43  ;;  %v8741_v12 = vcombine.low %v142_v28, %v146_v43 }
 0x322   :  { %7315 = vmatpush1.bf16.msra.mxu1 %v8773_v58  ;;  %v274_v47 = vld [vmem:[%s13635_s1 + $0x778] sm:$0xff] }
 0x323   :  { %7316 = vmatprep.subr.bf16.mxu1 %v8766_v39  ;;  %v8870_v52 = vcombine.high %v270_v21, %v274_v47  ;;  %v134_v7 = vld [vmem:[%s13635_s1 + $0x318] sm:$0xff]  ;;  %v8869_v17 = vcombine.low %v270_v21, %v274_v47 }
 0x324   :  { %7276 = vmatpush1.bf16.msra.mxu0 %v8637_v53  ;;  %v138_v63 = vld [vmem:[%s13635_s1 + $0x338] sm:$0xff] }
 0x325   :  { %7277 = vmatprep.subr.bf16.mxu0 %v8758_v24  ;;  %v262_v45 = vld [vmem:[%s13635_s1 + $0x718] sm:$0xff]  ;;  %v8734_v58 = vcombine.high %v134_v7, %v138_v63  ;;  %v8733_v13 = vcombine.low %v134_v7, %v138_v63 }
 0x326   :  { %7317 = vmatpush1.bf16.msra.mxu1 %v8765_v22  ;;  %v266_v57 = vld [vmem:[%s13635_s1 + $0x738] sm:$0xff] }
 0x327   :  { %7318 = vmatprep.subr.bf16.mxu1 %v8886_v25  ;;  %v8862_v23 = vcombine.high %v262_v45, %v266_v57  ;;  %v126_v39 = vld [vmem:[%s13635_s1 + $0x2d8] sm:$0xff]  ;;  %v8861_v53 = vcombine.low %v262_v45, %v266_v57 }
 0x328   :  { %7278 = vmatpush2.bf16.msra.mxu0 %v8757_v33  ;;  %v130_v19 = vld [vmem:[%s13635_s1 + $0x2f8] sm:$0xff] }
 0x329   :  { %7279 = vmatprep.subr.bf16.mxu0 %v8750_v15  ;;  %v254_v11 = vld [vmem:[%s13635_s1 + $0x6d8] sm:$0xff]  ;;  %v8726_v22 = vcombine.high %v126_v39, %v130_v19  ;;  %v8725_v30 = vcombine.low %v126_v39, %v130_v19 }
 0x32a   :  { %7319 = vmatpush2.bf16.msra.mxu1 %v8885_v35  ;;  %v258_v59 = vld [vmem:[%s13635_s1 + $0x6f8] sm:$0xff] }
 0x32b   :  { %7320 = vmatprep.subr.bf16.mxu1 %v8878_v37  ;;  %v8854_v24 = vcombine.high %v254_v11, %v258_v59  ;;  %v118_v25 = vld [vmem:[%s13635_s1 + $0x298] sm:$0xff]  ;;  %v8853_v33 = vcombine.low %v254_v11, %v258_v59 }
 0x32c   :  { %7280 = vmatpush2.bf16.msra.mxu0 %v8749_v48  ;;  %v122_v54 = vld [vmem:[%s13635_s1 + $0x2b8] sm:$0xff] }
 0x32d   :  { %7281 = vmatprep.subr.bf16.mxu0 %v8742_v0  ;;  %v246_v27 = vld [vmem:[%s13635_s1 + $0x698] sm:$0xff]  ;;  %v8718_v35 = vcombine.high %v118_v25, %v122_v54  ;;  %v8717_v47 = vcombine.low %v118_v25, %v122_v54 }
 0x32e   :  { %7321 = vmatpush2.bf16.msra.mxu1 %v8877_v51  ;;  %v250_v56 = vld [vmem:[%s13635_s1 + $0x6b8] sm:$0xff] }
 0x32f   :  { %7322 = vmatprep.subr.bf16.mxu1 %v8870_v52  ;;  %v8846_v15 = vcombine.high %v246_v27, %v250_v56  ;;  %v110_v37 = vld [vmem:[%s13635_s1 + $0x258] sm:$0xff]  ;;  %v8845_v48 = vcombine.low %v246_v27, %v250_v56 }
 0x330   :  { %7282 = vmatpush2.bf16.msra.mxu0 %v8741_v12  ;;  %v114_v28 = vld [vmem:[%s13635_s1 + $0x278] sm:$0xff] }
 0x331   :  { %7283 = vmatprep.subr.bf16.mxu0 %v8734_v58  ;;  %v238_v43 = vld [vmem:[%s13635_s1 + $0x658] sm:$0xff]  ;;  %v8710_v51 = vcombine.high %v110_v37, %v114_v28  ;;  %v8709_v57 = vcombine.low %v110_v37, %v114_v28 }
 0x332   :  { %7323 = vmatpush2.bf16.msra.mxu1 %v8869_v17  ;;  %v242_v21 = vld [vmem:[%s13635_s1 + $0x678] sm:$0xff] }
 0x333   :  { %7324 = vmatprep.subr.bf16.mxu1 %v8862_v23  ;;  %v8838_v0 = vcombine.high %v238_v43, %v242_v21  ;;  %v102_v52 = vld [vmem:[%s13635_s1 + $0x218] sm:$0xff]  ;;  %v8837_v12 = vcombine.low %v238_v43, %v242_v21 }
 0x334   :  { %7284 = vmatpush2.bf16.msra.mxu0 %v8733_v13  ;;  %v106_v7 = vld [vmem:[%s13635_s1 + $0x238] sm:$0xff] }
 0x335   :  { %7285 = vmatprep.subr.bf16.mxu0 %v8726_v22  ;;  %v230_v63 = vld [vmem:[%s13635_s1 + $0x618] sm:$0xff]  ;;  %v8702_v17 = vcombine.high %v102_v52, %v106_v7  ;;  %v8701_v59 = vcombine.low %v102_v52, %v106_v7 }
 0x336   :  { %7325 = vmatpush2.bf16.msra.mxu1 %v8861_v53  ;;  %v234_v45 = vld [vmem:[%s13635_s1 + $0x638] sm:$0xff] }
 0x337   :  { %7326 = vmatprep.subr.bf16.mxu1 %v8854_v24  ;;  %v8830_v58 = vcombine.high %v230_v63, %v234_v45  ;;  %v350_v23 = vld [vmem:[%s13635_s1 + $0x9d8] sm:$0xff]  ;;  %v8829_v13 = vcombine.low %v230_v63, %v234_v45 }
 0x338   :  { %7286 = vmatpush2.bf16.msra.mxu0 %v8725_v30  ;;  %v354_v39 = vld [vmem:[%s13635_s1 + $0x9f8] sm:$0xff] }
 0x339   :  { %7287 = vmatprep.subr.bf16.mxu0 %v8718_v35  ;;  %v478_v19 = vld [vmem:[%s13635_s1 + $0xdd8] sm:$0xff]  ;;  %v8950_v53 = vcombine.high %v350_v23, %v354_v39  ;;  %v8949_v56 = vcombine.low %v350_v23, %v354_v39 }
 0x33a   :  { %7327 = vmatpush2.bf16.msra.mxu1 %v8853_v33  ;;  %v482_v11 = vld [vmem:[%s13635_s1 + $0xdf8] sm:$0xff] }
 0x33b   :  { %7328 = vmatprep.subr.bf16.mxu1 %v8846_v15  ;;  %v9078_v22 = vcombine.high %v478_v19, %v482_v11  ;;  %v342_v24 = vld [vmem:[%s13635_s1 + $0x998] sm:$0xff]  ;;  %v9077_v30 = vcombine.low %v478_v19, %v482_v11 }
 0x33c   :  { %7288 = vmatpush2.bf16.msra.mxu0 %v8717_v47  ;;  %v346_v25 = vld [vmem:[%s13635_s1 + $0x9b8] sm:$0xff] }
 0x33d   :  { %7289 = vmatprep.subr.bf16.mxu0 %v8710_v51  ;;  %v470_v54 = vld [vmem:[%s13635_s1 + $0xd98] sm:$0xff]  ;;  %v8942_v33 = vcombine.high %v342_v24, %v346_v25  ;;  %v8941_v51 = vcombine.low %v342_v24, %v346_v25 }
 0x33e   :  { %7329 = vmatpush2.bf16.msra.mxu1 %v8845_v48  ;;  %v474_v27 = vld [vmem:[%s13635_s1 + $0xdb8] sm:$0xff] }
 0x33f   :  { %7330 = vmatprep.subr.bf16.mxu1 %v8838_v0  ;;  %v9070_v35 = vcombine.high %v470_v54, %v474_v27  ;;  %v334_v15 = vld [vmem:[%s13635_s1 + $0x958] sm:$0xff]  ;;  %v9069_v52 = vcombine.low %v470_v54, %v474_v27 }
 0x340   :  { %7290 = vmatpush2.bf16.msra.mxu0 %v8709_v57  ;;  %v338_v37 = vld [vmem:[%s13635_s1 + $0x978] sm:$0xff] }
 0x341   :  { %7291 = vmatprep.subr.bf16.mxu0 %v8702_v17  ;;  %v462_v43 = vld [vmem:[%s13635_s1 + $0xd58] sm:$0xff]  ;;  %v8933_v39 = vcombine.low %v334_v15, %v338_v37 }
 0x342   :  { %7331 = vmatpush2.bf16.msra.mxu1 %v8837_v12  ;;  %v466_v21 = vld [vmem:[%s13635_s1 + $0xd78] sm:$0xff] }
 0x343   :  { %7332 = vmatprep.subr.bf16.mxu1 %v8830_v58  ;;  %v9062_v57 = vcombine.high %v462_v43, %v466_v21  ;;  %v454_v17 = vld [vmem:[%s13635_s1 + $0xd18] sm:$0xff] }
 0x344   :  { %7292 = vmatpush2.bf16.msra.mxu0 %v8701_v59  ;;  %v450_v24 = vld [vmem:[%s13635_s1 + $0xcf8] sm:$0xff] }
 0x345   :  { %7343 = vmatprep.subr.bf16.mxu0 %v8950_v53  ;;  %v318_v53 = vld [vmem:[%s13635_s1 + $0x8d8] sm:$0xff] }
 0x346   :  { %7333 = vmatpush2.bf16.msra.mxu1 %v8829_v13 }
 0x347   :  { %7384 = vmatprep.subr.bf16.mxu1 %v9078_v22  ;;  %v7049_v28 = vpop.f32.mrf.mxu0  ;;  %7294 = vmatmul.mubr.bf16.vlgmr.msra.gmra.mxu0 %v10186_v16  ;;  %v8934_v16 = vcombine.high %v334_v15, %v338_v37  ;;  %v446_v22 = vld [vmem:[%s13635_s1 + $0xcd8] sm:$0xff] }
 0x348   :  { %v7050_v47 = vadd.f32 %v7049_v28, %v12573_v31  ;;  %7344 = vmatpush1.bf16.msra.mxu0 %v8949_v56  ;;  %v326_v31 = vld [vmem:[%s13635_s1 + $0x918] sm:$0xff]  ;;  %7375 = vmatprep.mubr.bf16.mxu0 %v10216_v26  ;;  %v9061_v26 = vcombine.low %v462_v43, %v466_v21  ;;  %v9046_v56 = vcombine.high %v446_v22, %v450_v24 }
 0x349   :  { %v7090_v48 = vpop.f32.mrf.mxu1  ;;  %7335 = vmatmul.mubr.bf16.vlgmr.msra.gmra.mxu1 %v10201_v20  ;;  %v7051_v0 = vpop.f32.mrf.mxu0  ;;  %7345 = vmatprep.subr.bf16.mxu0 %v8942_v33  ;;  %v330_v20 = vld [vmem:[%s13635_s1 + $0x938] sm:$0xff]  ;;  %v9045_v28 = vcombine.low %v446_v22, %v450_v24 }
 0x34a   :  { %7385 = vmatpush1.bf16.msra.mxu1 %v9077_v30  ;;  %v12774_v7 = vadd.f32 %v7090_v48, %v7050_v47  ;;  %v7052_v63 = vadd.f32 %v7051_v0, %v12589_v1  ;;  %v458_v1 = vld [vmem:[%s13635_s1 + $0xd38] sm:$0xff]  ;;  %7416 = vmatprep.mubr.bf16.mxu1 %v10227_v29  ;;  %v8926_v11 = vcombine.high %v326_v31, %v330_v20 }
 0x34b   :  { %v7092_v45 = vpop.f32.mrf.mxu1  ;;  %7386 = vmatprep.subr.bf16.mxu1 %v9070_v35  ;;  %v7053_v12 = vpop.f32.mrf.mxu0  ;;  %v9054_v13 = vcombine.high %v454_v17, %v458_v1  ;;  %v322_v29 = vld [vmem:[%s13635_s1 + $0x8f8] sm:$0xff]  ;;  %v8925_v25 = vcombine.low %v326_v31, %v330_v20  ;;  %v9053_v54 = vcombine.low %v454_v17, %v458_v1 }
 0x34c   :  { %v12791_v58 = vadd.f32 %v7092_v45, %v7052_v63  ;;  %7346 = vmatpush1.bf16.msra.mxu0 %v8941_v51  ;;  %v8918_v27 = vcombine.high %v318_v53, %v322_v29  ;;  %v310_v30 = vld [vmem:[%s13635_s1 + $0x898] sm:$0xff]  ;;  %v8917_v37 = vcombine.low %v318_v53, %v322_v29 }
 0x34d   :  { %v7094_v23 = vpop.f32.mrf.mxu1  ;;  %v7054_v19 = vpop.f32.mrf.mxu0  ;;  %7347 = vmatprep.subr.bf16.mxu0 %v8934_v16  ;;  %v314_v33 = vld [vmem:[%s13635_s1 + $0x8b8] sm:$0xff] }
 0x34e   :  { %7387 = vmatpush1.bf16.msra.mxu1 %v9069_v52  ;;  %v438_v35 = vld [vmem:[%s13635_s1 + $0xc98] sm:$0xff]  ;;  %v8910_v43 = vcombine.high %v310_v30, %v314_v33  ;;  %v8909_v52 = vcombine.low %v310_v30, %v314_v33 }
 0x34f   :  { %v7095_v59 = vpop.f32.mrf.mxu1  ;;  %7388 = vmatprep.subr.bf16.mxu1 %v9062_v57  ;;  %v442_v15 = vld [vmem:[%s13635_s1 + $0xcb8] sm:$0xff] }
 0x350   :  { %7348 = vmatpush1.bf16.msra.mxu0 %v8933_v39  ;;  %v9038_v21 = vcombine.high %v438_v35, %v442_v15  ;;  %v302_v47 = vld [vmem:[%s13635_s1 + $0x858] sm:$0xff]  ;;  %v9037_v16 = vcombine.low %v438_v35, %v442_v15 }
 0x351   :  { %7349 = vmatprep.subr.bf16.mxu0 %v8926_v11  ;;  %v306_v48 = vld [vmem:[%s13635_s1 + $0x878] sm:$0xff] }
 0x352   :  { %7389 = vmatpush1.bf16.msra.mxu1 %v9061_v26  ;;  %v430_v51 = vld [vmem:[%s13635_s1 + $0xc58] sm:$0xff]  ;;  %v8902_v63 = vcombine.high %v302_v47, %v306_v48  ;;  %v8901_v17 = vcombine.low %v302_v47, %v306_v48 }
 0x353   :  { %7390 = vmatprep.subr.bf16.mxu1 %v9054_v13  ;;  %v434_v0 = vld [vmem:[%s13635_s1 + $0xc78] sm:$0xff] }
 0x354   :  { %7350 = vmatpush1.bf16.msra.mxu0 %v8925_v25  ;;  %v9030_v45 = vcombine.high %v430_v51, %v434_v0  ;;  %v294_v57 = vld [vmem:[%s13635_s1 + $0x818] sm:$0xff]  ;;  %v9029_v1 = vcombine.low %v430_v51, %v434_v0 }
 0x355   :  { %7351 = vmatprep.subr.bf16.mxu0 %v8918_v27  ;;  %v298_v31 = vld [vmem:[%s13635_s1 + $0x838] sm:$0xff] }
 0x356   :  { %7391 = vmatpush1.bf16.msra.mxu1 %v9053_v54  ;;  %v422_v20 = vld [vmem:[%s13635_s1 + $0xc18] sm:$0xff]  ;;  %v8894_v23 = vcombine.high %v294_v57, %v298_v31  ;;  %v8893_v13 = vcombine.low %v294_v57, %v298_v31 }
 0x357   :  { %7392 = vmatprep.subr.bf16.mxu1 %v9046_v56  ;;  %v426_v12 = vld [vmem:[%s13635_s1 + $0xc38] sm:$0xff] }
 0x358   :  { %7352 = vmatpush1.bf16.msra.mxu0 %v8917_v37  ;;  %v9022_v39 = vcombine.high %v422_v20, %v426_v12  ;;  %v414_v19 = vld [vmem:[%s13635_s1 + $0xbd8] sm:$0xff]  ;;  %v9021_v53 = vcombine.low %v422_v20, %v426_v12 }
 0x359   :  { %7353 = vmatprep.subr.bf16.mxu0 %v8910_v43  ;;  %v418_v26 = vld [vmem:[%s13635_s1 + $0xbf8] sm:$0xff] }
 0x35a   :  { %7393 = vmatpush1.bf16.msra.mxu1 %v9045_v28  ;;  %v542_v11 = vld [vmem:[%s13635_s1 + $0xfd8] sm:$0xff]  ;;  %v9014_v29 = vcombine.high %v414_v19, %v418_v26  ;;  %v9013_v56 = vcombine.low %v414_v19, %v418_v26 }
 0x35b   :  { %7394 = vmatprep.subr.bf16.mxu1 %v9038_v21  ;;  %v546_v59 = vld [vmem:[%s13635_s1 + $0xff8] sm:$0xff] }
 0x35c   :  { %7354 = vmatpush1.bf16.msra.mxu0 %v8909_v52  ;;  %v9142_v22 = vcombine.high %v542_v11, %v546_v59  ;;  %v406_v24 = vld [vmem:[%s13635_s1 + $0xb98] sm:$0xff]  ;;  %v9141_v30 = vcombine.low %v542_v11, %v546_v59 }
 0x35d   :  { %7355 = vmatprep.subr.bf16.mxu0 %v8902_v63  ;;  %v410_v25 = vld [vmem:[%s13635_s1 + $0xbb8] sm:$0xff] }
 0x35e   :  { %7395 = vmatpush1.bf16.msra.mxu1 %v9037_v16  ;;  %v534_v54 = vld [vmem:[%s13635_s1 + $0xf98] sm:$0xff]  ;;  %v9006_v33 = vcombine.high %v406_v24, %v410_v25  ;;  %v9005_v21 = vcombine.low %v406_v24, %v410_v25 }
 0x35f   :  { %7396 = vmatprep.subr.bf16.mxu1 %v9030_v45  ;;  %v538_v27 = vld [vmem:[%s13635_s1 + $0xfb8] sm:$0xff] }
 0x360   :  { %7356 = vmatpush1.bf16.msra.mxu0 %v8901_v17  ;;  %v9134_v35 = vcombine.high %v534_v54, %v538_v27  ;;  %v398_v15 = vld [vmem:[%s13635_s1 + $0xb58] sm:$0xff]  ;;  %v9133_v47 = vcombine.low %v534_v54, %v538_v27 }
 0x361   :  { %7357 = vmatprep.subr.bf16.mxu0 %v8894_v23  ;;  %v402_v37 = vld [vmem:[%s13635_s1 + $0xb78] sm:$0xff] }
 0x362   :  { %7397 = vmatpush1.bf16.msra.mxu1 %v9029_v1  ;;  %v526_v28 = vld [vmem:[%s13635_s1 + $0xf58] sm:$0xff]  ;;  %v8998_v48 = vcombine.high %v398_v15, %v402_v37  ;;  %v8997_v45 = vcombine.low %v398_v15, %v402_v37 }
 0x363   :  { %7398 = vmatprep.subr.bf16.mxu1 %v9022_v39  ;;  %v530_v43 = vld [vmem:[%s13635_s1 + $0xf78] sm:$0xff] }
 0x364   :  { %7358 = vmatpush1.bf16.msra.mxu0 %v8893_v13  ;;  %v9126_v51 = vcombine.high %v526_v28, %v530_v43  ;;  %v390_v0 = vld [vmem:[%s13635_s1 + $0xb18] sm:$0xff]  ;;  %v9125_v57 = vcombine.low %v526_v28, %v530_v43 }
 0x365   :  { %7359 = vmatprep.subr.bf16.mxu0 %v9014_v29  ;;  %v394_v52 = vld [vmem:[%s13635_s1 + $0xb38] sm:$0xff] }
 0x366   :  { %7399 = vmatpush1.bf16.msra.mxu1 %v9021_v53  ;;  %v518_v16 = vld [vmem:[%s13635_s1 + $0xf18] sm:$0xff]  ;;  %v8990_v31 = vcombine.high %v390_v0, %v394_v52  ;;  %v8989_v39 = vcombine.low %v390_v0, %v394_v52 }
 0x367   :  { %7400 = vmatprep.subr.bf16.mxu1 %v9142_v22  ;;  %v522_v63 = vld [vmem:[%s13635_s1 + $0xf38] sm:$0xff] }
 0x368   :  { %7360 = vmatpush2.bf16.msra.mxu0 %v9013_v56  ;;  %v9118_v20 = vcombine.high %v518_v16, %v522_v63  ;;  %v382_v12 = vld [vmem:[%s13635_s1 + $0xad8] sm:$0xff]  ;;  %v9117_v19 = vcombine.low %v518_v16, %v522_v63 }
 0x369   :  { %7361 = vmatprep.subr.bf16.mxu0 %v9006_v33  ;;  %v386_v17 = vld [vmem:[%s13635_s1 + $0xaf8] sm:$0xff] }
 0x36a   :  { %7401 = vmatpush2.bf16.msra.mxu1 %v9141_v30  ;;  %v510_v1 = vld [vmem:[%s13635_s1 + $0xed8] sm:$0xff]  ;;  %v8982_v26 = vcombine.high %v382_v12, %v386_v17  ;;  %v8981_v22 = vcombine.low %v382_v12, %v386_v17 }
 0x36b   :  { %7402 = vmatprep.subr.bf16.mxu1 %v9134_v35  ;;  %v514_v23 = vld [vmem:[%s13635_s1 + $0xef8] sm:$0xff] }
 0x36c   :  { %7362 = vmatpush2.bf16.msra.mxu0 %v9005_v21  ;;  %v9110_v11 = vcombine.high %v510_v1, %v514_v23  ;;  %v374_v59 = vld [vmem:[%s13635_s1 + $0xa98] sm:$0xff]  ;;  %v9109_v24 = vcombine.low %v510_v1, %v514_v23 }
 0x36d   :  { %7363 = vmatprep.subr.bf16.mxu0 %v8998_v48  ;;  %v378_v13 = vld [vmem:[%s13635_s1 + $0xab8] sm:$0xff] }
 0x36e   :  { %7403 = vmatpush2.bf16.msra.mxu1 %v9133_v47  ;;  %v502_v53 = vld [vmem:[%s13635_s1 + $0xe98] sm:$0xff]  ;;  %v8974_v25 = vcombine.high %v374_v59, %v378_v13  ;;  %v8973_v35 = vcombine.low %v374_v59, %v378_v13 }
 0x36f   :  { %7404 = vmatprep.subr.bf16.mxu1 %v9126_v51  ;;  %v506_v29 = vld [vmem:[%s13635_s1 + $0xeb8] sm:$0xff] }
 0x370   :  { %7364 = vmatpush2.bf16.msra.mxu0 %v8997_v45  ;;  %v9102_v54 = vcombine.high %v502_v53, %v506_v29  ;;  %v366_v27 = vld [vmem:[%s13635_s1 + $0xa58] sm:$0xff]  ;;  %v9101_v15 = vcombine.low %v502_v53, %v506_v29 }
 0x371   :  { %7365 = vmatprep.subr.bf16.mxu0 %v8990_v31  ;;  %v370_v56 = vld [vmem:[%s13635_s1 + $0xa78] sm:$0xff] }
 0x372   :  { %7405 = vmatpush2.bf16.msra.mxu1 %v9125_v57  ;;  %v494_v30 = vld [vmem:[%s13635_s1 + $0xe58] sm:$0xff]  ;;  %v8966_v37 = vcombine.high %v366_v27, %v370_v56  ;;  %v8965_v51 = vcombine.low %v366_v27, %v370_v56 }
 0x373   :  { %7406 = vmatprep.subr.bf16.mxu1 %v9118_v20  ;;  %v498_v33 = vld [vmem:[%s13635_s1 + $0xe78] sm:$0xff] }
 0x374   :  { %7366 = vmatpush2.bf16.msra.mxu0 %v8989_v39  ;;  %v9094_v28 = vcombine.high %v494_v30, %v498_v33  ;;  %v358_v43 = vld [vmem:[%s13635_s1 + $0xa18] sm:$0xff]  ;;  %v9093_v0 = vcombine.low %v494_v30, %v498_v33 }
 0x375   :  { %7367 = vmatprep.subr.bf16.mxu0 %v8982_v26  ;;  %v362_v21 = vld [vmem:[%s13635_s1 + $0xa38] sm:$0xff] }
 0x376   :  { %7407 = vmatpush2.bf16.msra.mxu1 %v9117_v19  ;;  %v486_v47 = vld [vmem:[%s13635_s1 + $0xe18] sm:$0xff]  ;;  %v8958_v52 = vcombine.high %v358_v43, %v362_v21  ;;  %v8957_v20 = vcombine.low %v358_v43, %v362_v21 }
 0x377   :  { %7408 = vmatprep.subr.bf16.mxu1 %v9110_v11  ;;  %v490_v48 = vld [vmem:[%s13635_s1 + $0xe38] sm:$0xff] }
 0x378   :  { %7368 = vmatpush2.bf16.msra.mxu0 %v8981_v22  ;;  %v9086_v16 = vcombine.high %v486_v47, %v490_v48  ;;  %v606_v63 = vld [vmem:[%s13635_s1 + $0x11d8] sm:$0xff]  ;;  %v9085_v12 = vcombine.low %v486_v47, %v490_v48 }
 0x379   :  { %7369 = vmatprep.subr.bf16.mxu0 %v8974_v25  ;;  %v610_v45 = vld [vmem:[%s13635_s1 + $0x11f8] sm:$0xff] }
 0x37a   :  { %7409 = vmatpush2.bf16.msra.mxu1 %v9109_v24  ;;  %v734_v57 = vld [vmem:[%s13635_s1 + $0x15d8] sm:$0xff]  ;;  %v9206_v17 = vcombine.high %v606_v63, %v610_v45  ;;  %v9205_v11 = vcombine.low %v606_v63, %v610_v45 }
 0x37b   :  { %7410 = vmatprep.subr.bf16.mxu1 %v9102_v54  ;;  %v738_v31 = vld [vmem:[%s13635_s1 + $0x15f8] sm:$0xff] }
 0x37c   :  { %7370 = vmatpush2.bf16.msra.mxu0 %v8973_v35  ;;  %v9334_v1 = vcombine.high %v734_v57, %v738_v31  ;;  %v598_v23 = vld [vmem:[%s13635_s1 + $0x1198] sm:$0xff]  ;;  %v9333_v59 = vcombine.low %v734_v57, %v738_v31 }
 0x37d   :  { %7371 = vmatprep.subr.bf16.mxu0 %v8966_v37  ;;  %v602_v39 = vld [vmem:[%s13635_s1 + $0x11b8] sm:$0xff] }
 0x37e   :  { %7411 = vmatpush2.bf16.msra.mxu1 %v9101_v15  ;;  %v726_v19 = vld [vmem:[%s13635_s1 + $0x1598] sm:$0xff]  ;;  %v9198_v13 = vcombine.high %v598_v23, %v602_v39  ;;  %v9197_v30 = vcombine.low %v598_v23, %v602_v39 }
 0x37f   :  { %7412 = vmatprep.subr.bf16.mxu1 %v9094_v28  ;;  %v730_v26 = vld [vmem:[%s13635_s1 + $0x15b8] sm:$0xff] }
 0x380   :  { %7372 = vmatpush2.bf16.msra.mxu0 %v8965_v51  ;;  %v9326_v53 = vcombine.high %v726_v19, %v730_v26  ;;  %v590_v29 = vld [vmem:[%s13635_s1 + $0x1158] sm:$0xff]  ;;  %v9325_v35 = vcombine.low %v726_v19, %v730_v26 }
 0x381   :  { %7373 = vmatprep.subr.bf16.mxu0 %v8958_v52  ;;  %v594_v22 = vld [vmem:[%s13635_s1 + $0x1178] sm:$0xff] }
 0x382   :  { %7413 = vmatpush2.bf16.msra.mxu1 %v9093_v0  ;;  %v718_v25 = vld [vmem:[%s13635_s1 + $0x1558] sm:$0xff]  ;;  %v9189_v0 = vcombine.low %v590_v29, %v594_v22 }
 0x383   :  { %7414 = vmatprep.subr.bf16.mxu1 %v9086_v16  ;;  %v722_v54 = vld [vmem:[%s13635_s1 + $0x1578] sm:$0xff] }
 0x384   :  { %7374 = vmatpush2.bf16.msra.mxu0 %v8957_v20  ;;  %v9318_v43 = vcombine.high %v718_v25, %v722_v54  ;;  %v710_v47 = vld [vmem:[%s13635_s1 + $0x1518] sm:$0xff] }
 0x385   :  { %7425 = vmatprep.subr.bf16.mxu0 %v9206_v17  ;;  %v574_v57 = vld [vmem:[%s13635_s1 + $0x10d8] sm:$0xff] }
 0x386   :  { %7415 = vmatpush2.bf16.msra.mxu1 %v9085_v12  ;;  %v702_v31 = vld [vmem:[%s13635_s1 + $0x14d8] sm:$0xff] }
 0x387   :  { %7466 = vmatprep.subr.bf16.mxu1 %v9334_v1  ;;  %v7131_v24 = vpop.f32.mrf.mxu0  ;;  %7376 = vmatmul.mubr.bf16.vlgmr.msra.gmra.mxu0 %v10408_v36  ;;  %v9190_v36 = vcombine.high %v590_v29, %v594_v22  ;;  %v706_v20 = vld [vmem:[%s13635_s1 + $0x14f8] sm:$0xff] }
 0x388   :  { %v7132_v27 = vadd.f32 %v7131_v24, %v12774_v7  ;;  %7426 = vmatpush1.bf16.msra.mxu0 %v9205_v11  ;;  %v582_v7 = vld [vmem:[%s13635_s1 + $0x1118] sm:$0xff]  ;;  %7457 = vmatprep.mubr.bf16.mxu0 %v10438_v46  ;;  %v9317_v46 = vcombine.low %v718_v25, %v722_v54  ;;  %v9302_v23 = vcombine.high %v702_v31, %v706_v20 }
 0x389   :  { %v7172_v56 = vpop.f32.mrf.mxu1  ;;  %7417 = vmatmul.mubr.bf16.vlgmr.msra.gmra.mxu1 %v10423_v40  ;;  %v7133_v33 = vpop.f32.mrf.mxu0  ;;  %7427 = vmatprep.subr.bf16.mxu0 %v9198_v13  ;;  %v586_v40 = vld [vmem:[%s13635_s1 + $0x1138] sm:$0xff]  ;;  %v9301_v13 = vcombine.low %v702_v31, %v706_v20 }
 0x38a   :  { %7467 = vmatpush1.bf16.msra.mxu1 %v9333_v59  ;;  %v12976_v15 = vadd.f32 %v7172_v56, %v7132_v27  ;;  %v7134_v37 = vadd.f32 %v7133_v33, %v12791_v58  ;;  %v714_v58 = vld [vmem:[%s13635_s1 + $0x1538] sm:$0xff]  ;;  %7498 = vmatprep.mubr.bf16.mxu1 %v10449_v49  ;;  %v9182_v16 = vcombine.high %v582_v7, %v586_v40 }
 0x38b   :  { %v7174_v28 = vpop.f32.mrf.mxu1  ;;  %7468 = vmatprep.subr.bf16.mxu1 %v9326_v53  ;;  %v7135_v21 = vpop.f32.mrf.mxu0  ;;  %v9310_v45 = vcombine.high %v710_v47, %v714_v58  ;;  %v578_v49 = vld [vmem:[%s13635_s1 + $0x10f8] sm:$0xff]  ;;  %v9181_v12 = vcombine.low %v582_v7, %v586_v40  ;;  %v9309_v17 = vcombine.low %v710_v47, %v714_v58 }
 0x38c   :  { %v12993_v48 = vadd.f32 %v7174_v28, %v7134_v37  ;;  %7428 = vmatpush1.bf16.msra.mxu0 %v9197_v30  ;;  %v9174_v1 = vcombine.high %v574_v57, %v578_v49  ;;  %v566_v39 = vld [vmem:[%s13635_s1 + $0x1098] sm:$0xff]  ;;  %v9173_v59 = vcombine.low %v574_v57, %v578_v49 }
 0x38d   :  { %v7176_v51 = vpop.f32.mrf.mxu1  ;;  %v7136_v52 = vpop.f32.mrf.mxu0  ;;  %7429 = vmatprep.subr.bf16.mxu0 %v9190_v36  ;;  %v570_v19 = vld [vmem:[%s13635_s1 + $0x10b8] sm:$0xff] }
 0x38e   :  { %7469 = vmatpush1.bf16.msra.mxu1 %v9325_v35  ;;  %v694_v26 = vld [vmem:[%s13635_s1 + $0x1498] sm:$0xff]  ;;  %v9166_v53 = vcombine.high %v566_v39, %v570_v19  ;;  %v9165_v27 = vcombine.low %v566_v39, %v570_v19 }
 0x38f   :  { %v7177_v63 = vpop.f32.mrf.mxu1  ;;  %7470 = vmatprep.subr.bf16.mxu1 %v9318_v43  ;;  %v698_v11 = vld [vmem:[%s13635_s1 + $0x14b8] sm:$0xff] }
 0x390   :  { %7430 = vmatpush1.bf16.msra.mxu0 %v9189_v0  ;;  %v9294_v29 = vcombine.high %v694_v26, %v698_v11  ;;  %v558_v22 = vld [vmem:[%s13635_s1 + $0x1058] sm:$0xff]  ;;  %v9293_v56 = vcombine.low %v694_v26, %v698_v11 }
 0x391   :  { %7431 = vmatprep.subr.bf16.mxu0 %v9182_v16  ;;  %v562_v24 = vld [vmem:[%s13635_s1 + $0x1078] sm:$0xff] }
 0x392   :  { %7471 = vmatpush1.bf16.msra.mxu1 %v9317_v46  ;;  %v686_v25 = vld [vmem:[%s13635_s1 + $0x1458] sm:$0xff]  ;;  %v9158_v30 = vcombine.high %v558_v22, %v562_v24  ;;  %v9157_v43 = vcombine.low %v558_v22, %v562_v24 }
 0x393   :  { %7472 = vmatprep.subr.bf16.mxu1 %v9310_v45  ;;  %v690_v54 = vld [vmem:[%s13635_s1 + $0x1478] sm:$0xff] }
 0x394   :  { %7432 = vmatpush1.bf16.msra.mxu0 %v9181_v12  ;;  %v9286_v33 = vcombine.high %v686_v25, %v690_v54  ;;  %v550_v35 = vld [vmem:[%s13635_s1 + $0x1018] sm:$0xff]  ;;  %v9285_v7 = vcombine.low %v686_v25, %v690_v54 }
 0x395   :  { %7433 = vmatprep.subr.bf16.mxu0 %v9174_v1  ;;  %v554_v36 = vld [vmem:[%s13635_s1 + $0x1038] sm:$0xff] }
 0x396   :  { %7473 = vmatpush1.bf16.msra.mxu1 %v9309_v17  ;;  %v678_v37 = vld [vmem:[%s13635_s1 + $0x1418] sm:$0xff]  ;;  %v9150_v40 = vcombine.high %v550_v35, %v554_v36  ;;  %v9149_v52 = vcombine.low %v550_v35, %v554_v36 }
 0x397   :  { %7474 = vmatprep.subr.bf16.mxu1 %v9302_v23  ;;  %v682_v28 = vld [vmem:[%s13635_s1 + $0x1438] sm:$0xff] }
 0x398   :  { %7434 = vmatpush1.bf16.msra.mxu0 %v9173_v59  ;;  %v9278_v21 = vcombine.high %v678_v37, %v682_v28  ;;  %v670_v47 = vld [vmem:[%s13635_s1 + $0x13d8] sm:$0xff]  ;;  %v9277_v46 = vcombine.low %v678_v37, %v682_v28 }
 0x399   :  { %7435 = vmatprep.subr.bf16.mxu0 %v9166_v53  ;;  %v674_v58 = vld [vmem:[%s13635_s1 + $0x13f8] sm:$0xff] }
 0x39a   :  { %7475 = vmatpush1.bf16.msra.mxu1 %v9301_v13  ;;  %v798_v51 = vld [vmem:[%s13635_s1 + $0x17d8] sm:$0xff]  ;;  %v9270_v16 = vcombine.high %v670_v47, %v674_v58  ;;  %v9269_v20 = vcombine.low %v670_v47, %v674_v58 }
 0x39b   :  { %7476 = vmatprep.subr.bf16.mxu1 %v9294_v29  ;;  %v802_v0 = vld [vmem:[%s13635_s1 + $0x17f8] sm:$0xff] }
 0x39c   :  { %7436 = vmatpush1.bf16.msra.mxu0 %v9165_v27  ;;  %v9398_v63 = vcombine.high %v798_v51, %v802_v0  ;;  %v662_v45 = vld [vmem:[%s13635_s1 + $0x1398] sm:$0xff]  ;;  %v9397_v12 = vcombine.low %v798_v51, %v802_v0 }
 0x39d   :  { %7437 = vmatprep.subr.bf16.mxu0 %v9158_v30  ;;  %v666_v57 = vld [vmem:[%s13635_s1 + $0x13b8] sm:$0xff] }
 0x39e   :  { %7477 = vmatpush1.bf16.msra.mxu1 %v9293_v56  ;;  %v790_v49 = vld [vmem:[%s13635_s1 + $0x1798] sm:$0xff]  ;;  %v9262_v17 = vcombine.high %v662_v45, %v666_v57  ;;  %v9261_v11 = vcombine.low %v662_v45, %v666_v57 }
 0x39f   :  { %7478 = vmatprep.subr.bf16.mxu1 %v9286_v33  ;;  %v794_v31 = vld [vmem:[%s13635_s1 + $0x17b8] sm:$0xff] }
 0x3a0   :  { %7438 = vmatpush1.bf16.msra.mxu0 %v9157_v43  ;;  %v9390_v1 = vcombine.high %v790_v49, %v794_v31  ;;  %v654_v23 = vld [vmem:[%s13635_s1 + $0x1358] sm:$0xff]  ;;  %v9389_v59 = vcombine.low %v790_v49, %v794_v31 }
 0x3a1   :  { %7439 = vmatprep.subr.bf16.mxu0 %v9150_v40  ;;  %v658_v39 = vld [vmem:[%s13635_s1 + $0x1378] sm:$0xff] }
 0x3a2   :  { %7479 = vmatpush1.bf16.msra.mxu1 %v9285_v7  ;;  %v782_v19 = vld [vmem:[%s13635_s1 + $0x1758] sm:$0xff]  ;;  %v9254_v13 = vcombine.high %v654_v23, %v658_v39  ;;  %v9253_v54 = vcombine.low %v654_v23, %v658_v39 }
 0x3a3   :  { %7480 = vmatprep.subr.bf16.mxu1 %v9278_v21  ;;  %v786_v26 = vld [vmem:[%s13635_s1 + $0x1778] sm:$0xff] }
 0x3a4   :  { %7440 = vmatpush1.bf16.msra.mxu0 %v9149_v52  ;;  %v9382_v53 = vcombine.high %v782_v19, %v786_v26  ;;  %v646_v29 = vld [vmem:[%s13635_s1 + $0x1318] sm:$0xff]  ;;  %v9381_v27 = vcombine.low %v782_v19, %v786_v26 }
 0x3a5   :  { %7441 = vmatprep.subr.bf16.mxu0 %v9270_v16  ;;  %v650_v22 = vld [vmem:[%s13635_s1 + $0x1338] sm:$0xff] }
 0x3a6   :  { %7481 = vmatpush1.bf16.msra.mxu1 %v9277_v46  ;;  %v774_v24 = vld [vmem:[%s13635_s1 + $0x1718] sm:$0xff]  ;;  %v9246_v56 = vcombine.high %v646_v29, %v650_v22  ;;  %v9245_v28 = vcombine.low %v646_v29, %v650_v22 }
 0x3a7   :  { %7482 = vmatprep.subr.bf16.mxu1 %v9398_v63  ;;  %v778_v25 = vld [vmem:[%s13635_s1 + $0x1738] sm:$0xff] }
 0x3a8   :  { %7442 = vmatpush2.bf16.msra.mxu0 %v9269_v20  ;;  %v9374_v30 = vcombine.high %v774_v24, %v778_v25  ;;  %v638_v33 = vld [vmem:[%s13635_s1 + $0x12d8] sm:$0xff]  ;;  %v9373_v43 = vcombine.low %v774_v24, %v778_v25 }
 0x3a9   :  { %7443 = vmatprep.subr.bf16.mxu0 %v9262_v17  ;;  %v642_v35 = vld [vmem:[%s13635_s1 + $0x12f8] sm:$0xff] }
 0x3aa   :  { %7483 = vmatpush2.bf16.msra.mxu1 %v9397_v12  ;;  %v766_v36 = vld [vmem:[%s13635_s1 + $0x16d8] sm:$0xff]  ;;  %v9238_v7 = vcombine.high %v638_v33, %v642_v35  ;;  %v9237_v0 = vcombine.low %v638_v33, %v642_v35 }
 0x3ab   :  { %7484 = vmatprep.subr.bf16.mxu1 %v9390_v1  ;;  %v770_v37 = vld [vmem:[%s13635_s1 + $0x16f8] sm:$0xff] }
 0x3ac   :  { %7444 = vmatpush2.bf16.msra.mxu0 %v9261_v11  ;;  %v9366_v40 = vcombine.high %v766_v36, %v770_v37  ;;  %v630_v21 = vld [vmem:[%s13635_s1 + $0x1298] sm:$0xff]  ;;  %v9365_v52 = vcombine.low %v766_v36, %v770_v37 }
 0x3ad   :  { %7445 = vmatprep.subr.bf16.mxu0 %v9254_v13  ;;  %v634_v47 = vld [vmem:[%s13635_s1 + $0x12b8] sm:$0xff] }
 0x3ae   :  { %7485 = vmatpush2.bf16.msra.mxu1 %v9389_v59  ;;  %v758_v58 = vld [vmem:[%s13635_s1 + $0x1698] sm:$0xff]  ;;  %v9230_v46 = vcombine.high %v630_v21, %v634_v47  ;;  %v9229_v31 = vcombine.low %v630_v21, %v634_v47 }
 0x3af   :  { %7486 = vmatprep.subr.bf16.mxu1 %v9382_v53  ;;  %v762_v51 = vld [vmem:[%s13635_s1 + $0x16b8] sm:$0xff] }
 0x3b0   :  { %7446 = vmatpush2.bf16.msra.mxu0 %v9253_v54  ;;  %v9358_v16 = vcombine.high %v758_v58, %v762_v51  ;;  %v622_v63 = vld [vmem:[%s13635_s1 + $0x1258] sm:$0xff]  ;;  %v9357_v20 = vcombine.low %v758_v58, %v762_v51 }
 0x3b1   :  { %7447 = vmatprep.subr.bf16.mxu0 %v9246_v56  ;;  %v626_v45 = vld [vmem:[%s13635_s1 + $0x1278] sm:$0xff] }
 0x3b2   :  { %7487 = vmatpush2.bf16.msra.mxu1 %v9381_v27  ;;  %v750_v57 = vld [vmem:[%s13635_s1 + $0x1658] sm:$0xff]  ;;  %v9222_v12 = vcombine.high %v622_v63, %v626_v45  ;;  %v9221_v26 = vcombine.low %v622_v63, %v626_v45 }
 0x3b3   :  { %7488 = vmatprep.subr.bf16.mxu1 %v9374_v30  ;;  %v754_v49 = vld [vmem:[%s13635_s1 + $0x1678] sm:$0xff] }
 0x3b4   :  { %7448 = vmatpush2.bf16.msra.mxu0 %v9245_v28  ;;  %v9350_v17 = vcombine.high %v750_v57, %v754_v49  ;;  %v614_v1 = vld [vmem:[%s13635_s1 + $0x1218] sm:$0xff]  ;;  %v9349_v11 = vcombine.low %v750_v57, %v754_v49 }
 0x3b5   :  { %7449 = vmatprep.subr.bf16.mxu0 %v9238_v7  ;;  %v618_v23 = vld [vmem:[%s13635_s1 + $0x1238] sm:$0xff] }
 0x3b6   :  { %7489 = vmatpush2.bf16.msra.mxu1 %v9373_v43  ;;  %v742_v39 = vld [vmem:[%s13635_s1 + $0x1618] sm:$0xff]  ;;  %v9214_v59 = vcombine.high %v614_v1, %v618_v23  ;;  %v9213_v25 = vcombine.low %v614_v1, %v618_v23 }
 0x3b7   :  { %7490 = vmatprep.subr.bf16.mxu1 %v9366_v40  ;;  %v746_v19 = vld [vmem:[%s13635_s1 + $0x1638] sm:$0xff] }
 0x3b8   :  { %7450 = vmatpush2.bf16.msra.mxu0 %v9237_v0  ;;  %v9342_v13 = vcombine.high %v742_v39, %v746_v19  ;;  %v862_v53 = vld [vmem:[%s13635_s1 + $0x19d8] sm:$0xff]  ;;  %v9341_v54 = vcombine.low %v742_v39, %v746_v19 }
 0x3b9   :  { %7451 = vmatprep.subr.bf16.mxu0 %v9230_v46  ;;  %v866_v29 = vld [vmem:[%s13635_s1 + $0x19f8] sm:$0xff] }
 0x3ba   :  { %7491 = vmatpush2.bf16.msra.mxu1 %v9365_v52  ;;  %v990_v22 = vld [vmem:[%s13635_s1 + $0x1dd8] sm:$0xff]  ;;  %v9462_v27 = vcombine.high %v862_v53, %v866_v29  ;;  %v9461_v37 = vcombine.low %v862_v53, %v866_v29 }
 0x3bb   :  { %7492 = vmatprep.subr.bf16.mxu1 %v9358_v16  ;;  %v994_v24 = vld [vmem:[%s13635_s1 + $0x1df8] sm:$0xff] }
 0x3bc   :  { %7452 = vmatpush2.bf16.msra.mxu0 %v9229_v31  ;;  %v9590_v56 = vcombine.high %v990_v22, %v994_v24  ;;  %v854_v30 = vld [vmem:[%s13635_s1 + $0x1998] sm:$0xff]  ;;  %v9589_v28 = vcombine.low %v990_v22, %v994_v24 }
 0x3bd   :  { %7453 = vmatprep.subr.bf16.mxu0 %v9222_v12  ;;  %v858_v33 = vld [vmem:[%s13635_s1 + $0x19b8] sm:$0xff] }
 0x3be   :  { %7493 = vmatpush2.bf16.msra.mxu1 %v9357_v20  ;;  %v982_v35 = vld [vmem:[%s13635_s1 + $0x1d98] sm:$0xff]  ;;  %v9454_v43 = vcombine.high %v854_v30, %v858_v33  ;;  %v9453_v46 = vcombine.low %v854_v30, %v858_v33 }
 0x3bf   :  { %7494 = vmatprep.subr.bf16.mxu1 %v9350_v17  ;;  %v986_v36 = vld [vmem:[%s13635_s1 + $0x1db8] sm:$0xff] }
 0x3c0   :  { %7454 = vmatpush2.bf16.msra.mxu0 %v9221_v26  ;;  %v9582_v7 = vcombine.high %v982_v35, %v986_v36  ;;  %v846_v40 = vld [vmem:[%s13635_s1 + $0x1958] sm:$0xff]  ;;  %v9581_v63 = vcombine.low %v982_v35, %v986_v36 }
 0x3c1   :  { %7455 = vmatprep.subr.bf16.mxu0 %v9214_v59  ;;  %v850_v21 = vld [vmem:[%s13635_s1 + $0x1978] sm:$0xff] }
 0x3c2   :  { %7495 = vmatpush2.bf16.msra.mxu1 %v9349_v11  ;;  %v974_v58 = vld [vmem:[%s13635_s1 + $0x1d58] sm:$0xff]  ;;  %v9445_v23 = vcombine.low %v846_v40, %v850_v21 }
 0x3c3   :  { %7496 = vmatprep.subr.bf16.mxu1 %v9342_v13  ;;  %v978_v51 = vld [vmem:[%s13635_s1 + $0x1d78] sm:$0xff] }
 0x3c4   :  { %7456 = vmatpush2.bf16.msra.mxu0 %v9213_v25  ;;  %v9574_v31 = vcombine.high %v974_v58, %v978_v51  ;;  %v966_v12 = vld [vmem:[%s13635_s1 + $0x1d18] sm:$0xff] }
 0x3c5   :  { %7507 = vmatprep.subr.bf16.mxu0 %v9462_v27  ;;  %v830_v59 = vld [vmem:[%s13635_s1 + $0x18d8] sm:$0xff] }
 0x3c6   :  { %7497 = vmatpush2.bf16.msra.mxu1 %v9341_v54  ;;  %v958_v13 = vld [vmem:[%s13635_s1 + $0x1cd8] sm:$0xff] }
 0x3c7   :  { %7548 = vmatprep.subr.bf16.mxu1 %v9590_v56  ;;  %v7213_v47 = vpop.f32.mrf.mxu0  ;;  %7458 = vmatmul.mubr.bf16.vlgmr.msra.gmra.mxu0 %v10630_v4  ;;  %v9446_v4 = vcombine.high %v846_v40, %v850_v21  ;;  %v962_v53 = vld [vmem:[%s13635_s1 + $0x1cf8] sm:$0xff] }
 0x3c8   :  { %v7214_v0 = vadd.f32 %v7213_v47, %v12976_v15  ;;  %7508 = vmatpush1.bf16.msra.mxu0 %v9461_v37  ;;  %v838_v15 = vld [vmem:[%s13635_s1 + $0x1918] sm:$0xff]  ;;  %7539 = vmatprep.mubr.bf16.mxu0 %v10660_v14  ;;  %v9573_v14 = vcombine.low %v974_v58, %v978_v51  ;;  %v9558_v25 = vcombine.high %v958_v13, %v962_v53 }
 0x3c9   :  { %v7254_v52 = vpop.f32.mrf.mxu1  ;;  %7499 = vmatmul.mubr.bf16.vlgmr.msra.gmra.mxu1 %v10645_v8  ;;  %v7215_v16 = vpop.f32.mrf.mxu0  ;;  %7509 = vmatprep.subr.bf16.mxu0 %v9454_v43  ;;  %v842_v8 = vld [vmem:[%s13635_s1 + $0x1938] sm:$0xff]  ;;  %v9557_v35 = vcombine.low %v958_v13, %v962_v53 }
 0x3ca   :  { %7549 = vmatpush1.bf16.msra.mxu1 %v9589_v28  ;;  %v13178_v45 = vadd.f32 %v7254_v52, %v7214_v0  ;;  %v7216_v57 = vadd.f32 %v7215_v16, %v12993_v48  ;;  %v970_v48 = vld [vmem:[%s13635_s1 + $0x1d38] sm:$0xff]  ;;  %7580 = vmatprep.mubr.bf16.mxu1 %v10671_v18  ;;  %v9438_v19 = vcombine.high %v838_v15, %v842_v8 }
 0x3cb   :  { %v7256_v49 = vpop.f32.mrf.mxu1  ;;  %7550 = vmatprep.subr.bf16.mxu1 %v9582_v7  ;;  %v7217_v20 = vpop.f32.mrf.mxu0  ;;  %v9566_v11 = vcombine.high %v966_v12, %v970_v48  ;;  %v834_v18 = vld [vmem:[%s13635_s1 + $0x18f8] sm:$0xff]  ;;  %v9437_v29 = vcombine.low %v838_v15, %v842_v8  ;;  %v9565_v22 = vcombine.low %v966_v12, %v970_v48 }
 0x3cc   :  { %v13195_v17 = vadd.f32 %v7256_v49, %v7216_v57  ;;  %7510 = vmatpush1.bf16.msra.mxu0 %v9453_v46  ;;  %v9430_v24 = vcombine.high %v830_v59, %v834_v18  ;;  %v822_v54 = vld [vmem:[%s13635_s1 + $0x1898] sm:$0xff]  ;;  %v9429_v33 = vcombine.low %v830_v59, %v834_v18 }
 0x3cd   :  { %v7258_v1 = vpop.f32.mrf.mxu1  ;;  %v7218_v39 = vpop.f32.mrf.mxu0  ;;  %7511 = vmatprep.subr.bf16.mxu0 %v9446_v4  ;;  %v826_v27 = vld [vmem:[%s13635_s1 + $0x18b8] sm:$0xff] }
 0x3ce   :  { %7551 = vmatpush1.bf16.msra.mxu1 %v9581_v63  ;;  %v950_v56 = vld [vmem:[%s13635_s1 + $0x1c98] sm:$0xff]  ;;  %v9422_v36 = vcombine.high %v822_v54, %v826_v27  ;;  %v9421_v21 = vcombine.low %v822_v54, %v826_v27 }
 0x3cf   :  { %v7259_v26 = vpop.f32.mrf.mxu1  ;;  %7552 = vmatprep.subr.bf16.mxu1 %v9574_v31  ;;  %v954_v30 = vld [vmem:[%s13635_s1 + $0x1cb8] sm:$0xff] }
 0x3d0   :  { %7512 = vmatpush1.bf16.msra.mxu0 %v9445_v23  ;;  %v9550_v37 = vcombine.high %v950_v56, %v954_v30  ;;  %v814_v28 = vld [vmem:[%s13635_s1 + $0x1858] sm:$0xff]  ;;  %v9549_v47 = vcombine.low %v950_v56, %v954_v30 }
 0x3d1   :  { %7513 = vmatprep.subr.bf16.mxu0 %v9438_v19  ;;  %v818_v43 = vld [vmem:[%s13635_s1 + $0x1878] sm:$0xff] }
 0x3d2   :  { %7553 = vmatpush1.bf16.msra.mxu1 %v9573_v14  ;;  %v942_v7 = vld [vmem:[%s13635_s1 + $0x1c58] sm:$0xff]  ;;  %v9414_v58 = vcombine.high %v814_v28, %v818_v43  ;;  %v9413_v63 = vcombine.low %v814_v28, %v818_v43 }
 0x3d3   :  { %7554 = vmatprep.subr.bf16.mxu1 %v9566_v11  ;;  %v946_v40 = vld [vmem:[%s13635_s1 + $0x1c78] sm:$0xff] }
 0x3d4   :  { %7514 = vmatpush1.bf16.msra.mxu0 %v9437_v29  ;;  %v9542_v51 = vcombine.high %v942_v7, %v946_v40  ;;  %v806_v0 = vld [vmem:[%s13635_s1 + $0x1818] sm:$0xff]  ;;  %v9541_v4 = vcombine.low %v942_v7, %v946_v40 }
 0x3d5   :  { %7515 = vmatprep.subr.bf16.mxu0 %v9430_v24  ;;  %v810_v52 = vld [vmem:[%s13635_s1 + $0x1838] sm:$0xff] }
 0x3d6   :  { %7555 = vmatpush1.bf16.msra.mxu1 %v9565_v22  ;;  %v934_v46 = vld [vmem:[%s13635_s1 + $0x1c18] sm:$0xff]  ;;  %v9406_v57 = vcombine.high %v806_v0, %v810_v52  ;;  %v9405_v12 = vcombine.low %v806_v0, %v810_v52 }
 0x3d7   :  { %7556 = vmatprep.subr.bf16.mxu1 %v9558_v25  ;;  %v938_v16 = vld [vmem:[%s13635_s1 + $0x1c38] sm:$0xff] }
 0x3d8   :  { %7516 = vmatpush1.bf16.msra.mxu0 %v9429_v33  ;;  %v9534_v49 = vcombine.high %v934_v46, %v938_v16  ;;  %v926_v31 = vld [vmem:[%s13635_s1 + $0x1bd8] sm:$0xff]  ;;  %v9533_v48 = vcombine.low %v934_v46, %v938_v16 }
 0x3d9   :  { %7517 = vmatprep.subr.bf16.mxu0 %v9422_v36  ;;  %v930_v15 = vld [vmem:[%s13635_s1 + $0x1bf8] sm:$0xff] }
 0x3da   :  { %7557 = vmatpush1.bf16.msra.mxu1 %v9557_v35  ;;  %v1054_v8 = vld [vmem:[%s13635_s1 + $0x1fd8] sm:$0xff]  ;;  %v9526_v1 = vcombine.high %v926_v31, %v930_v15  ;;  %v9525_v11 = vcombine.low %v926_v31, %v930_v15 }
 0x3db   :  { %7558 = vmatprep.subr.bf16.mxu1 %v9550_v37  ;;  %v1058_v20 = vld [vmem:[%s13635_s1 + $0x1ff8] sm:$0xff] }
 0x3dc   :  { %7518 = vmatpush1.bf16.msra.mxu0 %v9421_v21  ;;  %v9654_v23 = vcombine.high %v1054_v8, %v1058_v20  ;;  %v918_v39 = vld [vmem:[%s13635_s1 + $0x1b98] sm:$0xff]  ;;  %v9653_v59 = vcombine.low %v1054_v8, %v1058_v20 }
 0x3dd   :  { %7519 = vmatprep.subr.bf16.mxu0 %v9414_v58  ;;  %v922_v14 = vld [vmem:[%s13635_s1 + $0x1bb8] sm:$0xff] }
 0x3de   :  { %7559 = vmatpush1.bf16.msra.mxu1 %v9549_v47  ;;  %v1046_v19 = vld [vmem:[%s13635_s1 + $0x1f98] sm:$0xff]  ;;  %v9518_v18 = vcombine.high %v918_v39, %v922_v14  ;;  %v9517_v25 = vcombine.low %v918_v39, %v922_v14 }
 0x3df   :  { %7560 = vmatprep.subr.bf16.mxu1 %v9542_v51  ;;  %v1050_v26 = vld [vmem:[%s13635_s1 + $0x1fb8] sm:$0xff] }
 0x3e0   :  { %7520 = vmatpush1.bf16.msra.mxu0 %v9413_v63  ;;  %v9646_v13 = vcombine.high %v1046_v19, %v1050_v26  ;;  %v910_v53 = vld [vmem:[%s13635_s1 + $0x1b58] sm:$0xff]  ;;  %v9645_v54 = vcombine.low %v1046_v19, %v1050_v26 }
 0x3e1   :  { %7521 = vmatprep.subr.bf16.mxu0 %v9406_v57  ;;  %v914_v29 = vld [vmem:[%s13635_s1 + $0x1b78] sm:$0xff] }
 0x3e2   :  { %7561 = vmatpush1.bf16.msra.mxu1 %v9541_v4  ;;  %v1038_v22 = vld [vmem:[%s13635_s1 + $0x1f58] sm:$0xff]  ;;  %v9510_v27 = vcombine.high %v910_v53, %v914_v29  ;;  %v9509_v37 = vcombine.low %v910_v53, %v914_v29 }
 0x3e3   :  { %7562 = vmatprep.subr.bf16.mxu1 %v9534_v49  ;;  %v1042_v24 = vld [vmem:[%s13635_s1 + $0x1f78] sm:$0xff] }
 0x3e4   :  { %7522 = vmatpush1.bf16.msra.mxu0 %v9405_v12  ;;  %v9638_v56 = vcombine.high %v1038_v22, %v1042_v24  ;;  %v902_v30 = vld [vmem:[%s13635_s1 + $0x1b18] sm:$0xff]  ;;  %v9637_v28 = vcombine.low %v1038_v22, %v1042_v24 }
 0x3e5   :  { %7523 = vmatprep.subr.bf16.mxu0 %v9526_v1  ;;  %v906_v33 = vld [vmem:[%s13635_s1 + $0x1b38] sm:$0xff] }
 0x3e6   :  { %7563 = vmatpush1.bf16.msra.mxu1 %v9533_v48  ;;  %v1030_v35 = vld [vmem:[%s13635_s1 + $0x1f18] sm:$0xff]  ;;  %v9502_v43 = vcombine.high %v902_v30, %v906_v33  ;;  %v9501_v51 = vcombine.low %v902_v30, %v906_v33 }
 0x3e7   :  { %7564 = vmatprep.subr.bf16.mxu1 %v9654_v23  ;;  %v1034_v36 = vld [vmem:[%s13635_s1 + $0x1f38] sm:$0xff] }
 0x3e8   :  { %7524 = vmatpush2.bf16.msra.mxu0 %v9525_v11  ;;  %v9630_v7 = vcombine.high %v1030_v35, %v1034_v36  ;;  %v894_v40 = vld [vmem:[%s13635_s1 + $0x1ad8] sm:$0xff]  ;;  %v9629_v0 = vcombine.low %v1030_v35, %v1034_v36 }
 0x3e9   :  { %7525 = vmatprep.subr.bf16.mxu0 %v9518_v18  ;;  %v898_v21 = vld [vmem:[%s13635_s1 + $0x1af8] sm:$0xff] }
 0x3ea   :  { %7565 = vmatpush2.bf16.msra.mxu1 %v9653_v59  ;;  %v1022_v47 = vld [vmem:[%s13635_s1 + $0x1ed8] sm:$0xff]  ;;  %v9494_v52 = vcombine.high %v894_v40, %v898_v21  ;;  %v9493_v49 = vcombine.low %v894_v40, %v898_v21 }
 0x3eb   :  { %7566 = vmatprep.subr.bf16.mxu1 %v9646_v13  ;;  %v1026_v58 = vld [vmem:[%s13635_s1 + $0x1ef8] sm:$0xff] }
 0x3ec   :  { %7526 = vmatpush2.bf16.msra.mxu0 %v9517_v25  ;;  %v9622_v46 = vcombine.high %v1022_v47, %v1026_v58  ;;  %v886_v16 = vld [vmem:[%s13635_s1 + $0x1a98] sm:$0xff]  ;;  %v9621_v31 = vcombine.low %v1022_v47, %v1026_v58  ;;  %v13342_v25 = vsub.s32 6, %v10832_v32 }
 0x3ed   :  { %7527 = vmatprep.subr.bf16.mxu0 %v9510_v27  ;;  %v890_v63 = vld [vmem:[%s13635_s1 + $0x1ab8] sm:$0xff]  ;;  %v13345_v27 = vsub.s32 7, %v10832_v32 }
 0x3ee   :  { %7567 = vmatpush2.bf16.msra.mxu1 %v9645_v54  ;;  %v1014_v4 = vld [vmem:[%s13635_s1 + $0x1e98] sm:$0xff]  ;;  %v9486_v15 = vcombine.high %v886_v16, %v890_v63  ;;  %v9485_v23 = vcombine.low %v886_v16, %v890_v63 }
 0x3ef   :  { %7568 = vmatprep.subr.bf16.mxu1 %v9638_v56  ;;  %v1018_v57 = vld [vmem:[%s13635_s1 + $0x1eb8] sm:$0xff]  ;;  %v9912_v56 = vld [vmem:[%s13637_s2] sm:$0xff] }
 0x3f0   :  { %7528 = vmatpush2.bf16.msra.mxu0 %v9509_v37  ;;  %v9614_v8 = vcombine.high %v1014_v4, %v1018_v57  ;;  %v878_v20 = vld [vmem:[%s13635_s1 + $0x1a58] sm:$0xff]  ;;  %v9613_v39 = vcombine.low %v1014_v4, %v1018_v57  ;;  %v1088_v30 = vrot.slane %v9912_v56, %v13342_v25  ;;  %v1092_v33 = vrot.slane %v9912_v56, %v13345_v27 }
 0x3f1   :  { %7529 = vmatprep.subr.bf16.mxu0 %v9502_v43  ;;  %v882_v12 = vld [vmem:[%s13635_s1 + $0x1a78] sm:$0xff] }
 0x3f2   :  { %7569 = vmatpush2.bf16.msra.mxu1 %v9637_v28  ;;  %v1006_v48 = vld [vmem:[%s13635_s1 + $0x1e58] sm:$0xff]  ;;  %v9478_v14 = vcombine.high %v878_v20, %v882_v12  ;;  %v9477_v13 = vcombine.low %v878_v20, %v882_v12 }
 0x3f3   :  { %7570 = vmatprep.subr.bf16.mxu1 %v9630_v7  ;;  %v1010_v1 = vld [vmem:[%s13635_s1 + $0x1e78] sm:$0xff] }
 0x3f4   :  { %7530 = vmatpush2.bf16.msra.mxu0 %v9501_v51  ;;  %v9606_v19 = vcombine.high %v1006_v48, %v1010_v1  ;;  %v870_v26 = vld [vmem:[%s13635_s1 + $0x1a18] sm:$0xff]  ;;  %v9605_v53 = vcombine.low %v1006_v48, %v1010_v1  ;;  %v9830_v1 = vld [vmem:[%s13638_s5 + $0x70] sm:$0xff]  }
 0x3f5   :  { %7531 = vmatprep.subr.bf16.mxu0 %v9494_v52  ;;  %v874_v11 = vld [vmem:[%s13635_s1 + $0x1a38] sm:$0xff] }
 0x3f6   :  { %7571 = vmatpush2.bf16.msra.mxu1 %v9629_v0  ;;  %v998_v59 = vld [vmem:[%s13635_s1 + $0x1e18] sm:$0xff]  ;;  %v9470_v29 = vcombine.high %v870_v26, %v874_v11  ;;  %v9469_v24 = vcombine.low %v870_v26, %v874_v11  ;;  %v9835_v26 = vld [vmem:[%s13638_s5 + $0xe8] sm:$0xff]  }
 0x3f7   :  { %7572 = vmatprep.subr.bf16.mxu1 %v9622_v46  ;;  %v1002_v18 = vld [vmem:[%s13635_s1 + $0x1e38] sm:$0xff]  ;;  %v9836_v11 = vld [vmem:[%s13638_s5 + $0x28] sm:$0xff]  }
 0x3f8   :  { %7532 = vmatpush2.bf16.msra.mxu0 %v9493_v49  ;;  %v9598_v22 = vcombine.high %v998_v59, %v1002_v18  ;;  %v9597_v54 = vcombine.low %v998_v59, %v1002_v18  ;;  %v9827_v20 = vld [vmem:[%s13638_s5 + $0xf8] sm:$0xff]   ;;  %v9837_v59 = vld [vmem:[%s13638_s5 + $0xa8] sm:$0xff]   ;;  %v9838_v18 = vld [vmem:[%s13638_s5 + $0x60] sm:$0xff]  }
 0x3f9   :  { %7533 = vmatprep.subr.bf16.mxu0 %v9486_v15  ;;  %v9828_v12 = vld [vmem:[%s13638_s5 + $0x38] sm:$0xff]  }
 0x3fa   :  { %7573 = vmatpush2.bf16.msra.mxu1 %v9621_v31  ;;  %v9829_v48 = vld [vmem:[%s13638_s5 + $0xb8] sm:$0xff]  }
 0x3fb   :  { %7574 = vmatprep.subr.bf16.mxu1 %v9614_v8  ;;  %v9826_v8 = vld [vmem:[%s13638_s5 + $0x78] sm:$0xff]  }
 0x3fc   :  { %7534 = vmatpush2.bf16.msra.mxu0 %v9485_v23  ;;  %v9831_v23 = vld [vmem:[%s13638_s5 + $0xf0] sm:$0xff]  }
 0x3fd   :  { %7535 = vmatprep.subr.bf16.mxu0 %v9478_v14  ;;  %v9833_v14 = vld [vmem:[%s13638_s5 + $0xb0] sm:$0xff]  }
 0x3fe   :  { %7575 = vmatpush2.bf16.msra.mxu1 %v9613_v39  ;;  %v9832_v39 = vld [vmem:[%s13638_s5 + $0x30] sm:$0xff]  }
 0x3ff   :  { %7576 = vmatprep.subr.bf16.mxu1 %v9606_v19  ;;  %v9834_v19 = vld [vmem:[%s13638_s5 + $0x68] sm:$0xff]  }
 0x400   :  { %7536 = vmatpush2.bf16.msra.mxu0 %v9477_v13  ;;  %v9839_v13 = vld [vmem:[%s13638_s5 + $0xe0] sm:$0xff]  }
 0x401   :  { %7537 = vmatprep.subr.bf16.mxu0 %v9470_v29  ;;  %v9841_v29 = vld [vmem:[%s13638_s5 + $0xa0] sm:$0xff]  }
 0x402   :  { %7577 = vmatpush2.bf16.msra.mxu1 %v9605_v53  ;;  %v9840_v53 = vld [vmem:[%s13638_s5 + $0x20] sm:$0xff]  }
 0x403   :  { %7578 = vmatprep.subr.bf16.mxu1 %v9598_v22  ;;  %v9842_v22 = vld [vmem:[%s13638_s5 + $0x58] sm:$0xff]  }
 0x404   :  { %7538 = vmatpush2.bf16.msra.mxu0 %v9469_v24  ;;  %v9843_v24 = vld [vmem:[%s13638_s5 + $0xd8] sm:$0xff]  }
 0x405   :  { %9721 = vmatprep.subr.bf16.mxu0 %v9826_v8 }
 0x406   :  { %7579 = vmatpush2.bf16.msra.mxu1 %v9597_v54  ;;  %v9844_v54 = vld [vmem:[%s13638_s5 + $0x18] sm:$0xff]  }
 0x407   :  { %v7295_v35 = vpop.f32.mrf.mxu0  ;;  %7540 = vmatmul.mubr.bf16.vlgmr.msra.gmra.mxu0 %v10863_v55  ;;  %9743 = vmatprep.subr.bf16.mxu1 %v9827_v20 }
 0x408   :  { %v7296_v36 = vadd.f32 %v7295_v35, %v1088_v30  ;;  %9722 = vmatpush3.bf16.msra.mxu0 %v9828_v12  ;;  %v9845_v30 = vld [vmem:[%s13638_s5 + $0x98] sm:$0xff]   ;;  %v9846_v35 = vld [vmem:[%s13638_s5 + $0x50] sm:$0xff]  }
 0x409   :  { %v7336_v37 = vpop.f32.mrf.mxu1  ;;  %7581 = vmatmul.mubr.bf16.vlgmr.msra.gmra.mxu1 %v10874_v61  ;;  %v7297_v28 = vpop.f32.mrf.mxu0  ;;  %9723 = vmatprep.subr.bf16.mxu0 %v9830_v1 }
 0x40a   :  { %v7337_v32 = vadd.f32 %v7336_v37, %v7296_v36  ;;  %v7298_v43 = vadd.f32 %v7297_v28, %v1092_v33  ;;  %9744 = vmatpush3.bf16.msra.mxu1 %v9829_v48  ;;  %v9847_v37 = vld [vmem:[%s13638_s5 + $0xd0] sm:$0xff]  }
 0x40b   :  { %v7338_v7 = vpop.f32.mrf.mxu1  ;;  %v7299_v40 = vpop.f32.mrf.mxu0  ;;  %9745 = vmatprep.subr.bf16.mxu1 %v9831_v23 }
 0x40c   :  { %v7339_v21 = vadd.f32 %v7338_v7, %v7298_v43  ;;  %9724 = vmatpush3.bf16.msra.mxu0 %v9832_v39  ;;  %v9849_v7 = vld [vmem:[%s13638_s5 + $0x90] sm:$0xff]  }
 0x40d   :  { %v7340_v47 = vpop.f32.mrf.mxu1  ;;  %v7300_v58 = vpop.f32.mrf.mxu0  ;;  %9725 = vmatprep.subr.bf16.mxu0 %v9834_v19 }
 0x40e   :  { %9746 = vmatpush3.bf16.msra.mxu1 %v9833_v14  ;;  %v9851_v58 = vld [vmem:[%s13638_s5 + $0xc8] sm:$0xff]  }
 0x40f   :  { %v7341_v51 = vpop.f32.mrf.mxu1  ;;  %9747 = vmatprep.subr.bf16.mxu1 %v9835_v26 }
 0x410   :  { %9726 = vmatpush3.bf16.msra.mxu0 %v9836_v11 }
 0x411   :  { %9727 = vmatprep.subr.bf16.mxu0 %v9838_v18 }
 0x412   :  { %9748 = vmatpush3.bf16.msra.mxu1 %v9837_v59 }
 0x413   :  { %9749 = vmatprep.subr.bf16.mxu1 %v9839_v13 }
 0x414   :  { %9728 = vmatpush3.bf16.msra.mxu0 %v9840_v53 }
 0x415   :  { %9729 = vmatprep.subr.bf16.mxu0 %v9842_v22 }
 0x416   :  { %9750 = vmatpush3.bf16.msra.mxu1 %v9841_v29 }
 0x417   :  { %9751 = vmatprep.subr.bf16.mxu1 %v9843_v24 }
 0x418   :  { %9730 = vmatpush3.bf16.msra.mxu0 %v9844_v54 }
 0x419   :  { %9731 = vmatprep.subr.bf16.mxu0 %v9846_v35 }
 0x41a   :  { %9752 = vmatpush3.bf16.msra.mxu1 %v9845_v30 }
 0x41b   :  { %9753 = vmatprep.subr.bf16.mxu1 %v9847_v37 }
 0x41e   :  { %9754 = vmatpush3.bf16.msra.mxu1 %v9849_v7 }
 0x41f   :  { %9755 = vmatprep.subr.bf16.mxu1 %v9851_v58 }
 0x447   :  { %v7377_v0 = vpop.f32.mrf.mxu0 }
 0x448   :  { %v7378_v52 = vadd.f32 %v7377_v0, %v7337_v32  ;;  %v9848_v32 = vld [vmem:[%s13638_s5 + $0x10] sm:$0xff]   ;;  %v9852_v0 = vld [vmem:[%s13638_s5 + $0x8] sm:$0xff]  }
 0x449   :  { %v7418_v46 = vpop.f32.mrf.mxu1  ;;  %v7379_v16 = vpop.f32.mrf.mxu0  ;;  %9732 = vmatpush3.bf16.msra.mxu0 %v9848_v32 }
 0x44a   :  { %v13354_v63 = vadd.f32 %v7418_v46, %v7378_v52  ;;  %v7380_v55 = vadd.f32 %v7379_v16, %v7339_v21  ;;  %v9850_v21 = vld [vmem:[%s13638_s5 + $0x48] sm:$0xff]   ;;  %v9854_v46 = vld [vmem:[%s13638_s5 + $0x40] sm:$0xff]  }
 0x44b   :  { %v7420_v4 = vpop.f32.mrf.mxu1  ;;  %v7381_v57 = vpop.f32.mrf.mxu0  ;;  %9733 = vmatprep.subr.bf16.mxu0 %v9850_v21  ;;  %v9853_v52 = vld [vmem:[%s13638_s5 + $0x88] sm:$0xff]   ;;  %v9855_v16 = vld [vmem:[%s13638_s5 + $0xc0] sm:$0xff]  }
 0x44c   :  { %v13356_v49 = vadd.f32 %v7420_v4, %v7380_v55  ;;  %9756 = vmatpush3.bf16.msra.mxu1 %v9853_v52  ;;  %v9856_v55 = vld [vmem:[%s13638_s5] sm:$0xff]   ;;  %v9858_v57 = vld [vmem:[%s13638_s5 + $0x178] sm:$0xff]  }
 0x44d   :  { %v7422_v61 = vpop.f32.mrf.mxu1  ;;  %v7382_v31 = vpop.f32.mrf.mxu0  ;;  %9734 = vmatpush3.bf16.msra.mxu0 %v9852_v0  ;;  %9757 = vmatprep.subr.bf16.mxu1 %v9855_v16  ;;  %v9857_v4 = vld [vmem:[%s13638_s5 + $0x80] sm:$0xff]  }
 0x44e   :  { %9735 = vmatprep.subr.bf16.mxu0 %v9854_v46  ;;  %v9859_v61 = vld [vmem:[%s13638_s5 + $0x1f8] sm:$0xff]   ;;  %v7619_v31 = vrot.slane %v13195_v17, 4 }
 0x44f   :  { %v7423_v15 = vpop.f32.mrf.mxu1 }
 0x450   :  { %9758 = vmatpush3.bf16.msra.mxu1 %v9857_v4  ;;  %v7613_v15 = vrot.slane %v13178_v45, 4  ;;  %v7620_v8 = vadd.f32 %v7619_v31, %v13195_v17 }
 0x451   :  { %9736 = vmatpush3.bf16.msra.mxu0 %v9856_v55  ;;  %9787 = vmatprep.subr.bf16.mxu1 %v9859_v61 }
 0x452   :  { %9765 = vmatprep.subr.bf16.mxu0 %v9858_v57  ;;  %v7614_v20 = vadd.f32 %v7613_v15, %v13178_v45  ;;  %v7621_v12 = vrot.slane %v7620_v8, 2 }
 0x454   :  { %v7615_v48 = vrot.slane %v7614_v20, 2  ;;  %v7622_v1 = vadd.f32 %v7621_v12, %v7620_v8 }
 0x456   :  { %v7616_v23 = vadd.f32 %v7615_v48, %v7614_v20  ;;  %v7623_v39 = vrot.slane %v7622_v1, 1 }
 0x458   :  { %v7617_v14 = vrot.slane %v7616_v23, 1  ;;  %v7624_v19 = vadd.f32 %v7623_v39, %v7622_v1 }
 0x45a   :  { %v7618_v26 = vadd.f32 %v7617_v14, %v7616_v23  ;;  %v7643_v11 = vmul.f32 0.125, %v7624_v19 }
 0x45c   :  { %v7642_v59 = vmul.f32 0.125, %v7618_v26  ;;  %v13466_v13 = vsub.f32 %v13195_v17, %v7643_v11 }
 0x45e   :  { %v13470_v29 = vsub.f32 %v13178_v45, %v7642_v59  ;;  %v7659_v54 = vmul.f32 %v13466_v13, %v13466_v13 }
 0x487   :  { %v7459_v56 = vpop.f32.mrf.mxu0 }
 0x488   :  { %v7460_v18 = vadd.f32 %v7459_v56, %v13354_v63  ;;  %v7658_v63 = vmul.f32 %v13470_v29, %v13470_v29 }
 0x489   :  { %v7500_v33 = vpop.f32.mrf.mxu1  ;;  %v7461_v36 = vpop.f32.mrf.mxu0 }
 0x48a   :  { %v7462_v53 = vadd.f32 %v7461_v36, %v13356_v49  ;;  %v7501_v22 = vadd.f32 %v7500_v33, %v7460_v18  ;;  %v7692_v49 = vrot.slane %v7659_v54, 4  ;;  %v7686_v21 = vrot.slane %v7658_v63, 4 }
 0x48b   :  { %v7502_v28 = vpop.f32.mrf.mxu1  ;;  %v7463_v43 = vpop.f32.mrf.mxu0 }
 0x48c   :  { %v7503_v30 = vadd.f32 %v7502_v28, %v7462_v53  ;;  %v7693_v28 = vadd.f32 %v7692_v49, %v7659_v54  ;;  %v7687_v46 = vadd.f32 %v7686_v21, %v7658_v63 }
 0x48d   :  { %v7504_v40 = vpop.f32.mrf.mxu1  ;;  %v7464_v47 = vpop.f32.mrf.mxu0 }
 0x48e   :  { %v7694_v4 = vrot.slane %v7693_v28, 2  ;;  %v7688_v31 = vrot.slane %v7687_v46, 2 }
 0x48f   :  { %v7505_v51 = vpop.f32.mrf.mxu1 }
 0x490   :  { %v7695_v20 = vadd.f32 %v7694_v4, %v7693_v28  ;;  %v7689_v1 = vadd.f32 %v7688_v31, %v7687_v46 }
 0x492   :  { %v7696_v14 = vrot.slane %v7695_v20, 1  ;;  %v7690_v11 = vrot.slane %v7689_v1, 1 }
 0x494   :  { %v7697_v53 = vadd.f32 %v7696_v14, %v7695_v20  ;;  %v7691_v54 = vadd.f32 %v7690_v11, %v7689_v1 }
 0x4c7   :  { %v7541_v24 = vpop.f32.mrf.mxu0 }
 0x4c8   :  { %v7542_v35 = vadd.f32 %v7541_v24, %v7501_v22 }
 0x4c9   :  { %v7582_v37 = vpop.f32.mrf.mxu1  ;;  %v7543_v32 = vpop.f32.mrf.mxu0 }
 0x4ca   :  { %v7583_v56 = vadd.f32 %v7582_v37, %v7542_v35  ;;  %v7544_v17 = vadd.f32 %v7543_v32, %v7503_v30  ;;  %v7715_v37 = vmul.f32 0.125, %v7697_v53 }
 0x4cb   :  { %v7584_v43 = vpop.f32.mrf.mxu1  ;;  %v7545_v7 = vpop.f32.mrf.mxu0 }
 0x4cc   :  { %v7625_v36 = vrot.slane %v7583_v56, 4  ;;  %v7585_v45 = vadd.f32 %v7584_v43, %v7544_v17  ;;  %v7724_v7 = vadd.f32 1e-05, %v7715_v37 }
 0x4cd   :  { %v7586_v40 = vpop.f32.mrf.mxu1  ;;  %v7546_v33 = vpop.f32.mrf.mxu0 }
 0x4ce   :  { %v7626_v47 = vadd.f32 %v7625_v36, %v7583_v56  ;;  %v7631_v58 = vrot.slane %v7585_v45, 4  ;;  %9898 = vrsqrt.f32 %v7724_v7  ;;  %v9860_v7 = vld [vmem:[%s13638_s5 + $0x138] sm:$0xff]  }
 0x4cf   :  { %v7587_v51 = vpop.f32.mrf.mxu1 }
 0x4d0   :  { %v7627_v0 = vrot.slane %v7626_v47, 2  ;;  %v7632_v52 = vadd.f32 %v7631_v58, %v7585_v45 }
 0x4d2   :  { %v7628_v16 = vadd.f32 %v7627_v0, %v7626_v47  ;;  %v7633_v55 = vrot.slane %v7632_v52, 2 }
 0x4d4   :  { %v7629_v57 = vrot.slane %v7628_v16, 1  ;;  %v7634_v61 = vadd.f32 %v7633_v55, %v7632_v52 }
 0x4d6   :  { %v7630_v15 = vadd.f32 %v7629_v57, %v7628_v16  ;;  %v7635_v8 = vrot.slane %v7634_v61, 1 }
 0x4d8   :  { %v7644_v12 = vmul.f32 0.125, %v7630_v15  ;;  %v7636_v48 = vadd.f32 %v7635_v8, %v7634_v61  ;;  %v7783_v61 = vrot.slane %v7775_v2, %v12511_v38  ;;  %v13490_v15 = vld [vmem:[%s13639_s4] sm:$0xff] }
 0x4d9   :  { %v7718_v8 = vld [vmem:[%s13640_s3] sm:$0xff]  ;;  %v7856_v42 = vrot.slane %v13490_v15, %v11692_v9  ;;  %v7860_v60 = vrot.slane %v13490_v15, %v11695_v34  ;;  %v7868_v2 = vrot.slane %v13490_v15, %v12540_v10 }
 0x4da   :  { %v13476_v23 = vsub.f32 %v7583_v56, %v7644_v12  ;;  %v7645_v39 = vmul.f32 0.125, %v7636_v48  ;;  %v7714_v56 = vmul.f32 0.125, %v7691_v54  ;;  %v7848_v12 = vrot.slane %v13490_v15, %v10847_v44 }
 0x4db   :  { %v9899_v51 = vpop.eup %9898 }
 0x4dc   :  { %v7660_v19 = vmul.f32 %v13476_v23, %v13476_v23  ;;  %v7653_v26 = vsub.f32 %v7585_v45, %v7645_v39  ;;  %v7723_v40 = vadd.f32 1e-05, %v7714_v56 }
 0x4de   :  { %v7698_v59 = vrot.slane %v7660_v19, 4  ;;  %v7661_v18 = vmul.f32 %v7653_v26, %v7653_v26  ;;  %9900 = vrsqrt.f32 %v7723_v40 }
 0x4e0   :  { %v7699_v22 = vadd.f32 %v7698_v59, %v7660_v19  ;;  %v7704_v24 = vrot.slane %v7661_v18, 4 }
 0x4e2   :  { %v7700_v30 = vrot.slane %v7699_v22, 2  ;;  %v7705_v35 = vadd.f32 %v7704_v24, %v7661_v18  ;;  %v7876_v18 = vrot.slane %v13490_v15, %v13345_v27 }
 0x4e4   :  { %v7701_v32 = vadd.f32 %v7700_v30, %v7699_v22  ;;  %v7706_v63 = vrot.slane %v7705_v35, 2 }
 0x4e6   :  { %v7702_v17 = vrot.slane %v7701_v32, 1  ;;  %v7707_v43 = vadd.f32 %v7706_v63, %v7705_v35 }
 0x4e8   :  { %v7703_v49 = vadd.f32 %v7702_v17, %v7701_v32  ;;  %v7708_v36 = vrot.slane %v7707_v43, 1 }
 0x4ea   :  { %v7716_v45 = vmul.f32 0.125, %v7703_v49  ;;  %v7709_v33 = vadd.f32 %v7708_v36, %v7707_v43  ;;  %v9861_v49 = vld [vmem:[%s13638_s5 + $0x1b8] sm:$0xff]  }
 0x4eb   :  { %v9901_v28 = vpop.eup %9900 }
 0x4ec   :  { %v7725_v21 = vadd.f32 1e-05, %v7716_v45  ;;  %v7717_v47 = vmul.f32 0.125, %v7709_v33  ;;  %v7745_v52 = vcombine.low %v9901_v28, %v9899_v51  ;;  %v9862_v33 = vld [vmem:[%s13638_s5 + $0x170] sm:$0xff]  }
 0x4ed   :  { %v9864_v28 = vld [vmem:[%s13638_s5 + $0x130] sm:$0xff]  }
 0x4ee   :  { %v7726_v58 = vadd.f32 1e-05, %v7717_v47  ;;  %9902 = vrsqrt.f32 %v7725_v21  ;;  %v7767_v55 = vrot.slane %v7745_v52, %v12511_v38  ;;  %v9863_v47 = vld [vmem:[%s13638_s5 + $0x1f0] sm:$0xff]  }
 0x4f0   :  { %9904 = vrsqrt.f32 %v7726_v58 }
 0x4fb   :  { %v9903_v0 = vpop.eup %9902 }
 0x4fd   :  { %v9905_v46 = vpop.eup %9904 }
 0x4fe   :  { %v7746_v16 = vcombine.low %v9903_v0, %v9905_v46  ;;  %v9865_v0 = vld [vmem:[%s13638_s5 + $0x1b0] sm:$0xff]   ;;  %v9866_v46 = vld [vmem:[%s13638_s5 + $0x168] sm:$0xff]  }
 0x500   :  { %v7774_v4 = vrot.slane %v7746_v16, %v12511_v38  ;;  %v9867_v16 = vld [vmem:[%s13638_s5 + $0x1e8] sm:$0xff]  }
 0x502   :  { %v7776_v57 = vcombine.low %v7767_v55, %v7774_v4  ;;  %v9868_v55 = vld [vmem:[%s13638_s5 + $0x128] sm:$0xff]  }
 0x503   :  { %v9869_v4 = vld [vmem:[%s13638_s5 + $0x1a8] sm:$0xff]  }
 0x504   :  { %v7790_v31 = vrot.slane %v7776_v57, %v12511_v38  ;;  %v7852_v38 = vrot.slane %v13490_v15, %v10853_v50  ;;  %v9870_v57 = vld [vmem:[%s13638_s5 + $0x160] sm:$0xff]  }
 0x506   :  { %v7791_v20 = vcombine.low %v7783_v61, %v7790_v31  ;;  %v9871_v61 = vld [vmem:[%s13638_s5 + $0x1e0] sm:$0xff]  }
 0x507   :  { %v9872_v31 = vld [vmem:[%s13638_s5 + $0x120] sm:$0xff]  }
 0x508   :  { %v13497_v48 = vmul.f32 %v7791_v20, %v7718_v8  ;;  %v9873_v8 = vld [vmem:[%s13638_s5 + $0x1a0] sm:$0xff]   ;;  %v9874_v20 = vld [vmem:[%s13638_s5 + $0x158] sm:$0xff]  }
 0x50a   :  { %v7826_v1 = vrot.slane %v13497_v48, %v13345_v27  ;;  %v7802_v39 = vrot.slane %v13497_v48, %v10853_v50  ;;  %v7810_v14 = vrot.slane %v13497_v48, %v11695_v34  ;;  %v7798_v19 = vrot.slane %v13497_v48, %v10847_v44 }
 0x50b   :  { %v7806_v11 = vrot.slane %v13497_v48, %v11692_v9  ;;  %v7818_v59 = vrot.slane %v13497_v48, %v12540_v10  ;;  %v7822_v53 = vrot.slane %v13497_v48, %v13342_v25 }
 0x50c   :  { %v7842_v22 = vmul.f32 %v7826_v1, %v7653_v26  ;;  %v7836_v50 = vmul.f32 %v7802_v39, %v11573_v41  ;;  %v7838_v34 = vmul.f32 %v7810_v14, %v12410_v62  ;;  %v7835_v24 = vmul.f32 %v7798_v19, %v11556_v5  ;;  %v9880_v19 = vld [vmem:[%s13638_s5 + $0x110] sm:$0xff]  }
 0x50d   :  { %v7837_v44 = vmul.f32 %v7806_v11, %v12393_v3  ;;  %v7840_v9 = vmul.f32 %v7818_v59, %v13466_v13  ;;  %v13529_v54 = vmul.f32 %v7822_v53, %v13476_v23  ;;  %v7864_v1 = vrot.slane %v13490_v15, %v12535_v6  ;;  %v9881_v11 = vld [vmem:[%s13638_s5 + $0x190] sm:$0xff]   ;;  %v9884_v59 = vld [vmem:[%s13638_s5 + $0x108] sm:$0xff]   ;;  %v9886_v53 = vld [vmem:[%s13638_s5 + $0x140] sm:$0xff]  }
 0x50e   :  { %v7886_v10 = vadd.f32 %v7852_v38, %v7836_v50  ;;  %v7888_v30 = vadd.f32 %v7860_v60, %v7838_v34  ;;  %v7885_v27 = vadd.f32 %v7848_v12, %v7835_v24  ;;  %v7892_v32 = vadd.f32 %v7876_v18, %v7842_v22  ;;  %v9875_v12 = vld [vmem:[%s13638_s5 + $0x1d8] sm:$0xff]   ;;  %v9885_v18 = vld [vmem:[%s13638_s5 + $0x188] sm:$0xff]   ;;  %v9887_v22 = vld [vmem:[%s13638_s5 + $0x1c0] sm:$0xff]  }
 0x50f   :  { %v7887_v35 = vadd.f32 %v7856_v42, %v7837_v44  ;;  %v7890_v37 = vadd.f32 %v7868_v2, %v7840_v9  ;;  %v7814_v42 = vrot.slane %v13497_v48, %v12535_v6  ;;  %v9876_v38 = vld [vmem:[%s13638_s5 + $0x118] sm:$0xff]   ;;  %v9878_v2 = vld [vmem:[%s13638_s5 + $0x150] sm:$0xff]   ;;  %v7872_v39 = vrot.slane %v13490_v15, %v13342_v25  ;;  %v9882_v6 = vld [vmem:[%s13638_s5 + $0x148] sm:$0xff]  }
 0x510   :  { %vm7894_vm0 = vcmp.gt.f32.partialorder %v7886_v10, 0.0  ;;  %v7902_v26 = vmul.f32 0.2, %v7886_v10  ;;  %vm7896_vm1 = vcmp.gt.f32.partialorder %v7888_v30, 0.0  ;;  %v7904_v41 = vmul.f32 0.2, %v7888_v30 }
 0x511   :  { %vm7893_vm2 = vcmp.gt.f32.partialorder %v7885_v27, 0.0  ;;  %v7901_v62 = vmul.f32 0.2, %v7885_v27  ;;  %vm7895_vm3 = vcmp.gt.f32.partialorder %v7887_v35, 0.0  ;;  %v7903_v5 = vmul.f32 0.2, %v7887_v35 }
 0x512   :  { %v7910_v3 = vsel %vm7894_vm0, %v7886_v10, %v7902_v26  ;;  %v7912_v63 = vsel %vm7896_vm1, %v7888_v30, %v7904_v41  ;;  %vm7898_vm4 = vcmp.gt.f32.partialorder %v7890_v37, 0.0  ;;  %v7906_v13 = vmul.f32 0.2, %v7890_v37  ;;  %v9877_v60 = vld [vmem:[%s13638_s5 + $0x198] sm:$0xff]   ;;  %v9879_v48 = vld [vmem:[%s13638_s5 + $0x1d0] sm:$0xff]   ;;  %v9883_v25 = vld [vmem:[%s13638_s5 + $0x1c8] sm:$0xff]  }
 0x513   :  { %v7918_v23 = vpack.c.bf16 %v7910_v3, %v7910_v3  ;;  %v7920_v56 = vpack.c.bf16 %v7912_v63, %v7912_v63  ;;  %v7909_v17 = vsel %vm7893_vm2, %v7885_v27, %v7901_v62  ;;  %v7911_v43 = vsel %vm7895_vm3, %v7887_v35, %v7903_v5  ;;  %v9888_v24 = vld [vmem:[%s13638_s5 + $0x100] sm:$0xff]  }
 0x514   :  { %v7917_v36 = vpack.c.bf16 %v7909_v17, %v7909_v17  ;;  %v7919_v40 = vpack.c.bf16 %v7911_v43, %v7911_v43  ;;  %v7914_v45 = vsel %vm7898_vm4, %v7890_v37, %v7906_v13  ;;  %vm7900_vm5 = vcmp.gt.f32.partialorder %v7892_v32, 0.0  ;;  %v9889_v44 = vld [vmem:[%s13638_s5 + $0x180] sm:$0xff]  }
 0x515   :  { %8476 = vmatprep.mubr.bf16.mxu0 %v7918_v23  ;;  %8516 = vmatprep.mubr.bf16.mxu1 %v7920_v56  ;;  %v7908_v21 = vmul.f32 0.2, %v7892_v32  ;;  %v7922_v58 = vpack.c.bf16 %v7914_v45, %v7914_v45  ;;  %v7839_v14 = vmul.f32 %v7814_v42, %v13470_v29  ;;  %v7891_v15 = vadd.f32 %v7872_v39, %v13529_v54  ;;  %v9655_v63 = vld [vmem:[%s13641_s6] ss:$0 sm:$0xff] }
 0x516   :  { %8477 = vmatmul.mubr.bf16.vlgmr.msra.gmra.mxu0 %v7917_v36  ;;  %8517 = vmatmul.mubr.bf16.vlgmr.msra.gmra.mxu1 %v7919_v40 }
 0x517   :  { %9766 = vmatpush3.bf16.msra.mxu0 %v9860_v7  ;;  %9788 = vmatpush3.bf16.msra.mxu1 %v9861_v49  ;;  %v7916_v51 = vsel %vm7900_vm5, %v7892_v32, %v7908_v21  ;;  %v7889_v29 = vadd.f32 %v7864_v1, %v7839_v14  ;;  %v7907_v34 = vmul.f32 0.2, %v7891_v15  ;;  %vm7899_vm7 = vcmp.gt.f32.partialorder %v7891_v15, 0.0 }
 0x518   :  { %8556 = vmatprep.mubr.bf16.mxu0 %v7922_v58  ;;  %v7924_v52 = vpack.c.bf16 %v7916_v51, %v7916_v51  ;;  %9767 = vmatprep.subr.bf16.mxu0 %v9862_v33 }
 0x519   :  { %9789 = vmatprep.subr.bf16.mxu1 %v9863_v47  ;;  %v7905_v50 = vmul.f32 0.2, %v7889_v29  ;;  %vm7897_vm6 = vcmp.gt.f32.partialorder %v7889_v29, 0.0  ;;  %v7915_v54 = vsel %vm7899_vm7, %v7891_v15, %v7907_v34 }
 0x51a   :  { %8596 = vmatprep.mubr.bf16.mxu1 %v7924_v52  ;;  %v7923_v30 = vpack.c.bf16 %v7915_v54, %v7915_v54 }
 0x51b   :  { %9768 = vmatpush3.bf16.msra.mxu0 %v9864_v28  ;;  %9790 = vmatpush3.bf16.msra.mxu1 %v9865_v0  ;;  %v7913_v9 = vsel %vm7897_vm6, %v7889_v29, %v7905_v50 }
 0x51c   :  { %9769 = vmatprep.subr.bf16.mxu0 %v9866_v46  ;;  %9791 = vmatprep.subr.bf16.mxu1 %v9867_v16  ;;  %v7921_v10 = vpack.c.bf16 %v7913_v9, %v7913_v9 }
 0x51f   :  { %9770 = vmatpush3.bf16.msra.mxu0 %v9868_v55  ;;  %9792 = vmatpush3.bf16.msra.mxu1 %v9869_v4 }
 0x520   :  { %9771 = vmatprep.subr.bf16.mxu0 %v9870_v57  ;;  %9793 = vmatprep.subr.bf16.mxu1 %v9871_v61 }
 0x523   :  { %9772 = vmatpush3.bf16.msra.mxu0 %v9872_v31  ;;  %9794 = vmatpush3.bf16.msra.mxu1 %v9873_v8 }
 0x524   :  { %9773 = vmatprep.subr.bf16.mxu0 %v9874_v20  ;;  %9795 = vmatprep.subr.bf16.mxu1 %v9875_v12 }
 0x527   :  { %9774 = vmatpush3.bf16.msra.mxu0 %v9876_v38  ;;  %9796 = vmatpush3.bf16.msra.mxu1 %v9877_v60 }
 0x528   :  { %9775 = vmatprep.subr.bf16.mxu0 %v9878_v2  ;;  %9797 = vmatprep.subr.bf16.mxu1 %v9879_v48 }
 0x52b   :  { %9776 = vmatpush3.bf16.msra.mxu0 %v9880_v19  ;;  %9798 = vmatpush3.bf16.msra.mxu1 %v9881_v11 }
 0x52c   :  { %9777 = vmatprep.subr.bf16.mxu0 %v9882_v6  ;;  %9799 = vmatprep.subr.bf16.mxu1 %v9883_v25 }
 0x52f   :  { %9778 = vmatpush3.bf16.msra.mxu0 %v9884_v59  ;;  %9800 = vmatpush3.bf16.msra.mxu1 %v9885_v18 }
 0x530   :  { %9779 = vmatprep.subr.bf16.mxu0 %v9886_v53  ;;  %9801 = vmatprep.subr.bf16.mxu1 %v9887_v22 }
 0x533   :  { %9780 = vmatpush3.bf16.msra.mxu0 %v9888_v24  ;;  %9802 = vmatpush3.bf16.msra.mxu1 %v9889_v44 }
 0x536   :  { %8557 = vmatmul.mubr.bf16.vlgmr.msra.gmra.mxu0 %v7921_v10  ;;  %8597 = vmatmul.mubr.bf16.vlgmr.msra.gmra.mxu1 %v7923_v30 }
 0x5d6   :  { %v9737_v27 = vpop.f32.mrf.mxu0  ;;  %v9759_v35 = vpop.f32.mrf.mxu1 }
 0x5d8   :  { %v9738_v37 = vpop.f32.mrf.mxu0  ;;  %v9760_v32 = vpop.f32.mrf.mxu1 }
 0x5d9   :  { %v9739_v3 = vadd.f32 %v9738_v37, %v9737_v27  ;;  %v9761_v17 = vadd.f32 %v9760_v32, %v9759_v35 }
 0x5da   :  { %v9740_v26 = vpop.f32.mrf.mxu0  ;;  %v9762_v41 = vpop.f32.mrf.mxu1 }
 0x5db   :  { %v8479_v13 = vadd.f32 %v9739_v3, %v9655_v63 }
 0x5dc   :  { %v9741_v62 = vpop.f32.mrf.mxu0  ;;  %v9763_v5 = vpop.f32.mrf.mxu1 }
 0x5dd   :  { %v8519_v49 = vadd.f32 %v9761_v17, %v8479_v13 }
 0x5f6   :  { %v9781_v23 = vpop.f32.mrf.mxu0  ;;  %v9803_v56 = vpop.f32.mrf.mxu1 }
 0x5f8   :  { %v9782_v43 = vpop.f32.mrf.mxu0  ;;  %v9804_v7 = vpop.f32.mrf.mxu1 }
 0x5f9   :  { %v9783_v36 = vadd.f32 %v9782_v43, %v9781_v23  ;;  %v9805_v21 = vadd.f32 %v9804_v7, %v9803_v56 }
 0x5fa   :  { %v9784_v40 = vpop.f32.mrf.mxu0  ;;  %v9806_v45 = vpop.f32.mrf.mxu1 }
 0x5fb   :  { %v8559_v33 = vadd.f32 %v9783_v36, %v8519_v49 }
 0x5fc   :  { %v9785_v47 = vpop.f32.mrf.mxu0  ;;  %v9807_v58 = vpop.f32.mrf.mxu1 }
 0x5fd   :  { %v8599_v51 = vadd.f32 %v9805_v21, %v8559_v33 }
 0x5ff   :  { %v9720_v28 = vmul.f32 -1.442695, %v8599_v51 }
 0x601   :  { %9906 = vpow2.f32 %v9720_v28 }
 0x60e   :  { %v9907_v0 = vpop.eup %9906 }
 0x60f   :  { %v8607_v52 = vadd.f32 1.0, %v9907_v0 }
 0x611   :  { %9908 = vrcp.f32 %v8607_v52 }
 0x61e   :  { %v9909_v46 = vpop.eup %9908 }
 0x61f   :  { %8610 = vst [vmem:[%s13642_s7] sm:$0xff] %v9909_v46 }

</bundles_post_ra>
